<compile_context>
chip_gen: v7x
topology: tpu7x:2x2x1
jax: 0.10.0
libtpu: 0.0.40
codegen_flags: <defaults>
</compile_context>

<pallas_src>
import numpy as np
import jax
import jax.numpy as jnp
from jax.experimental import pallas as pl
from jax.experimental.pallas import tpu as pltpu

# ---------------- hyper-parameters (synthetic, small) ----------------
_FFT_SIZE = 64
_HOP_SIZE = 16
_FREQ = _FFT_SIZE // 2 + 1          # 33  (GRU input size / mask size)
HIDDEN = 32
NUM_LAYERS = 2
BATCH = 2
WAVE_LEN = 256

# periodic hann window (torch.hann_window default)
_WIN = 0.5 * (1.0 - np.cos(2.0 * np.pi * np.arange(_FFT_SIZE) / _FFT_SIZE))

# ---------------- packed weight-slab row offsets (all 8-aligned) ----------------
_R_WIH0 = 0      # (F, 3H)  layer-0 input->hidden
_R_WIH1 = 40     # (H, 3H)  layer-1 input->hidden
_R_W0RZ = 72     # (H, 2H)  layer-0 hidden->hidden, r|z fused
_R_W0N = 104     # (H, H)   layer-0 hidden->hidden, n
_R_W1RZ = 136
_R_W1N = 168
_R_WD = 200      # (H, F)   dense mask head
_R_B0 = 232      # (1, 3H)  bih0 + [bhh0_r, bhh0_z, 0]
_R_BHN0 = 240    # (1, H)   bhh0_n
_R_B1 = 248
_R_BHN1 = 256
_R_BD = 264      # (1, F)
_SLAB_ROWS = 272
_SLAB_COLS = 3 * HIDDEN            # 96


# ---------------- constant transform matrices (built with numpy at trace time) ----------------
def _dft_mats():
    """Windowed forward DFT: frames (.,N) @ (N,F) -> re / im."""
    n = np.arange(_FFT_SIZE)[:, None].astype(np.float64)
    k = np.arange(_FREQ)[None, :].astype(np.float64)
    ang = 2.0 * np.pi * n * k / _FFT_SIZE
    dcos = (_WIN[:, None] * np.cos(ang)).astype(np.float32)       # (N, F)
    dmsin = (_WIN[:, None] * (-np.sin(ang))).astype(np.float32)   # (N, F)
    return jnp.asarray(dcos), jnp.asarray(dmsin)


def _idft_ola_mats(T):
    """Per-frame iDFT matrices with synthesis window, OLA placement, 1/env and
    center-trim all folded in: out[b] = sum_t re_m[t,b] @ idc[t] - im_m[t,b] @ ids[t]."""
    N, F, hop, pad = _FFT_SIZE, _FREQ, _HOP_SIZE, _FFT_SIZE // 2
    L_pad = N + hop * (T - 1)
    out_len = L_pad - 2 * pad
    k = np.arange(F)
    coef = np.where((k == 0) | (k == N // 2), 1.0, 2.0)
    # window-envelope (torch.istft normalization); strictly positive on the kept samples
    env = np.zeros(L_pad)
    for t in range(T):
        env[t * hop: t * hop + N] += _WIN ** 2
    inv_env = 1.0 / env[pad: L_pad - pad]
    nn = np.arange(N)
    base_c = (coef[:, None] * np.cos(2.0 * np.pi * k[:, None] * nn[None, :] / N)) / N * _WIN[None, :]
    base_s = (coef[:, None] * np.sin(2.0 * np.pi * k[:, None] * nn[None, :] / N)) / N * _WIN[None, :]
    idc = np.zeros((T, F, out_len), np.float32)
    ids = np.zeros((T, F, out_len), np.float32)
    for t in range(T):
        j0 = t * hop - pad                      # output column of local sample n=0
        for n_loc in range(N):
            j = j0 + n_loc
            if 0 <= j < out_len:
                idc[t, :, j] = base_c[:, n_loc] * inv_env[j]
                ids[t, :, j] = base_s[:, n_loc] * inv_env[j]
    return jnp.asarray(idc), jnp.asarray(ids), out_len


# ---------------- fused Pallas kernel ----------------
def _make_kernel(T, B, out_len):
    H = HIDDEN
    F = _FREQ

    def sig(v):
        # sigmoid via tanh -> EUP slot, keeps the VPU free for the gate blends
        return 0.5 * (jnp.tanh(0.5 * v) + 1.0)

    def kernel(frames_ref, dcos_ref, dmsin_ref, idc_ref, ids_ref, w_ref, out_ref):
        # ---- unpack weight slab (static, 8-aligned row offsets) ----
        wih0 = w_ref[_R_WIH0:_R_WIH0 + F, :]                 # (F, 3H)
        wih1 = w_ref[_R_WIH1:_R_WIH1 + H, :]                 # (H, 3H)
        w0rz = w_ref[_R_W0RZ:_R_W0RZ + H, 0:2 * H]           # (H, 2H)
        w0n = w_ref[_R_W0N:_R_W0N + H, 0:H]                  # (H, H)
        w1rz = w_ref[_R_W1RZ:_R_W1RZ + H, 0:2 * H]
        w1n = w_ref[_R_W1N:_R_W1N + H, 0:H]
        wd = w_ref[_R_WD:_R_WD + H, 0:F]                     # (H, F)
        b0 = w_ref[_R_B0:_R_B0 + 1, :]                       # (1, 3H)
        bhn0 = w_ref[_R_BHN0:_R_BHN0 + 1, 0:H]               # (1, H)
        b1 = w_ref[_R_B1:_R_B1 + 1, :]
        bhn1 = w_ref[_R_BHN1:_R_BHN1 + 1, 0:H]
        bd = w_ref[_R_BD:_R_BD + 1, 0:F]                     # (1, F)

        dcos = dcos_ref[...]                                  # (N, F)
        dmsin = dmsin_ref[...]

        def gru_step(h, gi, w_rz, w_n, bhn):
            # PyTorch GRU: r,z = sig(Wi x + bi + Wh h + bh); n = tanh(Win x + bin + r*(Whn h + bhn))
            g_rz = gi[:, 0:2 * H] + jnp.dot(h, w_rz, preferred_element_type=jnp.float32)
            rz = sig(g_rz)
            r = rz[:, 0:H]                                    # lane offset 0 -> rotation-free
            z = rz[:, H:2 * H]
            ghn = jnp.dot(h, w_n, preferred_element_type=jnp.float32) + bhn
            n = jnp.tanh(gi[:, 2 * H:3 * H] + r * ghn)
            return (1.0 - z) * n + z * h

        h0 = jnp.zeros((B, H), jnp.float32)
        h1 = jnp.zeros((B, H), jnp.float32)
        wav = jnp.zeros((B, out_len), jnp.float32)

        # Fully unrolled wavefront loop: only the h0/h1 chains are serial; the per-t DFT,
        # input projections, mask and iDFT/OLA dots hang off them and overlap freely.
        for t in range(T):
            fr = frames_ref[t]                                                    # (B, N)
            re = jnp.dot(fr, dcos, preferred_element_type=jnp.float32)            # (B, F)
            im = jnp.dot(fr, dmsin, preferred_element_type=jnp.float32)           # (B, F)
            mag = jnp.sqrt(re * re + im * im)

            gi0 = jnp.dot(mag, wih0, preferred_element_type=jnp.float32) + b0     # (B, 3H)
            h0 = gru_step(h0, gi0, w0rz, w0n, bhn0)

            gi1 = jnp.dot(h0, wih1, preferred_element_type=jnp.float32) + b1      # (B, 3H)
            h1 = gru_step(h1, gi1, w1rz, w1n, bhn1)

            mask = sig(jnp.dot(h1, wd, preferred_element_type=jnp.float32) + bd)  # (B, F)

            # iDFT + synthesis window + OLA + 1/env + trim, all folded into idc/ids[t]
            wav = wav + jnp.dot(re * mask, idc_ref[t], preferred_element_type=jnp.float32) \
                      - jnp.dot(im * mask, ids_ref[t], preferred_element_type=jnp.float32)

        out_ref[...] = wav                                     # (B, out_len), lane-dense store

    return kernel


# ---------------- parameter init (deterministic, PyTorch-style uniform) ----------------
def init_params(key):
    scale = float(1.0 / np.sqrt(HIDDEN))
    ks = jax.random.split(key, 10)

    def uni(k, shape):
        return jax.random.uniform(k, shape, jnp.float32, -scale, scale)

    return {
        # layer 0: input F -> 3H (stored transposed: (in, 3H), gate order [r; z; n])
        "wih0": uni(ks[0], (_FREQ, 3 * HIDDEN)),
        "whh0": uni(ks[1], (HIDDEN, 3 * HIDDEN)),
        "bih0": uni(ks[2], (1, 3 * HIDDEN)),
        "bhh0": uni(ks[3], (1, 3 * HIDDEN)),
        # layer 1: H -> 3H
        "wih1": uni(ks[4], (HIDDEN, 3 * HIDDEN)),
        "whh1": uni(ks[5], (HIDDEN, 3 * HIDDEN)),
        "bih1": uni(ks[6], (1, 3 * HIDDEN)),
        "bhh1": uni(ks[7], (1, 3 * HIDDEN)),
        # DNN Linear(H -> F), stored transposed
        "wd": uni(ks[8], (HIDDEN, _FREQ)),
        "bd": uni(ks[9], (1, _FREQ)),
    }


def pack_weights(params):
    """Pack all GRU / dense weights+biases into one lane-dense (272, 96) slab (done
    once outside jit). r/z hidden biases are folded into the input-projection bias."""
    H = HIDDEN
    slab = jnp.zeros((_SLAB_ROWS, _SLAB_COLS), jnp.float32)

    def put(s, row, a):
        return s.at[row:row + a.shape[0], 0:a.shape[1]].set(a)

    b0 = params["bih0"] + jnp.concatenate(
        [params["bhh0"][:, :2 * H], jnp.zeros((1, H), jnp.float32)], axis=1)
    b1 = params["bih1"] + jnp.concatenate(
        [params["bhh1"][:, :2 * H], jnp.zeros((1, H), jnp.float32)], axis=1)

    slab = put(slab, _R_WIH0, params["wih0"])
    slab = put(slab, _R_WIH1, params["wih1"])
    slab = put(slab, _R_W0RZ, params["whh0"][:, 0:2 * H])
    slab = put(slab, _R_W0N, params["whh0"][:, 2 * H:3 * H])
    slab = put(slab, _R_W1RZ, params["whh1"][:, 0:2 * H])
    slab = put(slab, _R_W1N, params["whh1"][:, 2 * H:3 * H])
    slab = put(slab, _R_WD, params["wd"])
    slab = put(slab, _R_B0, b0)
    slab = put(slab, _R_BHN0, params["bhh0"][:, 2 * H:3 * H])
    slab = put(slab, _R_B1, b1)
    slab = put(slab, _R_BHN1, params["bhh1"][:, 2 * H:3 * H])
    slab = put(slab, _R_BD, params["bd"])
    return slab


# ---------------- full forward (GRUNet.forward) ----------------
def grunet_forward(waveform, wslab):
    B, L = waveform.shape
    N, hop, pad = _FFT_SIZE, _HOP_SIZE, _FFT_SIZE // 2
    # reflect-pad + framing gather (torch.stft center=True) -- only remaining JAX glue
    xp = jnp.pad(waveform, ((0, 0), (pad, pad)), mode="reflect")
    T = 1 + (L + 2 * pad - N) // hop
    idx = np.arange(T)[:, None] * hop + np.arange(N)[None, :]
    frames = jnp.transpose(xp[:, idx], (1, 0, 2))              # (T, B, N) time-major

    dcos, dmsin = _dft_mats()
    idc, ids, out_len = _idft_ola_mats(T)

    vmem = pl.BlockSpec(memory_space=pltpu.MemorySpace.VMEM)
    inputs = (frames, dcos, dmsin, idc, ids, wslab)            # 6 operands / 6 DMAs
    return pl.pallas_call(
        _make_kernel(T, B, out_len),
        out_shape=jax.ShapeDtypeStruct((B, out_len), jnp.float32),
        in_specs=[vmem] * len(inputs),
        out_specs=vmem,
    )(*inputs)


if __name__ == "__main__":
    key = jax.random.PRNGKey(0)
    pkey, wkey = jax.random.split(key)
    params = init_params(pkey)
    wslab = pack_weights(params)                               # packed once, outside jit
    waveform = jax.random.normal(wkey, (BATCH, WAVE_LEN), jnp.float32)

    fwd = jax.jit(grunet_forward)
    out = fwd(waveform, wslab)
    jax.block_until_ready(out)
    assert out.shape == (BATCH, WAVE_LEN), out.shape
    assert bool(jnp.all(jnp.isfinite(out)))
    print("KERNEL_OK")
</pallas_src>

<mosaic_0001>
module attributes {stable_mosaic.version = 11 : i64} {
  func.func @kernel(%arg0: memref<17x2x64xf32, #tpu.memory_space<vmem>>, %arg1: memref<64x33xf32, #tpu.memory_space<vmem>>, %arg2: memref<64x33xf32, #tpu.memory_space<vmem>>, %arg3: memref<17x33x256xf32, #tpu.memory_space<vmem>>, %arg4: memref<17x33x256xf32, #tpu.memory_space<vmem>>, %arg5: memref<272x96xf32, #tpu.memory_space<vmem>>, %arg6: memref<2x256xf32, #tpu.memory_space<vmem>>) attributes {dimension_semantics = [], scalar_prefetch = 0 : i64, scratch_operands = 0 : i64, tpu.core_type = #tpu.core_type<tc>} {
    %c0 = arith.constant 0 : index
    %c0_0 = arith.constant 0 : index
    %0 = vector.load %arg5[%c0, %c0_0] : memref<272x96xf32, #tpu.memory_space<vmem>>, vector<33x96xf32>
    %c40 = arith.constant 40 : index
    %c0_1 = arith.constant 0 : index
    %1 = vector.load %arg5[%c40, %c0_1] : memref<272x96xf32, #tpu.memory_space<vmem>>, vector<32x96xf32>
    %c72 = arith.constant 72 : index
    %c0_2 = arith.constant 0 : index
    %2 = vector.load %arg5[%c72, %c0_2] : memref<272x96xf32, #tpu.memory_space<vmem>>, vector<32x64xf32>
    %c104 = arith.constant 104 : index
    %c0_3 = arith.constant 0 : index
    %3 = vector.load %arg5[%c104, %c0_3] : memref<272x96xf32, #tpu.memory_space<vmem>>, vector<32x32xf32>
    %c136 = arith.constant 136 : index
    %c0_4 = arith.constant 0 : index
    %4 = vector.load %arg5[%c136, %c0_4] : memref<272x96xf32, #tpu.memory_space<vmem>>, vector<32x64xf32>
    %c168 = arith.constant 168 : index
    %c0_5 = arith.constant 0 : index
    %5 = vector.load %arg5[%c168, %c0_5] : memref<272x96xf32, #tpu.memory_space<vmem>>, vector<32x32xf32>
    %c200 = arith.constant 200 : index
    %c0_6 = arith.constant 0 : index
    %6 = vector.load %arg5[%c200, %c0_6] : memref<272x96xf32, #tpu.memory_space<vmem>>, vector<32x33xf32>
    %c232 = arith.constant 232 : index
    %c0_7 = arith.constant 0 : index
    %7 = vector.load %arg5[%c232, %c0_7] : memref<272x96xf32, #tpu.memory_space<vmem>>, vector<1x96xf32>
    %c240 = arith.constant 240 : index
    %c0_8 = arith.constant 0 : index
    %8 = vector.load %arg5[%c240, %c0_8] : memref<272x96xf32, #tpu.memory_space<vmem>>, vector<1x32xf32>
    %c248 = arith.constant 248 : index
    %c0_9 = arith.constant 0 : index
    %9 = vector.load %arg5[%c248, %c0_9] : memref<272x96xf32, #tpu.memory_space<vmem>>, vector<1x96xf32>
    %c256 = arith.constant 256 : index
    %c0_10 = arith.constant 0 : index
    %10 = vector.load %arg5[%c256, %c0_10] : memref<272x96xf32, #tpu.memory_space<vmem>>, vector<1x32xf32>
    %c264 = arith.constant 264 : index
    %c0_11 = arith.constant 0 : index
    %11 = vector.load %arg5[%c264, %c0_11] : memref<272x96xf32, #tpu.memory_space<vmem>>, vector<1x33xf32>
    %c0_12 = arith.constant 0 : index
    %c0_13 = arith.constant 0 : index
    %12 = vector.load %arg1[%c0_12, %c0_13] : memref<64x33xf32, #tpu.memory_space<vmem>>, vector<64x33xf32>
    %c0_14 = arith.constant 0 : index
    %c0_15 = arith.constant 0 : index
    %13 = vector.load %arg2[%c0_14, %c0_15] : memref<64x33xf32, #tpu.memory_space<vmem>>, vector<64x33xf32>
    %cst = arith.constant 0.000000e+00 : f32
    %14 = vector.broadcast %cst : f32 to vector<2x32xf32>
    %cst_16 = arith.constant 0.000000e+00 : f32
    %15 = vector.broadcast %cst_16 : f32 to vector<2x32xf32>
    %cst_17 = arith.constant 0.000000e+00 : f32
    %16 = vector.broadcast %cst_17 : f32 to vector<2x256xf32>
    %c0_18 = arith.constant 0 : index
    %c0_19 = arith.constant 0 : index
    %c0_20 = arith.constant 0 : index
    %17 = vector.load %arg0[%c0_18, %c0_19, %c0_20] : memref<17x2x64xf32, #tpu.memory_space<vmem>>, vector<1x2x64xf32>
    %18 = vector.shape_cast %17 : vector<1x2x64xf32> to vector<2x64xf32>
    %cst_21 = arith.constant dense<0.000000e+00> : vector<2x33xf32>
    %19 = tpu.matmul %18, %12, %cst_21 {dimension_numbers = #tpu.dot_dimension_numbers<[1], [0], [0], [1], [0, 0, 1, 1], [], []>} : vector<2x64xf32>, vector<64x33xf32>, vector<2x33xf32> -> vector<2x33xf32>
    %cst_22 = arith.constant dense<0.000000e+00> : vector<2x33xf32>
    %20 = tpu.matmul %18, %13, %cst_22 {dimension_numbers = #tpu.dot_dimension_numbers<[1], [0], [0], [1], [0, 0, 1, 1], [], []>} : vector<2x64xf32>, vector<64x33xf32>, vector<2x33xf32> -> vector<2x33xf32>
    %21 = arith.mulf %19, %19 : vector<2x33xf32>
    %22 = arith.mulf %20, %20 : vector<2x33xf32>
    %23 = arith.addf %21, %22 : vector<2x33xf32>
    %24 = math.sqrt %23 : vector<2x33xf32>
    %cst_23 = arith.constant dense<0.000000e+00> : vector<2x96xf32>
    %25 = tpu.matmul %24, %0, %cst_23 {dimension_numbers = #tpu.dot_dimension_numbers<[1], [0], [0], [1], [0, 0, 1, 1], [], []>} : vector<2x33xf32>, vector<33x96xf32>, vector<2x96xf32> -> vector<2x96xf32>
    %26 = vector.broadcast %7 : vector<1x96xf32> to vector<2x96xf32>
    %27 = arith.addf %25, %26 : vector<2x96xf32>
    %28 = vector.extract_strided_slice %27 {offsets = [0, 0], sizes = [2, 64], strides = [1, 1]} : vector<2x96xf32> to vector<2x64xf32>
    %cst_24 = arith.constant dense<0.000000e+00> : vector<2x64xf32>
    %29 = tpu.matmul %14, %2, %cst_24 {dimension_numbers = #tpu.dot_dimension_numbers<[1], [0], [0], [1], [0, 0, 1, 1], [], []>} : vector<2x32xf32>, vector<32x64xf32>, vector<2x64xf32> -> vector<2x64xf32>
    %30 = arith.addf %28, %29 : vector<2x64xf32>
    %cst_25 = arith.constant 5.000000e-01 : f32
    %31 = vector.broadcast %cst_25 : f32 to vector<2x64xf32>
    %32 = arith.mulf %31, %30 : vector<2x64xf32>
    %33 = math.tanh %32 : vector<2x64xf32>
    %cst_26 = arith.constant 1.000000e+00 : f32
    %34 = vector.broadcast %cst_26 : f32 to vector<2x64xf32>
    %35 = arith.addf %33, %34 : vector<2x64xf32>
    %cst_27 = arith.constant 5.000000e-01 : f32
    %36 = vector.broadcast %cst_27 : f32 to vector<2x64xf32>
    %37 = arith.mulf %36, %35 : vector<2x64xf32>
    %38 = vector.extract_strided_slice %37 {offsets = [0, 0], sizes = [2, 32], strides = [1, 1]} : vector<2x64xf32> to vector<2x32xf32>
    %39 = vector.extract_strided_slice %37 {offsets = [0, 32], sizes = [2, 32], strides = [1, 1]} : vector<2x64xf32> to vector<2x32xf32>
    %cst_28 = arith.constant dense<0.000000e+00> : vector<2x32xf32>
    %40 = tpu.matmul %14, %3, %cst_28 {dimension_numbers = #tpu.dot_dimension_numbers<[1], [0], [0], [1], [0, 0, 1, 1], [], []>} : vector<2x32xf32>, vector<32x32xf32>, vector<2x32xf32> -> vector<2x32xf32>
    %41 = vector.broadcast %8 : vector<1x32xf32> to vector<2x32xf32>
    %42 = arith.addf %40, %41 : vector<2x32xf32>
    %43 = vector.extract_strided_slice %27 {offsets = [0, 64], sizes = [2, 32], strides = [1, 1]} : vector<2x96xf32> to vector<2x32xf32>
    %44 = arith.mulf %38, %42 : vector<2x32xf32>
    %45 = arith.addf %43, %44 : vector<2x32xf32>
    %46 = math.tanh %45 : vector<2x32xf32>
    %cst_29 = arith.constant 1.000000e+00 : f32
    %47 = vector.broadcast %cst_29 : f32 to vector<2x32xf32>
    %48 = arith.subf %47, %39 : vector<2x32xf32>
    %49 = arith.mulf %48, %46 : vector<2x32xf32>
    %50 = arith.mulf %39, %14 : vector<2x32xf32>
    %51 = arith.addf %49, %50 : vector<2x32xf32>
    %cst_30 = arith.constant dense<0.000000e+00> : vector<2x96xf32>
    %52 = tpu.matmul %51, %1, %cst_30 {dimension_numbers = #tpu.dot_dimension_numbers<[1], [0], [0], [1], [0, 0, 1, 1], [], []>} : vector<2x32xf32>, vector<32x96xf32>, vector<2x96xf32> -> vector<2x96xf32>
    %53 = vector.broadcast %9 : vector<1x96xf32> to vector<2x96xf32>
    %54 = arith.addf %52, %53 : vector<2x96xf32>
    %55 = vector.extract_strided_slice %54 {offsets = [0, 0], sizes = [2, 64], strides = [1, 1]} : vector<2x96xf32> to vector<2x64xf32>
    %cst_31 = arith.constant dense<0.000000e+00> : vector<2x64xf32>
    %56 = tpu.matmul %15, %4, %cst_31 {dimension_numbers = #tpu.dot_dimension_numbers<[1], [0], [0], [1], [0, 0, 1, 1], [], []>} : vector<2x32xf32>, vector<32x64xf32>, vector<2x64xf32> -> vector<2x64xf32>
    %57 = arith.addf %55, %56 : vector<2x64xf32>
    %cst_32 = arith.constant 5.000000e-01 : f32
    %58 = vector.broadcast %cst_32 : f32 to vector<2x64xf32>
    %59 = arith.mulf %58, %57 : vector<2x64xf32>
    %60 = math.tanh %59 : vector<2x64xf32>
    %cst_33 = arith.constant 1.000000e+00 : f32
    %61 = vector.broadcast %cst_33 : f32 to vector<2x64xf32>
    %62 = arith.addf %60, %61 : vector<2x64xf32>
    %cst_34 = arith.constant 5.000000e-01 : f32
    %63 = vector.broadcast %cst_34 : f32 to vector<2x64xf32>
    %64 = arith.mulf %63, %62 : vector<2x64xf32>
    %65 = vector.extract_strided_slice %64 {offsets = [0, 0], sizes = [2, 32], strides = [1, 1]} : vector<2x64xf32> to vector<2x32xf32>
    %66 = vector.extract_strided_slice %64 {offsets = [0, 32], sizes = [2, 32], strides = [1, 1]} : vector<2x64xf32> to vector<2x32xf32>
    %cst_35 = arith.constant dense<0.000000e+00> : vector<2x32xf32>
    %67 = tpu.matmul %15, %5, %cst_35 {dimension_numbers = #tpu.dot_dimension_numbers<[1], [0], [0], [1], [0, 0, 1, 1], [], []>} : vector<2x32xf32>, vector<32x32xf32>, vector<2x32xf32> -> vector<2x32xf32>
    %68 = vector.broadcast %10 : vector<1x32xf32> to vector<2x32xf32>
    %69 = arith.addf %67, %68 : vector<2x32xf32>
    %70 = vector.extract_strided_slice %54 {offsets = [0, 64], sizes = [2, 32], strides = [1, 1]} : vector<2x96xf32> to vector<2x32xf32>
    %71 = arith.mulf %65, %69 : vector<2x32xf32>
    %72 = arith.addf %70, %71 : vector<2x32xf32>
    %73 = math.tanh %72 : vector<2x32xf32>
    %cst_36 = arith.constant 1.000000e+00 : f32
    %74 = vector.broadcast %cst_36 : f32 to vector<2x32xf32>
    %75 = arith.subf %74, %66 : vector<2x32xf32>
    %76 = arith.mulf %75, %73 : vector<2x32xf32>
    %77 = arith.mulf %66, %15 : vector<2x32xf32>
    %78 = arith.addf %76, %77 : vector<2x32xf32>
    %cst_37 = arith.constant dense<0.000000e+00> : vector<2x33xf32>
    %79 = tpu.matmul %78, %6, %cst_37 {dimension_numbers = #tpu.dot_dimension_numbers<[1], [0], [0], [1], [0, 0, 1, 1], [], []>} : vector<2x32xf32>, vector<32x33xf32>, vector<2x33xf32> -> vector<2x33xf32>
    %80 = vector.broadcast %11 : vector<1x33xf32> to vector<2x33xf32>
    %81 = arith.addf %79, %80 : vector<2x33xf32>
    %cst_38 = arith.constant 5.000000e-01 : f32
    %82 = vector.broadcast %cst_38 : f32 to vector<2x33xf32>
    %83 = arith.mulf %82, %81 : vector<2x33xf32>
    %84 = math.tanh %83 : vector<2x33xf32>
    %cst_39 = arith.constant 1.000000e+00 : f32
    %85 = vector.broadcast %cst_39 : f32 to vector<2x33xf32>
    %86 = arith.addf %84, %85 : vector<2x33xf32>
    %cst_40 = arith.constant 5.000000e-01 : f32
    %87 = vector.broadcast %cst_40 : f32 to vector<2x33xf32>
    %88 = arith.mulf %87, %86 : vector<2x33xf32>
    %89 = arith.mulf %19, %88 : vector<2x33xf32>
    %c0_41 = arith.constant 0 : index
    %c0_42 = arith.constant 0 : index
    %c0_43 = arith.constant 0 : index
    %90 = vector.load %arg3[%c0_41, %c0_42, %c0_43] : memref<17x33x256xf32, #tpu.memory_space<vmem>>, vector<1x33x256xf32>
    %91 = vector.shape_cast %90 : vector<1x33x256xf32> to vector<33x256xf32>
    %cst_44 = arith.constant dense<0.000000e+00> : vector<2x256xf32>
    %92 = tpu.matmul %89, %91, %cst_44 {dimension_numbers = #tpu.dot_dimension_numbers<[1], [0], [0], [1], [0, 0, 1, 1], [], []>} : vector<2x33xf32>, vector<33x256xf32>, vector<2x256xf32> -> vector<2x256xf32>
    %93 = arith.addf %16, %92 : vector<2x256xf32>
    %94 = arith.mulf %20, %88 : vector<2x33xf32>
    %c0_45 = arith.constant 0 : index
    %c0_46 = arith.constant 0 : index
    %c0_47 = arith.constant 0 : index
    %95 = vector.load %arg4[%c0_45, %c0_46, %c0_47] : memref<17x33x256xf32, #tpu.memory_space<vmem>>, vector<1x33x256xf32>
    %96 = vector.shape_cast %95 : vector<1x33x256xf32> to vector<33x256xf32>
    %cst_48 = arith.constant dense<0.000000e+00> : vector<2x256xf32>
    %97 = tpu.matmul %94, %96, %cst_48 {dimension_numbers = #tpu.dot_dimension_numbers<[1], [0], [0], [1], [0, 0, 1, 1], [], []>} : vector<2x33xf32>, vector<33x256xf32>, vector<2x256xf32> -> vector<2x256xf32>
    %98 = arith.subf %93, %97 : vector<2x256xf32>
    %c1 = arith.constant 1 : index
    %c0_49 = arith.constant 0 : index
    %c0_50 = arith.constant 0 : index
    %99 = vector.load %arg0[%c1, %c0_49, %c0_50] : memref<17x2x64xf32, #tpu.memory_space<vmem>>, vector<1x2x64xf32>
    %100 = vector.shape_cast %99 : vector<1x2x64xf32> to vector<2x64xf32>
    %cst_51 = arith.constant dense<0.000000e+00> : vector<2x33xf32>
    %101 = tpu.matmul %100, %12, %cst_51 {dimension_numbers = #tpu.dot_dimension_numbers<[1], [0], [0], [1], [0, 0, 1, 1], [], []>} : vector<2x64xf32>, vector<64x33xf32>, vector<2x33xf32> -> vector<2x33xf32>
    %cst_52 = arith.constant dense<0.000000e+00> : vector<2x33xf32>
    %102 = tpu.matmul %100, %13, %cst_52 {dimension_numbers = #tpu.dot_dimension_numbers<[1], [0], [0], [1], [0, 0, 1, 1], [], []>} : vector<2x64xf32>, vector<64x33xf32>, vector<2x33xf32> -> vector<2x33xf32>
    %103 = arith.mulf %101, %101 : vector<2x33xf32>
    %104 = arith.mulf %102, %102 : vector<2x33xf32>
    %105 = arith.addf %103, %104 : vector<2x33xf32>
    %106 = math.sqrt %105 : vector<2x33xf32>
    %cst_53 = arith.constant dense<0.000000e+00> : vector<2x96xf32>
    %107 = tpu.matmul %106, %0, %cst_53 {dimension_numbers = #tpu.dot_dimension_numbers<[1], [0], [0], [1], [0, 0, 1, 1], [], []>} : vector<2x33xf32>, vector<33x96xf32>, vector<2x96xf32> -> vector<2x96xf32>
    %108 = vector.broadcast %7 : vector<1x96xf32> to vector<2x96xf32>
    %109 = arith.addf %107, %108 : vector<2x96xf32>
    %110 = vector.extract_strided_slice %109 {offsets = [0, 0], sizes = [2, 64], strides = [1, 1]} : vector<2x96xf32> to vector<2x64xf32>
    %cst_54 = arith.constant dense<0.000000e+00> : vector<2x64xf32>
    %111 = tpu.matmul %51, %2, %cst_54 {dimension_numbers = #tpu.dot_dimension_numbers<[1], [0], [0], [1], [0, 0, 1, 1], [], []>} : vector<2x32xf32>, vector<32x64xf32>, vector<2x64xf32> -> vector<2x64xf32>
    %112 = arith.addf %110, %111 : vector<2x64xf32>
    %cst_55 = arith.constant 5.000000e-01 : f32
    %113 = vector.broadcast %cst_55 : f32 to vector<2x64xf32>
    %114 = arith.mulf %113, %112 : vector<2x64xf32>
    %115 = math.tanh %114 : vector<2x64xf32>
    %cst_56 = arith.constant 1.000000e+00 : f32
    %116 = vector.broadcast %cst_56 : f32 to vector<2x64xf32>
    %117 = arith.addf %115, %116 : vector<2x64xf32>
    %cst_57 = arith.constant 5.000000e-01 : f32
    %118 = vector.broadcast %cst_57 : f32 to vector<2x64xf32>
    %119 = arith.mulf %118, %117 : vector<2x64xf32>
    %120 = vector.extract_strided_slice %119 {offsets = [0, 0], sizes = [2, 32], strides = [1, 1]} : vector<2x64xf32> to vector<2x32xf32>
    %121 = vector.extract_strided_slice %119 {offsets = [0, 32], sizes = [2, 32], strides = [1, 1]} : vector<2x64xf32> to vector<2x32xf32>
    %cst_58 = arith.constant dense<0.000000e+00> : vector<2x32xf32>
    %122 = tpu.matmul %51, %3, %cst_58 {dimension_numbers = #tpu.dot_dimension_numbers<[1], [0], [0], [1], [0, 0, 1, 1], [], []>} : vector<2x32xf32>, vector<32x32xf32>, vector<2x32xf32> -> vector<2x32xf32>
    %123 = vector.broadcast %8 : vector<1x32xf32> to vector<2x32xf32>
    %124 = arith.addf %122, %123 : vector<2x32xf32>
    %125 = vector.extract_strided_slice %109 {offsets = [0, 64], sizes = [2, 32], strides = [1, 1]} : vector<2x96xf32> to vector<2x32xf32>
    %126 = arith.mulf %120, %124 : vector<2x32xf32>
    %127 = arith.addf %125, %126 : vector<2x32xf32>
    %128 = math.tanh %127 : vector<2x32xf32>
    %cst_59 = arith.constant 1.000000e+00 : f32
    %129 = vector.broadcast %cst_59 : f32 to vector<2x32xf32>
    %130 = arith.subf %129, %121 : vector<2x32xf32>
    %131 = arith.mulf %130, %128 : vector<2x32xf32>
    %132 = arith.mulf %121, %51 : vector<2x32xf32>
    %133 = arith.addf %131, %132 : vector<2x32xf32>
    %cst_60 = arith.constant dense<0.000000e+00> : vector<2x96xf32>
    %134 = tpu.matmul %133, %1, %cst_60 {dimension_numbers = #tpu.dot_dimension_numbers<[1], [0], [0], [1], [0, 0, 1, 1], [], []>} : vector<2x32xf32>, vector<32x96xf32>, vector<2x96xf32> -> vector<2x96xf32>
    %135 = vector.broadcast %9 : vector<1x96xf32> to vector<2x96xf32>
    %136 = arith.addf %134, %135 : vector<2x96xf32>
    %137 = vector.extract_strided_slice %136 {offsets = [0, 0], sizes = [2, 64], strides = [1, 1]} : vector<2x96xf32> to vector<2x64xf32>
    %cst_61 = arith.constant dense<0.000000e+00> : vector<2x64xf32>
    %138 = tpu.matmul %78, %4, %cst_61 {dimension_numbers = #tpu.dot_dimension_numbers<[1], [0], [0], [1], [0, 0, 1, 1], [], []>} : vector<2x32xf32>, vector<32x64xf32>, vector<2x64xf32> -> vector<2x64xf32>
    %139 = arith.addf %137, %138 : vector<2x64xf32>
    %cst_62 = arith.constant 5.000000e-01 : f32
    %140 = vector.broadcast %cst_62 : f32 to vector<2x64xf32>
    %141 = arith.mulf %140, %139 : vector<2x64xf32>
    %142 = math.tanh %141 : vector<2x64xf32>
    %cst_63 = arith.constant 1.000000e+00 : f32
    %143 = vector.broadcast %cst_63 : f32 to vector<2x64xf32>
    %144 = arith.addf %142, %143 : vector<2x64xf32>
    %cst_64 = arith.constant 5.000000e-01 : f32
    %145 = vector.broadcast %cst_64 : f32 to vector<2x64xf32>
    %146 = arith.mulf %145, %144 : vector<2x64xf32>
    %147 = vector.extract_strided_slice %146 {offsets = [0, 0], sizes = [2, 32], strides = [1, 1]} : vector<2x64xf32> to vector<2x32xf32>
    %148 = vector.extract_strided_slice %146 {offsets = [0, 32], sizes = [2, 32], strides = [1, 1]} : vector<2x64xf32> to vector<2x32xf32>
    %cst_65 = arith.constant dense<0.000000e+00> : vector<2x32xf32>
    %149 = tpu.matmul %78, %5, %cst_65 {dimension_numbers = #tpu.dot_dimension_numbers<[1], [0], [0], [1], [0, 0, 1, 1], [], []>} : vector<2x32xf32>, vector<32x32xf32>, vector<2x32xf32> -> vector<2x32xf32>
    %150 = vector.broadcast %10 : vector<1x32xf32> to vector<2x32xf32>
    %151 = arith.addf %149, %150 : vector<2x32xf32>
    %152 = vector.extract_strided_slice %136 {offsets = [0, 64], sizes = [2, 32], strides = [1, 1]} : vector<2x96xf32> to vector<2x32xf32>
    %153 = arith.mulf %147, %151 : vector<2x32xf32>
    %154 = arith.addf %152, %153 : vector<2x32xf32>
    %155 = math.tanh %154 : vector<2x32xf32>
    %cst_66 = arith.constant 1.000000e+00 : f32
    %156 = vector.broadcast %cst_66 : f32 to vector<2x32xf32>
    %157 = arith.subf %156, %148 : vector<2x32xf32>
    %158 = arith.mulf %157, %155 : vector<2x32xf32>
    %159 = arith.mulf %148, %78 : vector<2x32xf32>
    %160 = arith.addf %158, %159 : vector<2x32xf32>
    %cst_67 = arith.constant dense<0.000000e+00> : vector<2x33xf32>
    %161 = tpu.matmul %160, %6, %cst_67 {dimension_numbers = #tpu.dot_dimension_numbers<[1], [0], [0], [1], [0, 0, 1, 1], [], []>} : vector<2x32xf32>, vector<32x33xf32>, vector<2x33xf32> -> vector<2x33xf32>
    %162 = vector.broadcast %11 : vector<1x33xf32> to vector<2x33xf32>
    %163 = arith.addf %161, %162 : vector<2x33xf32>
    %cst_68 = arith.constant 5.000000e-01 : f32
    %164 = vector.broadcast %cst_68 : f32 to vector<2x33xf32>
    %165 = arith.mulf %164, %163 : vector<2x33xf32>
    %166 = math.tanh %165 : vector<2x33xf32>
    %cst_69 = arith.constant 1.000000e+00 : f32
    %167 = vector.broadcast %cst_69 : f32 to vector<2x33xf32>
    %168 = arith.addf %166, %167 : vector<2x33xf32>
    %cst_70 = arith.constant 5.000000e-01 : f32
    %169 = vector.broadcast %cst_70 : f32 to vector<2x33xf32>
    %170 = arith.mulf %169, %168 : vector<2x33xf32>
    %171 = arith.mulf %101, %170 : vector<2x33xf32>
    %c1_71 = arith.constant 1 : index
    %c0_72 = arith.constant 0 : index
    %c0_73 = arith.constant 0 : index
    %172 = vector.load %arg3[%c1_71, %c0_72, %c0_73] : memref<17x33x256xf32, #tpu.memory_space<vmem>>, vector<1x33x256xf32>
    %173 = vector.shape_cast %172 : vector<1x33x256xf32> to vector<33x256xf32>
    %cst_74 = arith.constant dense<0.000000e+00> : vector<2x256xf32>
    %174 = tpu.matmul %171, %173, %cst_74 {dimension_numbers = #tpu.dot_dimension_numbers<[1], [0], [0], [1], [0, 0, 1, 1], [], []>} : vector<2x33xf32>, vector<33x256xf32>, vector<2x256xf32> -> vector<2x256xf32>
    %175 = arith.addf %98, %174 : vector<2x256xf32>
    %176 = arith.mulf %102, %170 : vector<2x33xf32>
    %c1_75 = arith.constant 1 : index
    %c0_76 = arith.constant 0 : index
    %c0_77 = arith.constant 0 : index
    %177 = vector.load %arg4[%c1_75, %c0_76, %c0_77] : memref<17x33x256xf32, #tpu.memory_space<vmem>>, vector<1x33x256xf32>
    %178 = vector.shape_cast %177 : vector<1x33x256xf32> to vector<33x256xf32>
    %cst_78 = arith.constant dense<0.000000e+00> : vector<2x256xf32>
    %179 = tpu.matmul %176, %178, %cst_78 {dimension_numbers = #tpu.dot_dimension_numbers<[1], [0], [0], [1], [0, 0, 1, 1], [], []>} : vector<2x33xf32>, vector<33x256xf32>, vector<2x256xf32> -> vector<2x256xf32>
    %180 = arith.subf %175, %179 : vector<2x256xf32>
    %c2 = arith.constant 2 : index
    %c0_79 = arith.constant 0 : index
    %c0_80 = arith.constant 0 : index
    %181 = vector.load %arg0[%c2, %c0_79, %c0_80] : memref<17x2x64xf32, #tpu.memory_space<vmem>>, vector<1x2x64xf32>
    %182 = vector.shape_cast %181 : vector<1x2x64xf32> to vector<2x64xf32>
    %cst_81 = arith.constant dense<0.000000e+00> : vector<2x33xf32>
    %183 = tpu.matmul %182, %12, %cst_81 {dimension_numbers = #tpu.dot_dimension_numbers<[1], [0], [0], [1], [0, 0, 1, 1], [], []>} : vector<2x64xf32>, vector<64x33xf32>, vector<2x33xf32> -> vector<2x33xf32>
    %cst_82 = arith.constant dense<0.000000e+00> : vector<2x33xf32>
    %184 = tpu.matmul %182, %13, %cst_82 {dimension_numbers = #tpu.dot_dimension_numbers<[1], [0], [0], [1], [0, 0, 1, 1], [], []>} : vector<2x64xf32>, vector<64x33xf32>, vector<2x33xf32> -> vector<2x33xf32>
    %185 = arith.mulf %183, %183 : vector<2x33xf32>
    %186 = arith.mulf %184, %184 : vector<2x33xf32>
    %187 = arith.addf %185, %186 : vector<2x33xf32>
    %188 = math.sqrt %187 : vector<2x33xf32>
    %cst_83 = arith.constant dense<0.000000e+00> : vector<2x96xf32>
    %189 = tpu.matmul %188, %0, %cst_83 {dimension_numbers = #tpu.dot_dimension_numbers<[1], [0], [0], [1], [0, 0, 1, 1], [], []>} : vector<2x33xf32>, vector<33x96xf32>, vector<2x96xf32> -> vector<2x96xf32>
    %190 = vector.broadcast %7 : vector<1x96xf32> to vector<2x96xf32>
    %191 = arith.addf %189, %190 : vector<2x96xf32>
    %192 = vector.extract_strided_slice %191 {offsets = [0, 0], sizes = [2, 64], strides = [1, 1]} : vector<2x96xf32> to vector<2x64xf32>
    %cst_84 = arith.constant dense<0.000000e+00> : vector<2x64xf32>
    %193 = tpu.matmul %133, %2, %cst_84 {dimension_numbers = #tpu.dot_dimension_numbers<[1], [0], [0], [1], [0, 0, 1, 1], [], []>} : vector<2x32xf32>, vector<32x64xf32>, vector<2x64xf32> -> vector<2x64xf32>
    %194 = arith.addf %192, %193 : vector<2x64xf32>
    %cst_85 = arith.constant 5.000000e-01 : f32
    %195 = vector.broadcast %cst_85 : f32 to vector<2x64xf32>
    %196 = arith.mulf %195, %194 : vector<2x64xf32>
    %197 = math.tanh %196 : vector<2x64xf32>
    %cst_86 = arith.constant 1.000000e+00 : f32
    %198 = vector.broadcast %cst_86 : f32 to vector<2x64xf32>
    %199 = arith.addf %197, %198 : vector<2x64xf32>
    %cst_87 = arith.constant 5.000000e-01 : f32
    %200 = vector.broadcast %cst_87 : f32 to vector<2x64xf32>
    %201 = arith.mulf %200, %199 : vector<2x64xf32>
    %202 = vector.extract_strided_slice %201 {offsets = [0, 0], sizes = [2, 32], strides = [1, 1]} : vector<2x64xf32> to vector<2x32xf32>
    %203 = vector.extract_strided_slice %201 {offsets = [0, 32], sizes = [2, 32], strides = [1, 1]} : vector<2x64xf32> to vector<2x32xf32>
    %cst_88 = arith.constant dense<0.000000e+00> : vector<2x32xf32>
    %204 = tpu.matmul %133, %3, %cst_88 {dimension_numbers = #tpu.dot_dimension_numbers<[1], [0], [0], [1], [0, 0, 1, 1], [], []>} : vector<2x32xf32>, vector<32x32xf32>, vector<2x32xf32> -> vector<2x32xf32>
    %205 = vector.broadcast %8 : vector<1x32xf32> to vector<2x32xf32>
    %206 = arith.addf %204, %205 : vector<2x32xf32>
    %207 = vector.extract_strided_slice %191 {offsets = [0, 64], sizes = [2, 32], strides = [1, 1]} : vector<2x96xf32> to vector<2x32xf32>
    %208 = arith.mulf %202, %206 : vector<2x32xf32>
    %209 = arith.addf %207, %208 : vector<2x32xf32>
    %210 = math.tanh %209 : vector<2x32xf32>
    %cst_89 = arith.constant 1.000000e+00 : f32
    %211 = vector.broadcast %cst_89 : f32 to vector<2x32xf32>
    %212 = arith.subf %211, %203 : vector<2x32xf32>
    %213 = arith.mulf %212, %210 : vector<2x32xf32>
    %214 = arith.mulf %203, %133 : vector<2x32xf32>
    %215 = arith.addf %213, %214 : vector<2x32xf32>
    %cst_90 = arith.constant dense<0.000000e+00> : vector<2x96xf32>
    %216 = tpu.matmul %215, %1, %cst_90 {dimension_numbers = #tpu.dot_dimension_numbers<[1], [0], [0], [1], [0, 0, 1, 1], [], []>} : vector<2x32xf32>, vector<32x96xf32>, vector<2x96xf32> -> vector<2x96xf32>
    %217 = vector.broadcast %9 : vector<1x96xf32> to vector<2x96xf32>
    %218 = arith.addf %216, %217 : vector<2x96xf32>
    %219 = vector.extract_strided_slice %218 {offsets = [0, 0], sizes = [2, 64], strides = [1, 1]} : vector<2x96xf32> to vector<2x64xf32>
    %cst_91 = arith.constant dense<0.000000e+00> : vector<2x64xf32>
    %220 = tpu.matmul %160, %4, %cst_91 {dimension_numbers = #tpu.dot_dimension_numbers<[1], [0], [0], [1], [0, 0, 1, 1], [], []>} : vector<2x32xf32>, vector<32x64xf32>, vector<2x64xf32> -> vector<2x64xf32>
    %221 = arith.addf %219, %220 : vector<2x64xf32>
    %cst_92 = arith.constant 5.000000e-01 : f32
    %222 = vector.broadcast %cst_92 : f32 to vector<2x64xf32>
    %223 = arith.mulf %222, %221 : vector<2x64xf32>
    %224 = math.tanh %223 : vector<2x64xf32>
    %cst_93 = arith.constant 1.000000e+00 : f32
    %225 = vector.broadcast %cst_93 : f32 to vector<2x64xf32>
    %226 = arith.addf %224, %225 : vector<2x64xf32>
    %cst_94 = arith.constant 5.000000e-01 : f32
    %227 = vector.broadcast %cst_94 : f32 to vector<2x64xf32>
    %228 = arith.mulf %227, %226 : vector<2x64xf32>
    %229 = vector.extract_strided_slice %228 {offsets = [0, 0], sizes = [2, 32], strides = [1, 1]} : vector<2x64xf32> to vector<2x32xf32>
    %230 = vector.extract_strided_slice %228 {offsets = [0, 32], sizes = [2, 32], strides = [1, 1]} : vector<2x64xf32> to vector<2x32xf32>
    %cst_95 = arith.constant dense<0.000000e+00> : vector<2x32xf32>
    %231 = tpu.matmul %160, %5, %cst_95 {dimension_numbers = #tpu.dot_dimension_numbers<[1], [0], [0], [1], [0, 0, 1, 1], [], []>} : vector<2x32xf32>, vector<32x32xf32>, vector<2x32xf32> -> vector<2x32xf32>
    %232 = vector.broadcast %10 : vector<1x32xf32> to vector<2x32xf32>
    %233 = arith.addf %231, %232 : vector<2x32xf32>
    %234 = vector.extract_strided_slice %218 {offsets = [0, 64], sizes = [2, 32], strides = [1, 1]} : vector<2x96xf32> to vector<2x32xf32>
    %235 = arith.mulf %229, %233 : vector<2x32xf32>
    %236 = arith.addf %234, %235 : vector<2x32xf32>
    %237 = math.tanh %236 : vector<2x32xf32>
    %cst_96 = arith.constant 1.000000e+00 : f32
    %238 = vector.broadcast %cst_96 : f32 to vector<2x32xf32>
    %239 = arith.subf %238, %230 : vector<2x32xf32>
    %240 = arith.mulf %239, %237 : vector<2x32xf32>
    %241 = arith.mulf %230, %160 : vector<2x32xf32>
    %242 = arith.addf %240, %241 : vector<2x32xf32>
    %cst_97 = arith.constant dense<0.000000e+00> : vector<2x33xf32>
    %243 = tpu.matmul %242, %6, %cst_97 {dimension_numbers = #tpu.dot_dimension_numbers<[1], [0], [0], [1], [0, 0, 1, 1], [], []>} : vector<2x32xf32>, vector<32x33xf32>, vector<2x33xf32> -> vector<2x33xf32>
    %244 = vector.broadcast %11 : vector<1x33xf32> to vector<2x33xf32>
    %245 = arith.addf %243, %244 : vector<2x33xf32>
    %cst_98 = arith.constant 5.000000e-01 : f32
    %246 = vector.broadcast %cst_98 : f32 to vector<2x33xf32>
    %247 = arith.mulf %246, %245 : vector<2x33xf32>
    %248 = math.tanh %247 : vector<2x33xf32>
    %cst_99 = arith.constant 1.000000e+00 : f32
    %249 = vector.broadcast %cst_99 : f32 to vector<2x33xf32>
    %250 = arith.addf %248, %249 : vector<2x33xf32>
    %cst_100 = arith.constant 5.000000e-01 : f32
    %251 = vector.broadcast %cst_100 : f32 to vector<2x33xf32>
    %252 = arith.mulf %251, %250 : vector<2x33xf32>
    %253 = arith.mulf %183, %252 : vector<2x33xf32>
    %c2_101 = arith.constant 2 : index
    %c0_102 = arith.constant 0 : index
    %c0_103 = arith.constant 0 : index
    %254 = vector.load %arg3[%c2_101, %c0_102, %c0_103] : memref<17x33x256xf32, #tpu.memory_space<vmem>>, vector<1x33x256xf32>
    %255 = vector.shape_cast %254 : vector<1x33x256xf32> to vector<33x256xf32>
    %cst_104 = arith.constant dense<0.000000e+00> : vector<2x256xf32>
    %256 = tpu.matmul %253, %255, %cst_104 {dimension_numbers = #tpu.dot_dimension_numbers<[1], [0], [0], [1], [0, 0, 1, 1], [], []>} : vector<2x33xf32>, vector<33x256xf32>, vector<2x256xf32> -> vector<2x256xf32>
    %257 = arith.addf %180, %256 : vector<2x256xf32>
    %258 = arith.mulf %184, %252 : vector<2x33xf32>
    %c2_105 = arith.constant 2 : index
    %c0_106 = arith.constant 0 : index
    %c0_107 = arith.constant 0 : index
    %259 = vector.load %arg4[%c2_105, %c0_106, %c0_107] : memref<17x33x256xf32, #tpu.memory_space<vmem>>, vector<1x33x256xf32>
    %260 = vector.shape_cast %259 : vector<1x33x256xf32> to vector<33x256xf32>
    %cst_108 = arith.constant dense<0.000000e+00> : vector<2x256xf32>
    %261 = tpu.matmul %258, %260, %cst_108 {dimension_numbers = #tpu.dot_dimension_numbers<[1], [0], [0], [1], [0, 0, 1, 1], [], []>} : vector<2x33xf32>, vector<33x256xf32>, vector<2x256xf32> -> vector<2x256xf32>
    %262 = arith.subf %257, %261 : vector<2x256xf32>
    %c3 = arith.constant 3 : index
    %c0_109 = arith.constant 0 : index
    %c0_110 = arith.constant 0 : index
    %263 = vector.load %arg0[%c3, %c0_109, %c0_110] : memref<17x2x64xf32, #tpu.memory_space<vmem>>, vector<1x2x64xf32>
    %264 = vector.shape_cast %263 : vector<1x2x64xf32> to vector<2x64xf32>
    %cst_111 = arith.constant dense<0.000000e+00> : vector<2x33xf32>
    %265 = tpu.matmul %264, %12, %cst_111 {dimension_numbers = #tpu.dot_dimension_numbers<[1], [0], [0], [1], [0, 0, 1, 1], [], []>} : vector<2x64xf32>, vector<64x33xf32>, vector<2x33xf32> -> vector<2x33xf32>
    %cst_112 = arith.constant dense<0.000000e+00> : vector<2x33xf32>
    %266 = tpu.matmul %264, %13, %cst_112 {dimension_numbers = #tpu.dot_dimension_numbers<[1], [0], [0], [1], [0, 0, 1, 1], [], []>} : vector<2x64xf32>, vector<64x33xf32>, vector<2x33xf32> -> vector<2x33xf32>
    %267 = arith.mulf %265, %265 : vector<2x33xf32>
    %268 = arith.mulf %266, %266 : vector<2x33xf32>
    %269 = arith.addf %267, %268 : vector<2x33xf32>
    %270 = math.sqrt %269 : vector<2x33xf32>
    %cst_113 = arith.constant dense<0.000000e+00> : vector<2x96xf32>
    %271 = tpu.matmul %270, %0, %cst_113 {dimension_numbers = #tpu.dot_dimension_numbers<[1], [0], [0], [1], [0, 0, 1, 1], [], []>} : vector<2x33xf32>, vector<33x96xf32>, vector<2x96xf32> -> vector<2x96xf32>
    %272 = vector.broadcast %7 : vector<1x96xf32> to vector<2x96xf32>
    %273 = arith.addf %271, %272 : vector<2x96xf32>
    %274 = vector.extract_strided_slice %273 {offsets = [0, 0], sizes = [2, 64], strides = [1, 1]} : vector<2x96xf32> to vector<2x64xf32>
    %cst_114 = arith.constant dense<0.000000e+00> : vector<2x64xf32>
    %275 = tpu.matmul %215, %2, %cst_114 {dimension_numbers = #tpu.dot_dimension_numbers<[1], [0], [0], [1], [0, 0, 1, 1], [], []>} : vector<2x32xf32>, vector<32x64xf32>, vector<2x64xf32> -> vector<2x64xf32>
    %276 = arith.addf %274, %275 : vector<2x64xf32>
    %cst_115 = arith.constant 5.000000e-01 : f32
    %277 = vector.broadcast %cst_115 : f32 to vector<2x64xf32>
    %278 = arith.mulf %277, %276 : vector<2x64xf32>
    %279 = math.tanh %278 : vector<2x64xf32>
    %cst_116 = arith.constant 1.000000e+00 : f32
    %280 = vector.broadcast %cst_116 : f32 to vector<2x64xf32>
    %281 = arith.addf %279, %280 : vector<2x64xf32>
    %cst_117 = arith.constant 5.000000e-01 : f32
    %282 = vector.broadcast %cst_117 : f32 to vector<2x64xf32>
    %283 = arith.mulf %282, %281 : vector<2x64xf32>
    %284 = vector.extract_strided_slice %283 {offsets = [0, 0], sizes = [2, 32], strides = [1, 1]} : vector<2x64xf32> to vector<2x32xf32>
    %285 = vector.extract_strided_slice %283 {offsets = [0, 32], sizes = [2, 32], strides = [1, 1]} : vector<2x64xf32> to vector<2x32xf32>
    %cst_118 = arith.constant dense<0.000000e+00> : vector<2x32xf32>
    %286 = tpu.matmul %215, %3, %cst_118 {dimension_numbers = #tpu.dot_dimension_numbers<[1], [0], [0], [1], [0, 0, 1, 1], [], []>} : vector<2x32xf32>, vector<32x32xf32>, vector<2x32xf32> -> vector<2x32xf32>
    %287 = vector.broadcast %8 : vector<1x32xf32> to vector<2x32xf32>
    %288 = arith.addf %286, %287 : vector<2x32xf32>
    %289 = vector.extract_strided_slice %273 {offsets = [0, 64], sizes = [2, 32], strides = [1, 1]} : vector<2x96xf32> to vector<2x32xf32>
    %290 = arith.mulf %284, %288 : vector<2x32xf32>
    %291 = arith.addf %289, %290 : vector<2x32xf32>
    %292 = math.tanh %291 : vector<2x32xf32>
    %cst_119 = arith.constant 1.000000e+00 : f32
    %293 = vector.broadcast %cst_119 : f32 to vector<2x32xf32>
    %294 = arith.subf %293, %285 : vector<2x32xf32>
    %295 = arith.mulf %294, %292 : vector<2x32xf32>
    %296 = arith.mulf %285, %215 : vector<2x32xf32>
    %297 = arith.addf %295, %296 : vector<2x32xf32>
    %cst_120 = arith.constant dense<0.000000e+00> : vector<2x96xf32>
    %298 = tpu.matmul %297, %1, %cst_120 {dimension_numbers = #tpu.dot_dimension_numbers<[1], [0], [0], [1], [0, 0, 1, 1], [], []>} : vector<2x32xf32>, vector<32x96xf32>, vector<2x96xf32> -> vector<2x96xf32>
    %299 = vector.broadcast %9 : vector<1x96xf32> to vector<2x96xf32>
    %300 = arith.addf %298, %299 : vector<2x96xf32>
    %301 = vector.extract_strided_slice %300 {offsets = [0, 0], sizes = [2, 64], strides = [1, 1]} : vector<2x96xf32> to vector<2x64xf32>
    %cst_121 = arith.constant dense<0.000000e+00> : vector<2x64xf32>
    %302 = tpu.matmul %242, %4, %cst_121 {dimension_numbers = #tpu.dot_dimension_numbers<[1], [0], [0], [1], [0, 0, 1, 1], [], []>} : vector<2x32xf32>, vector<32x64xf32>, vector<2x64xf32> -> vector<2x64xf32>
    %303 = arith.addf %301, %302 : vector<2x64xf32>
    %cst_122 = arith.constant 5.000000e-01 : f32
    %304 = vector.broadcast %cst_122 : f32 to vector<2x64xf32>
    %305 = arith.mulf %304, %303 : vector<2x64xf32>
    %306 = math.tanh %305 : vector<2x64xf32>
    %cst_123 = arith.constant 1.000000e+00 : f32
    %307 = vector.broadcast %cst_123 : f32 to vector<2x64xf32>
    %308 = arith.addf %306, %307 : vector<2x64xf32>
    %cst_124 = arith.constant 5.000000e-01 : f32
    %309 = vector.broadcast %cst_124 : f32 to vector<2x64xf32>
    %310 = arith.mulf %309, %308 : vector<2x64xf32>
    %311 = vector.extract_strided_slice %310 {offsets = [0, 0], sizes = [2, 32], strides = [1, 1]} : vector<2x64xf32> to vector<2x32xf32>
    %312 = vector.extract_strided_slice %310 {offsets = [0, 32], sizes = [2, 32], strides = [1, 1]} : vector<2x64xf32> to vector<2x32xf32>
    %cst_125 = arith.constant dense<0.000000e+00> : vector<2x32xf32>
    %313 = tpu.matmul %242, %5, %cst_125 {dimension_numbers = #tpu.dot_dimension_numbers<[1], [0], [0], [1], [0, 0, 1, 1], [], []>} : vector<2x32xf32>, vector<32x32xf32>, vector<2x32xf32> -> vector<2x32xf32>
    %314 = vector.broadcast %10 : vector<1x32xf32> to vector<2x32xf32>
    %315 = arith.addf %313, %314 : vector<2x32xf32>
    %316 = vector.extract_strided_slice %300 {offsets = [0, 64], sizes = [2, 32], strides = [1, 1]} : vector<2x96xf32> to vector<2x32xf32>
    %317 = arith.mulf %311, %315 : vector<2x32xf32>
    %318 = arith.addf %316, %317 : vector<2x32xf32>
    %319 = math.tanh %318 : vector<2x32xf32>
    %cst_126 = arith.constant 1.000000e+00 : f32
    %320 = vector.broadcast %cst_126 : f32 to vector<2x32xf32>
    %321 = arith.subf %320, %312 : vector<2x32xf32>
    %322 = arith.mulf %321, %319 : vector<2x32xf32>
    %323 = arith.mulf %312, %242 : vector<2x32xf32>
    %324 = arith.addf %322, %323 : vector<2x32xf32>
    %cst_127 = arith.constant dense<0.000000e+00> : vector<2x33xf32>
    %325 = tpu.matmul %324, %6, %cst_127 {dimension_numbers = #tpu.dot_dimension_numbers<[1], [0], [0], [1], [0, 0, 1, 1], [], []>} : vector<2x32xf32>, vector<32x33xf32>, vector<2x33xf32> -> vector<2x33xf32>
    %326 = vector.broadcast %11 : vector<1x33xf32> to vector<2x33xf32>
    %327 = arith.addf %325, %326 : vector<2x33xf32>
    %cst_128 = arith.constant 5.000000e-01 : f32
    %328 = vector.broadcast %cst_128 : f32 to vector<2x33xf32>
    %329 = arith.mulf %328, %327 : vector<2x33xf32>
    %330 = math.tanh %329 : vector<2x33xf32>
    %cst_129 = arith.constant 1.000000e+00 : f32
    %331 = vector.broadcast %cst_129 : f32 to vector<2x33xf32>
    %332 = arith.addf %330, %331 : vector<2x33xf32>
    %cst_130 = arith.constant 5.000000e-01 : f32
    %333 = vector.broadcast %cst_130 : f32 to vector<2x33xf32>
    %334 = arith.mulf %333, %332 : vector<2x33xf32>
    %335 = arith.mulf %265, %334 : vector<2x33xf32>
    %c3_131 = arith.constant 3 : index
    %c0_132 = arith.constant 0 : index
    %c0_133 = arith.constant 0 : index
    %336 = vector.load %arg3[%c3_131, %c0_132, %c0_133] : memref<17x33x256xf32, #tpu.memory_space<vmem>>, vector<1x33x256xf32>
    %337 = vector.shape_cast %336 : vector<1x33x256xf32> to vector<33x256xf32>
    %cst_134 = arith.constant dense<0.000000e+00> : vector<2x256xf32>
    %338 = tpu.matmul %335, %337, %cst_134 {dimension_numbers = #tpu.dot_dimension_numbers<[1], [0], [0], [1], [0, 0, 1, 1], [], []>} : vector<2x33xf32>, vector<33x256xf32>, vector<2x256xf32> -> vector<2x256xf32>
    %339 = arith.addf %262, %338 : vector<2x256xf32>
    %340 = arith.mulf %266, %334 : vector<2x33xf32>
    %c3_135 = arith.constant 3 : index
    %c0_136 = arith.constant 0 : index
    %c0_137 = arith.constant 0 : index
    %341 = vector.load %arg4[%c3_135, %c0_136, %c0_137] : memref<17x33x256xf32, #tpu.memory_space<vmem>>, vector<1x33x256xf32>
    %342 = vector.shape_cast %341 : vector<1x33x256xf32> to vector<33x256xf32>
    %cst_138 = arith.constant dense<0.000000e+00> : vector<2x256xf32>
    %343 = tpu.matmul %340, %342, %cst_138 {dimension_numbers = #tpu.dot_dimension_numbers<[1], [0], [0], [1], [0, 0, 1, 1], [], []>} : vector<2x33xf32>, vector<33x256xf32>, vector<2x256xf32> -> vector<2x256xf32>
    %344 = arith.subf %339, %343 : vector<2x256xf32>
    %c4 = arith.constant 4 : index
    %c0_139 = arith.constant 0 : index
    %c0_140 = arith.constant 0 : index
    %345 = vector.load %arg0[%c4, %c0_139, %c0_140] : memref<17x2x64xf32, #tpu.memory_space<vmem>>, vector<1x2x64xf32>
    %346 = vector.shape_cast %345 : vector<1x2x64xf32> to vector<2x64xf32>
    %cst_141 = arith.constant dense<0.000000e+00> : vector<2x33xf32>
    %347 = tpu.matmul %346, %12, %cst_141 {dimension_numbers = #tpu.dot_dimension_numbers<[1], [0], [0], [1], [0, 0, 1, 1], [], []>} : vector<2x64xf32>, vector<64x33xf32>, vector<2x33xf32> -> vector<2x33xf32>
    %cst_142 = arith.constant dense<0.000000e+00> : vector<2x33xf32>
    %348 = tpu.matmul %346, %13, %cst_142 {dimension_numbers = #tpu.dot_dimension_numbers<[1], [0], [0], [1], [0, 0, 1, 1], [], []>} : vector<2x64xf32>, vector<64x33xf32>, vector<2x33xf32> -> vector<2x33xf32>
    %349 = arith.mulf %347, %347 : vector<2x33xf32>
    %350 = arith.mulf %348, %348 : vector<2x33xf32>
    %351 = arith.addf %349, %350 : vector<2x33xf32>
    %352 = math.sqrt %351 : vector<2x33xf32>
    %cst_143 = arith.constant dense<0.000000e+00> : vector<2x96xf32>
    %353 = tpu.matmul %352, %0, %cst_143 {dimension_numbers = #tpu.dot_dimension_numbers<[1], [0], [0], [1], [0, 0, 1, 1], [], []>} : vector<2x33xf32>, vector<33x96xf32>, vector<2x96xf32> -> vector<2x96xf32>
    %354 = vector.broadcast %7 : vector<1x96xf32> to vector<2x96xf32>
    %355 = arith.addf %353, %354 : vector<2x96xf32>
    %356 = vector.extract_strided_slice %355 {offsets = [0, 0], sizes = [2, 64], strides = [1, 1]} : vector<2x96xf32> to vector<2x64xf32>
    %cst_144 = arith.constant dense<0.000000e+00> : vector<2x64xf32>
    %357 = tpu.matmul %297, %2, %cst_144 {dimension_numbers = #tpu.dot_dimension_numbers<[1], [0], [0], [1], [0, 0, 1, 1], [], []>} : vector<2x32xf32>, vector<32x64xf32>, vector<2x64xf32> -> vector<2x64xf32>
    %358 = arith.addf %356, %357 : vector<2x64xf32>
    %cst_145 = arith.constant 5.000000e-01 : f32
    %359 = vector.broadcast %cst_145 : f32 to vector<2x64xf32>
    %360 = arith.mulf %359, %358 : vector<2x64xf32>
    %361 = math.tanh %360 : vector<2x64xf32>
    %cst_146 = arith.constant 1.000000e+00 : f32
    %362 = vector.broadcast %cst_146 : f32 to vector<2x64xf32>
    %363 = arith.addf %361, %362 : vector<2x64xf32>
    %cst_147 = arith.constant 5.000000e-01 : f32
    %364 = vector.broadcast %cst_147 : f32 to vector<2x64xf32>
    %365 = arith.mulf %364, %363 : vector<2x64xf32>
    %366 = vector.extract_strided_slice %365 {offsets = [0, 0], sizes = [2, 32], strides = [1, 1]} : vector<2x64xf32> to vector<2x32xf32>
    %367 = vector.extract_strided_slice %365 {offsets = [0, 32], sizes = [2, 32], strides = [1, 1]} : vector<2x64xf32> to vector<2x32xf32>
    %cst_148 = arith.constant dense<0.000000e+00> : vector<2x32xf32>
    %368 = tpu.matmul %297, %3, %cst_148 {dimension_numbers = #tpu.dot_dimension_numbers<[1], [0], [0], [1], [0, 0, 1, 1], [], []>} : vector<2x32xf32>, vector<32x32xf32>, vector<2x32xf32> -> vector<2x32xf32>
    %369 = vector.broadcast %8 : vector<1x32xf32> to vector<2x32xf32>
    %370 = arith.addf %368, %369 : vector<2x32xf32>
    %371 = vector.extract_strided_slice %355 {offsets = [0, 64], sizes = [2, 32], strides = [1, 1]} : vector<2x96xf32> to vector<2x32xf32>
    %372 = arith.mulf %366, %370 : vector<2x32xf32>
    %373 = arith.addf %371, %372 : vector<2x32xf32>
    %374 = math.tanh %373 : vector<2x32xf32>
    %cst_149 = arith.constant 1.000000e+00 : f32
    %375 = vector.broadcast %cst_149 : f32 to vector<2x32xf32>
    %376 = arith.subf %375, %367 : vector<2x32xf32>
    %377 = arith.mulf %376, %374 : vector<2x32xf32>
    %378 = arith.mulf %367, %297 : vector<2x32xf32>
    %379 = arith.addf %377, %378 : vector<2x32xf32>
    %cst_150 = arith.constant dense<0.000000e+00> : vector<2x96xf32>
    %380 = tpu.matmul %379, %1, %cst_150 {dimension_numbers = #tpu.dot_dimension_numbers<[1], [0], [0], [1], [0, 0, 1, 1], [], []>} : vector<2x32xf32>, vector<32x96xf32>, vector<2x96xf32> -> vector<2x96xf32>
    %381 = vector.broadcast %9 : vector<1x96xf32> to vector<2x96xf32>
    %382 = arith.addf %380, %381 : vector<2x96xf32>
    %383 = vector.extract_strided_slice %382 {offsets = [0, 0], sizes = [2, 64], strides = [1, 1]} : vector<2x96xf32> to vector<2x64xf32>
    %cst_151 = arith.constant dense<0.000000e+00> : vector<2x64xf32>
    %384 = tpu.matmul %324, %4, %cst_151 {dimension_numbers = #tpu.dot_dimension_numbers<[1], [0], [0], [1], [0, 0, 1, 1], [], []>} : vector<2x32xf32>, vector<32x64xf32>, vector<2x64xf32> -> vector<2x64xf32>
    %385 = arith.addf %383, %384 : vector<2x64xf32>
    %cst_152 = arith.constant 5.000000e-01 : f32
    %386 = vector.broadcast %cst_152 : f32 to vector<2x64xf32>
    %387 = arith.mulf %386, %385 : vector<2x64xf32>
    %388 = math.tanh %387 : vector<2x64xf32>
    %cst_153 = arith.constant 1.000000e+00 : f32
    %389 = vector.broadcast %cst_153 : f32 to vector<2x64xf32>
    %390 = arith.addf %388, %389 : vector<2x64xf32>
    %cst_154 = arith.constant 5.000000e-01 : f32
    %391 = vector.broadcast %cst_154 : f32 to vector<2x64xf32>
    %392 = arith.mulf %391, %390 : vector<2x64xf32>
    %393 = vector.extract_strided_slice %392 {offsets = [0, 0], sizes = [2, 32], strides = [1, 1]} : vector<2x64xf32> to vector<2x32xf32>
    %394 = vector.extract_strided_slice %392 {offsets = [0, 32], sizes = [2, 32], strides = [1, 1]} : vector<2x64xf32> to vector<2x32xf32>
    %cst_155 = arith.constant dense<0.000000e+00> : vector<2x32xf32>
    %395 = tpu.matmul %324, %5, %cst_155 {dimension_numbers = #tpu.dot_dimension_numbers<[1], [0], [0], [1], [0, 0, 1, 1], [], []>} : vector<2x32xf32>, vector<32x32xf32>, vector<2x32xf32> -> vector<2x32xf32>
    %396 = vector.broadcast %10 : vector<1x32xf32> to vector<2x32xf32>
    %397 = arith.addf %395, %396 : vector<2x32xf32>
    %398 = vector.extract_strided_slice %382 {offsets = [0, 64], sizes = [2, 32], strides = [1, 1]} : vector<2x96xf32> to vector<2x32xf32>
    %399 = arith.mulf %393, %397 : vector<2x32xf32>
    %400 = arith.addf %398, %399 : vector<2x32xf32>
    %401 = math.tanh %400 : vector<2x32xf32>
    %cst_156 = arith.constant 1.000000e+00 : f32
    %402 = vector.broadcast %cst_156 : f32 to vector<2x32xf32>
    %403 = arith.subf %402, %394 : vector<2x32xf32>
    %404 = arith.mulf %403, %401 : vector<2x32xf32>
    %405 = arith.mulf %394, %324 : vector<2x32xf32>
    %406 = arith.addf %404, %405 : vector<2x32xf32>
    %cst_157 = arith.constant dense<0.000000e+00> : vector<2x33xf32>
    %407 = tpu.matmul %406, %6, %cst_157 {dimension_numbers = #tpu.dot_dimension_numbers<[1], [0], [0], [1], [0, 0, 1, 1], [], []>} : vector<2x32xf32>, vector<32x33xf32>, vector<2x33xf32> -> vector<2x33xf32>
    %408 = vector.broadcast %11 : vector<1x33xf32> to vector<2x33xf32>
    %409 = arith.addf %407, %408 : vector<2x33xf32>
    %cst_158 = arith.constant 5.000000e-01 : f32
    %410 = vector.broadcast %cst_158 : f32 to vector<2x33xf32>
    %411 = arith.mulf %410, %409 : vector<2x33xf32>
    %412 = math.tanh %411 : vector<2x33xf32>
    %cst_159 = arith.constant 1.000000e+00 : f32
    %413 = vector.broadcast %cst_159 : f32 to vector<2x33xf32>
    %414 = arith.addf %412, %413 : vector<2x33xf32>
    %cst_160 = arith.constant 5.000000e-01 : f32
    %415 = vector.broadcast %cst_160 : f32 to vector<2x33xf32>
    %416 = arith.mulf %415, %414 : vector<2x33xf32>
    %417 = arith.mulf %347, %416 : vector<2x33xf32>
    %c4_161 = arith.constant 4 : index
    %c0_162 = arith.constant 0 : index
    %c0_163 = arith.constant 0 : index
    %418 = vector.load %arg3[%c4_161, %c0_162, %c0_163] : memref<17x33x256xf32, #tpu.memory_space<vmem>>, vector<1x33x256xf32>
    %419 = vector.shape_cast %418 : vector<1x33x256xf32> to vector<33x256xf32>
    %cst_164 = arith.constant dense<0.000000e+00> : vector<2x256xf32>
    %420 = tpu.matmul %417, %419, %cst_164 {dimension_numbers = #tpu.dot_dimension_numbers<[1], [0], [0], [1], [0, 0, 1, 1], [], []>} : vector<2x33xf32>, vector<33x256xf32>, vector<2x256xf32> -> vector<2x256xf32>
    %421 = arith.addf %344, %420 : vector<2x256xf32>
    %422 = arith.mulf %348, %416 : vector<2x33xf32>
    %c4_165 = arith.constant 4 : index
    %c0_166 = arith.constant 0 : index
    %c0_167 = arith.constant 0 : index
    %423 = vector.load %arg4[%c4_165, %c0_166, %c0_167] : memref<17x33x256xf32, #tpu.memory_space<vmem>>, vector<1x33x256xf32>
    %424 = vector.shape_cast %423 : vector<1x33x256xf32> to vector<33x256xf32>
    %cst_168 = arith.constant dense<0.000000e+00> : vector<2x256xf32>
    %425 = tpu.matmul %422, %424, %cst_168 {dimension_numbers = #tpu.dot_dimension_numbers<[1], [0], [0], [1], [0, 0, 1, 1], [], []>} : vector<2x33xf32>, vector<33x256xf32>, vector<2x256xf32> -> vector<2x256xf32>
    %426 = arith.subf %421, %425 : vector<2x256xf32>
    %c5 = arith.constant 5 : index
    %c0_169 = arith.constant 0 : index
    %c0_170 = arith.constant 0 : index
    %427 = vector.load %arg0[%c5, %c0_169, %c0_170] : memref<17x2x64xf32, #tpu.memory_space<vmem>>, vector<1x2x64xf32>
    %428 = vector.shape_cast %427 : vector<1x2x64xf32> to vector<2x64xf32>
    %cst_171 = arith.constant dense<0.000000e+00> : vector<2x33xf32>
    %429 = tpu.matmul %428, %12, %cst_171 {dimension_numbers = #tpu.dot_dimension_numbers<[1], [0], [0], [1], [0, 0, 1, 1], [], []>} : vector<2x64xf32>, vector<64x33xf32>, vector<2x33xf32> -> vector<2x33xf32>
    %cst_172 = arith.constant dense<0.000000e+00> : vector<2x33xf32>
    %430 = tpu.matmul %428, %13, %cst_172 {dimension_numbers = #tpu.dot_dimension_numbers<[1], [0], [0], [1], [0, 0, 1, 1], [], []>} : vector<2x64xf32>, vector<64x33xf32>, vector<2x33xf32> -> vector<2x33xf32>
    %431 = arith.mulf %429, %429 : vector<2x33xf32>
    %432 = arith.mulf %430, %430 : vector<2x33xf32>
    %433 = arith.addf %431, %432 : vector<2x33xf32>
    %434 = math.sqrt %433 : vector<2x33xf32>
    %cst_173 = arith.constant dense<0.000000e+00> : vector<2x96xf32>
    %435 = tpu.matmul %434, %0, %cst_173 {dimension_numbers = #tpu.dot_dimension_numbers<[1], [0], [0], [1], [0, 0, 1, 1], [], []>} : vector<2x33xf32>, vector<33x96xf32>, vector<2x96xf32> -> vector<2x96xf32>
    %436 = vector.broadcast %7 : vector<1x96xf32> to vector<2x96xf32>
    %437 = arith.addf %435, %436 : vector<2x96xf32>
    %438 = vector.extract_strided_slice %437 {offsets = [0, 0], sizes = [2, 64], strides = [1, 1]} : vector<2x96xf32> to vector<2x64xf32>
    %cst_174 = arith.constant dense<0.000000e+00> : vector<2x64xf32>
    %439 = tpu.matmul %379, %2, %cst_174 {dimension_numbers = #tpu.dot_dimension_numbers<[1], [0], [0], [1], [0, 0, 1, 1], [], []>} : vector<2x32xf32>, vector<32x64xf32>, vector<2x64xf32> -> vector<2x64xf32>
    %440 = arith.addf %438, %439 : vector<2x64xf32>
    %cst_175 = arith.constant 5.000000e-01 : f32
    %441 = vector.broadcast %cst_175 : f32 to vector<2x64xf32>
    %442 = arith.mulf %441, %440 : vector<2x64xf32>
    %443 = math.tanh %442 : vector<2x64xf32>
    %cst_176 = arith.constant 1.000000e+00 : f32
    %444 = vector.broadcast %cst_176 : f32 to vector<2x64xf32>
    %445 = arith.addf %443, %444 : vector<2x64xf32>
    %cst_177 = arith.constant 5.000000e-01 : f32
    %446 = vector.broadcast %cst_177 : f32 to vector<2x64xf32>
    %447 = arith.mulf %446, %445 : vector<2x64xf32>
    %448 = vector.extract_strided_slice %447 {offsets = [0, 0], sizes = [2, 32], strides = [1, 1]} : vector<2x64xf32> to vector<2x32xf32>
    %449 = vector.extract_strided_slice %447 {offsets = [0, 32], sizes = [2, 32], strides = [1, 1]} : vector<2x64xf32> to vector<2x32xf32>
    %cst_178 = arith.constant dense<0.000000e+00> : vector<2x32xf32>
    %450 = tpu.matmul %379, %3, %cst_178 {dimension_numbers = #tpu.dot_dimension_numbers<[1], [0], [0], [1], [0, 0, 1, 1], [], []>} : vector<2x32xf32>, vector<32x32xf32>, vector<2x32xf32> -> vector<2x32xf32>
    %451 = vector.broadcast %8 : vector<1x32xf32> to vector<2x32xf32>
    %452 = arith.addf %450, %451 : vector<2x32xf32>
    %453 = vector.extract_strided_slice %437 {offsets = [0, 64], sizes = [2, 32], strides = [1, 1]} : vector<2x96xf32> to vector<2x32xf32>
    %454 = arith.mulf %448, %452 : vector<2x32xf32>
    %455 = arith.addf %453, %454 : vector<2x32xf32>
    %456 = math.tanh %455 : vector<2x32xf32>
    %cst_179 = arith.constant 1.000000e+00 : f32
    %457 = vector.broadcast %cst_179 : f32 to vector<2x32xf32>
    %458 = arith.subf %457, %449 : vector<2x32xf32>
    %459 = arith.mulf %458, %456 : vector<2x32xf32>
    %460 = arith.mulf %449, %379 : vector<2x32xf32>
    %461 = arith.addf %459, %460 : vector<2x32xf32>
    %cst_180 = arith.constant dense<0.000000e+00> : vector<2x96xf32>
    %462 = tpu.matmul %461, %1, %cst_180 {dimension_numbers = #tpu.dot_dimension_numbers<[1], [0], [0], [1], [0, 0, 1, 1], [], []>} : vector<2x32xf32>, vector<32x96xf32>, vector<2x96xf32> -> vector<2x96xf32>
    %463 = vector.broadcast %9 : vector<1x96xf32> to vector<2x96xf32>
    %464 = arith.addf %462, %463 : vector<2x96xf32>
    %465 = vector.extract_strided_slice %464 {offsets = [0, 0], sizes = [2, 64], strides = [1, 1]} : vector<2x96xf32> to vector<2x64xf32>
    %cst_181 = arith.constant dense<0.000000e+00> : vector<2x64xf32>
    %466 = tpu.matmul %406, %4, %cst_181 {dimension_numbers = #tpu.dot_dimension_numbers<[1], [0], [0], [1], [0, 0, 1, 1], [], []>} : vector<2x32xf32>, vector<32x64xf32>, vector<2x64xf32> -> vector<2x64xf32>
    %467 = arith.addf %465, %466 : vector<2x64xf32>
    %cst_182 = arith.constant 5.000000e-01 : f32
    %468 = vector.broadcast %cst_182 : f32 to vector<2x64xf32>
    %469 = arith.mulf %468, %467 : vector<2x64xf32>
    %470 = math.tanh %469 : vector<2x64xf32>
    %cst_183 = arith.constant 1.000000e+00 : f32
    %471 = vector.broadcast %cst_183 : f32 to vector<2x64xf32>
    %472 = arith.addf %470, %471 : vector<2x64xf32>
    %cst_184 = arith.constant 5.000000e-01 : f32
    %473 = vector.broadcast %cst_184 : f32 to vector<2x64xf32>
    %474 = arith.mulf %473, %472 : vector<2x64xf32>
    %475 = vector.extract_strided_slice %474 {offsets = [0, 0], sizes = [2, 32], strides = [1, 1]} : vector<2x64xf32> to vector<2x32xf32>
    %476 = vector.extract_strided_slice %474 {offsets = [0, 32], sizes = [2, 32], strides = [1, 1]} : vector<2x64xf32> to vector<2x32xf32>
    %cst_185 = arith.constant dense<0.000000e+00> : vector<2x32xf32>
    %477 = tpu.matmul %406, %5, %cst_185 {dimension_numbers = #tpu.dot_dimension_numbers<[1], [0], [0], [1], [0, 0, 1, 1], [], []>} : vector<2x32xf32>, vector<32x32xf32>, vector<2x32xf32> -> vector<2x32xf32>
    %478 = vector.broadcast %10 : vector<1x32xf32> to vector<2x32xf32>
    %479 = arith.addf %477, %478 : vector<2x32xf32>
    %480 = vector.extract_strided_slice %464 {offsets = [0, 64], sizes = [2, 32], strides = [1, 1]} : vector<2x96xf32> to vector<2x32xf32>
    %481 = arith.mulf %475, %479 : vector<2x32xf32>
    %482 = arith.addf %480, %481 : vector<2x32xf32>
    %483 = math.tanh %482 : vector<2x32xf32>
    %cst_186 = arith.constant 1.000000e+00 : f32
    %484 = vector.broadcast %cst_186 : f32 to vector<2x32xf32>
    %485 = arith.subf %484, %476 : vector<2x32xf32>
    %486 = arith.mulf %485, %483 : vector<2x32xf32>
    %487 = arith.mulf %476, %406 : vector<2x32xf32>
    %488 = arith.addf %486, %487 : vector<2x32xf32>
    %cst_187 = arith.constant dense<0.000000e+00> : vector<2x33xf32>
    %489 = tpu.matmul %488, %6, %cst_187 {dimension_numbers = #tpu.dot_dimension_numbers<[1], [0], [0], [1], [0, 0, 1, 1], [], []>} : vector<2x32xf32>, vector<32x33xf32>, vector<2x33xf32> -> vector<2x33xf32>
    %490 = vector.broadcast %11 : vector<1x33xf32> to vector<2x33xf32>
    %491 = arith.addf %489, %490 : vector<2x33xf32>
    %cst_188 = arith.constant 5.000000e-01 : f32
    %492 = vector.broadcast %cst_188 : f32 to vector<2x33xf32>
    %493 = arith.mulf %492, %491 : vector<2x33xf32>
    %494 = math.tanh %493 : vector<2x33xf32>
    %cst_189 = arith.constant 1.000000e+00 : f32
    %495 = vector.broadcast %cst_189 : f32 to vector<2x33xf32>
    %496 = arith.addf %494, %495 : vector<2x33xf32>
    %cst_190 = arith.constant 5.000000e-01 : f32
    %497 = vector.broadcast %cst_190 : f32 to vector<2x33xf32>
    %498 = arith.mulf %497, %496 : vector<2x33xf32>
    %499 = arith.mulf %429, %498 : vector<2x33xf32>
    %c5_191 = arith.constant 5 : index
    %c0_192 = arith.constant 0 : index
    %c0_193 = arith.constant 0 : index
    %500 = vector.load %arg3[%c5_191, %c0_192, %c0_193] : memref<17x33x256xf32, #tpu.memory_space<vmem>>, vector<1x33x256xf32>
    %501 = vector.shape_cast %500 : vector<1x33x256xf32> to vector<33x256xf32>
    %cst_194 = arith.constant dense<0.000000e+00> : vector<2x256xf32>
    %502 = tpu.matmul %499, %501, %cst_194 {dimension_numbers = #tpu.dot_dimension_numbers<[1], [0], [0], [1], [0, 0, 1, 1], [], []>} : vector<2x33xf32>, vector<33x256xf32>, vector<2x256xf32> -> vector<2x256xf32>
    %503 = arith.addf %426, %502 : vector<2x256xf32>
    %504 = arith.mulf %430, %498 : vector<2x33xf32>
    %c5_195 = arith.constant 5 : index
    %c0_196 = arith.constant 0 : index
    %c0_197 = arith.constant 0 : index
    %505 = vector.load %arg4[%c5_195, %c0_196, %c0_197] : memref<17x33x256xf32, #tpu.memory_space<vmem>>, vector<1x33x256xf32>
    %506 = vector.shape_cast %505 : vector<1x33x256xf32> to vector<33x256xf32>
    %cst_198 = arith.constant dense<0.000000e+00> : vector<2x256xf32>
    %507 = tpu.matmul %504, %506, %cst_198 {dimension_numbers = #tpu.dot_dimension_numbers<[1], [0], [0], [1], [0, 0, 1, 1], [], []>} : vector<2x33xf32>, vector<33x256xf32>, vector<2x256xf32> -> vector<2x256xf32>
    %508 = arith.subf %503, %507 : vector<2x256xf32>
    %c6 = arith.constant 6 : index
    %c0_199 = arith.constant 0 : index
    %c0_200 = arith.constant 0 : index
    %509 = vector.load %arg0[%c6, %c0_199, %c0_200] : memref<17x2x64xf32, #tpu.memory_space<vmem>>, vector<1x2x64xf32>
    %510 = vector.shape_cast %509 : vector<1x2x64xf32> to vector<2x64xf32>
    %cst_201 = arith.constant dense<0.000000e+00> : vector<2x33xf32>
    %511 = tpu.matmul %510, %12, %cst_201 {dimension_numbers = #tpu.dot_dimension_numbers<[1], [0], [0], [1], [0, 0, 1, 1], [], []>} : vector<2x64xf32>, vector<64x33xf32>, vector<2x33xf32> -> vector<2x33xf32>
    %cst_202 = arith.constant dense<0.000000e+00> : vector<2x33xf32>
    %512 = tpu.matmul %510, %13, %cst_202 {dimension_numbers = #tpu.dot_dimension_numbers<[1], [0], [0], [1], [0, 0, 1, 1], [], []>} : vector<2x64xf32>, vector<64x33xf32>, vector<2x33xf32> -> vector<2x33xf32>
    %513 = arith.mulf %511, %511 : vector<2x33xf32>
    %514 = arith.mulf %512, %512 : vector<2x33xf32>
    %515 = arith.addf %513, %514 : vector<2x33xf32>
    %516 = math.sqrt %515 : vector<2x33xf32>
    %cst_203 = arith.constant dense<0.000000e+00> : vector<2x96xf32>
    %517 = tpu.matmul %516, %0, %cst_203 {dimension_numbers = #tpu.dot_dimension_numbers<[1], [0], [0], [1], [0, 0, 1, 1], [], []>} : vector<2x33xf32>, vector<33x96xf32>, vector<2x96xf32> -> vector<2x96xf32>
    %518 = vector.broadcast %7 : vector<1x96xf32> to vector<2x96xf32>
    %519 = arith.addf %517, %518 : vector<2x96xf32>
    %520 = vector.extract_strided_slice %519 {offsets = [0, 0], sizes = [2, 64], strides = [1, 1]} : vector<2x96xf32> to vector<2x64xf32>
    %cst_204 = arith.constant dense<0.000000e+00> : vector<2x64xf32>
    %521 = tpu.matmul %461, %2, %cst_204 {dimension_numbers = #tpu.dot_dimension_numbers<[1], [0], [0], [1], [0, 0, 1, 1], [], []>} : vector<2x32xf32>, vector<32x64xf32>, vector<2x64xf32> -> vector<2x64xf32>
    %522 = arith.addf %520, %521 : vector<2x64xf32>
    %cst_205 = arith.constant 5.000000e-01 : f32
    %523 = vector.broadcast %cst_205 : f32 to vector<2x64xf32>
    %524 = arith.mulf %523, %522 : vector<2x64xf32>
    %525 = math.tanh %524 : vector<2x64xf32>
    %cst_206 = arith.constant 1.000000e+00 : f32
    %526 = vector.broadcast %cst_206 : f32 to vector<2x64xf32>
    %527 = arith.addf %525, %526 : vector<2x64xf32>
    %cst_207 = arith.constant 5.000000e-01 : f32
    %528 = vector.broadcast %cst_207 : f32 to vector<2x64xf32>
    %529 = arith.mulf %528, %527 : vector<2x64xf32>
    %530 = vector.extract_strided_slice %529 {offsets = [0, 0], sizes = [2, 32], strides = [1, 1]} : vector<2x64xf32> to vector<2x32xf32>
    %531 = vector.extract_strided_slice %529 {offsets = [0, 32], sizes = [2, 32], strides = [1, 1]} : vector<2x64xf32> to vector<2x32xf32>
    %cst_208 = arith.constant dense<0.000000e+00> : vector<2x32xf32>
    %532 = tpu.matmul %461, %3, %cst_208 {dimension_numbers = #tpu.dot_dimension_numbers<[1], [0], [0], [1], [0, 0, 1, 1], [], []>} : vector<2x32xf32>, vector<32x32xf32>, vector<2x32xf32> -> vector<2x32xf32>
    %533 = vector.broadcast %8 : vector<1x32xf32> to vector<2x32xf32>
    %534 = arith.addf %532, %533 : vector<2x32xf32>
    %535 = vector.extract_strided_slice %519 {offsets = [0, 64], sizes = [2, 32], strides = [1, 1]} : vector<2x96xf32> to vector<2x32xf32>
    %536 = arith.mulf %530, %534 : vector<2x32xf32>
    %537 = arith.addf %535, %536 : vector<2x32xf32>
    %538 = math.tanh %537 : vector<2x32xf32>
    %cst_209 = arith.constant 1.000000e+00 : f32
    %539 = vector.broadcast %cst_209 : f32 to vector<2x32xf32>
    %540 = arith.subf %539, %531 : vector<2x32xf32>
    %541 = arith.mulf %540, %538 : vector<2x32xf32>
    %542 = arith.mulf %531, %461 : vector<2x32xf32>
    %543 = arith.addf %541, %542 : vector<2x32xf32>
    %cst_210 = arith.constant dense<0.000000e+00> : vector<2x96xf32>
    %544 = tpu.matmul %543, %1, %cst_210 {dimension_numbers = #tpu.dot_dimension_numbers<[1], [0], [0], [1], [0, 0, 1, 1], [], []>} : vector<2x32xf32>, vector<32x96xf32>, vector<2x96xf32> -> vector<2x96xf32>
    %545 = vector.broadcast %9 : vector<1x96xf32> to vector<2x96xf32>
    %546 = arith.addf %544, %545 : vector<2x96xf32>
    %547 = vector.extract_strided_slice %546 {offsets = [0, 0], sizes = [2, 64], strides = [1, 1]} : vector<2x96xf32> to vector<2x64xf32>
    %cst_211 = arith.constant dense<0.000000e+00> : vector<2x64xf32>
    %548 = tpu.matmul %488, %4, %cst_211 {dimension_numbers = #tpu.dot_dimension_numbers<[1], [0], [0], [1], [0, 0, 1, 1], [], []>} : vector<2x32xf32>, vector<32x64xf32>, vector<2x64xf32> -> vector<2x64xf32>
    %549 = arith.addf %547, %548 : vector<2x64xf32>
    %cst_212 = arith.constant 5.000000e-01 : f32
    %550 = vector.broadcast %cst_212 : f32 to vector<2x64xf32>
    %551 = arith.mulf %550, %549 : vector<2x64xf32>
    %552 = math.tanh %551 : vector<2x64xf32>
    %cst_213 = arith.constant 1.000000e+00 : f32
    %553 = vector.broadcast %cst_213 : f32 to vector<2x64xf32>
    %554 = arith.addf %552, %553 : vector<2x64xf32>
    %cst_214 = arith.constant 5.000000e-01 : f32
    %555 = vector.broadcast %cst_214 : f32 to vector<2x64xf32>
    %556 = arith.mulf %555, %554 : vector<2x64xf32>
    %557 = vector.extract_strided_slice %556 {offsets = [0, 0], sizes = [2, 32], strides = [1, 1]} : vector<2x64xf32> to vector<2x32xf32>
    %558 = vector.extract_strided_slice %556 {offsets = [0, 32], sizes = [2, 32], strides = [1, 1]} : vector<2x64xf32> to vector<2x32xf32>
    %cst_215 = arith.constant dense<0.000000e+00> : vector<2x32xf32>
    %559 = tpu.matmul %488, %5, %cst_215 {dimension_numbers = #tpu.dot_dimension_numbers<[1], [0], [0], [1], [0, 0, 1, 1], [], []>} : vector<2x32xf32>, vector<32x32xf32>, vector<2x32xf32> -> vector<2x32xf32>
    %560 = vector.broadcast %10 : vector<1x32xf32> to vector<2x32xf32>
    %561 = arith.addf %559, %560 : vector<2x32xf32>
    %562 = vector.extract_strided_slice %546 {offsets = [0, 64], sizes = [2, 32], strides = [1, 1]} : vector<2x96xf32> to vector<2x32xf32>
    %563 = arith.mulf %557, %561 : vector<2x32xf32>
    %564 = arith.addf %562, %563 : vector<2x32xf32>
    %565 = math.tanh %564 : vector<2x32xf32>
    %cst_216 = arith.constant 1.000000e+00 : f32
    %566 = vector.broadcast %cst_216 : f32 to vector<2x32xf32>
    %567 = arith.subf %566, %558 : vector<2x32xf32>
    %568 = arith.mulf %567, %565 : vector<2x32xf32>
    %569 = arith.mulf %558, %488 : vector<2x32xf32>
    %570 = arith.addf %568, %569 : vector<2x32xf32>
    %cst_217 = arith.constant dense<0.000000e+00> : vector<2x33xf32>
    %571 = tpu.matmul %570, %6, %cst_217 {dimension_numbers = #tpu.dot_dimension_numbers<[1], [0], [0], [1], [0, 0, 1, 1], [], []>} : vector<2x32xf32>, vector<32x33xf32>, vector<2x33xf32> -> vector<2x33xf32>
    %572 = vector.broadcast %11 : vector<1x33xf32> to vector<2x33xf32>
    %573 = arith.addf %571, %572 : vector<2x33xf32>
    %cst_218 = arith.constant 5.000000e-01 : f32
    %574 = vector.broadcast %cst_218 : f32 to vector<2x33xf32>
    %575 = arith.mulf %574, %573 : vector<2x33xf32>
    %576 = math.tanh %575 : vector<2x33xf32>
    %cst_219 = arith.constant 1.000000e+00 : f32
    %577 = vector.broadcast %cst_219 : f32 to vector<2x33xf32>
    %578 = arith.addf %576, %577 : vector<2x33xf32>
    %cst_220 = arith.constant 5.000000e-01 : f32
    %579 = vector.broadcast %cst_220 : f32 to vector<2x33xf32>
    %580 = arith.mulf %579, %578 : vector<2x33xf32>
    %581 = arith.mulf %511, %580 : vector<2x33xf32>
    %c6_221 = arith.constant 6 : index
    %c0_222 = arith.constant 0 : index
    %c0_223 = arith.constant 0 : index
    %582 = vector.load %arg3[%c6_221, %c0_222, %c0_223] : memref<17x33x256xf32, #tpu.memory_space<vmem>>, vector<1x33x256xf32>
    %583 = vector.shape_cast %582 : vector<1x33x256xf32> to vector<33x256xf32>
    %cst_224 = arith.constant dense<0.000000e+00> : vector<2x256xf32>
    %584 = tpu.matmul %581, %583, %cst_224 {dimension_numbers = #tpu.dot_dimension_numbers<[1], [0], [0], [1], [0, 0, 1, 1], [], []>} : vector<2x33xf32>, vector<33x256xf32>, vector<2x256xf32> -> vector<2x256xf32>
    %585 = arith.addf %508, %584 : vector<2x256xf32>
    %586 = arith.mulf %512, %580 : vector<2x33xf32>
    %c6_225 = arith.constant 6 : index
    %c0_226 = arith.constant 0 : index
    %c0_227 = arith.constant 0 : index
    %587 = vector.load %arg4[%c6_225, %c0_226, %c0_227] : memref<17x33x256xf32, #tpu.memory_space<vmem>>, vector<1x33x256xf32>
    %588 = vector.shape_cast %587 : vector<1x33x256xf32> to vector<33x256xf32>
    %cst_228 = arith.constant dense<0.000000e+00> : vector<2x256xf32>
    %589 = tpu.matmul %586, %588, %cst_228 {dimension_numbers = #tpu.dot_dimension_numbers<[1], [0], [0], [1], [0, 0, 1, 1], [], []>} : vector<2x33xf32>, vector<33x256xf32>, vector<2x256xf32> -> vector<2x256xf32>
    %590 = arith.subf %585, %589 : vector<2x256xf32>
    %c7 = arith.constant 7 : index
    %c0_229 = arith.constant 0 : index
    %c0_230 = arith.constant 0 : index
    %591 = vector.load %arg0[%c7, %c0_229, %c0_230] : memref<17x2x64xf32, #tpu.memory_space<vmem>>, vector<1x2x64xf32>
    %592 = vector.shape_cast %591 : vector<1x2x64xf32> to vector<2x64xf32>
    %cst_231 = arith.constant dense<0.000000e+00> : vector<2x33xf32>
    %593 = tpu.matmul %592, %12, %cst_231 {dimension_numbers = #tpu.dot_dimension_numbers<[1], [0], [0], [1], [0, 0, 1, 1], [], []>} : vector<2x64xf32>, vector<64x33xf32>, vector<2x33xf32> -> vector<2x33xf32>
    %cst_232 = arith.constant dense<0.000000e+00> : vector<2x33xf32>
    %594 = tpu.matmul %592, %13, %cst_232 {dimension_numbers = #tpu.dot_dimension_numbers<[1], [0], [0], [1], [0, 0, 1, 1], [], []>} : vector<2x64xf32>, vector<64x33xf32>, vector<2x33xf32> -> vector<2x33xf32>
    %595 = arith.mulf %593, %593 : vector<2x33xf32>
    %596 = arith.mulf %594, %594 : vector<2x33xf32>
    %597 = arith.addf %595, %596 : vector<2x33xf32>
    %598 = math.sqrt %597 : vector<2x33xf32>
    %cst_233 = arith.constant dense<0.000000e+00> : vector<2x96xf32>
    %599 = tpu.matmul %598, %0, %cst_233 {dimension_numbers = #tpu.dot_dimension_numbers<[1], [0], [0], [1], [0, 0, 1, 1], [], []>} : vector<2x33xf32>, vector<33x96xf32>, vector<2x96xf32> -> vector<2x96xf32>
    %600 = vector.broadcast %7 : vector<1x96xf32> to vector<2x96xf32>
    %601 = arith.addf %599, %600 : vector<2x96xf32>
    %602 = vector.extract_strided_slice %601 {offsets = [0, 0], sizes = [2, 64], strides = [1, 1]} : vector<2x96xf32> to vector<2x64xf32>
    %cst_234 = arith.constant dense<0.000000e+00> : vector<2x64xf32>
    %603 = tpu.matmul %543, %2, %cst_234 {dimension_numbers = #tpu.dot_dimension_numbers<[1], [0], [0], [1], [0, 0, 1, 1], [], []>} : vector<2x32xf32>, vector<32x64xf32>, vector<2x64xf32> -> vector<2x64xf32>
    %604 = arith.addf %602, %603 : vector<2x64xf32>
    %cst_235 = arith.constant 5.000000e-01 : f32
    %605 = vector.broadcast %cst_235 : f32 to vector<2x64xf32>
    %606 = arith.mulf %605, %604 : vector<2x64xf32>
    %607 = math.tanh %606 : vector<2x64xf32>
    %cst_236 = arith.constant 1.000000e+00 : f32
    %608 = vector.broadcast %cst_236 : f32 to vector<2x64xf32>
    %609 = arith.addf %607, %608 : vector<2x64xf32>
    %cst_237 = arith.constant 5.000000e-01 : f32
    %610 = vector.broadcast %cst_237 : f32 to vector<2x64xf32>
    %611 = arith.mulf %610, %609 : vector<2x64xf32>
    %612 = vector.extract_strided_slice %611 {offsets = [0, 0], sizes = [2, 32], strides = [1, 1]} : vector<2x64xf32> to vector<2x32xf32>
    %613 = vector.extract_strided_slice %611 {offsets = [0, 32], sizes = [2, 32], strides = [1, 1]} : vector<2x64xf32> to vector<2x32xf32>
    %cst_238 = arith.constant dense<0.000000e+00> : vector<2x32xf32>
    %614 = tpu.matmul %543, %3, %cst_238 {dimension_numbers = #tpu.dot_dimension_numbers<[1], [0], [0], [1], [0, 0, 1, 1], [], []>} : vector<2x32xf32>, vector<32x32xf32>, vector<2x32xf32> -> vector<2x32xf32>
    %615 = vector.broadcast %8 : vector<1x32xf32> to vector<2x32xf32>
    %616 = arith.addf %614, %615 : vector<2x32xf32>
    %617 = vector.extract_strided_slice %601 {offsets = [0, 64], sizes = [2, 32], strides = [1, 1]} : vector<2x96xf32> to vector<2x32xf32>
    %618 = arith.mulf %612, %616 : vector<2x32xf32>
    %619 = arith.addf %617, %618 : vector<2x32xf32>
    %620 = math.tanh %619 : vector<2x32xf32>
    %cst_239 = arith.constant 1.000000e+00 : f32
    %621 = vector.broadcast %cst_239 : f32 to vector<2x32xf32>
    %622 = arith.subf %621, %613 : vector<2x32xf32>
    %623 = arith.mulf %622, %620 : vector<2x32xf32>
    %624 = arith.mulf %613, %543 : vector<2x32xf32>
    %625 = arith.addf %623, %624 : vector<2x32xf32>
    %cst_240 = arith.constant dense<0.000000e+00> : vector<2x96xf32>
    %626 = tpu.matmul %625, %1, %cst_240 {dimension_numbers = #tpu.dot_dimension_numbers<[1], [0], [0], [1], [0, 0, 1, 1], [], []>} : vector<2x32xf32>, vector<32x96xf32>, vector<2x96xf32> -> vector<2x96xf32>
    %627 = vector.broadcast %9 : vector<1x96xf32> to vector<2x96xf32>
    %628 = arith.addf %626, %627 : vector<2x96xf32>
    %629 = vector.extract_strided_slice %628 {offsets = [0, 0], sizes = [2, 64], strides = [1, 1]} : vector<2x96xf32> to vector<2x64xf32>
    %cst_241 = arith.constant dense<0.000000e+00> : vector<2x64xf32>
    %630 = tpu.matmul %570, %4, %cst_241 {dimension_numbers = #tpu.dot_dimension_numbers<[1], [0], [0], [1], [0, 0, 1, 1], [], []>} : vector<2x32xf32>, vector<32x64xf32>, vector<2x64xf32> -> vector<2x64xf32>
    %631 = arith.addf %629, %630 : vector<2x64xf32>
    %cst_242 = arith.constant 5.000000e-01 : f32
    %632 = vector.broadcast %cst_242 : f32 to vector<2x64xf32>
    %633 = arith.mulf %632, %631 : vector<2x64xf32>
    %634 = math.tanh %633 : vector<2x64xf32>
    %cst_243 = arith.constant 1.000000e+00 : f32
    %635 = vector.broadcast %cst_243 : f32 to vector<2x64xf32>
    %636 = arith.addf %634, %635 : vector<2x64xf32>
    %cst_244 = arith.constant 5.000000e-01 : f32
    %637 = vector.broadcast %cst_244 : f32 to vector<2x64xf32>
    %638 = arith.mulf %637, %636 : vector<2x64xf32>
    %639 = vector.extract_strided_slice %638 {offsets = [0, 0], sizes = [2, 32], strides = [1, 1]} : vector<2x64xf32> to vector<2x32xf32>
    %640 = vector.extract_strided_slice %638 {offsets = [0, 32], sizes = [2, 32], strides = [1, 1]} : vector<2x64xf32> to vector<2x32xf32>
    %cst_245 = arith.constant dense<0.000000e+00> : vector<2x32xf32>
    %641 = tpu.matmul %570, %5, %cst_245 {dimension_numbers = #tpu.dot_dimension_numbers<[1], [0], [0], [1], [0, 0, 1, 1], [], []>} : vector<2x32xf32>, vector<32x32xf32>, vector<2x32xf32> -> vector<2x32xf32>
    %642 = vector.broadcast %10 : vector<1x32xf32> to vector<2x32xf32>
    %643 = arith.addf %641, %642 : vector<2x32xf32>
    %644 = vector.extract_strided_slice %628 {offsets = [0, 64], sizes = [2, 32], strides = [1, 1]} : vector<2x96xf32> to vector<2x32xf32>
    %645 = arith.mulf %639, %643 : vector<2x32xf32>
    %646 = arith.addf %644, %645 : vector<2x32xf32>
    %647 = math.tanh %646 : vector<2x32xf32>
    %cst_246 = arith.constant 1.000000e+00 : f32
    %648 = vector.broadcast %cst_246 : f32 to vector<2x32xf32>
    %649 = arith.subf %648, %640 : vector<2x32xf32>
    %650 = arith.mulf %649, %647 : vector<2x32xf32>
    %651 = arith.mulf %640, %570 : vector<2x32xf32>
    %652 = arith.addf %650, %651 : vector<2x32xf32>
    %cst_247 = arith.constant dense<0.000000e+00> : vector<2x33xf32>
    %653 = tpu.matmul %652, %6, %cst_247 {dimension_numbers = #tpu.dot_dimension_numbers<[1], [0], [0], [1], [0, 0, 1, 1], [], []>} : vector<2x32xf32>, vector<32x33xf32>, vector<2x33xf32> -> vector<2x33xf32>
    %654 = vector.broadcast %11 : vector<1x33xf32> to vector<2x33xf32>
    %655 = arith.addf %653, %654 : vector<2x33xf32>
    %cst_248 = arith.constant 5.000000e-01 : f32
    %656 = vector.broadcast %cst_248 : f32 to vector<2x33xf32>
    %657 = arith.mulf %656, %655 : vector<2x33xf32>
    %658 = math.tanh %657 : vector<2x33xf32>
    %cst_249 = arith.constant 1.000000e+00 : f32
    %659 = vector.broadcast %cst_249 : f32 to vector<2x33xf32>
    %660 = arith.addf %658, %659 : vector<2x33xf32>
    %cst_250 = arith.constant 5.000000e-01 : f32
    %661 = vector.broadcast %cst_250 : f32 to vector<2x33xf32>
    %662 = arith.mulf %661, %660 : vector<2x33xf32>
    %663 = arith.mulf %593, %662 : vector<2x33xf32>
    %c7_251 = arith.constant 7 : index
    %c0_252 = arith.constant 0 : index
    %c0_253 = arith.constant 0 : index
    %664 = vector.load %arg3[%c7_251, %c0_252, %c0_253] : memref<17x33x256xf32, #tpu.memory_space<vmem>>, vector<1x33x256xf32>
    %665 = vector.shape_cast %664 : vector<1x33x256xf32> to vector<33x256xf32>
    %cst_254 = arith.constant dense<0.000000e+00> : vector<2x256xf32>
    %666 = tpu.matmul %663, %665, %cst_254 {dimension_numbers = #tpu.dot_dimension_numbers<[1], [0], [0], [1], [0, 0, 1, 1], [], []>} : vector<2x33xf32>, vector<33x256xf32>, vector<2x256xf32> -> vector<2x256xf32>
    %667 = arith.addf %590, %666 : vector<2x256xf32>
    %668 = arith.mulf %594, %662 : vector<2x33xf32>
    %c7_255 = arith.constant 7 : index
    %c0_256 = arith.constant 0 : index
    %c0_257 = arith.constant 0 : index
    %669 = vector.load %arg4[%c7_255, %c0_256, %c0_257] : memref<17x33x256xf32, #tpu.memory_space<vmem>>, vector<1x33x256xf32>
    %670 = vector.shape_cast %669 : vector<1x33x256xf32> to vector<33x256xf32>
    %cst_258 = arith.constant dense<0.000000e+00> : vector<2x256xf32>
    %671 = tpu.matmul %668, %670, %cst_258 {dimension_numbers = #tpu.dot_dimension_numbers<[1], [0], [0], [1], [0, 0, 1, 1], [], []>} : vector<2x33xf32>, vector<33x256xf32>, vector<2x256xf32> -> vector<2x256xf32>
    %672 = arith.subf %667, %671 : vector<2x256xf32>
    %c8 = arith.constant 8 : index
    %c0_259 = arith.constant 0 : index
    %c0_260 = arith.constant 0 : index
    %673 = vector.load %arg0[%c8, %c0_259, %c0_260] : memref<17x2x64xf32, #tpu.memory_space<vmem>>, vector<1x2x64xf32>
    %674 = vector.shape_cast %673 : vector<1x2x64xf32> to vector<2x64xf32>
    %cst_261 = arith.constant dense<0.000000e+00> : vector<2x33xf32>
    %675 = tpu.matmul %674, %12, %cst_261 {dimension_numbers = #tpu.dot_dimension_numbers<[1], [0], [0], [1], [0, 0, 1, 1], [], []>} : vector<2x64xf32>, vector<64x33xf32>, vector<2x33xf32> -> vector<2x33xf32>
    %cst_262 = arith.constant dense<0.000000e+00> : vector<2x33xf32>
    %676 = tpu.matmul %674, %13, %cst_262 {dimension_numbers = #tpu.dot_dimension_numbers<[1], [0], [0], [1], [0, 0, 1, 1], [], []>} : vector<2x64xf32>, vector<64x33xf32>, vector<2x33xf32> -> vector<2x33xf32>
    %677 = arith.mulf %675, %675 : vector<2x33xf32>
    %678 = arith.mulf %676, %676 : vector<2x33xf32>
    %679 = arith.addf %677, %678 : vector<2x33xf32>
    %680 = math.sqrt %679 : vector<2x33xf32>
    %cst_263 = arith.constant dense<0.000000e+00> : vector<2x96xf32>
    %681 = tpu.matmul %680, %0, %cst_263 {dimension_numbers = #tpu.dot_dimension_numbers<[1], [0], [0], [1], [0, 0, 1, 1], [], []>} : vector<2x33xf32>, vector<33x96xf32>, vector<2x96xf32> -> vector<2x96xf32>
    %682 = vector.broadcast %7 : vector<1x96xf32> to vector<2x96xf32>
    %683 = arith.addf %681, %682 : vector<2x96xf32>
    %684 = vector.extract_strided_slice %683 {offsets = [0, 0], sizes = [2, 64], strides = [1, 1]} : vector<2x96xf32> to vector<2x64xf32>
    %cst_264 = arith.constant dense<0.000000e+00> : vector<2x64xf32>
    %685 = tpu.matmul %625, %2, %cst_264 {dimension_numbers = #tpu.dot_dimension_numbers<[1], [0], [0], [1], [0, 0, 1, 1], [], []>} : vector<2x32xf32>, vector<32x64xf32>, vector<2x64xf32> -> vector<2x64xf32>
    %686 = arith.addf %684, %685 : vector<2x64xf32>
    %cst_265 = arith.constant 5.000000e-01 : f32
    %687 = vector.broadcast %cst_265 : f32 to vector<2x64xf32>
    %688 = arith.mulf %687, %686 : vector<2x64xf32>
    %689 = math.tanh %688 : vector<2x64xf32>
    %cst_266 = arith.constant 1.000000e+00 : f32
    %690 = vector.broadcast %cst_266 : f32 to vector<2x64xf32>
    %691 = arith.addf %689, %690 : vector<2x64xf32>
    %cst_267 = arith.constant 5.000000e-01 : f32
    %692 = vector.broadcast %cst_267 : f32 to vector<2x64xf32>
    %693 = arith.mulf %692, %691 : vector<2x64xf32>
    %694 = vector.extract_strided_slice %693 {offsets = [0, 0], sizes = [2, 32], strides = [1, 1]} : vector<2x64xf32> to vector<2x32xf32>
    %695 = vector.extract_strided_slice %693 {offsets = [0, 32], sizes = [2, 32], strides = [1, 1]} : vector<2x64xf32> to vector<2x32xf32>
    %cst_268 = arith.constant dense<0.000000e+00> : vector<2x32xf32>
    %696 = tpu.matmul %625, %3, %cst_268 {dimension_numbers = #tpu.dot_dimension_numbers<[1], [0], [0], [1], [0, 0, 1, 1], [], []>} : vector<2x32xf32>, vector<32x32xf32>, vector<2x32xf32> -> vector<2x32xf32>
    %697 = vector.broadcast %8 : vector<1x32xf32> to vector<2x32xf32>
    %698 = arith.addf %696, %697 : vector<2x32xf32>
    %699 = vector.extract_strided_slice %683 {offsets = [0, 64], sizes = [2, 32], strides = [1, 1]} : vector<2x96xf32> to vector<2x32xf32>
    %700 = arith.mulf %694, %698 : vector<2x32xf32>
    %701 = arith.addf %699, %700 : vector<2x32xf32>
    %702 = math.tanh %701 : vector<2x32xf32>
    %cst_269 = arith.constant 1.000000e+00 : f32
    %703 = vector.broadcast %cst_269 : f32 to vector<2x32xf32>
    %704 = arith.subf %703, %695 : vector<2x32xf32>
    %705 = arith.mulf %704, %702 : vector<2x32xf32>
    %706 = arith.mulf %695, %625 : vector<2x32xf32>
    %707 = arith.addf %705, %706 : vector<2x32xf32>
    %cst_270 = arith.constant dense<0.000000e+00> : vector<2x96xf32>
    %708 = tpu.matmul %707, %1, %cst_270 {dimension_numbers = #tpu.dot_dimension_numbers<[1], [0], [0], [1], [0, 0, 1, 1], [], []>} : vector<2x32xf32>, vector<32x96xf32>, vector<2x96xf32> -> vector<2x96xf32>
    %709 = vector.broadcast %9 : vector<1x96xf32> to vector<2x96xf32>
    %710 = arith.addf %708, %709 : vector<2x96xf32>
    %711 = vector.extract_strided_slice %710 {offsets = [0, 0], sizes = [2, 64], strides = [1, 1]} : vector<2x96xf32> to vector<2x64xf32>
    %cst_271 = arith.constant dense<0.000000e+00> : vector<2x64xf32>
    %712 = tpu.matmul %652, %4, %cst_271 {dimension_numbers = #tpu.dot_dimension_numbers<[1], [0], [0], [1], [0, 0, 1, 1], [], []>} : vector<2x32xf32>, vector<32x64xf32>, vector<2x64xf32> -> vector<2x64xf32>
    %713 = arith.addf %711, %712 : vector<2x64xf32>
    %cst_272 = arith.constant 5.000000e-01 : f32
    %714 = vector.broadcast %cst_272 : f32 to vector<2x64xf32>
    %715 = arith.mulf %714, %713 : vector<2x64xf32>
    %716 = math.tanh %715 : vector<2x64xf32>
    %cst_273 = arith.constant 1.000000e+00 : f32
    %717 = vector.broadcast %cst_273 : f32 to vector<2x64xf32>
    %718 = arith.addf %716, %717 : vector<2x64xf32>
    %cst_274 = arith.constant 5.000000e-01 : f32
    %719 = vector.broadcast %cst_274 : f32 to vector<2x64xf32>
    %720 = arith.mulf %719, %718 : vector<2x64xf32>
    %721 = vector.extract_strided_slice %720 {offsets = [0, 0], sizes = [2, 32], strides = [1, 1]} : vector<2x64xf32> to vector<2x32xf32>
    %722 = vector.extract_strided_slice %720 {offsets = [0, 32], sizes = [2, 32], strides = [1, 1]} : vector<2x64xf32> to vector<2x32xf32>
    %cst_275 = arith.constant dense<0.000000e+00> : vector<2x32xf32>
    %723 = tpu.matmul %652, %5, %cst_275 {dimension_numbers = #tpu.dot_dimension_numbers<[1], [0], [0], [1], [0, 0, 1, 1], [], []>} : vector<2x32xf32>, vector<32x32xf32>, vector<2x32xf32> -> vector<2x32xf32>
    %724 = vector.broadcast %10 : vector<1x32xf32> to vector<2x32xf32>
    %725 = arith.addf %723, %724 : vector<2x32xf32>
    %726 = vector.extract_strided_slice %710 {offsets = [0, 64], sizes = [2, 32], strides = [1, 1]} : vector<2x96xf32> to vector<2x32xf32>
    %727 = arith.mulf %721, %725 : vector<2x32xf32>
    %728 = arith.addf %726, %727 : vector<2x32xf32>
    %729 = math.tanh %728 : vector<2x32xf32>
    %cst_276 = arith.constant 1.000000e+00 : f32
    %730 = vector.broadcast %cst_276 : f32 to vector<2x32xf32>
    %731 = arith.subf %730, %722 : vector<2x32xf32>
    %732 = arith.mulf %731, %729 : vector<2x32xf32>
    %733 = arith.mulf %722, %652 : vector<2x32xf32>
    %734 = arith.addf %732, %733 : vector<2x32xf32>
    %cst_277 = arith.constant dense<0.000000e+00> : vector<2x33xf32>
    %735 = tpu.matmul %734, %6, %cst_277 {dimension_numbers = #tpu.dot_dimension_numbers<[1], [0], [0], [1], [0, 0, 1, 1], [], []>} : vector<2x32xf32>, vector<32x33xf32>, vector<2x33xf32> -> vector<2x33xf32>
    %736 = vector.broadcast %11 : vector<1x33xf32> to vector<2x33xf32>
    %737 = arith.addf %735, %736 : vector<2x33xf32>
    %cst_278 = arith.constant 5.000000e-01 : f32
    %738 = vector.broadcast %cst_278 : f32 to vector<2x33xf32>
    %739 = arith.mulf %738, %737 : vector<2x33xf32>
    %740 = math.tanh %739 : vector<2x33xf32>
    %cst_279 = arith.constant 1.000000e+00 : f32
    %741 = vector.broadcast %cst_279 : f32 to vector<2x33xf32>
    %742 = arith.addf %740, %741 : vector<2x33xf32>
    %cst_280 = arith.constant 5.000000e-01 : f32
    %743 = vector.broadcast %cst_280 : f32 to vector<2x33xf32>
    %744 = arith.mulf %743, %742 : vector<2x33xf32>
    %745 = arith.mulf %675, %744 : vector<2x33xf32>
    %c8_281 = arith.constant 8 : index
    %c0_282 = arith.constant 0 : index
    %c0_283 = arith.constant 0 : index
    %746 = vector.load %arg3[%c8_281, %c0_282, %c0_283] : memref<17x33x256xf32, #tpu.memory_space<vmem>>, vector<1x33x256xf32>
    %747 = vector.shape_cast %746 : vector<1x33x256xf32> to vector<33x256xf32>
    %cst_284 = arith.constant dense<0.000000e+00> : vector<2x256xf32>
    %748 = tpu.matmul %745, %747, %cst_284 {dimension_numbers = #tpu.dot_dimension_numbers<[1], [0], [0], [1], [0, 0, 1, 1], [], []>} : vector<2x33xf32>, vector<33x256xf32>, vector<2x256xf32> -> vector<2x256xf32>
    %749 = arith.addf %672, %748 : vector<2x256xf32>
    %750 = arith.mulf %676, %744 : vector<2x33xf32>
    %c8_285 = arith.constant 8 : index
    %c0_286 = arith.constant 0 : index
    %c0_287 = arith.constant 0 : index
    %751 = vector.load %arg4[%c8_285, %c0_286, %c0_287] : memref<17x33x256xf32, #tpu.memory_space<vmem>>, vector<1x33x256xf32>
    %752 = vector.shape_cast %751 : vector<1x33x256xf32> to vector<33x256xf32>
    %cst_288 = arith.constant dense<0.000000e+00> : vector<2x256xf32>
    %753 = tpu.matmul %750, %752, %cst_288 {dimension_numbers = #tpu.dot_dimension_numbers<[1], [0], [0], [1], [0, 0, 1, 1], [], []>} : vector<2x33xf32>, vector<33x256xf32>, vector<2x256xf32> -> vector<2x256xf32>
    %754 = arith.subf %749, %753 : vector<2x256xf32>
    %c9 = arith.constant 9 : index
    %c0_289 = arith.constant 0 : index
    %c0_290 = arith.constant 0 : index
    %755 = vector.load %arg0[%c9, %c0_289, %c0_290] : memref<17x2x64xf32, #tpu.memory_space<vmem>>, vector<1x2x64xf32>
    %756 = vector.shape_cast %755 : vector<1x2x64xf32> to vector<2x64xf32>
    %cst_291 = arith.constant dense<0.000000e+00> : vector<2x33xf32>
    %757 = tpu.matmul %756, %12, %cst_291 {dimension_numbers = #tpu.dot_dimension_numbers<[1], [0], [0], [1], [0, 0, 1, 1], [], []>} : vector<2x64xf32>, vector<64x33xf32>, vector<2x33xf32> -> vector<2x33xf32>
    %cst_292 = arith.constant dense<0.000000e+00> : vector<2x33xf32>
    %758 = tpu.matmul %756, %13, %cst_292 {dimension_numbers = #tpu.dot_dimension_numbers<[1], [0], [0], [1], [0, 0, 1, 1], [], []>} : vector<2x64xf32>, vector<64x33xf32>, vector<2x33xf32> -> vector<2x33xf32>
    %759 = arith.mulf %757, %757 : vector<2x33xf32>
    %760 = arith.mulf %758, %758 : vector<2x33xf32>
    %761 = arith.addf %759, %760 : vector<2x33xf32>
    %762 = math.sqrt %761 : vector<2x33xf32>
    %cst_293 = arith.constant dense<0.000000e+00> : vector<2x96xf32>
    %763 = tpu.matmul %762, %0, %cst_293 {dimension_numbers = #tpu.dot_dimension_numbers<[1], [0], [0], [1], [0, 0, 1, 1], [], []>} : vector<2x33xf32>, vector<33x96xf32>, vector<2x96xf32> -> vector<2x96xf32>
    %764 = vector.broadcast %7 : vector<1x96xf32> to vector<2x96xf32>
    %765 = arith.addf %763, %764 : vector<2x96xf32>
    %766 = vector.extract_strided_slice %765 {offsets = [0, 0], sizes = [2, 64], strides = [1, 1]} : vector<2x96xf32> to vector<2x64xf32>
    %cst_294 = arith.constant dense<0.000000e+00> : vector<2x64xf32>
    %767 = tpu.matmul %707, %2, %cst_294 {dimension_numbers = #tpu.dot_dimension_numbers<[1], [0], [0], [1], [0, 0, 1, 1], [], []>} : vector<2x32xf32>, vector<32x64xf32>, vector<2x64xf32> -> vector<2x64xf32>
    %768 = arith.addf %766, %767 : vector<2x64xf32>
    %cst_295 = arith.constant 5.000000e-01 : f32
    %769 = vector.broadcast %cst_295 : f32 to vector<2x64xf32>
    %770 = arith.mulf %769, %768 : vector<2x64xf32>
    %771 = math.tanh %770 : vector<2x64xf32>
    %cst_296 = arith.constant 1.000000e+00 : f32
    %772 = vector.broadcast %cst_296 : f32 to vector<2x64xf32>
    %773 = arith.addf %771, %772 : vector<2x64xf32>
    %cst_297 = arith.constant 5.000000e-01 : f32
    %774 = vector.broadcast %cst_297 : f32 to vector<2x64xf32>
    %775 = arith.mulf %774, %773 : vector<2x64xf32>
    %776 = vector.extract_strided_slice %775 {offsets = [0, 0], sizes = [2, 32], strides = [1, 1]} : vector<2x64xf32> to vector<2x32xf32>
    %777 = vector.extract_strided_slice %775 {offsets = [0, 32], sizes = [2, 32], strides = [1, 1]} : vector<2x64xf32> to vector<2x32xf32>
    %cst_298 = arith.constant dense<0.000000e+00> : vector<2x32xf32>
    %778 = tpu.matmul %707, %3, %cst_298 {dimension_numbers = #tpu.dot_dimension_numbers<[1], [0], [0], [1], [0, 0, 1, 1], [], []>} : vector<2x32xf32>, vector<32x32xf32>, vector<2x32xf32> -> vector<2x32xf32>
    %779 = vector.broadcast %8 : vector<1x32xf32> to vector<2x32xf32>
    %780 = arith.addf %778, %779 : vector<2x32xf32>
    %781 = vector.extract_strided_slice %765 {offsets = [0, 64], sizes = [2, 32], strides = [1, 1]} : vector<2x96xf32> to vector<2x32xf32>
    %782 = arith.mulf %776, %780 : vector<2x32xf32>
    %783 = arith.addf %781, %782 : vector<2x32xf32>
    %784 = math.tanh %783 : vector<2x32xf32>
    %cst_299 = arith.constant 1.000000e+00 : f32
    %785 = vector.broadcast %cst_299 : f32 to vector<2x32xf32>
    %786 = arith.subf %785, %777 : vector<2x32xf32>
    %787 = arith.mulf %786, %784 : vector<2x32xf32>
    %788 = arith.mulf %777, %707 : vector<2x32xf32>
    %789 = arith.addf %787, %788 : vector<2x32xf32>
    %cst_300 = arith.constant dense<0.000000e+00> : vector<2x96xf32>
    %790 = tpu.matmul %789, %1, %cst_300 {dimension_numbers = #tpu.dot_dimension_numbers<[1], [0], [0], [1], [0, 0, 1, 1], [], []>} : vector<2x32xf32>, vector<32x96xf32>, vector<2x96xf32> -> vector<2x96xf32>
    %791 = vector.broadcast %9 : vector<1x96xf32> to vector<2x96xf32>
    %792 = arith.addf %790, %791 : vector<2x96xf32>
    %793 = vector.extract_strided_slice %792 {offsets = [0, 0], sizes = [2, 64], strides = [1, 1]} : vector<2x96xf32> to vector<2x64xf32>
    %cst_301 = arith.constant dense<0.000000e+00> : vector<2x64xf32>
    %794 = tpu.matmul %734, %4, %cst_301 {dimension_numbers = #tpu.dot_dimension_numbers<[1], [0], [0], [1], [0, 0, 1, 1], [], []>} : vector<2x32xf32>, vector<32x64xf32>, vector<2x64xf32> -> vector<2x64xf32>
    %795 = arith.addf %793, %794 : vector<2x64xf32>
    %cst_302 = arith.constant 5.000000e-01 : f32
    %796 = vector.broadcast %cst_302 : f32 to vector<2x64xf32>
    %797 = arith.mulf %796, %795 : vector<2x64xf32>
    %798 = math.tanh %797 : vector<2x64xf32>
    %cst_303 = arith.constant 1.000000e+00 : f32
    %799 = vector.broadcast %cst_303 : f32 to vector<2x64xf32>
    %800 = arith.addf %798, %799 : vector<2x64xf32>
    %cst_304 = arith.constant 5.000000e-01 : f32
    %801 = vector.broadcast %cst_304 : f32 to vector<2x64xf32>
    %802 = arith.mulf %801, %800 : vector<2x64xf32>
    %803 = vector.extract_strided_slice %802 {offsets = [0, 0], sizes = [2, 32], strides = [1, 1]} : vector<2x64xf32> to vector<2x32xf32>
    %804 = vector.extract_strided_slice %802 {offsets = [0, 32], sizes = [2, 32], strides = [1, 1]} : vector<2x64xf32> to vector<2x32xf32>
    %cst_305 = arith.constant dense<0.000000e+00> : vector<2x32xf32>
    %805 = tpu.matmul %734, %5, %cst_305 {dimension_numbers = #tpu.dot_dimension_numbers<[1], [0], [0], [1], [0, 0, 1, 1], [], []>} : vector<2x32xf32>, vector<32x32xf32>, vector<2x32xf32> -> vector<2x32xf32>
    %806 = vector.broadcast %10 : vector<1x32xf32> to vector<2x32xf32>
    %807 = arith.addf %805, %806 : vector<2x32xf32>
    %808 = vector.extract_strided_slice %792 {offsets = [0, 64], sizes = [2, 32], strides = [1, 1]} : vector<2x96xf32> to vector<2x32xf32>
    %809 = arith.mulf %803, %807 : vector<2x32xf32>
    %810 = arith.addf %808, %809 : vector<2x32xf32>
    %811 = math.tanh %810 : vector<2x32xf32>
    %cst_306 = arith.constant 1.000000e+00 : f32
    %812 = vector.broadcast %cst_306 : f32 to vector<2x32xf32>
    %813 = arith.subf %812, %804 : vector<2x32xf32>
    %814 = arith.mulf %813, %811 : vector<2x32xf32>
    %815 = arith.mulf %804, %734 : vector<2x32xf32>
    %816 = arith.addf %814, %815 : vector<2x32xf32>
    %cst_307 = arith.constant dense<0.000000e+00> : vector<2x33xf32>
    %817 = tpu.matmul %816, %6, %cst_307 {dimension_numbers = #tpu.dot_dimension_numbers<[1], [0], [0], [1], [0, 0, 1, 1], [], []>} : vector<2x32xf32>, vector<32x33xf32>, vector<2x33xf32> -> vector<2x33xf32>
    %818 = vector.broadcast %11 : vector<1x33xf32> to vector<2x33xf32>
    %819 = arith.addf %817, %818 : vector<2x33xf32>
    %cst_308 = arith.constant 5.000000e-01 : f32
    %820 = vector.broadcast %cst_308 : f32 to vector<2x33xf32>
    %821 = arith.mulf %820, %819 : vector<2x33xf32>
    %822 = math.tanh %821 : vector<2x33xf32>
    %cst_309 = arith.constant 1.000000e+00 : f32
    %823 = vector.broadcast %cst_309 : f32 to vector<2x33xf32>
    %824 = arith.addf %822, %823 : vector<2x33xf32>
    %cst_310 = arith.constant 5.000000e-01 : f32
    %825 = vector.broadcast %cst_310 : f32 to vector<2x33xf32>
    %826 = arith.mulf %825, %824 : vector<2x33xf32>
    %827 = arith.mulf %757, %826 : vector<2x33xf32>
    %c9_311 = arith.constant 9 : index
    %c0_312 = arith.constant 0 : index
    %c0_313 = arith.constant 0 : index
    %828 = vector.load %arg3[%c9_311, %c0_312, %c0_313] : memref<17x33x256xf32, #tpu.memory_space<vmem>>, vector<1x33x256xf32>
    %829 = vector.shape_cast %828 : vector<1x33x256xf32> to vector<33x256xf32>
    %cst_314 = arith.constant dense<0.000000e+00> : vector<2x256xf32>
    %830 = tpu.matmul %827, %829, %cst_314 {dimension_numbers = #tpu.dot_dimension_numbers<[1], [0], [0], [1], [0, 0, 1, 1], [], []>} : vector<2x33xf32>, vector<33x256xf32>, vector<2x256xf32> -> vector<2x256xf32>
    %831 = arith.addf %754, %830 : vector<2x256xf32>
    %832 = arith.mulf %758, %826 : vector<2x33xf32>
    %c9_315 = arith.constant 9 : index
    %c0_316 = arith.constant 0 : index
    %c0_317 = arith.constant 0 : index
    %833 = vector.load %arg4[%c9_315, %c0_316, %c0_317] : memref<17x33x256xf32, #tpu.memory_space<vmem>>, vector<1x33x256xf32>
    %834 = vector.shape_cast %833 : vector<1x33x256xf32> to vector<33x256xf32>
    %cst_318 = arith.constant dense<0.000000e+00> : vector<2x256xf32>
    %835 = tpu.matmul %832, %834, %cst_318 {dimension_numbers = #tpu.dot_dimension_numbers<[1], [0], [0], [1], [0, 0, 1, 1], [], []>} : vector<2x33xf32>, vector<33x256xf32>, vector<2x256xf32> -> vector<2x256xf32>
    %836 = arith.subf %831, %835 : vector<2x256xf32>
    %c10 = arith.constant 10 : index
    %c0_319 = arith.constant 0 : index
    %c0_320 = arith.constant 0 : index
    %837 = vector.load %arg0[%c10, %c0_319, %c0_320] : memref<17x2x64xf32, #tpu.memory_space<vmem>>, vector<1x2x64xf32>
    %838 = vector.shape_cast %837 : vector<1x2x64xf32> to vector<2x64xf32>
    %cst_321 = arith.constant dense<0.000000e+00> : vector<2x33xf32>
    %839 = tpu.matmul %838, %12, %cst_321 {dimension_numbers = #tpu.dot_dimension_numbers<[1], [0], [0], [1], [0, 0, 1, 1], [], []>} : vector<2x64xf32>, vector<64x33xf32>, vector<2x33xf32> -> vector<2x33xf32>
    %cst_322 = arith.constant dense<0.000000e+00> : vector<2x33xf32>
    %840 = tpu.matmul %838, %13, %cst_322 {dimension_numbers = #tpu.dot_dimension_numbers<[1], [0], [0], [1], [0, 0, 1, 1], [], []>} : vector<2x64xf32>, vector<64x33xf32>, vector<2x33xf32> -> vector<2x33xf32>
    %841 = arith.mulf %839, %839 : vector<2x33xf32>
    %842 = arith.mulf %840, %840 : vector<2x33xf32>
    %843 = arith.addf %841, %842 : vector<2x33xf32>
    %844 = math.sqrt %843 : vector<2x33xf32>
    %cst_323 = arith.constant dense<0.000000e+00> : vector<2x96xf32>
    %845 = tpu.matmul %844, %0, %cst_323 {dimension_numbers = #tpu.dot_dimension_numbers<[1], [0], [0], [1], [0, 0, 1, 1], [], []>} : vector<2x33xf32>, vector<33x96xf32>, vector<2x96xf32> -> vector<2x96xf32>
    %846 = vector.broadcast %7 : vector<1x96xf32> to vector<2x96xf32>
    %847 = arith.addf %845, %846 : vector<2x96xf32>
    %848 = vector.extract_strided_slice %847 {offsets = [0, 0], sizes = [2, 64], strides = [1, 1]} : vector<2x96xf32> to vector<2x64xf32>
    %cst_324 = arith.constant dense<0.000000e+00> : vector<2x64xf32>
    %849 = tpu.matmul %789, %2, %cst_324 {dimension_numbers = #tpu.dot_dimension_numbers<[1], [0], [0], [1], [0, 0, 1, 1], [], []>} : vector<2x32xf32>, vector<32x64xf32>, vector<2x64xf32> -> vector<2x64xf32>
    %850 = arith.addf %848, %849 : vector<2x64xf32>
    %cst_325 = arith.constant 5.000000e-01 : f32
    %851 = vector.broadcast %cst_325 : f32 to vector<2x64xf32>
    %852 = arith.mulf %851, %850 : vector<2x64xf32>
    %853 = math.tanh %852 : vector<2x64xf32>
    %cst_326 = arith.constant 1.000000e+00 : f32
    %854 = vector.broadcast %cst_326 : f32 to vector<2x64xf32>
    %855 = arith.addf %853, %854 : vector<2x64xf32>
    %cst_327 = arith.constant 5.000000e-01 : f32
    %856 = vector.broadcast %cst_327 : f32 to vector<2x64xf32>
    %857 = arith.mulf %856, %855 : vector<2x64xf32>
    %858 = vector.extract_strided_slice %857 {offsets = [0, 0], sizes = [2, 32], strides = [1, 1]} : vector<2x64xf32> to vector<2x32xf32>
    %859 = vector.extract_strided_slice %857 {offsets = [0, 32], sizes = [2, 32], strides = [1, 1]} : vector<2x64xf32> to vector<2x32xf32>
    %cst_328 = arith.constant dense<0.000000e+00> : vector<2x32xf32>
    %860 = tpu.matmul %789, %3, %cst_328 {dimension_numbers = #tpu.dot_dimension_numbers<[1], [0], [0], [1], [0, 0, 1, 1], [], []>} : vector<2x32xf32>, vector<32x32xf32>, vector<2x32xf32> -> vector<2x32xf32>
    %861 = vector.broadcast %8 : vector<1x32xf32> to vector<2x32xf32>
    %862 = arith.addf %860, %861 : vector<2x32xf32>
    %863 = vector.extract_strided_slice %847 {offsets = [0, 64], sizes = [2, 32], strides = [1, 1]} : vector<2x96xf32> to vector<2x32xf32>
    %864 = arith.mulf %858, %862 : vector<2x32xf32>
    %865 = arith.addf %863, %864 : vector<2x32xf32>
    %866 = math.tanh %865 : vector<2x32xf32>
    %cst_329 = arith.constant 1.000000e+00 : f32
    %867 = vector.broadcast %cst_329 : f32 to vector<2x32xf32>
    %868 = arith.subf %867, %859 : vector<2x32xf32>
    %869 = arith.mulf %868, %866 : vector<2x32xf32>
    %870 = arith.mulf %859, %789 : vector<2x32xf32>
    %871 = arith.addf %869, %870 : vector<2x32xf32>
    %cst_330 = arith.constant dense<0.000000e+00> : vector<2x96xf32>
    %872 = tpu.matmul %871, %1, %cst_330 {dimension_numbers = #tpu.dot_dimension_numbers<[1], [0], [0], [1], [0, 0, 1, 1], [], []>} : vector<2x32xf32>, vector<32x96xf32>, vector<2x96xf32> -> vector<2x96xf32>
    %873 = vector.broadcast %9 : vector<1x96xf32> to vector<2x96xf32>
    %874 = arith.addf %872, %873 : vector<2x96xf32>
    %875 = vector.extract_strided_slice %874 {offsets = [0, 0], sizes = [2, 64], strides = [1, 1]} : vector<2x96xf32> to vector<2x64xf32>
    %cst_331 = arith.constant dense<0.000000e+00> : vector<2x64xf32>
    %876 = tpu.matmul %816, %4, %cst_331 {dimension_numbers = #tpu.dot_dimension_numbers<[1], [0], [0], [1], [0, 0, 1, 1], [], []>} : vector<2x32xf32>, vector<32x64xf32>, vector<2x64xf32> -> vector<2x64xf32>
    %877 = arith.addf %875, %876 : vector<2x64xf32>
    %cst_332 = arith.constant 5.000000e-01 : f32
    %878 = vector.broadcast %cst_332 : f32 to vector<2x64xf32>
    %879 = arith.mulf %878, %877 : vector<2x64xf32>
    %880 = math.tanh %879 : vector<2x64xf32>
    %cst_333 = arith.constant 1.000000e+00 : f32
    %881 = vector.broadcast %cst_333 : f32 to vector<2x64xf32>
    %882 = arith.addf %880, %881 : vector<2x64xf32>
    %cst_334 = arith.constant 5.000000e-01 : f32
    %883 = vector.broadcast %cst_334 : f32 to vector<2x64xf32>
    %884 = arith.mulf %883, %882 : vector<2x64xf32>
    %885 = vector.extract_strided_slice %884 {offsets = [0, 0], sizes = [2, 32], strides = [1, 1]} : vector<2x64xf32> to vector<2x32xf32>
    %886 = vector.extract_strided_slice %884 {offsets = [0, 32], sizes = [2, 32], strides = [1, 1]} : vector<2x64xf32> to vector<2x32xf32>
    %cst_335 = arith.constant dense<0.000000e+00> : vector<2x32xf32>
    %887 = tpu.matmul %816, %5, %cst_335 {dimension_numbers = #tpu.dot_dimension_numbers<[1], [0], [0], [1], [0, 0, 1, 1], [], []>} : vector<2x32xf32>, vector<32x32xf32>, vector<2x32xf32> -> vector<2x32xf32>
    %888 = vector.broadcast %10 : vector<1x32xf32> to vector<2x32xf32>
    %889 = arith.addf %887, %888 : vector<2x32xf32>
    %890 = vector.extract_strided_slice %874 {offsets = [0, 64], sizes = [2, 32], strides = [1, 1]} : vector<2x96xf32> to vector<2x32xf32>
    %891 = arith.mulf %885, %889 : vector<2x32xf32>
    %892 = arith.addf %890, %891 : vector<2x32xf32>
    %893 = math.tanh %892 : vector<2x32xf32>
    %cst_336 = arith.constant 1.000000e+00 : f32
    %894 = vector.broadcast %cst_336 : f32 to vector<2x32xf32>
    %895 = arith.subf %894, %886 : vector<2x32xf32>
    %896 = arith.mulf %895, %893 : vector<2x32xf32>
    %897 = arith.mulf %886, %816 : vector<2x32xf32>
    %898 = arith.addf %896, %897 : vector<2x32xf32>
    %cst_337 = arith.constant dense<0.000000e+00> : vector<2x33xf32>
    %899 = tpu.matmul %898, %6, %cst_337 {dimension_numbers = #tpu.dot_dimension_numbers<[1], [0], [0], [1], [0, 0, 1, 1], [], []>} : vector<2x32xf32>, vector<32x33xf32>, vector<2x33xf32> -> vector<2x33xf32>
    %900 = vector.broadcast %11 : vector<1x33xf32> to vector<2x33xf32>
    %901 = arith.addf %899, %900 : vector<2x33xf32>
    %cst_338 = arith.constant 5.000000e-01 : f32
    %902 = vector.broadcast %cst_338 : f32 to vector<2x33xf32>
    %903 = arith.mulf %902, %901 : vector<2x33xf32>
    %904 = math.tanh %903 : vector<2x33xf32>
    %cst_339 = arith.constant 1.000000e+00 : f32
    %905 = vector.broadcast %cst_339 : f32 to vector<2x33xf32>
    %906 = arith.addf %904, %905 : vector<2x33xf32>
    %cst_340 = arith.constant 5.000000e-01 : f32
    %907 = vector.broadcast %cst_340 : f32 to vector<2x33xf32>
    %908 = arith.mulf %907, %906 : vector<2x33xf32>
    %909 = arith.mulf %839, %908 : vector<2x33xf32>
    %c10_341 = arith.constant 10 : index
    %c0_342 = arith.constant 0 : index
    %c0_343 = arith.constant 0 : index
    %910 = vector.load %arg3[%c10_341, %c0_342, %c0_343] : memref<17x33x256xf32, #tpu.memory_space<vmem>>, vector<1x33x256xf32>
    %911 = vector.shape_cast %910 : vector<1x33x256xf32> to vector<33x256xf32>
    %cst_344 = arith.constant dense<0.000000e+00> : vector<2x256xf32>
    %912 = tpu.matmul %909, %911, %cst_344 {dimension_numbers = #tpu.dot_dimension_numbers<[1], [0], [0], [1], [0, 0, 1, 1], [], []>} : vector<2x33xf32>, vector<33x256xf32>, vector<2x256xf32> -> vector<2x256xf32>
    %913 = arith.addf %836, %912 : vector<2x256xf32>
    %914 = arith.mulf %840, %908 : vector<2x33xf32>
    %c10_345 = arith.constant 10 : index
    %c0_346 = arith.constant 0 : index
    %c0_347 = arith.constant 0 : index
    %915 = vector.load %arg4[%c10_345, %c0_346, %c0_347] : memref<17x33x256xf32, #tpu.memory_space<vmem>>, vector<1x33x256xf32>
    %916 = vector.shape_cast %915 : vector<1x33x256xf32> to vector<33x256xf32>
    %cst_348 = arith.constant dense<0.000000e+00> : vector<2x256xf32>
    %917 = tpu.matmul %914, %916, %cst_348 {dimension_numbers = #tpu.dot_dimension_numbers<[1], [0], [0], [1], [0, 0, 1, 1], [], []>} : vector<2x33xf32>, vector<33x256xf32>, vector<2x256xf32> -> vector<2x256xf32>
    %918 = arith.subf %913, %917 : vector<2x256xf32>
    %c11 = arith.constant 11 : index
    %c0_349 = arith.constant 0 : index
    %c0_350 = arith.constant 0 : index
    %919 = vector.load %arg0[%c11, %c0_349, %c0_350] : memref<17x2x64xf32, #tpu.memory_space<vmem>>, vector<1x2x64xf32>
    %920 = vector.shape_cast %919 : vector<1x2x64xf32> to vector<2x64xf32>
    %cst_351 = arith.constant dense<0.000000e+00> : vector<2x33xf32>
    %921 = tpu.matmul %920, %12, %cst_351 {dimension_numbers = #tpu.dot_dimension_numbers<[1], [0], [0], [1], [0, 0, 1, 1], [], []>} : vector<2x64xf32>, vector<64x33xf32>, vector<2x33xf32> -> vector<2x33xf32>
    %cst_352 = arith.constant dense<0.000000e+00> : vector<2x33xf32>
    %922 = tpu.matmul %920, %13, %cst_352 {dimension_numbers = #tpu.dot_dimension_numbers<[1], [0], [0], [1], [0, 0, 1, 1], [], []>} : vector<2x64xf32>, vector<64x33xf32>, vector<2x33xf32> -> vector<2x33xf32>
    %923 = arith.mulf %921, %921 : vector<2x33xf32>
    %924 = arith.mulf %922, %922 : vector<2x33xf32>
    %925 = arith.addf %923, %924 : vector<2x33xf32>
    %926 = math.sqrt %925 : vector<2x33xf32>
    %cst_353 = arith.constant dense<0.000000e+00> : vector<2x96xf32>
    %927 = tpu.matmul %926, %0, %cst_353 {dimension_numbers = #tpu.dot_dimension_numbers<[1], [0], [0], [1], [0, 0, 1, 1], [], []>} : vector<2x33xf32>, vector<33x96xf32>, vector<2x96xf32> -> vector<2x96xf32>
    %928 = vector.broadcast %7 : vector<1x96xf32> to vector<2x96xf32>
    %929 = arith.addf %927, %928 : vector<2x96xf32>
    %930 = vector.extract_strided_slice %929 {offsets = [0, 0], sizes = [2, 64], strides = [1, 1]} : vector<2x96xf32> to vector<2x64xf32>
    %cst_354 = arith.constant dense<0.000000e+00> : vector<2x64xf32>
    %931 = tpu.matmul %871, %2, %cst_354 {dimension_numbers = #tpu.dot_dimension_numbers<[1], [0], [0], [1], [0, 0, 1, 1], [], []>} : vector<2x32xf32>, vector<32x64xf32>, vector<2x64xf32> -> vector<2x64xf32>
    %932 = arith.addf %930, %931 : vector<2x64xf32>
    %cst_355 = arith.constant 5.000000e-01 : f32
    %933 = vector.broadcast %cst_355 : f32 to vector<2x64xf32>
    %934 = arith.mulf %933, %932 : vector<2x64xf32>
    %935 = math.tanh %934 : vector<2x64xf32>
    %cst_356 = arith.constant 1.000000e+00 : f32
    %936 = vector.broadcast %cst_356 : f32 to vector<2x64xf32>
    %937 = arith.addf %935, %936 : vector<2x64xf32>
    %cst_357 = arith.constant 5.000000e-01 : f32
    %938 = vector.broadcast %cst_357 : f32 to vector<2x64xf32>
    %939 = arith.mulf %938, %937 : vector<2x64xf32>
    %940 = vector.extract_strided_slice %939 {offsets = [0, 0], sizes = [2, 32], strides = [1, 1]} : vector<2x64xf32> to vector<2x32xf32>
    %941 = vector.extract_strided_slice %939 {offsets = [0, 32], sizes = [2, 32], strides = [1, 1]} : vector<2x64xf32> to vector<2x32xf32>
    %cst_358 = arith.constant dense<0.000000e+00> : vector<2x32xf32>
    %942 = tpu.matmul %871, %3, %cst_358 {dimension_numbers = #tpu.dot_dimension_numbers<[1], [0], [0], [1], [0, 0, 1, 1], [], []>} : vector<2x32xf32>, vector<32x32xf32>, vector<2x32xf32> -> vector<2x32xf32>
    %943 = vector.broadcast %8 : vector<1x32xf32> to vector<2x32xf32>
    %944 = arith.addf %942, %943 : vector<2x32xf32>
    %945 = vector.extract_strided_slice %929 {offsets = [0, 64], sizes = [2, 32], strides = [1, 1]} : vector<2x96xf32> to vector<2x32xf32>
    %946 = arith.mulf %940, %944 : vector<2x32xf32>
    %947 = arith.addf %945, %946 : vector<2x32xf32>
    %948 = math.tanh %947 : vector<2x32xf32>
    %cst_359 = arith.constant 1.000000e+00 : f32
    %949 = vector.broadcast %cst_359 : f32 to vector<2x32xf32>
    %950 = arith.subf %949, %941 : vector<2x32xf32>
    %951 = arith.mulf %950, %948 : vector<2x32xf32>
    %952 = arith.mulf %941, %871 : vector<2x32xf32>
    %953 = arith.addf %951, %952 : vector<2x32xf32>
    %cst_360 = arith.constant dense<0.000000e+00> : vector<2x96xf32>
    %954 = tpu.matmul %953, %1, %cst_360 {dimension_numbers = #tpu.dot_dimension_numbers<[1], [0], [0], [1], [0, 0, 1, 1], [], []>} : vector<2x32xf32>, vector<32x96xf32>, vector<2x96xf32> -> vector<2x96xf32>
    %955 = vector.broadcast %9 : vector<1x96xf32> to vector<2x96xf32>
    %956 = arith.addf %954, %955 : vector<2x96xf32>
    %957 = vector.extract_strided_slice %956 {offsets = [0, 0], sizes = [2, 64], strides = [1, 1]} : vector<2x96xf32> to vector<2x64xf32>
    %cst_361 = arith.constant dense<0.000000e+00> : vector<2x64xf32>
    %958 = tpu.matmul %898, %4, %cst_361 {dimension_numbers = #tpu.dot_dimension_numbers<[1], [0], [0], [1], [0, 0, 1, 1], [], []>} : vector<2x32xf32>, vector<32x64xf32>, vector<2x64xf32> -> vector<2x64xf32>
    %959 = arith.addf %957, %958 : vector<2x64xf32>
    %cst_362 = arith.constant 5.000000e-01 : f32
    %960 = vector.broadcast %cst_362 : f32 to vector<2x64xf32>
    %961 = arith.mulf %960, %959 : vector<2x64xf32>
    %962 = math.tanh %961 : vector<2x64xf32>
    %cst_363 = arith.constant 1.000000e+00 : f32
    %963 = vector.broadcast %cst_363 : f32 to vector<2x64xf32>
    %964 = arith.addf %962, %963 : vector<2x64xf32>
    %cst_364 = arith.constant 5.000000e-01 : f32
    %965 = vector.broadcast %cst_364 : f32 to vector<2x64xf32>
    %966 = arith.mulf %965, %964 : vector<2x64xf32>
    %967 = vector.extract_strided_slice %966 {offsets = [0, 0], sizes = [2, 32], strides = [1, 1]} : vector<2x64xf32> to vector<2x32xf32>
    %968 = vector.extract_strided_slice %966 {offsets = [0, 32], sizes = [2, 32], strides = [1, 1]} : vector<2x64xf32> to vector<2x32xf32>
    %cst_365 = arith.constant dense<0.000000e+00> : vector<2x32xf32>
    %969 = tpu.matmul %898, %5, %cst_365 {dimension_numbers = #tpu.dot_dimension_numbers<[1], [0], [0], [1], [0, 0, 1, 1], [], []>} : vector<2x32xf32>, vector<32x32xf32>, vector<2x32xf32> -> vector<2x32xf32>
    %970 = vector.broadcast %10 : vector<1x32xf32> to vector<2x32xf32>
    %971 = arith.addf %969, %970 : vector<2x32xf32>
    %972 = vector.extract_strided_slice %956 {offsets = [0, 64], sizes = [2, 32], strides = [1, 1]} : vector<2x96xf32> to vector<2x32xf32>
    %973 = arith.mulf %967, %971 : vector<2x32xf32>
    %974 = arith.addf %972, %973 : vector<2x32xf32>
    %975 = math.tanh %974 : vector<2x32xf32>
    %cst_366 = arith.constant 1.000000e+00 : f32
    %976 = vector.broadcast %cst_366 : f32 to vector<2x32xf32>
    %977 = arith.subf %976, %968 : vector<2x32xf32>
    %978 = arith.mulf %977, %975 : vector<2x32xf32>
    %979 = arith.mulf %968, %898 : vector<2x32xf32>
    %980 = arith.addf %978, %979 : vector<2x32xf32>
    %cst_367 = arith.constant dense<0.000000e+00> : vector<2x33xf32>
    %981 = tpu.matmul %980, %6, %cst_367 {dimension_numbers = #tpu.dot_dimension_numbers<[1], [0], [0], [1], [0, 0, 1, 1], [], []>} : vector<2x32xf32>, vector<32x33xf32>, vector<2x33xf32> -> vector<2x33xf32>
    %982 = vector.broadcast %11 : vector<1x33xf32> to vector<2x33xf32>
    %983 = arith.addf %981, %982 : vector<2x33xf32>
    %cst_368 = arith.constant 5.000000e-01 : f32
    %984 = vector.broadcast %cst_368 : f32 to vector<2x33xf32>
    %985 = arith.mulf %984, %983 : vector<2x33xf32>
    %986 = math.tanh %985 : vector<2x33xf32>
    %cst_369 = arith.constant 1.000000e+00 : f32
    %987 = vector.broadcast %cst_369 : f32 to vector<2x33xf32>
    %988 = arith.addf %986, %987 : vector<2x33xf32>
    %cst_370 = arith.constant 5.000000e-01 : f32
    %989 = vector.broadcast %cst_370 : f32 to vector<2x33xf32>
    %990 = arith.mulf %989, %988 : vector<2x33xf32>
    %991 = arith.mulf %921, %990 : vector<2x33xf32>
    %c11_371 = arith.constant 11 : index
    %c0_372 = arith.constant 0 : index
    %c0_373 = arith.constant 0 : index
    %992 = vector.load %arg3[%c11_371, %c0_372, %c0_373] : memref<17x33x256xf32, #tpu.memory_space<vmem>>, vector<1x33x256xf32>
    %993 = vector.shape_cast %992 : vector<1x33x256xf32> to vector<33x256xf32>
    %cst_374 = arith.constant dense<0.000000e+00> : vector<2x256xf32>
    %994 = tpu.matmul %991, %993, %cst_374 {dimension_numbers = #tpu.dot_dimension_numbers<[1], [0], [0], [1], [0, 0, 1, 1], [], []>} : vector<2x33xf32>, vector<33x256xf32>, vector<2x256xf32> -> vector<2x256xf32>
    %995 = arith.addf %918, %994 : vector<2x256xf32>
    %996 = arith.mulf %922, %990 : vector<2x33xf32>
    %c11_375 = arith.constant 11 : index
    %c0_376 = arith.constant 0 : index
    %c0_377 = arith.constant 0 : index
    %997 = vector.load %arg4[%c11_375, %c0_376, %c0_377] : memref<17x33x256xf32, #tpu.memory_space<vmem>>, vector<1x33x256xf32>
    %998 = vector.shape_cast %997 : vector<1x33x256xf32> to vector<33x256xf32>
    %cst_378 = arith.constant dense<0.000000e+00> : vector<2x256xf32>
    %999 = tpu.matmul %996, %998, %cst_378 {dimension_numbers = #tpu.dot_dimension_numbers<[1], [0], [0], [1], [0, 0, 1, 1], [], []>} : vector<2x33xf32>, vector<33x256xf32>, vector<2x256xf32> -> vector<2x256xf32>
    %1000 = arith.subf %995, %999 : vector<2x256xf32>
    %c12 = arith.constant 12 : index
    %c0_379 = arith.constant 0 : index
    %c0_380 = arith.constant 0 : index
    %1001 = vector.load %arg0[%c12, %c0_379, %c0_380] : memref<17x2x64xf32, #tpu.memory_space<vmem>>, vector<1x2x64xf32>
    %1002 = vector.shape_cast %1001 : vector<1x2x64xf32> to vector<2x64xf32>
    %cst_381 = arith.constant dense<0.000000e+00> : vector<2x33xf32>
    %1003 = tpu.matmul %1002, %12, %cst_381 {dimension_numbers = #tpu.dot_dimension_numbers<[1], [0], [0], [1], [0, 0, 1, 1], [], []>} : vector<2x64xf32>, vector<64x33xf32>, vector<2x33xf32> -> vector<2x33xf32>
    %cst_382 = arith.constant dense<0.000000e+00> : vector<2x33xf32>
    %1004 = tpu.matmul %1002, %13, %cst_382 {dimension_numbers = #tpu.dot_dimension_numbers<[1], [0], [0], [1], [0, 0, 1, 1], [], []>} : vector<2x64xf32>, vector<64x33xf32>, vector<2x33xf32> -> vector<2x33xf32>
    %1005 = arith.mulf %1003, %1003 : vector<2x33xf32>
    %1006 = arith.mulf %1004, %1004 : vector<2x33xf32>
    %1007 = arith.addf %1005, %1006 : vector<2x33xf32>
    %1008 = math.sqrt %1007 : vector<2x33xf32>
    %cst_383 = arith.constant dense<0.000000e+00> : vector<2x96xf32>
    %1009 = tpu.matmul %1008, %0, %cst_383 {dimension_numbers = #tpu.dot_dimension_numbers<[1], [0], [0], [1], [0, 0, 1, 1], [], []>} : vector<2x33xf32>, vector<33x96xf32>, vector<2x96xf32> -> vector<2x96xf32>
    %1010 = vector.broadcast %7 : vector<1x96xf32> to vector<2x96xf32>
    %1011 = arith.addf %1009, %1010 : vector<2x96xf32>
    %1012 = vector.extract_strided_slice %1011 {offsets = [0, 0], sizes = [2, 64], strides = [1, 1]} : vector<2x96xf32> to vector<2x64xf32>
    %cst_384 = arith.constant dense<0.000000e+00> : vector<2x64xf32>
    %1013 = tpu.matmul %953, %2, %cst_384 {dimension_numbers = #tpu.dot_dimension_numbers<[1], [0], [0], [1], [0, 0, 1, 1], [], []>} : vector<2x32xf32>, vector<32x64xf32>, vector<2x64xf32> -> vector<2x64xf32>
    %1014 = arith.addf %1012, %1013 : vector<2x64xf32>
    %cst_385 = arith.constant 5.000000e-01 : f32
    %1015 = vector.broadcast %cst_385 : f32 to vector<2x64xf32>
    %1016 = arith.mulf %1015, %1014 : vector<2x64xf32>
    %1017 = math.tanh %1016 : vector<2x64xf32>
    %cst_386 = arith.constant 1.000000e+00 : f32
    %1018 = vector.broadcast %cst_386 : f32 to vector<2x64xf32>
    %1019 = arith.addf %1017, %1018 : vector<2x64xf32>
    %cst_387 = arith.constant 5.000000e-01 : f32
    %1020 = vector.broadcast %cst_387 : f32 to vector<2x64xf32>
    %1021 = arith.mulf %1020, %1019 : vector<2x64xf32>
    %1022 = vector.extract_strided_slice %1021 {offsets = [0, 0], sizes = [2, 32], strides = [1, 1]} : vector<2x64xf32> to vector<2x32xf32>
    %1023 = vector.extract_strided_slice %1021 {offsets = [0, 32], sizes = [2, 32], strides = [1, 1]} : vector<2x64xf32> to vector<2x32xf32>
    %cst_388 = arith.constant dense<0.000000e+00> : vector<2x32xf32>
    %1024 = tpu.matmul %953, %3, %cst_388 {dimension_numbers = #tpu.dot_dimension_numbers<[1], [0], [0], [1], [0, 0, 1, 1], [], []>} : vector<2x32xf32>, vector<32x32xf32>, vector<2x32xf32> -> vector<2x32xf32>
    %1025 = vector.broadcast %8 : vector<1x32xf32> to vector<2x32xf32>
    %1026 = arith.addf %1024, %1025 : vector<2x32xf32>
    %1027 = vector.extract_strided_slice %1011 {offsets = [0, 64], sizes = [2, 32], strides = [1, 1]} : vector<2x96xf32> to vector<2x32xf32>
    %1028 = arith.mulf %1022, %1026 : vector<2x32xf32>
    %1029 = arith.addf %1027, %1028 : vector<2x32xf32>
    %1030 = math.tanh %1029 : vector<2x32xf32>
    %cst_389 = arith.constant 1.000000e+00 : f32
    %1031 = vector.broadcast %cst_389 : f32 to vector<2x32xf32>
    %1032 = arith.subf %1031, %1023 : vector<2x32xf32>
    %1033 = arith.mulf %1032, %1030 : vector<2x32xf32>
    %1034 = arith.mulf %1023, %953 : vector<2x32xf32>
    %1035 = arith.addf %1033, %1034 : vector<2x32xf32>
    %cst_390 = arith.constant dense<0.000000e+00> : vector<2x96xf32>
    %1036 = tpu.matmul %1035, %1, %cst_390 {dimension_numbers = #tpu.dot_dimension_numbers<[1], [0], [0], [1], [0, 0, 1, 1], [], []>} : vector<2x32xf32>, vector<32x96xf32>, vector<2x96xf32> -> vector<2x96xf32>
    %1037 = vector.broadcast %9 : vector<1x96xf32> to vector<2x96xf32>
    %1038 = arith.addf %1036, %1037 : vector<2x96xf32>
    %1039 = vector.extract_strided_slice %1038 {offsets = [0, 0], sizes = [2, 64], strides = [1, 1]} : vector<2x96xf32> to vector<2x64xf32>
    %cst_391 = arith.constant dense<0.000000e+00> : vector<2x64xf32>
    %1040 = tpu.matmul %980, %4, %cst_391 {dimension_numbers = #tpu.dot_dimension_numbers<[1], [0], [0], [1], [0, 0, 1, 1], [], []>} : vector<2x32xf32>, vector<32x64xf32>, vector<2x64xf32> -> vector<2x64xf32>
    %1041 = arith.addf %1039, %1040 : vector<2x64xf32>
    %cst_392 = arith.constant 5.000000e-01 : f32
    %1042 = vector.broadcast %cst_392 : f32 to vector<2x64xf32>
    %1043 = arith.mulf %1042, %1041 : vector<2x64xf32>
    %1044 = math.tanh %1043 : vector<2x64xf32>
    %cst_393 = arith.constant 1.000000e+00 : f32
    %1045 = vector.broadcast %cst_393 : f32 to vector<2x64xf32>
    %1046 = arith.addf %1044, %1045 : vector<2x64xf32>
    %cst_394 = arith.constant 5.000000e-01 : f32
    %1047 = vector.broadcast %cst_394 : f32 to vector<2x64xf32>
    %1048 = arith.mulf %1047, %1046 : vector<2x64xf32>
    %1049 = vector.extract_strided_slice %1048 {offsets = [0, 0], sizes = [2, 32], strides = [1, 1]} : vector<2x64xf32> to vector<2x32xf32>
    %1050 = vector.extract_strided_slice %1048 {offsets = [0, 32], sizes = [2, 32], strides = [1, 1]} : vector<2x64xf32> to vector<2x32xf32>
    %cst_395 = arith.constant dense<0.000000e+00> : vector<2x32xf32>
    %1051 = tpu.matmul %980, %5, %cst_395 {dimension_numbers = #tpu.dot_dimension_numbers<[1], [0], [0], [1], [0, 0, 1, 1], [], []>} : vector<2x32xf32>, vector<32x32xf32>, vector<2x32xf32> -> vector<2x32xf32>
    %1052 = vector.broadcast %10 : vector<1x32xf32> to vector<2x32xf32>
    %1053 = arith.addf %1051, %1052 : vector<2x32xf32>
    %1054 = vector.extract_strided_slice %1038 {offsets = [0, 64], sizes = [2, 32], strides = [1, 1]} : vector<2x96xf32> to vector<2x32xf32>
    %1055 = arith.mulf %1049, %1053 : vector<2x32xf32>
    %1056 = arith.addf %1054, %1055 : vector<2x32xf32>
    %1057 = math.tanh %1056 : vector<2x32xf32>
    %cst_396 = arith.constant 1.000000e+00 : f32
    %1058 = vector.broadcast %cst_396 : f32 to vector<2x32xf32>
    %1059 = arith.subf %1058, %1050 : vector<2x32xf32>
    %1060 = arith.mulf %1059, %1057 : vector<2x32xf32>
    %1061 = arith.mulf %1050, %980 : vector<2x32xf32>
    %1062 = arith.addf %1060, %1061 : vector<2x32xf32>
    %cst_397 = arith.constant dense<0.000000e+00> : vector<2x33xf32>
    %1063 = tpu.matmul %1062, %6, %cst_397 {dimension_numbers = #tpu.dot_dimension_numbers<[1], [0], [0], [1], [0, 0, 1, 1], [], []>} : vector<2x32xf32>, vector<32x33xf32>, vector<2x33xf32> -> vector<2x33xf32>
    %1064 = vector.broadcast %11 : vector<1x33xf32> to vector<2x33xf32>
    %1065 = arith.addf %1063, %1064 : vector<2x33xf32>
    %cst_398 = arith.constant 5.000000e-01 : f32
    %1066 = vector.broadcast %cst_398 : f32 to vector<2x33xf32>
    %1067 = arith.mulf %1066, %1065 : vector<2x33xf32>
    %1068 = math.tanh %1067 : vector<2x33xf32>
    %cst_399 = arith.constant 1.000000e+00 : f32
    %1069 = vector.broadcast %cst_399 : f32 to vector<2x33xf32>
    %1070 = arith.addf %1068, %1069 : vector<2x33xf32>
    %cst_400 = arith.constant 5.000000e-01 : f32
    %1071 = vector.broadcast %cst_400 : f32 to vector<2x33xf32>
    %1072 = arith.mulf %1071, %1070 : vector<2x33xf32>
    %1073 = arith.mulf %1003, %1072 : vector<2x33xf32>
    %c12_401 = arith.constant 12 : index
    %c0_402 = arith.constant 0 : index
    %c0_403 = arith.constant 0 : index
    %1074 = vector.load %arg3[%c12_401, %c0_402, %c0_403] : memref<17x33x256xf32, #tpu.memory_space<vmem>>, vector<1x33x256xf32>
    %1075 = vector.shape_cast %1074 : vector<1x33x256xf32> to vector<33x256xf32>
    %cst_404 = arith.constant dense<0.000000e+00> : vector<2x256xf32>
    %1076 = tpu.matmul %1073, %1075, %cst_404 {dimension_numbers = #tpu.dot_dimension_numbers<[1], [0], [0], [1], [0, 0, 1, 1], [], []>} : vector<2x33xf32>, vector<33x256xf32>, vector<2x256xf32> -> vector<2x256xf32>
    %1077 = arith.addf %1000, %1076 : vector<2x256xf32>
    %1078 = arith.mulf %1004, %1072 : vector<2x33xf32>
    %c12_405 = arith.constant 12 : index
    %c0_406 = arith.constant 0 : index
    %c0_407 = arith.constant 0 : index
    %1079 = vector.load %arg4[%c12_405, %c0_406, %c0_407] : memref<17x33x256xf32, #tpu.memory_space<vmem>>, vector<1x33x256xf32>
    %1080 = vector.shape_cast %1079 : vector<1x33x256xf32> to vector<33x256xf32>
    %cst_408 = arith.constant dense<0.000000e+00> : vector<2x256xf32>
    %1081 = tpu.matmul %1078, %1080, %cst_408 {dimension_numbers = #tpu.dot_dimension_numbers<[1], [0], [0], [1], [0, 0, 1, 1], [], []>} : vector<2x33xf32>, vector<33x256xf32>, vector<2x256xf32> -> vector<2x256xf32>
    %1082 = arith.subf %1077, %1081 : vector<2x256xf32>
    %c13 = arith.constant 13 : index
    %c0_409 = arith.constant 0 : index
    %c0_410 = arith.constant 0 : index
    %1083 = vector.load %arg0[%c13, %c0_409, %c0_410] : memref<17x2x64xf32, #tpu.memory_space<vmem>>, vector<1x2x64xf32>
    %1084 = vector.shape_cast %1083 : vector<1x2x64xf32> to vector<2x64xf32>
    %cst_411 = arith.constant dense<0.000000e+00> : vector<2x33xf32>
    %1085 = tpu.matmul %1084, %12, %cst_411 {dimension_numbers = #tpu.dot_dimension_numbers<[1], [0], [0], [1], [0, 0, 1, 1], [], []>} : vector<2x64xf32>, vector<64x33xf32>, vector<2x33xf32> -> vector<2x33xf32>
    %cst_412 = arith.constant dense<0.000000e+00> : vector<2x33xf32>
    %1086 = tpu.matmul %1084, %13, %cst_412 {dimension_numbers = #tpu.dot_dimension_numbers<[1], [0], [0], [1], [0, 0, 1, 1], [], []>} : vector<2x64xf32>, vector<64x33xf32>, vector<2x33xf32> -> vector<2x33xf32>
    %1087 = arith.mulf %1085, %1085 : vector<2x33xf32>
    %1088 = arith.mulf %1086, %1086 : vector<2x33xf32>
    %1089 = arith.addf %1087, %1088 : vector<2x33xf32>
    %1090 = math.sqrt %1089 : vector<2x33xf32>
    %cst_413 = arith.constant dense<0.000000e+00> : vector<2x96xf32>
    %1091 = tpu.matmul %1090, %0, %cst_413 {dimension_numbers = #tpu.dot_dimension_numbers<[1], [0], [0], [1], [0, 0, 1, 1], [], []>} : vector<2x33xf32>, vector<33x96xf32>, vector<2x96xf32> -> vector<2x96xf32>
    %1092 = vector.broadcast %7 : vector<1x96xf32> to vector<2x96xf32>
    %1093 = arith.addf %1091, %1092 : vector<2x96xf32>
    %1094 = vector.extract_strided_slice %1093 {offsets = [0, 0], sizes = [2, 64], strides = [1, 1]} : vector<2x96xf32> to vector<2x64xf32>
    %cst_414 = arith.constant dense<0.000000e+00> : vector<2x64xf32>
    %1095 = tpu.matmul %1035, %2, %cst_414 {dimension_numbers = #tpu.dot_dimension_numbers<[1], [0], [0], [1], [0, 0, 1, 1], [], []>} : vector<2x32xf32>, vector<32x64xf32>, vector<2x64xf32> -> vector<2x64xf32>
    %1096 = arith.addf %1094, %1095 : vector<2x64xf32>
    %cst_415 = arith.constant 5.000000e-01 : f32
    %1097 = vector.broadcast %cst_415 : f32 to vector<2x64xf32>
    %1098 = arith.mulf %1097, %1096 : vector<2x64xf32>
    %1099 = math.tanh %1098 : vector<2x64xf32>
    %cst_416 = arith.constant 1.000000e+00 : f32
    %1100 = vector.broadcast %cst_416 : f32 to vector<2x64xf32>
    %1101 = arith.addf %1099, %1100 : vector<2x64xf32>
    %cst_417 = arith.constant 5.000000e-01 : f32
    %1102 = vector.broadcast %cst_417 : f32 to vector<2x64xf32>
    %1103 = arith.mulf %1102, %1101 : vector<2x64xf32>
    %1104 = vector.extract_strided_slice %1103 {offsets = [0, 0], sizes = [2, 32], strides = [1, 1]} : vector<2x64xf32> to vector<2x32xf32>
    %1105 = vector.extract_strided_slice %1103 {offsets = [0, 32], sizes = [2, 32], strides = [1, 1]} : vector<2x64xf32> to vector<2x32xf32>
    %cst_418 = arith.constant dense<0.000000e+00> : vector<2x32xf32>
    %1106 = tpu.matmul %1035, %3, %cst_418 {dimension_numbers = #tpu.dot_dimension_numbers<[1], [0], [0], [1], [0, 0, 1, 1], [], []>} : vector<2x32xf32>, vector<32x32xf32>, vector<2x32xf32> -> vector<2x32xf32>
    %1107 = vector.broadcast %8 : vector<1x32xf32> to vector<2x32xf32>
    %1108 = arith.addf %1106, %1107 : vector<2x32xf32>
    %1109 = vector.extract_strided_slice %1093 {offsets = [0, 64], sizes = [2, 32], strides = [1, 1]} : vector<2x96xf32> to vector<2x32xf32>
    %1110 = arith.mulf %1104, %1108 : vector<2x32xf32>
    %1111 = arith.addf %1109, %1110 : vector<2x32xf32>
    %1112 = math.tanh %1111 : vector<2x32xf32>
    %cst_419 = arith.constant 1.000000e+00 : f32
    %1113 = vector.broadcast %cst_419 : f32 to vector<2x32xf32>
    %1114 = arith.subf %1113, %1105 : vector<2x32xf32>
    %1115 = arith.mulf %1114, %1112 : vector<2x32xf32>
    %1116 = arith.mulf %1105, %1035 : vector<2x32xf32>
    %1117 = arith.addf %1115, %1116 : vector<2x32xf32>
    %cst_420 = arith.constant dense<0.000000e+00> : vector<2x96xf32>
    %1118 = tpu.matmul %1117, %1, %cst_420 {dimension_numbers = #tpu.dot_dimension_numbers<[1], [0], [0], [1], [0, 0, 1, 1], [], []>} : vector<2x32xf32>, vector<32x96xf32>, vector<2x96xf32> -> vector<2x96xf32>
    %1119 = vector.broadcast %9 : vector<1x96xf32> to vector<2x96xf32>
    %1120 = arith.addf %1118, %1119 : vector<2x96xf32>
    %1121 = vector.extract_strided_slice %1120 {offsets = [0, 0], sizes = [2, 64], strides = [1, 1]} : vector<2x96xf32> to vector<2x64xf32>
    %cst_421 = arith.constant dense<0.000000e+00> : vector<2x64xf32>
    %1122 = tpu.matmul %1062, %4, %cst_421 {dimension_numbers = #tpu.dot_dimension_numbers<[1], [0], [0], [1], [0, 0, 1, 1], [], []>} : vector<2x32xf32>, vector<32x64xf32>, vector<2x64xf32> -> vector<2x64xf32>
    %1123 = arith.addf %1121, %1122 : vector<2x64xf32>
    %cst_422 = arith.constant 5.000000e-01 : f32
    %1124 = vector.broadcast %cst_422 : f32 to vector<2x64xf32>
    %1125 = arith.mulf %1124, %1123 : vector<2x64xf32>
    %1126 = math.tanh %1125 : vector<2x64xf32>
    %cst_423 = arith.constant 1.000000e+00 : f32
    %1127 = vector.broadcast %cst_423 : f32 to vector<2x64xf32>
    %1128 = arith.addf %1126, %1127 : vector<2x64xf32>
    %cst_424 = arith.constant 5.000000e-01 : f32
    %1129 = vector.broadcast %cst_424 : f32 to vector<2x64xf32>
    %1130 = arith.mulf %1129, %1128 : vector<2x64xf32>
    %1131 = vector.extract_strided_slice %1130 {offsets = [0, 0], sizes = [2, 32], strides = [1, 1]} : vector<2x64xf32> to vector<2x32xf32>
    %1132 = vector.extract_strided_slice %1130 {offsets = [0, 32], sizes = [2, 32], strides = [1, 1]} : vector<2x64xf32> to vector<2x32xf32>
    %cst_425 = arith.constant dense<0.000000e+00> : vector<2x32xf32>
    %1133 = tpu.matmul %1062, %5, %cst_425 {dimension_numbers = #tpu.dot_dimension_numbers<[1], [0], [0], [1], [0, 0, 1, 1], [], []>} : vector<2x32xf32>, vector<32x32xf32>, vector<2x32xf32> -> vector<2x32xf32>
    %1134 = vector.broadcast %10 : vector<1x32xf32> to vector<2x32xf32>
    %1135 = arith.addf %1133, %1134 : vector<2x32xf32>
    %1136 = vector.extract_strided_slice %1120 {offsets = [0, 64], sizes = [2, 32], strides = [1, 1]} : vector<2x96xf32> to vector<2x32xf32>
    %1137 = arith.mulf %1131, %1135 : vector<2x32xf32>
    %1138 = arith.addf %1136, %1137 : vector<2x32xf32>
    %1139 = math.tanh %1138 : vector<2x32xf32>
    %cst_426 = arith.constant 1.000000e+00 : f32
    %1140 = vector.broadcast %cst_426 : f32 to vector<2x32xf32>
    %1141 = arith.subf %1140, %1132 : vector<2x32xf32>
    %1142 = arith.mulf %1141, %1139 : vector<2x32xf32>
    %1143 = arith.mulf %1132, %1062 : vector<2x32xf32>
    %1144 = arith.addf %1142, %1143 : vector<2x32xf32>
    %cst_427 = arith.constant dense<0.000000e+00> : vector<2x33xf32>
    %1145 = tpu.matmul %1144, %6, %cst_427 {dimension_numbers = #tpu.dot_dimension_numbers<[1], [0], [0], [1], [0, 0, 1, 1], [], []>} : vector<2x32xf32>, vector<32x33xf32>, vector<2x33xf32> -> vector<2x33xf32>
    %1146 = vector.broadcast %11 : vector<1x33xf32> to vector<2x33xf32>
    %1147 = arith.addf %1145, %1146 : vector<2x33xf32>
    %cst_428 = arith.constant 5.000000e-01 : f32
    %1148 = vector.broadcast %cst_428 : f32 to vector<2x33xf32>
    %1149 = arith.mulf %1148, %1147 : vector<2x33xf32>
    %1150 = math.tanh %1149 : vector<2x33xf32>
    %cst_429 = arith.constant 1.000000e+00 : f32
    %1151 = vector.broadcast %cst_429 : f32 to vector<2x33xf32>
    %1152 = arith.addf %1150, %1151 : vector<2x33xf32>
    %cst_430 = arith.constant 5.000000e-01 : f32
    %1153 = vector.broadcast %cst_430 : f32 to vector<2x33xf32>
    %1154 = arith.mulf %1153, %1152 : vector<2x33xf32>
    %1155 = arith.mulf %1085, %1154 : vector<2x33xf32>
    %c13_431 = arith.constant 13 : index
    %c0_432 = arith.constant 0 : index
    %c0_433 = arith.constant 0 : index
    %1156 = vector.load %arg3[%c13_431, %c0_432, %c0_433] : memref<17x33x256xf32, #tpu.memory_space<vmem>>, vector<1x33x256xf32>
    %1157 = vector.shape_cast %1156 : vector<1x33x256xf32> to vector<33x256xf32>
    %cst_434 = arith.constant dense<0.000000e+00> : vector<2x256xf32>
    %1158 = tpu.matmul %1155, %1157, %cst_434 {dimension_numbers = #tpu.dot_dimension_numbers<[1], [0], [0], [1], [0, 0, 1, 1], [], []>} : vector<2x33xf32>, vector<33x256xf32>, vector<2x256xf32> -> vector<2x256xf32>
    %1159 = arith.addf %1082, %1158 : vector<2x256xf32>
    %1160 = arith.mulf %1086, %1154 : vector<2x33xf32>
    %c13_435 = arith.constant 13 : index
    %c0_436 = arith.constant 0 : index
    %c0_437 = arith.constant 0 : index
    %1161 = vector.load %arg4[%c13_435, %c0_436, %c0_437] : memref<17x33x256xf32, #tpu.memory_space<vmem>>, vector<1x33x256xf32>
    %1162 = vector.shape_cast %1161 : vector<1x33x256xf32> to vector<33x256xf32>
    %cst_438 = arith.constant dense<0.000000e+00> : vector<2x256xf32>
    %1163 = tpu.matmul %1160, %1162, %cst_438 {dimension_numbers = #tpu.dot_dimension_numbers<[1], [0], [0], [1], [0, 0, 1, 1], [], []>} : vector<2x33xf32>, vector<33x256xf32>, vector<2x256xf32> -> vector<2x256xf32>
    %1164 = arith.subf %1159, %1163 : vector<2x256xf32>
    %c14 = arith.constant 14 : index
    %c0_439 = arith.constant 0 : index
    %c0_440 = arith.constant 0 : index
    %1165 = vector.load %arg0[%c14, %c0_439, %c0_440] : memref<17x2x64xf32, #tpu.memory_space<vmem>>, vector<1x2x64xf32>
    %1166 = vector.shape_cast %1165 : vector<1x2x64xf32> to vector<2x64xf32>
    %cst_441 = arith.constant dense<0.000000e+00> : vector<2x33xf32>
    %1167 = tpu.matmul %1166, %12, %cst_441 {dimension_numbers = #tpu.dot_dimension_numbers<[1], [0], [0], [1], [0, 0, 1, 1], [], []>} : vector<2x64xf32>, vector<64x33xf32>, vector<2x33xf32> -> vector<2x33xf32>
    %cst_442 = arith.constant dense<0.000000e+00> : vector<2x33xf32>
    %1168 = tpu.matmul %1166, %13, %cst_442 {dimension_numbers = #tpu.dot_dimension_numbers<[1], [0], [0], [1], [0, 0, 1, 1], [], []>} : vector<2x64xf32>, vector<64x33xf32>, vector<2x33xf32> -> vector<2x33xf32>
    %1169 = arith.mulf %1167, %1167 : vector<2x33xf32>
    %1170 = arith.mulf %1168, %1168 : vector<2x33xf32>
    %1171 = arith.addf %1169, %1170 : vector<2x33xf32>
    %1172 = math.sqrt %1171 : vector<2x33xf32>
    %cst_443 = arith.constant dense<0.000000e+00> : vector<2x96xf32>
    %1173 = tpu.matmul %1172, %0, %cst_443 {dimension_numbers = #tpu.dot_dimension_numbers<[1], [0], [0], [1], [0, 0, 1, 1], [], []>} : vector<2x33xf32>, vector<33x96xf32>, vector<2x96xf32> -> vector<2x96xf32>
    %1174 = vector.broadcast %7 : vector<1x96xf32> to vector<2x96xf32>
    %1175 = arith.addf %1173, %1174 : vector<2x96xf32>
    %1176 = vector.extract_strided_slice %1175 {offsets = [0, 0], sizes = [2, 64], strides = [1, 1]} : vector<2x96xf32> to vector<2x64xf32>
    %cst_444 = arith.constant dense<0.000000e+00> : vector<2x64xf32>
    %1177 = tpu.matmul %1117, %2, %cst_444 {dimension_numbers = #tpu.dot_dimension_numbers<[1], [0], [0], [1], [0, 0, 1, 1], [], []>} : vector<2x32xf32>, vector<32x64xf32>, vector<2x64xf32> -> vector<2x64xf32>
    %1178 = arith.addf %1176, %1177 : vector<2x64xf32>
    %cst_445 = arith.constant 5.000000e-01 : f32
    %1179 = vector.broadcast %cst_445 : f32 to vector<2x64xf32>
    %1180 = arith.mulf %1179, %1178 : vector<2x64xf32>
    %1181 = math.tanh %1180 : vector<2x64xf32>
    %cst_446 = arith.constant 1.000000e+00 : f32
    %1182 = vector.broadcast %cst_446 : f32 to vector<2x64xf32>
    %1183 = arith.addf %1181, %1182 : vector<2x64xf32>
    %cst_447 = arith.constant 5.000000e-01 : f32
    %1184 = vector.broadcast %cst_447 : f32 to vector<2x64xf32>
    %1185 = arith.mulf %1184, %1183 : vector<2x64xf32>
    %1186 = vector.extract_strided_slice %1185 {offsets = [0, 0], sizes = [2, 32], strides = [1, 1]} : vector<2x64xf32> to vector<2x32xf32>
    %1187 = vector.extract_strided_slice %1185 {offsets = [0, 32], sizes = [2, 32], strides = [1, 1]} : vector<2x64xf32> to vector<2x32xf32>
    %cst_448 = arith.constant dense<0.000000e+00> : vector<2x32xf32>
    %1188 = tpu.matmul %1117, %3, %cst_448 {dimension_numbers = #tpu.dot_dimension_numbers<[1], [0], [0], [1], [0, 0, 1, 1], [], []>} : vector<2x32xf32>, vector<32x32xf32>, vector<2x32xf32> -> vector<2x32xf32>
    %1189 = vector.broadcast %8 : vector<1x32xf32> to vector<2x32xf32>
    %1190 = arith.addf %1188, %1189 : vector<2x32xf32>
    %1191 = vector.extract_strided_slice %1175 {offsets = [0, 64], sizes = [2, 32], strides = [1, 1]} : vector<2x96xf32> to vector<2x32xf32>
    %1192 = arith.mulf %1186, %1190 : vector<2x32xf32>
    %1193 = arith.addf %1191, %1192 : vector<2x32xf32>
    %1194 = math.tanh %1193 : vector<2x32xf32>
    %cst_449 = arith.constant 1.000000e+00 : f32
    %1195 = vector.broadcast %cst_449 : f32 to vector<2x32xf32>
    %1196 = arith.subf %1195, %1187 : vector<2x32xf32>
    %1197 = arith.mulf %1196, %1194 : vector<2x32xf32>
    %1198 = arith.mulf %1187, %1117 : vector<2x32xf32>
    %1199 = arith.addf %1197, %1198 : vector<2x32xf32>
    %cst_450 = arith.constant dense<0.000000e+00> : vector<2x96xf32>
    %1200 = tpu.matmul %1199, %1, %cst_450 {dimension_numbers = #tpu.dot_dimension_numbers<[1], [0], [0], [1], [0, 0, 1, 1], [], []>} : vector<2x32xf32>, vector<32x96xf32>, vector<2x96xf32> -> vector<2x96xf32>
    %1201 = vector.broadcast %9 : vector<1x96xf32> to vector<2x96xf32>
    %1202 = arith.addf %1200, %1201 : vector<2x96xf32>
    %1203 = vector.extract_strided_slice %1202 {offsets = [0, 0], sizes = [2, 64], strides = [1, 1]} : vector<2x96xf32> to vector<2x64xf32>
    %cst_451 = arith.constant dense<0.000000e+00> : vector<2x64xf32>
    %1204 = tpu.matmul %1144, %4, %cst_451 {dimension_numbers = #tpu.dot_dimension_numbers<[1], [0], [0], [1], [0, 0, 1, 1], [], []>} : vector<2x32xf32>, vector<32x64xf32>, vector<2x64xf32> -> vector<2x64xf32>
    %1205 = arith.addf %1203, %1204 : vector<2x64xf32>
    %cst_452 = arith.constant 5.000000e-01 : f32
    %1206 = vector.broadcast %cst_452 : f32 to vector<2x64xf32>
    %1207 = arith.mulf %1206, %1205 : vector<2x64xf32>
    %1208 = math.tanh %1207 : vector<2x64xf32>
    %cst_453 = arith.constant 1.000000e+00 : f32
    %1209 = vector.broadcast %cst_453 : f32 to vector<2x64xf32>
    %1210 = arith.addf %1208, %1209 : vector<2x64xf32>
    %cst_454 = arith.constant 5.000000e-01 : f32
    %1211 = vector.broadcast %cst_454 : f32 to vector<2x64xf32>
    %1212 = arith.mulf %1211, %1210 : vector<2x64xf32>
    %1213 = vector.extract_strided_slice %1212 {offsets = [0, 0], sizes = [2, 32], strides = [1, 1]} : vector<2x64xf32> to vector<2x32xf32>
    %1214 = vector.extract_strided_slice %1212 {offsets = [0, 32], sizes = [2, 32], strides = [1, 1]} : vector<2x64xf32> to vector<2x32xf32>
    %cst_455 = arith.constant dense<0.000000e+00> : vector<2x32xf32>
    %1215 = tpu.matmul %1144, %5, %cst_455 {dimension_numbers = #tpu.dot_dimension_numbers<[1], [0], [0], [1], [0, 0, 1, 1], [], []>} : vector<2x32xf32>, vector<32x32xf32>, vector<2x32xf32> -> vector<2x32xf32>
    %1216 = vector.broadcast %10 : vector<1x32xf32> to vector<2x32xf32>
    %1217 = arith.addf %1215, %1216 : vector<2x32xf32>
    %1218 = vector.extract_strided_slice %1202 {offsets = [0, 64], sizes = [2, 32], strides = [1, 1]} : vector<2x96xf32> to vector<2x32xf32>
    %1219 = arith.mulf %1213, %1217 : vector<2x32xf32>
    %1220 = arith.addf %1218, %1219 : vector<2x32xf32>
    %1221 = math.tanh %1220 : vector<2x32xf32>
    %cst_456 = arith.constant 1.000000e+00 : f32
    %1222 = vector.broadcast %cst_456 : f32 to vector<2x32xf32>
    %1223 = arith.subf %1222, %1214 : vector<2x32xf32>
    %1224 = arith.mulf %1223, %1221 : vector<2x32xf32>
    %1225 = arith.mulf %1214, %1144 : vector<2x32xf32>
    %1226 = arith.addf %1224, %1225 : vector<2x32xf32>
    %cst_457 = arith.constant dense<0.000000e+00> : vector<2x33xf32>
    %1227 = tpu.matmul %1226, %6, %cst_457 {dimension_numbers = #tpu.dot_dimension_numbers<[1], [0], [0], [1], [0, 0, 1, 1], [], []>} : vector<2x32xf32>, vector<32x33xf32>, vector<2x33xf32> -> vector<2x33xf32>
    %1228 = vector.broadcast %11 : vector<1x33xf32> to vector<2x33xf32>
    %1229 = arith.addf %1227, %1228 : vector<2x33xf32>
    %cst_458 = arith.constant 5.000000e-01 : f32
    %1230 = vector.broadcast %cst_458 : f32 to vector<2x33xf32>
    %1231 = arith.mulf %1230, %1229 : vector<2x33xf32>
    %1232 = math.tanh %1231 : vector<2x33xf32>
    %cst_459 = arith.constant 1.000000e+00 : f32
    %1233 = vector.broadcast %cst_459 : f32 to vector<2x33xf32>
    %1234 = arith.addf %1232, %1233 : vector<2x33xf32>
    %cst_460 = arith.constant 5.000000e-01 : f32
    %1235 = vector.broadcast %cst_460 : f32 to vector<2x33xf32>
    %1236 = arith.mulf %1235, %1234 : vector<2x33xf32>
    %1237 = arith.mulf %1167, %1236 : vector<2x33xf32>
    %c14_461 = arith.constant 14 : index
    %c0_462 = arith.constant 0 : index
    %c0_463 = arith.constant 0 : index
    %1238 = vector.load %arg3[%c14_461, %c0_462, %c0_463] : memref<17x33x256xf32, #tpu.memory_space<vmem>>, vector<1x33x256xf32>
    %1239 = vector.shape_cast %1238 : vector<1x33x256xf32> to vector<33x256xf32>
    %cst_464 = arith.constant dense<0.000000e+00> : vector<2x256xf32>
    %1240 = tpu.matmul %1237, %1239, %cst_464 {dimension_numbers = #tpu.dot_dimension_numbers<[1], [0], [0], [1], [0, 0, 1, 1], [], []>} : vector<2x33xf32>, vector<33x256xf32>, vector<2x256xf32> -> vector<2x256xf32>
    %1241 = arith.addf %1164, %1240 : vector<2x256xf32>
    %1242 = arith.mulf %1168, %1236 : vector<2x33xf32>
    %c14_465 = arith.constant 14 : index
    %c0_466 = arith.constant 0 : index
    %c0_467 = arith.constant 0 : index
    %1243 = vector.load %arg4[%c14_465, %c0_466, %c0_467] : memref<17x33x256xf32, #tpu.memory_space<vmem>>, vector<1x33x256xf32>
    %1244 = vector.shape_cast %1243 : vector<1x33x256xf32> to vector<33x256xf32>
    %cst_468 = arith.constant dense<0.000000e+00> : vector<2x256xf32>
    %1245 = tpu.matmul %1242, %1244, %cst_468 {dimension_numbers = #tpu.dot_dimension_numbers<[1], [0], [0], [1], [0, 0, 1, 1], [], []>} : vector<2x33xf32>, vector<33x256xf32>, vector<2x256xf32> -> vector<2x256xf32>
    %1246 = arith.subf %1241, %1245 : vector<2x256xf32>
    %c15 = arith.constant 15 : index
    %c0_469 = arith.constant 0 : index
    %c0_470 = arith.constant 0 : index
    %1247 = vector.load %arg0[%c15, %c0_469, %c0_470] : memref<17x2x64xf32, #tpu.memory_space<vmem>>, vector<1x2x64xf32>
    %1248 = vector.shape_cast %1247 : vector<1x2x64xf32> to vector<2x64xf32>
    %cst_471 = arith.constant dense<0.000000e+00> : vector<2x33xf32>
    %1249 = tpu.matmul %1248, %12, %cst_471 {dimension_numbers = #tpu.dot_dimension_numbers<[1], [0], [0], [1], [0, 0, 1, 1], [], []>} : vector<2x64xf32>, vector<64x33xf32>, vector<2x33xf32> -> vector<2x33xf32>
    %cst_472 = arith.constant dense<0.000000e+00> : vector<2x33xf32>
    %1250 = tpu.matmul %1248, %13, %cst_472 {dimension_numbers = #tpu.dot_dimension_numbers<[1], [0], [0], [1], [0, 0, 1, 1], [], []>} : vector<2x64xf32>, vector<64x33xf32>, vector<2x33xf32> -> vector<2x33xf32>
    %1251 = arith.mulf %1249, %1249 : vector<2x33xf32>
    %1252 = arith.mulf %1250, %1250 : vector<2x33xf32>
    %1253 = arith.addf %1251, %1252 : vector<2x33xf32>
    %1254 = math.sqrt %1253 : vector<2x33xf32>
    %cst_473 = arith.constant dense<0.000000e+00> : vector<2x96xf32>
    %1255 = tpu.matmul %1254, %0, %cst_473 {dimension_numbers = #tpu.dot_dimension_numbers<[1], [0], [0], [1], [0, 0, 1, 1], [], []>} : vector<2x33xf32>, vector<33x96xf32>, vector<2x96xf32> -> vector<2x96xf32>
    %1256 = vector.broadcast %7 : vector<1x96xf32> to vector<2x96xf32>
    %1257 = arith.addf %1255, %1256 : vector<2x96xf32>
    %1258 = vector.extract_strided_slice %1257 {offsets = [0, 0], sizes = [2, 64], strides = [1, 1]} : vector<2x96xf32> to vector<2x64xf32>
    %cst_474 = arith.constant dense<0.000000e+00> : vector<2x64xf32>
    %1259 = tpu.matmul %1199, %2, %cst_474 {dimension_numbers = #tpu.dot_dimension_numbers<[1], [0], [0], [1], [0, 0, 1, 1], [], []>} : vector<2x32xf32>, vector<32x64xf32>, vector<2x64xf32> -> vector<2x64xf32>
    %1260 = arith.addf %1258, %1259 : vector<2x64xf32>
    %cst_475 = arith.constant 5.000000e-01 : f32
    %1261 = vector.broadcast %cst_475 : f32 to vector<2x64xf32>
    %1262 = arith.mulf %1261, %1260 : vector<2x64xf32>
    %1263 = math.tanh %1262 : vector<2x64xf32>
    %cst_476 = arith.constant 1.000000e+00 : f32
    %1264 = vector.broadcast %cst_476 : f32 to vector<2x64xf32>
    %1265 = arith.addf %1263, %1264 : vector<2x64xf32>
    %cst_477 = arith.constant 5.000000e-01 : f32
    %1266 = vector.broadcast %cst_477 : f32 to vector<2x64xf32>
    %1267 = arith.mulf %1266, %1265 : vector<2x64xf32>
    %1268 = vector.extract_strided_slice %1267 {offsets = [0, 0], sizes = [2, 32], strides = [1, 1]} : vector<2x64xf32> to vector<2x32xf32>
    %1269 = vector.extract_strided_slice %1267 {offsets = [0, 32], sizes = [2, 32], strides = [1, 1]} : vector<2x64xf32> to vector<2x32xf32>
    %cst_478 = arith.constant dense<0.000000e+00> : vector<2x32xf32>
    %1270 = tpu.matmul %1199, %3, %cst_478 {dimension_numbers = #tpu.dot_dimension_numbers<[1], [0], [0], [1], [0, 0, 1, 1], [], []>} : vector<2x32xf32>, vector<32x32xf32>, vector<2x32xf32> -> vector<2x32xf32>
    %1271 = vector.broadcast %8 : vector<1x32xf32> to vector<2x32xf32>
    %1272 = arith.addf %1270, %1271 : vector<2x32xf32>
    %1273 = vector.extract_strided_slice %1257 {offsets = [0, 64], sizes = [2, 32], strides = [1, 1]} : vector<2x96xf32> to vector<2x32xf32>
    %1274 = arith.mulf %1268, %1272 : vector<2x32xf32>
    %1275 = arith.addf %1273, %1274 : vector<2x32xf32>
    %1276 = math.tanh %1275 : vector<2x32xf32>
    %cst_479 = arith.constant 1.000000e+00 : f32
    %1277 = vector.broadcast %cst_479 : f32 to vector<2x32xf32>
    %1278 = arith.subf %1277, %1269 : vector<2x32xf32>
    %1279 = arith.mulf %1278, %1276 : vector<2x32xf32>
    %1280 = arith.mulf %1269, %1199 : vector<2x32xf32>
    %1281 = arith.addf %1279, %1280 : vector<2x32xf32>
    %cst_480 = arith.constant dense<0.000000e+00> : vector<2x96xf32>
    %1282 = tpu.matmul %1281, %1, %cst_480 {dimension_numbers = #tpu.dot_dimension_numbers<[1], [0], [0], [1], [0, 0, 1, 1], [], []>} : vector<2x32xf32>, vector<32x96xf32>, vector<2x96xf32> -> vector<2x96xf32>
    %1283 = vector.broadcast %9 : vector<1x96xf32> to vector<2x96xf32>
    %1284 = arith.addf %1282, %1283 : vector<2x96xf32>
    %1285 = vector.extract_strided_slice %1284 {offsets = [0, 0], sizes = [2, 64], strides = [1, 1]} : vector<2x96xf32> to vector<2x64xf32>
    %cst_481 = arith.constant dense<0.000000e+00> : vector<2x64xf32>
    %1286 = tpu.matmul %1226, %4, %cst_481 {dimension_numbers = #tpu.dot_dimension_numbers<[1], [0], [0], [1], [0, 0, 1, 1], [], []>} : vector<2x32xf32>, vector<32x64xf32>, vector<2x64xf32> -> vector<2x64xf32>
    %1287 = arith.addf %1285, %1286 : vector<2x64xf32>
    %cst_482 = arith.constant 5.000000e-01 : f32
    %1288 = vector.broadcast %cst_482 : f32 to vector<2x64xf32>
    %1289 = arith.mulf %1288, %1287 : vector<2x64xf32>
    %1290 = math.tanh %1289 : vector<2x64xf32>
    %cst_483 = arith.constant 1.000000e+00 : f32
    %1291 = vector.broadcast %cst_483 : f32 to vector<2x64xf32>
    %1292 = arith.addf %1290, %1291 : vector<2x64xf32>
    %cst_484 = arith.constant 5.000000e-01 : f32
    %1293 = vector.broadcast %cst_484 : f32 to vector<2x64xf32>
    %1294 = arith.mulf %1293, %1292 : vector<2x64xf32>
    %1295 = vector.extract_strided_slice %1294 {offsets = [0, 0], sizes = [2, 32], strides = [1, 1]} : vector<2x64xf32> to vector<2x32xf32>
    %1296 = vector.extract_strided_slice %1294 {offsets = [0, 32], sizes = [2, 32], strides = [1, 1]} : vector<2x64xf32> to vector<2x32xf32>
    %cst_485 = arith.constant dense<0.000000e+00> : vector<2x32xf32>
    %1297 = tpu.matmul %1226, %5, %cst_485 {dimension_numbers = #tpu.dot_dimension_numbers<[1], [0], [0], [1], [0, 0, 1, 1], [], []>} : vector<2x32xf32>, vector<32x32xf32>, vector<2x32xf32> -> vector<2x32xf32>
    %1298 = vector.broadcast %10 : vector<1x32xf32> to vector<2x32xf32>
    %1299 = arith.addf %1297, %1298 : vector<2x32xf32>
    %1300 = vector.extract_strided_slice %1284 {offsets = [0, 64], sizes = [2, 32], strides = [1, 1]} : vector<2x96xf32> to vector<2x32xf32>
    %1301 = arith.mulf %1295, %1299 : vector<2x32xf32>
    %1302 = arith.addf %1300, %1301 : vector<2x32xf32>
    %1303 = math.tanh %1302 : vector<2x32xf32>
    %cst_486 = arith.constant 1.000000e+00 : f32
    %1304 = vector.broadcast %cst_486 : f32 to vector<2x32xf32>
    %1305 = arith.subf %1304, %1296 : vector<2x32xf32>
    %1306 = arith.mulf %1305, %1303 : vector<2x32xf32>
    %1307 = arith.mulf %1296, %1226 : vector<2x32xf32>
    %1308 = arith.addf %1306, %1307 : vector<2x32xf32>
    %cst_487 = arith.constant dense<0.000000e+00> : vector<2x33xf32>
    %1309 = tpu.matmul %1308, %6, %cst_487 {dimension_numbers = #tpu.dot_dimension_numbers<[1], [0], [0], [1], [0, 0, 1, 1], [], []>} : vector<2x32xf32>, vector<32x33xf32>, vector<2x33xf32> -> vector<2x33xf32>
    %1310 = vector.broadcast %11 : vector<1x33xf32> to vector<2x33xf32>
    %1311 = arith.addf %1309, %1310 : vector<2x33xf32>
    %cst_488 = arith.constant 5.000000e-01 : f32
    %1312 = vector.broadcast %cst_488 : f32 to vector<2x33xf32>
    %1313 = arith.mulf %1312, %1311 : vector<2x33xf32>
    %1314 = math.tanh %1313 : vector<2x33xf32>
    %cst_489 = arith.constant 1.000000e+00 : f32
    %1315 = vector.broadcast %cst_489 : f32 to vector<2x33xf32>
    %1316 = arith.addf %1314, %1315 : vector<2x33xf32>
    %cst_490 = arith.constant 5.000000e-01 : f32
    %1317 = vector.broadcast %cst_490 : f32 to vector<2x33xf32>
    %1318 = arith.mulf %1317, %1316 : vector<2x33xf32>
    %1319 = arith.mulf %1249, %1318 : vector<2x33xf32>
    %c15_491 = arith.constant 15 : index
    %c0_492 = arith.constant 0 : index
    %c0_493 = arith.constant 0 : index
    %1320 = vector.load %arg3[%c15_491, %c0_492, %c0_493] : memref<17x33x256xf32, #tpu.memory_space<vmem>>, vector<1x33x256xf32>
    %1321 = vector.shape_cast %1320 : vector<1x33x256xf32> to vector<33x256xf32>
    %cst_494 = arith.constant dense<0.000000e+00> : vector<2x256xf32>
    %1322 = tpu.matmul %1319, %1321, %cst_494 {dimension_numbers = #tpu.dot_dimension_numbers<[1], [0], [0], [1], [0, 0, 1, 1], [], []>} : vector<2x33xf32>, vector<33x256xf32>, vector<2x256xf32> -> vector<2x256xf32>
    %1323 = arith.addf %1246, %1322 : vector<2x256xf32>
    %1324 = arith.mulf %1250, %1318 : vector<2x33xf32>
    %c15_495 = arith.constant 15 : index
    %c0_496 = arith.constant 0 : index
    %c0_497 = arith.constant 0 : index
    %1325 = vector.load %arg4[%c15_495, %c0_496, %c0_497] : memref<17x33x256xf32, #tpu.memory_space<vmem>>, vector<1x33x256xf32>
    %1326 = vector.shape_cast %1325 : vector<1x33x256xf32> to vector<33x256xf32>
    %cst_498 = arith.constant dense<0.000000e+00> : vector<2x256xf32>
    %1327 = tpu.matmul %1324, %1326, %cst_498 {dimension_numbers = #tpu.dot_dimension_numbers<[1], [0], [0], [1], [0, 0, 1, 1], [], []>} : vector<2x33xf32>, vector<33x256xf32>, vector<2x256xf32> -> vector<2x256xf32>
    %1328 = arith.subf %1323, %1327 : vector<2x256xf32>
    %c16 = arith.constant 16 : index
    %c0_499 = arith.constant 0 : index
    %c0_500 = arith.constant 0 : index
    %1329 = vector.load %arg0[%c16, %c0_499, %c0_500] : memref<17x2x64xf32, #tpu.memory_space<vmem>>, vector<1x2x64xf32>
    %1330 = vector.shape_cast %1329 : vector<1x2x64xf32> to vector<2x64xf32>
    %cst_501 = arith.constant dense<0.000000e+00> : vector<2x33xf32>
    %1331 = tpu.matmul %1330, %12, %cst_501 {dimension_numbers = #tpu.dot_dimension_numbers<[1], [0], [0], [1], [0, 0, 1, 1], [], []>} : vector<2x64xf32>, vector<64x33xf32>, vector<2x33xf32> -> vector<2x33xf32>
    %cst_502 = arith.constant dense<0.000000e+00> : vector<2x33xf32>
    %1332 = tpu.matmul %1330, %13, %cst_502 {dimension_numbers = #tpu.dot_dimension_numbers<[1], [0], [0], [1], [0, 0, 1, 1], [], []>} : vector<2x64xf32>, vector<64x33xf32>, vector<2x33xf32> -> vector<2x33xf32>
    %1333 = arith.mulf %1331, %1331 : vector<2x33xf32>
    %1334 = arith.mulf %1332, %1332 : vector<2x33xf32>
    %1335 = arith.addf %1333, %1334 : vector<2x33xf32>
    %1336 = math.sqrt %1335 : vector<2x33xf32>
    %cst_503 = arith.constant dense<0.000000e+00> : vector<2x96xf32>
    %1337 = tpu.matmul %1336, %0, %cst_503 {dimension_numbers = #tpu.dot_dimension_numbers<[1], [0], [0], [1], [0, 0, 1, 1], [], []>} : vector<2x33xf32>, vector<33x96xf32>, vector<2x96xf32> -> vector<2x96xf32>
    %1338 = vector.broadcast %7 : vector<1x96xf32> to vector<2x96xf32>
    %1339 = arith.addf %1337, %1338 : vector<2x96xf32>
    %1340 = vector.extract_strided_slice %1339 {offsets = [0, 0], sizes = [2, 64], strides = [1, 1]} : vector<2x96xf32> to vector<2x64xf32>
    %cst_504 = arith.constant dense<0.000000e+00> : vector<2x64xf32>
    %1341 = tpu.matmul %1281, %2, %cst_504 {dimension_numbers = #tpu.dot_dimension_numbers<[1], [0], [0], [1], [0, 0, 1, 1], [], []>} : vector<2x32xf32>, vector<32x64xf32>, vector<2x64xf32> -> vector<2x64xf32>
    %1342 = arith.addf %1340, %1341 : vector<2x64xf32>
    %cst_505 = arith.constant 5.000000e-01 : f32
    %1343 = vector.broadcast %cst_505 : f32 to vector<2x64xf32>
    %1344 = arith.mulf %1343, %1342 : vector<2x64xf32>
    %1345 = math.tanh %1344 : vector<2x64xf32>
    %cst_506 = arith.constant 1.000000e+00 : f32
    %1346 = vector.broadcast %cst_506 : f32 to vector<2x64xf32>
    %1347 = arith.addf %1345, %1346 : vector<2x64xf32>
    %cst_507 = arith.constant 5.000000e-01 : f32
    %1348 = vector.broadcast %cst_507 : f32 to vector<2x64xf32>
    %1349 = arith.mulf %1348, %1347 : vector<2x64xf32>
    %1350 = vector.extract_strided_slice %1349 {offsets = [0, 0], sizes = [2, 32], strides = [1, 1]} : vector<2x64xf32> to vector<2x32xf32>
    %1351 = vector.extract_strided_slice %1349 {offsets = [0, 32], sizes = [2, 32], strides = [1, 1]} : vector<2x64xf32> to vector<2x32xf32>
    %cst_508 = arith.constant dense<0.000000e+00> : vector<2x32xf32>
    %1352 = tpu.matmul %1281, %3, %cst_508 {dimension_numbers = #tpu.dot_dimension_numbers<[1], [0], [0], [1], [0, 0, 1, 1], [], []>} : vector<2x32xf32>, vector<32x32xf32>, vector<2x32xf32> -> vector<2x32xf32>
    %1353 = vector.broadcast %8 : vector<1x32xf32> to vector<2x32xf32>
    %1354 = arith.addf %1352, %1353 : vector<2x32xf32>
    %1355 = vector.extract_strided_slice %1339 {offsets = [0, 64], sizes = [2, 32], strides = [1, 1]} : vector<2x96xf32> to vector<2x32xf32>
    %1356 = arith.mulf %1350, %1354 : vector<2x32xf32>
    %1357 = arith.addf %1355, %1356 : vector<2x32xf32>
    %1358 = math.tanh %1357 : vector<2x32xf32>
    %cst_509 = arith.constant 1.000000e+00 : f32
    %1359 = vector.broadcast %cst_509 : f32 to vector<2x32xf32>
    %1360 = arith.subf %1359, %1351 : vector<2x32xf32>
    %1361 = arith.mulf %1360, %1358 : vector<2x32xf32>
    %1362 = arith.mulf %1351, %1281 : vector<2x32xf32>
    %1363 = arith.addf %1361, %1362 : vector<2x32xf32>
    %cst_510 = arith.constant dense<0.000000e+00> : vector<2x96xf32>
    %1364 = tpu.matmul %1363, %1, %cst_510 {dimension_numbers = #tpu.dot_dimension_numbers<[1], [0], [0], [1], [0, 0, 1, 1], [], []>} : vector<2x32xf32>, vector<32x96xf32>, vector<2x96xf32> -> vector<2x96xf32>
    %1365 = vector.broadcast %9 : vector<1x96xf32> to vector<2x96xf32>
    %1366 = arith.addf %1364, %1365 : vector<2x96xf32>
    %1367 = vector.extract_strided_slice %1366 {offsets = [0, 0], sizes = [2, 64], strides = [1, 1]} : vector<2x96xf32> to vector<2x64xf32>
    %cst_511 = arith.constant dense<0.000000e+00> : vector<2x64xf32>
    %1368 = tpu.matmul %1308, %4, %cst_511 {dimension_numbers = #tpu.dot_dimension_numbers<[1], [0], [0], [1], [0, 0, 1, 1], [], []>} : vector<2x32xf32>, vector<32x64xf32>, vector<2x64xf32> -> vector<2x64xf32>
    %1369 = arith.addf %1367, %1368 : vector<2x64xf32>
    %cst_512 = arith.constant 5.000000e-01 : f32
    %1370 = vector.broadcast %cst_512 : f32 to vector<2x64xf32>
    %1371 = arith.mulf %1370, %1369 : vector<2x64xf32>
    %1372 = math.tanh %1371 : vector<2x64xf32>
    %cst_513 = arith.constant 1.000000e+00 : f32
    %1373 = vector.broadcast %cst_513 : f32 to vector<2x64xf32>
    %1374 = arith.addf %1372, %1373 : vector<2x64xf32>
    %cst_514 = arith.constant 5.000000e-01 : f32
    %1375 = vector.broadcast %cst_514 : f32 to vector<2x64xf32>
    %1376 = arith.mulf %1375, %1374 : vector<2x64xf32>
    %1377 = vector.extract_strided_slice %1376 {offsets = [0, 0], sizes = [2, 32], strides = [1, 1]} : vector<2x64xf32> to vector<2x32xf32>
    %1378 = vector.extract_strided_slice %1376 {offsets = [0, 32], sizes = [2, 32], strides = [1, 1]} : vector<2x64xf32> to vector<2x32xf32>
    %cst_515 = arith.constant dense<0.000000e+00> : vector<2x32xf32>
    %1379 = tpu.matmul %1308, %5, %cst_515 {dimension_numbers = #tpu.dot_dimension_numbers<[1], [0], [0], [1], [0, 0, 1, 1], [], []>} : vector<2x32xf32>, vector<32x32xf32>, vector<2x32xf32> -> vector<2x32xf32>
    %1380 = vector.broadcast %10 : vector<1x32xf32> to vector<2x32xf32>
    %1381 = arith.addf %1379, %1380 : vector<2x32xf32>
    %1382 = vector.extract_strided_slice %1366 {offsets = [0, 64], sizes = [2, 32], strides = [1, 1]} : vector<2x96xf32> to vector<2x32xf32>
    %1383 = arith.mulf %1377, %1381 : vector<2x32xf32>
    %1384 = arith.addf %1382, %1383 : vector<2x32xf32>
    %1385 = math.tanh %1384 : vector<2x32xf32>
    %cst_516 = arith.constant 1.000000e+00 : f32
    %1386 = vector.broadcast %cst_516 : f32 to vector<2x32xf32>
    %1387 = arith.subf %1386, %1378 : vector<2x32xf32>
    %1388 = arith.mulf %1387, %1385 : vector<2x32xf32>
    %1389 = arith.mulf %1378, %1308 : vector<2x32xf32>
    %1390 = arith.addf %1388, %1389 : vector<2x32xf32>
    %cst_517 = arith.constant dense<0.000000e+00> : vector<2x33xf32>
    %1391 = tpu.matmul %1390, %6, %cst_517 {dimension_numbers = #tpu.dot_dimension_numbers<[1], [0], [0], [1], [0, 0, 1, 1], [], []>} : vector<2x32xf32>, vector<32x33xf32>, vector<2x33xf32> -> vector<2x33xf32>
    %1392 = vector.broadcast %11 : vector<1x33xf32> to vector<2x33xf32>
    %1393 = arith.addf %1391, %1392 : vector<2x33xf32>
    %cst_518 = arith.constant 5.000000e-01 : f32
    %1394 = vector.broadcast %cst_518 : f32 to vector<2x33xf32>
    %1395 = arith.mulf %1394, %1393 : vector<2x33xf32>
    %1396 = math.tanh %1395 : vector<2x33xf32>
    %cst_519 = arith.constant 1.000000e+00 : f32
    %1397 = vector.broadcast %cst_519 : f32 to vector<2x33xf32>
    %1398 = arith.addf %1396, %1397 : vector<2x33xf32>
    %cst_520 = arith.constant 5.000000e-01 : f32
    %1399 = vector.broadcast %cst_520 : f32 to vector<2x33xf32>
    %1400 = arith.mulf %1399, %1398 : vector<2x33xf32>
    %1401 = arith.mulf %1331, %1400 : vector<2x33xf32>
    %c16_521 = arith.constant 16 : index
    %c0_522 = arith.constant 0 : index
    %c0_523 = arith.constant 0 : index
    %1402 = vector.load %arg3[%c16_521, %c0_522, %c0_523] : memref<17x33x256xf32, #tpu.memory_space<vmem>>, vector<1x33x256xf32>
    %1403 = vector.shape_cast %1402 : vector<1x33x256xf32> to vector<33x256xf32>
    %cst_524 = arith.constant dense<0.000000e+00> : vector<2x256xf32>
    %1404 = tpu.matmul %1401, %1403, %cst_524 {dimension_numbers = #tpu.dot_dimension_numbers<[1], [0], [0], [1], [0, 0, 1, 1], [], []>} : vector<2x33xf32>, vector<33x256xf32>, vector<2x256xf32> -> vector<2x256xf32>
    %1405 = arith.addf %1328, %1404 : vector<2x256xf32>
    %1406 = arith.mulf %1332, %1400 : vector<2x33xf32>
    %c16_525 = arith.constant 16 : index
    %c0_526 = arith.constant 0 : index
    %c0_527 = arith.constant 0 : index
    %1407 = vector.load %arg4[%c16_525, %c0_526, %c0_527] : memref<17x33x256xf32, #tpu.memory_space<vmem>>, vector<1x33x256xf32>
    %1408 = vector.shape_cast %1407 : vector<1x33x256xf32> to vector<33x256xf32>
    %cst_528 = arith.constant dense<0.000000e+00> : vector<2x256xf32>
    %1409 = tpu.matmul %1406, %1408, %cst_528 {dimension_numbers = #tpu.dot_dimension_numbers<[1], [0], [0], [1], [0, 0, 1, 1], [], []>} : vector<2x33xf32>, vector<33x256xf32>, vector<2x256xf32> -> vector<2x256xf32>
    %1410 = arith.subf %1405, %1409 : vector<2x256xf32>
    %c0_529 = arith.constant 0 : index
    %c0_530 = arith.constant 0 : index
    %1411 = vector.load %arg6[%c0_529, %c0_530] : memref<2x256xf32, #tpu.memory_space<vmem>>, vector<2x256xf32>
    tpu.vector_store %arg6[%c0_529, %c0_530], %1410 {strides = array<i32>} : memref<2x256xf32, #tpu.memory_space<vmem>>, vector<2x256xf32>,
    return
  }
}

</mosaic_0001>

<bundles_post_ra>
// kernel: grunet_forward.1
= control target key start
LH: loop header
LB: loop body
LE: loop exit
PB: predicated region body
PF: predicated region fallthrough
CT: control target
= control target key end

     0   :  { %11 = vsyncpa [#allocation3], 0  ;;  %s23624_s0 = inlined_call_operand.vmem [shape: f32[17,2,64], index: 0, kind: input, shape index: {}]   ;;  %s23625_s1 = inlined_call_operand.vmem [shape: f32[64,33], index: 1, kind: input, shape index: {}]   ;;  %s23626_s2 = inlined_call_operand.vmem [shape: f32[64,33], index: 2, kind: input, shape index: {}]   ;;  %s23627_s3 = inlined_call_operand.hbm [shape: f32[17,33,256], index: 3, kind: input, shape index: {}]   ;;  %s23628_s4 = inlined_call_operand.vmem [shape: f32[17,33,256], index: 4, kind: input, shape index: {}]   ;;  %s23629_s5 = inlined_call_operand.vmem [shape: f32[272,96], index: 5, kind: input, shape index: {}]   ;;  %s23630_s6 = inlined_call_operand.hbm [shape: f32[2,256], index: 6, kind: output, shape index: {}]  }
   0x1   :  { %12 = vsyncpa [#allocation4], 0  ;;  %s20312_s21 = smov [#allocation2]   ;;  %s20264_s25 = scalar_lea.hbm %s23627_s3, 21760 }
   0x2   :  { %s24_s22 = sshll.u32 %s20312_s21, 4  ;;  %p20265_p0 = scmp.ne.s32.totalorder %s23627_s3, %s20264_s25  ;;  %s25_s22 = int_to_ptr.vmem [resolvable:$true] %s24_s22 }
   0x3   :  { %p20268_p1 = scmp.lt.u32.totalorder %s20264_s25, %s23627_s3 }
   0x5   :  { %p20270_p2 = pnand %p20268_p1, %p20265_p0 }
   0x7   :  { %20273 = shalt.err (!%p20270_p2)
}
   0x8   :  { %s20274_s30 = scalar_lea.vmem %s25_s22, 21760  ;;  %p20279_p4 = scmp.lt.s32.totalorder %s25_s22, %s25_s22 }
   0x9   :  { %p20275_p3 = scmp.ne.s32.totalorder %s25_s22, %s20274_s30  ;;  %p20280_p5 = scmp.lt.s32.totalorder %s20274_s30, %s20274_s30 }
   0xb   :  { %p20281_p6 = por %p20280_p5, %p20279_p4 }
   0xd   :  { %p20282_p7 = pnand %p20281_p6, %p20275_p3 }
   0xf   :  { %20285 = shalt.err (!%p20282_p7)
}
  0x10   :  { %s20313_s7 = smov 256   ;;  %s20314_s8 = smov 16  }
  0x11   :  { %30 = dma.hbm_to_vmem [thread:$0]  %s23627_s3, 21760, %s25_s22, [#allocation3], %s20313_s7, %s20313_s7, %s20314_s8  }
  0x12   :  { %20308 = dma.done.wait [#allocation3], 21760  }
  0x13   :  { %20309 = vsyncadd [#allocation3], 4294945536  ;;  %v20315_v0 = vmov 0.0|0.0   ;;  %vm20316_vm0 = vmmov 0   ;;  %v20317_v1 = vmov 0.0   ;;  %v72_v2 = vld [vmem:[%s23625_s1] sm:$0xff] }
  0x14   :  { %18627 = vmatprep.subr.bf16.mxu0 %v20315_v0  ;;  %18639 = vmatprep.subr.bf16.mxu1 %v20315_v0  ;;  %v73_v3 = vld [vmem:[%s23625_s1 + $0x8] sm:$0xff]  ;;  %v80_v4 = vld [vmem:[%s23626_s2] sm:$0xff]  ;;  %v74_v7 = vld [vmem:[%s23625_s1 + $0x10] sm:$0xff]  ;;  %vm89_vm1 = vcmask 523264   ;;  %vm251_vm2 = vcmask 1040384   ;;  %vm247_vm4 = vcmask 269312  }
  0x15   :  { %16654 = vmatprep.mubr.msk.f32.mxu0 %vm20316_vm0, %v20317_v1  ;;  %16673 = vmatprep.mubr.msk.f32.mxu1 %vm20316_vm0, %v20317_v1  ;;  %v20383_v5 = vpack.c.bf16 %v73_v3, %v72_v2  ;;  %v81_v6 = vld [vmem:[%s23626_s2 + $0x8] sm:$0xff]  ;;  %v75_v8 = vld [vmem:[%s23625_s1 + $0x18] sm:$0xff]  ;;  %v82_v10 = vld [vmem:[%s23626_s2 + $0x10] sm:$0xff]  ;;  %s20318_s20 = smov 64   ;;  %s20319_s3 = smov 96   ;;  %vm325_vm6 = vcmask 261120  }
  0x16   :  { %v20394_v9 = vpack.c.bf16 %v81_v6, %v80_v4  ;;  %v83_v11 = vld [vmem:[%s23626_s2 + $0x18] sm:$0xff]  ;;  %v20403_v12 = vpack.c.bf16 %v75_v8, %v74_v7  ;;  %v76_v14 = vld [vmem:[%s23625_s1 + $0x20] sm:$0xff]  ;;  %v77_v15 = vld [vmem:[%s23625_s1 + $0x28] sm:$0xff] }
  0x17   :  { %18629 = vmatpush3.bf16.msra.mxu0 %v20383_v5  ;;  %v20407_v13 = vpack.c.bf16 %v83_v11, %v82_v10  ;;  %v84_v16 = vld [vmem:[%s23626_s2 + $0x20] sm:$0xff]  ;;  %v85_v17 = vld [vmem:[%s23626_s2 + $0x28] sm:$0xff]  ;;  %v20423_v18 = vpack.c.bf16 %v77_v15, %v76_v14  ;;  %v78_v20 = vld [vmem:[%s23625_s1 + $0x30] sm:$0xff] }
  0x18   :  { %18641 = vmatpush3.bf16.msra.mxu1 %v20394_v9  ;;  %18630 = vmatprep.subr.bf16.mxu0 %v20315_v0  ;;  %v20427_v19 = vpack.c.bf16 %v85_v17, %v84_v16  ;;  %v79_v21 = vld [vmem:[%s23625_s1 + $0x38] sm:$0xff]  ;;  %v86_v22 = vld [vmem:[%s23626_s2 + $0x30] sm:$0xff]  ;;  %v88_v26 = vld [vmem:[%s23624_s0] sm:$0x3] }
  0x19   :  { %18642 = vmatprep.subr.bf16.mxu1 %v20315_v0  ;;  %v87_v23 = vld [vmem:[%s23626_s2 + $0x38] sm:$0xff]  ;;  %v20443_v24 = vpack.c.bf16 %v79_v21, %v78_v20  ;;  %v38_v27 = vld [vmem:[%s23629_s5] sm:$0xff]  ;;  %v39_v28 = vld [vmem:[%s23629_s5 + $0x8] sm:$0xff] }
  0x1a   :  { %v20447_v25 = vpack.c.bf16 %v87_v23, %v86_v22  ;;  %v47_v29 = vld [vmem:[%s23629_s5 + $0x48] sm:$0xff]  ;;  %v20472_v30 = vpack.c.bf16 %v39_v28, %v38_v27  ;;  %v48_v31 = vld [vmem:[%s23629_s5 + $0x50] sm:$0xff]  ;;  %v41_v33 = vld [vmem:[%s23629_s5 + $0x18] sm:$0xff] }
  0x1b   :  { %18632 = vmatpush3.bf16.msra.mxu0 %v20403_v12  ;;  %v40_v32 = vld [vmem:[%s23629_s5 + $0x10] sm:$0xff]  ;;  %v20483_v34 = vpack.c.bf16 %v48_v31, %v47_v29  ;;  %v49_v35 = vld [vmem:[%s23629_s5 + $0x58] sm:$0xff]  ;;  %v50_v36 = vld [vmem:[%s23629_s5 + $0x60] sm:$0xff] }
  0x1c   :  { %18644 = vmatpush3.bf16.msra.mxu1 %v20407_v13  ;;  %18633 = vmatprep.subr.bf16.mxu0 %v20315_v0  ;;  %v20492_v37 = vpack.c.bf16 %v41_v33, %v40_v32  ;;  %v20496_v38 = vpack.c.bf16 %v50_v36, %v49_v35  ;;  %v20505_v39 = vld [vmem:[%s23629_s5 + $0x20] sm:$0x1]  ;;  %v51_v40 = vld [vmem:[%s23629_s5 + $0x68] sm:$0xff]  ;;  %v52_v41 = vld [vmem:[%s23629_s5 + $0x70] sm:$0xff] }
  0x1d   :  { %18645 = vmatprep.subr.bf16.mxu1 %v20315_v0  ;;  %v53_v42 = vld [vmem:[%s23629_s5 + $0x78] sm:$0xff]  ;;  %v20523_v43 = vpack.c.bf16 %v52_v41, %v51_v40  ;;  %v54_v44 = vld [vmem:[%s23629_s5 + $0x80] sm:$0xff]  ;;  %v20551_v62 = vld [vmem:[%s23629_s5 + $0xe8] ss:$0 sm:$0xff] }
  0x1e   :  { %v20529_v45 = vpack.c.bf16 %v54_v44, %v53_v42  ;;  %v20557_v7 = vld [vmem:[%s23629_s5 + $0xf0] ss:$0 sm:$0xff]  ;;  %v43_v20 = vld [vmem:[%s23629_s5 + $0x28] sm:$0xff]  ;;  %v45_v27 = vld [vmem:[%s23629_s5 + $0x38] sm:$0xff] }
  0x1f   :  { %18635 = vmatpush3.bf16.msra.mxu0 %v20423_v18  ;;  %v44_v21 = vld [vmem:[%s23629_s5 + $0x30] sm:$0xff]  ;;  %v55_v22 = vld [vmem:[%s23629_s5 + $0x88] sm:$0xff]  ;;  %v46_v28 = vld [vmem:[%s23629_s5 + $0x40] sm:$0xff] }
  0x20   :  { %18647 = vmatpush3.bf16.msra.mxu1 %v20427_v19  ;;  %18636 = vmatprep.subr.bf16.mxu0 %v20315_v0  ;;  %v20570_v23 = vpack.c.bf16 %v44_v21, %v43_v20  ;;  %v57_v31 = vld [vmem:[%s23629_s5 + $0x98] sm:$0xff]  ;;  %v58_v32 = vld [vmem:[%s23629_s5 + $0xa0] sm:$0xff]  ;;  %v20590_v33 = vpack.c.bf16 %v46_v28, %v45_v27  ;;  %v63_v20 = vld [vmem:[%s23629_s5 + $0xc8] sm:$0xff] }
  0x21   :  { %18648 = vmatprep.subr.bf16.mxu1 %v20315_v0  ;;  %v20594_v35 = vpack.c.bf16 %v58_v32, %v57_v31  ;;  %v64_v21 = vld [vmem:[%s23629_s5 + $0xd0] sm:$0xff]  ;;  %v66_v27 = vld [vmem:[%s23629_s5 + $0xe0] sm:$0xff] }
  0x23   :  { %18638 = vmatpush3.bf16.msra.mxu0 %v20443_v24 }
  0x24   :  { %18650 = vmatpush3.bf16.msra.mxu1 %v20447_v25  ;;  %18651 = vmatprep.subr.bf16.mxu0 %v20315_v0 }
  0x25   :  { %18657 = vmatprep.subr.bf16.mxu1 %v20315_v0 }
  0x26   :  { %16655 = vmatmul.mubr.msk.f32.vlgmr.msra.gmra.mrb[0].mxu0 %vm89_vm1, %v88_v26 }
  0x27   :  { %16674 = vmatmul.mubr.msk.f32.vlgmr.msra.gmra.mrb[0].mxu1 %vm89_vm1, %v88_v26  ;;  %16686 = vmatprep.mubr.msk.f32.mxu0 %vm20316_vm0, %v20317_v1  ;;  %v56_v26 = vld [vmem:[%s23629_s5 + $0x90] sm:$0xff] }
  0x28   :  { %16697 = vmatprep.mubr.msk.f32.mxu1 %vm20316_vm0, %v20317_v1  ;;  %18653 = vmatpush3.bf16.msra.mxu0 %v20472_v30  ;;  %v20581_v29 = vpack.c.bf16 %v56_v26, %v55_v22  ;;  %v65_v22 = vld [vmem:[%s23629_s5 + $0xd8] sm:$0xff]  ;;  %v20658_v26 = vpack.c.bf16 %v64_v21, %v63_v20  ;;  %v915_v21 = vld [vmem:[%s23628_s4 + $0x20] sm:$0xff] }
  0x29   :  { %18654 = vmatprep.subr.bf16.mxu0 %v20315_v0  ;;  %18659 = vmatpush3.bf16.msra.mxu1 %v20483_v34  ;;  %v20664_v28 = vpack.c.bf16 %v66_v27, %v65_v22  ;;  %v917_v22 = vld [vmem:[%s23628_s4 + $0x30] sm:$0xff] }
  0x2a   :  { %18660 = vmatprep.subr.bf16.mxu1 %v20315_v0  ;;  %v18707_v27 = vpack.c.bf16 %v917_v22, %v915_v21 }
  0x2c   :  { %18656 = vmatpush3.bf16.msra.mxu0 %v20492_v37 }
  0x2d   :  { %16684 = vmatprep.subr.mxu0 %v20317_v1  ;;  %18662 = vmatpush3.bf16.msra.mxu1 %v20496_v38 }
  0x2e   :  { %18663 = vmatprep.subr.bf16.mxu1 %v20315_v0 }
  0x30   :  { %16685 = vmatpush3.msk.msra.mxu0 %vm251_vm2, %v20505_v39  ;;  %16698 = vmatmul.mubr.f32.vlgmr.msra.gmra.mrb[2].mxu1 %v20317_v1 }
  0x31   :  { %16708 = vmatprep.mubr.msk.f32.mxu1 %vm20316_vm0, %v20317_v1  ;;  %18669 = vmatprep.subr.bf16.mxu0 %v20315_v0 }
  0x32   :  { %18665 = vmatpush3.bf16.msra.mxu1 %v20523_v43 }
  0x33   :  { %18666 = vmatprep.subr.bf16.mxu1 %v20315_v0 }
  0x36   :  { %18668 = vmatpush3.bf16.msra.mxu1 %v20529_v45 }
  0x37   :  { %18675 = vmatprep.subr.bf16.mxu1 %v20315_v0 }
  0x39   :  { %16709 = vmatmul.mubr.f32.vlgmr.msra.gmra.mrb[4].mxu1 %v20317_v1 }
  0x3a   :  { %16730 = vmatprep.mubr.msk.f32.mxu1 %vm20316_vm0, %v20317_v1  ;;  %18677 = vmatpush3.bf16.msra.mxu1 %v20581_v29 }
  0x3b   :  { %18678 = vmatprep.subr.bf16.mxu1 %v20315_v0 }
  0x3e   :  { %18680 = vmatpush3.bf16.msra.mxu1 %v20594_v35 }
  0x3f   :  { %18687 = vmatprep.subr.bf16.mxu1 %v20315_v0 }
  0x41   :  { %16731 = vmatmul.mubr.f32.vlgmr.msra.gmra.mrb[6].mxu1 %v20317_v1 }
  0x42   :  { %16752 = vmatprep.mubr.msk.f32.mxu1 %vm20316_vm0, %v20317_v1  ;;  %18689 = vmatpush3.bf16.msra.mxu1 %v20658_v26 }
  0x43   :  { %18690 = vmatprep.subr.bf16.mxu1 %v20315_v0 }
  0x46   :  { %18692 = vmatpush3.bf16.msra.mxu1 %v20664_v28 }
  0xf9   :  { %v20537_v46 = vpop.f32.mrb[0].mxu0 }
  0xfa   :  { %v233_v47 = vmul.f32 %v20537_v46, %v20537_v46  ;;  %v20541_v48 = vpop.f32.mrb[0].mxu1  ;;  %v16656_v49 = vpop.f32.mrb[1].mxu0 }
  0xfb   :  { %v234_v50 = vmul.f32 %v20541_v48, %v20541_v48  ;;  %v16675_v51 = vpop.f32.mrb[1].mxu1  ;;  %v59_v49 = vld [vmem:[%s23629_s5 + $0xa8] sm:$0xff] }
  0xfd   :  { %v235_v52 = vadd.f32 %v234_v50, %v233_v47  ;;  %v60_v50 = vld [vmem:[%s23629_s5 + $0xb0] sm:$0xff] }
  0xfe   :  { %v20615_v51 = vpack.c.bf16 %v60_v50, %v59_v49  ;;  %v821_v49 = vld [vmem:[#allocation2 + $0x8] sm:$0xff]  ;;  %v823_v50 = vld [vmem:[#allocation2 + $0x18] sm:$0xff] }
  0xff   :  { %20030 = vrsqrt.f32 %v235_v52  ;;  %vm238_vm3 = vcmp.eq.f32.partialorder %v235_v52, inf  ;;  %v241_v55 = vand.u32 2147483648, %v235_v52  ;;  %vm240_vm5 = vcmp.eq.f32.partialorder %v235_v52, 0.0 }
 0x103   :  { %v395_v58 = vpop.f32.mrb[2].mxu1 }
 0x104   :  { %v16699_v59 = vpop.f32.mrb[3].mxu1 }
 0x109   :  { %v20031_v53 = vpop.eup %20030 }
 0x10a   :  { %v237_v54 = vmul.f32 %v20031_v53, %v235_v52  ;;  %v62_v53 = vld [vmem:[%s23629_s5 + $0xc0] sm:$0xff] }
 0x10c   :  { %v239_v56 = vsel %vm238_vm3, %v235_v52, %v237_v54  ;;  %v474_v60 = vpop.f32.mrb[4].mxu1  ;;  %v61_v52 = vld [vmem:[%s23629_s5 + $0xb8] sm:$0xff] }
 0x10d   :  { %v242_v57 = vsel %vm240_vm5, %v241_v55, %v239_v56  ;;  %v16710_v61 = vpop.f32.mrb[5].mxu1  ;;  %v475_v11 = vadd.f32 %v20557_v7, %v474_v60  ;;  %v20628_v55 = vpack.c.bf16 %v62_v53, %v61_v52  ;;  %v912_v52 = vld [vmem:[%s23628_s4 + $0x8] sm:$0xff]  ;;  %v18693_v53 = vpack.c.bf16 %v823_v50, %v821_v49 }
 0x10e   :  { %16687 = vmatmul.mubr.msk.f32.vlgmr.msra.gmra.mrb[2].mxu0 %vm247_vm4, %v242_v57 }
 0x10f   :  { %16719 = vmatprep.mubr.msk.f32.mxu0 %vm20316_vm0, %v20317_v1  ;;  %18671 = vmatpush3.bf16.msra.mxu0 %v20570_v23 }
 0x110   :  { %18672 = vmatprep.subr.bf16.mxu0 %v20315_v0 }
 0x113   :  { %18674 = vmatpush3.bf16.msra.mxu0 %v20590_v33 }
 0x114   :  { %18681 = vmatprep.subr.bf16.mxu0 %v20315_v0  ;;  %v638_v56 = vpop.f32.mrb[6].mxu1 }
 0x115   :  { %v16732_v57 = vpop.f32.mrb[7].mxu1 }
 0x116   :  { %v820_v57 = vld [vmem:[#allocation2] sm:$0xff] }
 0x1e1   :  { %v321_v63 = vpop.f32.mrb[2].mxu0 }
 0x1e2   :  { %v322_v2 = vadd.f32 %v20551_v62, %v321_v63  ;;  %v16688_v3 = vpop.f32.mrb[3].mxu0 }
 0x1e4   :  { %v399_v4 = vadd.f32 %v395_v58, %v322_v2  ;;  %v20639_v58 = vld [vmem:[%s23629_s5 + $0xf8] ss:$0 sm:$0xff] }
 0x1e6   :  { %v400_v6 = vmul.f32 0.5, %v399_v4 }
 0x1e8   :  { %20032 = vtanh.f32 %v400_v6  ;;  %v20645_v6 = vld [vmem:[%s23629_s5 + $0x100] ss:$0 sm:$0xff] }
 0x1f2   :  { %v20033_v8 = vpop.eup %20032 }
 0x1f3   :  { %v402_v10 = vadd.f32 1.0, %v20033_v8 }
 0x1f5   :  { %v403_v14 = vmul.f32 0.5, %v402_v10 }
 0x1f7   :  { %v478_v15 = vmul.f32 %v475_v11, %v403_v14  ;;  %v485_v40 = vsub.f32 1.0, %v403_v14  ;;  %v491_v44 = vmul.f32 0.0, %v403_v14 }
 0x1f9   :  { %480 = vrot.lane.b32.xlu0 %v478_v15, %s20318_s20 }
 0x26b   :  { %v481_v16 = vpop.permute.xlu0 %480 }
 0x26c   :  { %v483_v17 = vadd.f32 %v481_v16, %v322_v2 }
 0x26e   :  { %20034 = vtanh.f32 %v483_v17 }
 0x278   :  { %v20035_v36 = vpop.eup %20034 }
 0x279   :  { %487 = vrot.lane.b32.xlu0 %v20035_v36, %s20319_s3 }
 0x2eb   :  { %v488_v41 = vpop.permute.xlu0 %487 }
 0x2ec   :  { %v490_v42 = vmul.f32 %v488_v41, %v485_v40 }
 0x2ee   :  { %v20605_v47 = vadd.f32 %v491_v44, %v490_v42 }
 0x2f0   :  { %498 = vrot.lane.b32.xlu1 %v20605_v47, %s20319_s3 }
 0x362   :  { %v20623_v54 = vpop.permute.xlu1 %498 }
 0x363   :  { %16720 = vmatmul.mubr.msk.f32.vlgmr.msra.gmra.mrb[4].mxu0 %vm325_vm6, %v20623_v54 }
 0x364   :  { %18683 = vmatpush3.bf16.msra.mxu0 %v20615_v51  ;;  %16741 = vmatprep.mubr.msk.f32.mxu0 %vm20316_vm0, %v20317_v1 }
 0x365   :  { %18684 = vmatprep.subr.bf16.mxu0 %v20315_v0 }
 0x368   :  { %18686 = vmatpush3.bf16.msra.mxu0 %v20628_v55 }
 0x369   :  { %18694 = vmatprep.subr.bf16.mxu0 %v18693_v53 }
 0x36b   :  { %16742 = vmatmul.mubr.f32.vlgmr.msra.gmra.mrb[6].mxu0 %v20317_v1 }
 0x36c   :  { %903 = vmatprep.mubr.f32.mxu0 %v20317_v1 }
 0x436   :  { %v568_v59 = vpop.f32.mrb[4].mxu0 }
 0x437   :  { %v569_v60 = vadd.f32 %v20639_v58, %v568_v59  ;;  %v16721_v61 = vpop.f32.mrb[5].mxu0  ;;  %v822_v59 = vld [vmem:[#allocation2 + $0x10] sm:$0xff] }
 0x438   :  { %v18695_v61 = vpack.c.bf16 %v822_v59, %v820_v57 }
 0x439   :  { %v642_v63 = vadd.f32 %v638_v56, %v569_v60  ;;  %v914_v56 = vld [vmem:[%s23628_s4 + $0x18] sm:$0xff] }
 0x43a   :  { %18696 = vmatpush1.bf16.msra.mxu0 %v18695_v61 }
 0x43b   :  { %v643_v2 = vmul.f32 0.5, %v642_v63  ;;  %v911_v63 = vld [vmem:[%s23628_s4] sm:$0xff] }
 0x43d   :  { %20036 = vtanh.f32 %v643_v2  ;;  %v913_v2 = vld [vmem:[%s23628_s4 + $0x10] sm:$0xff] }
 0x43e   :  { %v717_v3 = vpop.f32.mrb[6].mxu0 }
 0x43f   :  { %v16743_v4 = vpop.f32.mrb[7].mxu0  ;;  %v718_v11 = vadd.f32 %v20645_v6, %v717_v3  ;;  %v18703_v3 = vpack.c.bf16 %v913_v2, %v911_v63 }
 0x440   :  { %v825_v4 = vld [vmem:[#allocation2 + $0x28] sm:$0xff] }
 0x447   :  { %v20037_v8 = vpop.eup %20036 }
 0x448   :  { %v645_v10 = vadd.f32 1.0, %v20037_v8  ;;  %v827_v8 = vld [vmem:[#allocation2 + $0x38] sm:$0xff] }
 0x44a   :  { %v646_v14 = vmul.f32 0.5, %v645_v10  ;;  %v916_v10 = vld [vmem:[%s23628_s4 + $0x28] sm:$0xff] }
 0x44c   :  { %v721_v15 = vmul.f32 %v718_v11, %v646_v14  ;;  %v728_v32 = vsub.f32 1.0, %v646_v14  ;;  %v734_v40 = vmul.f32 0.0, %v646_v14  ;;  %v18697_v11 = vpack.c.bf16 %v827_v8, %v825_v4  ;;  %v918_v14 = vld [vmem:[%s23628_s4 + $0x38] sm:$0xff] }
 0x44e   :  { %723 = vrot.lane.b32.xlu1 %v721_v15, %s20318_s20  ;;  %v824_v15 = vld [vmem:[#allocation2 + $0x20] sm:$0xff]  ;;  %18698 = vmatprep.subr.bf16.mxu0 %v18697_v11 }
 0x4c0   :  { %v724_v16 = vpop.permute.xlu1 %723 }
 0x4c1   :  { %v726_v17 = vadd.f32 %v724_v16, %v569_v60  ;;  %v18701_v60 = vpack.c.bf16 %v914_v56, %v912_v52  ;;  %v826_v16 = vld [vmem:[#allocation2 + $0x30] sm:$0xff] }
 0x4c2   :  { %v18699_v20 = vpack.c.bf16 %v826_v16, %v824_v15 }
 0x4c3   :  { %20038 = vtanh.f32 %v726_v17  ;;  %18702 = vmatprep.subr.bf16.mxu1 %v18701_v60  ;;  %v18705_v17 = vpack.c.bf16 %v918_v14, %v916_v10 }
 0x4c4   :  { %18700 = vmatpush1.bf16.msra.mxu0 %v18699_v20 }
 0x4cd   :  { %v20039_v31 = vpop.eup %20038 }
 0x4ce   :  { %730 = vrot.lane.b32.xlu0 %v20039_v31, %s20319_s3  ;;  %v829_v31 = vld [vmem:[#allocation2 + $0x48] sm:$0x1] }
 0x4cf   :  { %15281 = vmatprep.subr.msk.mxu0 %vm251_vm2, %v829_v31 }
 0x540   :  { %v731_v36 = vpop.permute.xlu0 %730 }
 0x541   :  { %v733_v41 = vmul.f32 %v731_v36, %v728_v32  ;;  %v920_v32 = vld [vmem:[%s23628_s4 + $0x48] sm:$0x1]  ;;  %v828_v36 = vld [vmem:[#allocation2 + $0x40] sm:$0x1] }
 0x542   :  { %15282 = vmatpush1.msk.msra.mxu0 %vm251_vm2, %v828_v36 }
 0x543   :  { %v20669_v42 = vadd.f32 %v734_v40, %v733_v41  ;;  %v919_v40 = vld [vmem:[%s23628_s4 + $0x40] sm:$0x1]  ;;  %18709 = vmatprep.subr.bf16.mxu0 %v20315_v0  ;;  %v20717_v41 = vld [vmem:[%s23629_s5 + $0x108] ss:$0 sm:$0xff] }
 0x545   :  { %741 = vrot.lane.b32.xlu1 %v20669_v42, %s20319_s3 }
 0x5b7   :  { %v20673_v44 = vpop.permute.xlu1 %741 }
 0x5b8   :  { %16753 = vmatmul.mubr.msk.f32.vlgmr.msra.gmra.mrb[8].mxu1 %vm325_vm6, %v20673_v44 }
 0x5b9   :  { %994 = vmatprep.mubr.f32.mxu1 %v20317_v1  ;;  %18704 = vmatpush1.bf16.msra.mxu1 %v18703_v3 }
 0x5ba   :  { %18706 = vmatprep.subr.bf16.mxu1 %v18705_v17 }
 0x5bd   :  { %18708 = vmatpush1.bf16.msra.mxu1 %v18707_v27 }
 0x5be   :  { %15284 = vmatprep.subr.msk.mxu1 %vm251_vm2, %v920_v32 }
 0x5c1   :  { %15285 = vmatpush1.msk.msra.mxu1 %vm251_vm2, %v919_v40 }
 0x5c2   :  { %18721 = vmatprep.subr.bf16.mxu1 %v20315_v0 }
 0x68b   :  { %v811_v49 = vpop.f32.mrb[8].mxu1 }
 0x68c   :  { %v812_v50 = vadd.f32 %v20717_v41, %v811_v49  ;;  %v16754_v52 = vpop.f32.mrb[9].mxu1 }
 0x68e   :  { %v815_v53 = vmul.f32 0.5, %v812_v50 }
 0x690   :  { %20040 = vtanh.f32 %v815_v53 }
 0x69a   :  { %v20041_v56 = vpop.eup %20040 }
 0x69b   :  { %v817_v57 = vadd.f32 1.0, %v20041_v56 }
 0x69d   :  { %v818_v59 = vmul.f32 0.5, %v817_v57 }
 0x69f   :  { %v819_v60 = vmul.f32 %v818_v59, %v20537_v46  ;;  %v910_v61 = vmul.f32 %v818_v59, %v20541_v48  ;;  %v15287_v46 = vld [vmem:[%s23624_s0 + $0x2] sm:$0x3] }
 0x6a1   :  { %15283 = vmatmul.mubr.msk.f32.vlgmr.msra.gmra.mrb[8].mxu0 %vm247_vm4, %v819_v60  ;;  %15286 = vmatmul.mubr.msk.f32.vlgmr.msra.gmra.mrb[10].mxu1 %vm247_vm4, %v910_v61 }
 0x6a2   :  { %18711 = vmatpush3.bf16.msra.mxu0 %v20383_v5  ;;  %18723 = vmatpush3.bf16.msra.mxu1 %v20394_v9 }
 0x6a3   :  { %18712 = vmatprep.subr.bf16.mxu0 %v20315_v0  ;;  %18724 = vmatprep.subr.bf16.mxu1 %v20315_v0 }
 0x6a4   :  { %16771 = vmatprep.mubr.msk.f32.mxu0 %vm20316_vm0, %v20317_v1  ;;  %16790 = vmatprep.mubr.msk.f32.mxu1 %vm20316_vm0, %v20317_v1 }
 0x6a6   :  { %18714 = vmatpush3.bf16.msra.mxu0 %v20403_v12  ;;  %18726 = vmatpush3.bf16.msra.mxu1 %v20407_v13 }
 0x6a7   :  { %18715 = vmatprep.subr.bf16.mxu0 %v20315_v0  ;;  %18727 = vmatprep.subr.bf16.mxu1 %v20315_v0 }
 0x6aa   :  { %18717 = vmatpush3.bf16.msra.mxu0 %v20423_v18  ;;  %18729 = vmatpush3.bf16.msra.mxu1 %v20427_v19 }
 0x6ab   :  { %18718 = vmatprep.subr.bf16.mxu0 %v20315_v0  ;;  %18730 = vmatprep.subr.bf16.mxu1 %v20315_v0 }
 0x6ae   :  { %18720 = vmatpush3.bf16.msra.mxu0 %v20443_v24  ;;  %18732 = vmatpush3.bf16.msra.mxu1 %v20447_v25 }
 0x6af   :  { %18739 = vmatprep.subr.bf16.mxu1 %v20315_v0  ;;  %18733 = vmatprep.subr.bf16.mxu0 %v20315_v0 }
 0x6b1   :  { %16772 = vmatmul.mubr.msk.f32.vlgmr.msra.gmra.mrb[10].mxu0 %vm89_vm1, %v15287_v46  ;;  %16791 = vmatmul.mubr.msk.f32.vlgmr.msra.gmra.mrb[12].mxu1 %vm89_vm1, %v15287_v46 }
 0x6b2   :  { %18741 = vmatpush3.bf16.msra.mxu1 %v20483_v34  ;;  %16814 = vmatprep.mubr.msk.f32.mxu1 %vm20316_vm0, %v20317_v1 }
 0x6b3   :  { %18742 = vmatprep.subr.bf16.mxu1 %v20315_v0  ;;  %18735 = vmatpush3.bf16.msra.mxu0 %v20472_v30 }
 0x6b4   :  { %18736 = vmatprep.subr.bf16.mxu0 %v20315_v0  ;;  %16803 = vmatprep.mubr.msk.f32.mxu0 %vm20316_vm0, %v20317_v1 }
 0x6b6   :  { %18744 = vmatpush3.bf16.msra.mxu1 %v20496_v38 }
 0x6b7   :  { %18738 = vmatpush3.bf16.msra.mxu0 %v20492_v37  ;;  %18751 = vmatprep.subr.bf16.mxu1 %v20315_v0 }
 0x6b8   :  { %16801 = vmatprep.subr.mxu0 %v20317_v1 }
 0x6b9   :  { %16815 = vmatmul.mubr.msk.f32.vlgmr.msra.gmra.mrb[14].mxu1 %vm325_vm6, %v20623_v54 }
 0x6ba   :  { %18753 = vmatpush3.bf16.msra.mxu1 %v20570_v23  ;;  %16836 = vmatprep.mubr.msk.f32.mxu1 %vm20316_vm0, %v20317_v1 }
 0x6bb   :  { %16802 = vmatpush3.msk.msra.mxu0 %vm251_vm2, %v20505_v39  ;;  %18754 = vmatprep.subr.bf16.mxu1 %v20315_v0 }
 0x6bc   :  { %18745 = vmatprep.subr.bf16.mxu0 %v20315_v0 }
 0x6be   :  { %18756 = vmatpush3.bf16.msra.mxu1 %v20590_v33 }
 0x6bf   :  { %18763 = vmatprep.subr.bf16.mxu1 %v20315_v0 }
 0x774   :  { %v20772_v48 = vpop.f32.mrb[8].mxu0  ;;  %v20774_v63 = vpop.f32.mrb[10].mxu1 }
 0x775   :  { %v1001_v2 = vsub.f32 %v20772_v48, %v20774_v63  ;;  %v20778_v3 = vpop.f32.mrb[9].mxu0  ;;  %v20780_v4 = vpop.f32.mrb[11].mxu1 }
 0x776   :  { %v1002_v8 = vsub.f32 %v20778_v3, %v20780_v4 }
 0x784   :  { %v20784_v10 = vpop.f32.mrb[10].mxu0  ;;  %v20786_v11 = vpop.f32.mrb[12].mxu1 }
 0x785   :  { %v1148_v14 = vmul.f32 %v20784_v10, %v20784_v10  ;;  %v1149_v15 = vmul.f32 %v20786_v11, %v20786_v11  ;;  %v16773_v16 = vpop.f32.mrb[11].mxu0  ;;  %v16792_v17 = vpop.f32.mrb[13].mxu1 }
 0x787   :  { %v1150_v20 = vadd.f32 %v1149_v15, %v1148_v14 }
 0x789   :  { %20042 = vrsqrt.f32 %v1150_v20  ;;  %vm1153_vm7 = vcmp.eq.f32.partialorder %v1150_v20, inf  ;;  %v1156_v32 = vand.u32 2147483648, %v1150_v20  ;;  %vm1155_vm8 = vcmp.eq.f32.partialorder %v1150_v20, 0.0 }
 0x78c   :  { %v1297_v21 = vpop.f32.mrb[14].mxu1 }
 0x78d   :  { %v16816_v22 = vpop.f32.mrb[15].mxu1 }
 0x793   :  { %v20043_v27 = vpop.eup %20042 }
 0x794   :  { %v1152_v31 = vmul.f32 %v20043_v27, %v1150_v20 }
 0x796   :  { %v1154_v36 = vsel %vm1153_vm7, %v1150_v20, %v1152_v31 }
 0x797   :  { %v1157_v40 = vsel %vm1155_vm8, %v1156_v32, %v1154_v36 }
 0x798   :  { %16804 = vmatmul.mubr.msk.f32.vlgmr.msra.gmra.mrb[12].mxu0 %vm247_vm4, %v1157_v40 }
 0x799   :  { %18747 = vmatpush3.bf16.msra.mxu0 %v20523_v43  ;;  %16825 = vmatprep.mubr.msk.f32.mxu0 %vm20316_vm0, %v20317_v1 }
 0x79a   :  { %18748 = vmatprep.subr.bf16.mxu0 %v20315_v0 }
 0x79d   :  { %18750 = vmatpush3.bf16.msra.mxu0 %v20529_v45 }
 0x79e   :  { %18757 = vmatprep.subr.bf16.mxu0 %v20315_v0 }
 0x7a0   :  { %16826 = vmatmul.mubr.msk.f32.vlgmr.msra.gmra.mrb[14].mxu0 %vm325_vm6, %v20623_v54 }
 0x7a1   :  { %18759 = vmatpush3.bf16.msra.mxu0 %v20581_v29  ;;  %16847 = vmatprep.mubr.msk.f32.mxu0 %vm20316_vm0, %v20317_v1 }
 0x7a2   :  { %18760 = vmatprep.subr.bf16.mxu0 %v20315_v0 }
 0x7a5   :  { %18762 = vmatpush3.bf16.msra.mxu0 %v20594_v35 }
 0x7a6   :  { %18769 = vmatprep.subr.bf16.mxu0 %v20315_v0 }
 0x7a8   :  { %16848 = vmatmul.mubr.msk.f32.vlgmr.msra.gmra.mrb[16].mxu0 %vm325_vm6, %v20673_v44 }
 0x7a9   :  { %18771 = vmatpush3.bf16.msra.mxu0 %v20658_v26  ;;  %16869 = vmatprep.mubr.msk.f32.mxu0 %vm20316_vm0, %v20317_v1 }
 0x7aa   :  { %18772 = vmatprep.subr.bf16.mxu0 %v20315_v0 }
 0x7ad   :  { %18774 = vmatpush3.bf16.msra.mxu0 %v20664_v28 }
 0x86b   :  { %v1227_v54 = vpop.f32.mrb[12].mxu0 }
 0x86c   :  { %v1228_v49 = vadd.f32 %v20551_v62, %v1227_v54  ;;  %v16805_v50 = vpop.f32.mrb[13].mxu0 }
 0x86e   :  { %v1301_v52 = vadd.f32 %v1297_v21, %v1228_v49 }
 0x870   :  { %v1302_v53 = vmul.f32 0.5, %v1301_v52 }
 0x872   :  { %20044 = vtanh.f32 %v1302_v53 }
 0x873   :  { %v1372_v56 = vpop.f32.mrb[14].mxu0 }
 0x874   :  { %v16827_v57 = vpop.f32.mrb[15].mxu0  ;;  %v1373_v15 = vadd.f32 %v20557_v7, %v1372_v56 }
 0x87b   :  { %v1532_v59 = vpop.f32.mrb[16].mxu0 }
 0x87c   :  { %v20045_v60 = vpop.eup %20044  ;;  %v16849_v61 = vpop.f32.mrb[17].mxu0 }
 0x87d   :  { %v1304_v46 = vadd.f32 1.0, %v20045_v60 }
 0x87f   :  { %v1305_v14 = vmul.f32 0.5, %v1304_v46 }
 0x881   :  { %v1376_v16 = vmul.f32 %v1373_v15, %v1305_v14  ;;  %v1383_v21 = vsub.f32 1.0, %v1305_v14  ;;  %v1389_v31 = vmul.f32 %v1305_v14, %v20605_v47 }
 0x883   :  { %1378 = vrot.lane.b32.xlu0 %v1376_v16, %s20318_s20 }
 0x8f5   :  { %v1379_v17 = vpop.permute.xlu0 %1378 }
 0x8f6   :  { %v1381_v20 = vadd.f32 %v1379_v17, %v1228_v49 }
 0x8f8   :  { %20046 = vtanh.f32 %v1381_v20 }
 0x902   :  { %v20047_v22 = vpop.eup %20046 }
 0x903   :  { %1385 = vrot.lane.b32.xlu1 %v20047_v22, %s20319_s3 }
 0x975   :  { %v1386_v27 = vpop.permute.xlu1 %1385 }
 0x976   :  { %v1388_v32 = vmul.f32 %v1386_v27, %v1383_v21 }
 0x978   :  { %v20819_v36 = vadd.f32 %v1389_v31, %v1388_v32  ;;  %v1708_v31 = vld [vmem:[#allocation2 + $0x58] sm:$0xff]  ;;  %v1710_v32 = vld [vmem:[#allocation2 + $0x68] sm:$0xff] }
 0x97a   :  { %1392 = vrot.lane.b32.xlu0 %v20819_v36, %s20319_s3 }
 0x9ec   :  { %v20823_v40 = vpop.permute.xlu0 %1392 }
 0x9ed   :  { %16837 = vmatmul.mubr.msk.f32.vlgmr.msra.gmra.mrb[16].mxu1 %vm325_vm6, %v20823_v40 }
 0x9ee   :  { %18765 = vmatpush3.bf16.msra.mxu1 %v20615_v51  ;;  %16858 = vmatprep.mubr.msk.f32.mxu1 %vm20316_vm0, %v20317_v1 }
 0x9ef   :  { %18766 = vmatprep.subr.bf16.mxu1 %v20315_v0 }
 0x9f2   :  { %18768 = vmatpush3.bf16.msra.mxu1 %v20628_v55 }
 0x9f5   :  { %16859 = vmatmul.mubr.msk.f32.vlgmr.msra.gmra.mrb[18].mxu1 %vm325_vm6, %v20673_v44 }
 0x9f6   :  { %1790 = vmatprep.mubr.f32.mxu1 %v20317_v1 }
 0xac0   :  { %v1462_v47 = vpop.f32.mrb[16].mxu1 }
 0xac1   :  { %v1463_v54 = vadd.f32 %v20639_v58, %v1462_v47  ;;  %v16838_v49 = vpop.f32.mrb[17].mxu1  ;;  %v15302_v47 = vld [vmem:[%s23628_s4 + $0x58] sm:$0xff] }
 0xac2   :  { %v1707_v49 = vld [vmem:[#allocation2 + $0x50] sm:$0xff] }
 0xac3   :  { %v1536_v50 = vadd.f32 %v1532_v59, %v1463_v54 }
 0xac5   :  { %v1537_v52 = vmul.f32 0.5, %v1536_v50  ;;  %v1709_v50 = vld [vmem:[#allocation2 + $0x60] sm:$0xff] }
 0xac7   :  { %20048 = vtanh.f32 %v1537_v52 }
 0xac8   :  { %v1607_v53 = vpop.f32.mrb[18].mxu1 }
 0xac9   :  { %v16860_v56 = vpop.f32.mrb[19].mxu1  ;;  %v1608_v46 = vadd.f32 %v20645_v6, %v1607_v53  ;;  %v18777_v53 = vpack.c.bf16 %v1709_v50, %v1707_v49  ;;  %v15309_v49 = vld [vmem:[%s23628_s4 + $0x90] sm:$0x1] }
 0xaca   :  { %v15301_v56 = vld [vmem:[%s23628_s4 + $0x50] sm:$0xff] }
 0xad1   :  { %v20049_v57 = vpop.eup %20048 }
 0xad2   :  { %v1539_v60 = vadd.f32 1.0, %v20049_v57  ;;  %v15303_v57 = vld [vmem:[%s23628_s4 + $0x60] sm:$0xff] }
 0xad4   :  { %v1540_v61 = vmul.f32 0.5, %v1539_v60  ;;  %v18785_v60 = vpack.c.bf16 %v15303_v57, %v15301_v56 }
 0xad6   :  { %v1611_v14 = vmul.f32 %v1608_v46, %v1540_v61  ;;  %v1618_v17 = vsub.f32 1.0, %v1540_v61  ;;  %v1624_v20 = vmul.f32 %v1540_v61, %v20669_v42  ;;  %v18775_v42 = vpack.c.bf16 %v1710_v32, %v1708_v31  ;;  %v1712_v61 = vld [vmem:[#allocation2 + $0x78] sm:$0xff]  ;;  %v1714_v46 = vld [vmem:[#allocation2 + $0x88] sm:$0xff]  ;;  %v15307_v31 = vld [vmem:[%s23628_s4 + $0x80] sm:$0xff] }
 0xad8   :  { %1613 = vrot.lane.b32.xlu1 %v1611_v14, %s20318_s20  ;;  %18776 = vmatprep.subr.bf16.mxu1 %v18775_v42  ;;  %v15306_v14 = vld [vmem:[%s23628_s4 + $0x78] sm:$0xff] }
 0xad9   :  { %18778 = vmatpush1.bf16.msra.mxu1 %v18777_v53  ;;  %v15310_v42 = vld [vmem:[%s23628_s4 + $0x98] sm:$0x1] }
 0xb4a   :  { %v1614_v44 = vpop.permute.xlu1 %1613 }
 0xb4b   :  { %v1616_v15 = vadd.f32 %v1614_v44, %v1463_v54  ;;  %v15304_v54 = vld [vmem:[%s23628_s4 + $0x68] sm:$0xff]  ;;  %v18779_v44 = vpack.c.bf16 %v1714_v46, %v1712_v61 }
 0xb4c   :  { %v18783_v52 = vpack.c.bf16 %v15304_v54, %v15302_v47  ;;  %v1716_v47 = vld [vmem:[#allocation2 + $0x98] sm:$0x1]  ;;  %v1715_v54 = vld [vmem:[#allocation2 + $0x90] sm:$0x1] }
 0xb4d   :  { %20050 = vtanh.f32 %v1616_v15  ;;  %v15308_v15 = vld [vmem:[%s23628_s4 + $0x88] sm:$0xff]  ;;  %18780 = vmatprep.subr.bf16.mxu1 %v18779_v44 }
 0xb4e   :  { %18784 = vmatprep.subr.bf16.mxu0 %v18783_v52 }
 0xb57   :  { %v20051_v16 = vpop.eup %20050 }
 0xb58   :  { %1620 = vrot.lane.b32.xlu0 %v20051_v16, %s20319_s3  ;;  %v1711_v16 = vld [vmem:[#allocation2 + $0x70] sm:$0xff] }
 0xbca   :  { %v1621_v59 = vpop.permute.xlu0 %1620 }
 0xbcb   :  { %v1623_v22 = vmul.f32 %v1621_v59, %v1618_v17  ;;  %v1713_v17 = vld [vmem:[#allocation2 + $0x80] sm:$0xff]  ;;  %v18787_v59 = vpack.c.bf16 %v15308_v15, %v15306_v14 }
 0xbcd   :  { %v20840_v21 = vadd.f32 %v1624_v20, %v1623_v22  ;;  %v18781_v20 = vpack.c.bf16 %v1713_v17, %v1711_v16  ;;  %v15305_v22 = vld [vmem:[%s23628_s4 + $0x70] sm:$0xff] }
 0xbce   :  { %v18789_v32 = vpack.c.bf16 %v15307_v31, %v15305_v22 }
 0xbcf   :  { %1627 = vrot.lane.b32.xlu1 %v20840_v21, %s20319_s3  ;;  %18782 = vmatpush1.bf16.msra.mxu1 %v18781_v20 }
 0xbd0   :  { %15298 = vmatprep.subr.msk.mxu1 %vm251_vm2, %v1716_v47 }
 0xbd3   :  { %15299 = vmatpush1.msk.msra.mxu1 %vm251_vm2, %v1715_v54 }
 0xbd4   :  { %18791 = vmatprep.subr.bf16.mxu1 %v20315_v0 }
 0xc41   :  { %v20844_v27 = vpop.permute.xlu1 %1627 }
 0xc42   :  { %16870 = vmatmul.mubr.msk.f32.vlgmr.msra.gmra.mrb[18].mxu0 %vm325_vm6, %v20844_v27 }
 0xc43   :  { %1884 = vmatprep.mubr.f32.mxu0 %v20317_v1  ;;  %18786 = vmatpush1.bf16.msra.mxu0 %v18785_v60 }
 0xc44   :  { %18788 = vmatprep.subr.bf16.mxu0 %v18787_v59 }
 0xc47   :  { %18790 = vmatpush1.bf16.msra.mxu0 %v18789_v32 }
 0xc48   :  { %15311 = vmatprep.subr.msk.mxu0 %vm251_vm2, %v15310_v42 }
 0xc4b   :  { %15312 = vmatpush1.msk.msra.mxu0 %vm251_vm2, %v15309_v49 }
 0xc4c   :  { %18803 = vmatprep.subr.bf16.mxu0 %v20315_v0 }
 0xd15   :  { %v1697_v50 = vpop.f32.mrb[18].mxu0 }
 0xd16   :  { %v1698_v52 = vadd.f32 %v20717_v41, %v1697_v50  ;;  %v16871_v53 = vpop.f32.mrb[19].mxu0 }
 0xd18   :  { %v1701_v56 = vmul.f32 0.5, %v1698_v52 }
 0xd1a   :  { %20052 = vtanh.f32 %v1701_v56 }
 0xd24   :  { %v20053_v57 = vpop.eup %20052 }
 0xd25   :  { %v1703_v60 = vadd.f32 1.0, %v20053_v57 }
 0xd27   :  { %v1704_v61 = vmul.f32 0.5, %v1703_v60 }
 0xd29   :  { %v1705_v46 = vmul.f32 %v1704_v61, %v20784_v10  ;;  %v1799_v14 = vmul.f32 %v1704_v61, %v20786_v11  ;;  %v15314_v10 = vld [vmem:[%s23624_s0 + $0x4] sm:$0x3] }
 0xd2b   :  { %15300 = vmatmul.mubr.msk.f32.vlgmr.msra.gmra.mrb[20].mxu1 %vm247_vm4, %v1705_v46  ;;  %15313 = vmatmul.mubr.msk.f32.vlgmr.msra.gmra.mrb[20].mxu0 %vm247_vm4, %v1799_v14 }
 0xd2c   :  { %18793 = vmatpush3.bf16.msra.mxu1 %v20383_v5  ;;  %18805 = vmatpush3.bf16.msra.mxu0 %v20394_v9 }
 0xd2d   :  { %18794 = vmatprep.subr.bf16.mxu1 %v20315_v0  ;;  %18806 = vmatprep.subr.bf16.mxu0 %v20315_v0 }
 0xd2e   :  { %16888 = vmatprep.mubr.msk.f32.mxu1 %vm20316_vm0, %v20317_v1  ;;  %16907 = vmatprep.mubr.msk.f32.mxu0 %vm20316_vm0, %v20317_v1 }
 0xd30   :  { %18796 = vmatpush3.bf16.msra.mxu1 %v20403_v12  ;;  %18808 = vmatpush3.bf16.msra.mxu0 %v20407_v13 }
 0xd31   :  { %18797 = vmatprep.subr.bf16.mxu1 %v20315_v0  ;;  %18809 = vmatprep.subr.bf16.mxu0 %v20315_v0 }
 0xd34   :  { %18799 = vmatpush3.bf16.msra.mxu1 %v20423_v18  ;;  %18811 = vmatpush3.bf16.msra.mxu0 %v20427_v19 }
 0xd35   :  { %18800 = vmatprep.subr.bf16.mxu1 %v20315_v0  ;;  %18812 = vmatprep.subr.bf16.mxu0 %v20315_v0 }
 0xd38   :  { %18802 = vmatpush3.bf16.msra.mxu1 %v20443_v24  ;;  %18814 = vmatpush3.bf16.msra.mxu0 %v20447_v25 }
 0xd39   :  { %18821 = vmatprep.subr.bf16.mxu0 %v20315_v0  ;;  %18815 = vmatprep.subr.bf16.mxu1 %v20315_v0 }
 0xd3b   :  { %16889 = vmatmul.mubr.msk.f32.vlgmr.msra.gmra.mrb[22].mxu1 %vm89_vm1, %v15314_v10  ;;  %16908 = vmatmul.mubr.msk.f32.vlgmr.msra.gmra.mrb[22].mxu0 %vm89_vm1, %v15314_v10 }
 0xd3c   :  { %18823 = vmatpush3.bf16.msra.mxu0 %v20483_v34  ;;  %16931 = vmatprep.mubr.msk.f32.mxu0 %vm20316_vm0, %v20317_v1 }
 0xd3d   :  { %18824 = vmatprep.subr.bf16.mxu0 %v20315_v0  ;;  %18817 = vmatpush3.bf16.msra.mxu1 %v20472_v30 }
 0xd3e   :  { %18818 = vmatprep.subr.bf16.mxu1 %v20315_v0  ;;  %16920 = vmatprep.mubr.msk.f32.mxu1 %vm20316_vm0, %v20317_v1 }
 0xd40   :  { %18826 = vmatpush3.bf16.msra.mxu0 %v20496_v38 }
 0xd41   :  { %18820 = vmatpush3.bf16.msra.mxu1 %v20492_v37  ;;  %18833 = vmatprep.subr.bf16.mxu0 %v20315_v0 }
 0xd42   :  { %16918 = vmatprep.subr.mxu1 %v20317_v1 }
 0xd43   :  { %16932 = vmatmul.mubr.msk.f32.vlgmr.msra.gmra.mrb[24].mxu0 %vm325_vm6, %v20823_v40 }
 0xd44   :  { %18835 = vmatpush3.bf16.msra.mxu0 %v20570_v23  ;;  %16953 = vmatprep.mubr.msk.f32.mxu0 %vm20316_vm0, %v20317_v1 }
 0xd45   :  { %16919 = vmatpush3.msk.msra.mxu1 %vm251_vm2, %v20505_v39  ;;  %18836 = vmatprep.subr.bf16.mxu0 %v20315_v0 }
 0xd46   :  { %18827 = vmatprep.subr.bf16.mxu1 %v20315_v0 }
 0xd48   :  { %18838 = vmatpush3.bf16.msra.mxu0 %v20590_v33 }
 0xd49   :  { %18845 = vmatprep.subr.bf16.mxu0 %v20315_v0 }
 0xdfe   :  { %v1792_v11 = vpop.f32.mrb[20].mxu1  ;;  %v20938_v44 = vpop.f32.mrb[20].mxu0 }
 0xdff   :  { %v20943_v15 = vadd.f32 %v1792_v11, %v1001_v2  ;;  %v1794_v16 = vpop.f32.mrb[21].mxu1  ;;  %v20945_v17 = vpop.f32.mrb[21].mxu0 }
 0xe00   :  { %v20950_v39 = vadd.f32 %v1794_v16, %v1002_v8 }
 0xe01   :  { %v1891_v59 = vsub.f32 %v20943_v15, %v20938_v44 }
 0xe02   :  { %v1892_v20 = vsub.f32 %v20950_v39, %v20945_v17 }
 0xe0e   :  { %v20956_v22 = vpop.f32.mrb[22].mxu1  ;;  %v20958_v31 = vpop.f32.mrb[22].mxu0 }
 0xe0f   :  { %v2038_v48 = vmul.f32 %v20956_v22, %v20956_v22  ;;  %v2039_v63 = vmul.f32 %v20958_v31, %v20958_v31  ;;  %v16890_v2 = vpop.f32.mrb[23].mxu1  ;;  %v16909_v3 = vpop.f32.mrb[23].mxu0 }
 0xe11   :  { %v2040_v4 = vadd.f32 %v2039_v63, %v2038_v48 }
 0xe13   :  { %20054 = vrsqrt.f32 %v2040_v4  ;;  %vm2043_vm9 = vcmp.eq.f32.partialorder %v2040_v4, inf  ;;  %v2046_v54 = vand.u32 2147483648, %v2040_v4  ;;  %vm2045_vm10 = vcmp.eq.f32.partialorder %v2040_v4, 0.0 }
 0xe16   :  { %v2187_v8 = vpop.f32.mrb[24].mxu0 }
 0xe17   :  { %v16933_v32 = vpop.f32.mrb[25].mxu0 }
 0xe1d   :  { %v20055_v47 = vpop.eup %20054 }
 0xe1e   :  { %v2042_v42 = vmul.f32 %v20055_v47, %v2040_v4 }
 0xe20   :  { %v2044_v49 = vsel %vm2043_vm9, %v2040_v4, %v2042_v42 }
 0xe21   :  { %v2047_v50 = vsel %vm2045_vm10, %v2046_v54, %v2044_v49 }
 0xe22   :  { %16921 = vmatmul.mubr.msk.f32.vlgmr.msra.gmra.mrb[24].mxu1 %vm247_vm4, %v2047_v50 }
 0xe23   :  { %18829 = vmatpush3.bf16.msra.mxu1 %v20523_v43  ;;  %16942 = vmatprep.mubr.msk.f32.mxu1 %vm20316_vm0, %v20317_v1 }
 0xe24   :  { %18830 = vmatprep.subr.bf16.mxu1 %v20315_v0 }
 0xe27   :  { %18832 = vmatpush3.bf16.msra.mxu1 %v20529_v45 }
 0xe28   :  { %18839 = vmatprep.subr.bf16.mxu1 %v20315_v0 }
 0xe2a   :  { %16943 = vmatmul.mubr.msk.f32.vlgmr.msra.gmra.mrb[26].mxu1 %vm325_vm6, %v20823_v40 }
 0xe2b   :  { %18841 = vmatpush3.bf16.msra.mxu1 %v20581_v29  ;;  %16964 = vmatprep.mubr.msk.f32.mxu1 %vm20316_vm0, %v20317_v1 }
 0xe2c   :  { %18842 = vmatprep.subr.bf16.mxu1 %v20315_v0 }
 0xe2f   :  { %18844 = vmatpush3.bf16.msra.mxu1 %v20594_v35 }
 0xe30   :  { %18851 = vmatprep.subr.bf16.mxu1 %v20315_v0 }
 0xe32   :  { %16965 = vmatmul.mubr.msk.f32.vlgmr.msra.gmra.mrb[28].mxu1 %vm325_vm6, %v20844_v27 }
 0xe33   :  { %18853 = vmatpush3.bf16.msra.mxu1 %v20658_v26  ;;  %16986 = vmatprep.mubr.msk.f32.mxu1 %vm20316_vm0, %v20317_v1 }
 0xe34   :  { %18854 = vmatprep.subr.bf16.mxu1 %v20315_v0 }
 0xe37   :  { %18856 = vmatpush3.bf16.msra.mxu1 %v20664_v28 }
 0xef5   :  { %v2117_v40 = vpop.f32.mrb[24].mxu1 }
 0xef6   :  { %v2118_v52 = vadd.f32 %v20551_v62, %v2117_v40  ;;  %v16922_v53 = vpop.f32.mrb[25].mxu1 }
 0xef8   :  { %v2191_v56 = vadd.f32 %v2187_v8, %v2118_v52 }
 0xefa   :  { %v2192_v57 = vmul.f32 0.5, %v2191_v56 }
 0xefc   :  { %20056 = vtanh.f32 %v2192_v57 }
 0xefd   :  { %v2262_v60 = vpop.f32.mrb[26].mxu1 }
 0xefe   :  { %v16944_v61 = vpop.f32.mrb[27].mxu1  ;;  %v2263_v48 = vadd.f32 %v20557_v7, %v2262_v60 }
 0xf05   :  { %v2422_v46 = vpop.f32.mrb[28].mxu1 }
 0xf06   :  { %v20057_v14 = vpop.eup %20056  ;;  %v16966_v10 = vpop.f32.mrb[29].mxu1 }
 0xf07   :  { %v2194_v11 = vadd.f32 1.0, %v20057_v14 }
 0xf09   :  { %v2195_v16 = vmul.f32 0.5, %v2194_v11 }
 0xf0b   :  { %v2266_v63 = vmul.f32 %v2263_v48, %v2195_v16  ;;  %v2273_v4 = vsub.f32 1.0, %v2195_v16  ;;  %v2279_v32 = vmul.f32 %v2195_v16, %v20819_v36 }
 0xf0d   :  { %2268 = vrot.lane.b32.xlu0 %v2266_v63, %s20318_s20 }
 0xf7f   :  { %v2269_v2 = vpop.permute.xlu0 %2268 }
 0xf80   :  { %v2271_v3 = vadd.f32 %v2269_v2, %v2118_v52  ;;  %v2598_v2 = vld [vmem:[#allocation2 + $0xa8] sm:$0xff] }
 0xf82   :  { %20058 = vtanh.f32 %v2271_v3  ;;  %v2600_v3 = vld [vmem:[#allocation2 + $0xb8] sm:$0xff] }
 0xf8c   :  { %v20059_v62 = vpop.eup %20058 }
 0xf8d   :  { %2275 = vrot.lane.b32.xlu1 %v20059_v62, %s20319_s3  ;;  %v15329_v62 = vld [vmem:[%s23628_s4 + $0xa8] sm:$0xff] }
 0xfff   :  { %v2276_v8 = vpop.permute.xlu1 %2275 }
0x1000   :  { %v2278_v47 = vmul.f32 %v2276_v8, %v2273_v4  ;;  %v15331_v4 = vld [vmem:[%s23628_s4 + $0xb8] sm:$0xff]  ;;  %v2597_v8 = vld [vmem:[#allocation2 + $0xa0] sm:$0xff] }
0x1002   :  { %v20991_v42 = vadd.f32 %v2279_v32, %v2278_v47  ;;  %v2599_v32 = vld [vmem:[#allocation2 + $0xb0] sm:$0xff]  ;;  %v18865_v47 = vpack.c.bf16 %v15331_v4, %v15329_v62 }
0x1004   :  { %2282 = vrot.lane.b32.xlu0 %v20991_v42, %s20319_s3  ;;  %18866 = vmatprep.subr.bf16.mxu1 %v18865_v47 }
0x1076   :  { %v20995_v7 = vpop.permute.xlu0 %2282 }
0x1077   :  { %16954 = vmatmul.mubr.msk.f32.vlgmr.msra.gmra.mrb[26].mxu0 %vm325_vm6, %v20995_v7 }
0x1078   :  { %18847 = vmatpush3.bf16.msra.mxu0 %v20615_v51  ;;  %16975 = vmatprep.mubr.msk.f32.mxu0 %vm20316_vm0, %v20317_v1 }
0x1079   :  { %18848 = vmatprep.subr.bf16.mxu0 %v20315_v0 }
0x107c   :  { %18850 = vmatpush3.bf16.msra.mxu0 %v20628_v55 }
0x107f   :  { %16976 = vmatmul.mubr.msk.f32.vlgmr.msra.gmra.mrb[28].mxu0 %vm325_vm6, %v20844_v27 }
0x1080   :  { %2680 = vmatprep.mubr.f32.mxu0 %v20317_v1 }
0x114a   :  { %v2352_v36 = vpop.f32.mrb[26].mxu0 }
0x114b   :  { %v2353_v54 = vadd.f32 %v20639_v58, %v2352_v36  ;;  %v16955_v49 = vpop.f32.mrb[27].mxu0  ;;  %v18859_v36 = vpack.c.bf16 %v2599_v32, %v2597_v8 }
0x114c   :  { %v15330_v49 = vld [vmem:[%s23628_s4 + $0xb0] sm:$0xff] }
0x114d   :  { %v2426_v50 = vadd.f32 %v2422_v46, %v2353_v54 }
0x114f   :  { %v2427_v40 = vmul.f32 0.5, %v2426_v50 }
0x1151   :  { %20060 = vtanh.f32 %v2427_v40  ;;  %v2602_v40 = vld [vmem:[#allocation2 + $0xc8] sm:$0xff] }
0x1152   :  { %v2497_v52 = vpop.f32.mrb[28].mxu0 }
0x1153   :  { %v16977_v53 = vpop.f32.mrb[29].mxu0  ;;  %v2498_v61 = vadd.f32 %v20645_v6, %v2497_v52  ;;  %v2604_v52 = vld [vmem:[#allocation2 + $0xd8] sm:$0xff] }
0x1154   :  { %v15333_v53 = vld [vmem:[%s23628_s4 + $0xc8] sm:$0xff] }
0x115b   :  { %v20061_v56 = vpop.eup %20060 }
0x115c   :  { %v2429_v57 = vadd.f32 1.0, %v20061_v56  ;;  %v18861_v56 = vpack.c.bf16 %v2604_v52, %v2602_v40 }
0x115e   :  { %v2430_v60 = vmul.f32 0.5, %v2429_v57  ;;  %v15335_v57 = vld [vmem:[%s23628_s4 + $0xd8] sm:$0xff] }
0x1160   :  { %v2501_v14 = vmul.f32 %v2498_v61, %v2430_v60  ;;  %v2508_v58 = vsub.f32 1.0, %v2430_v60  ;;  %v2514_v16 = vmul.f32 %v2430_v60, %v20840_v21  ;;  %v18857_v21 = vpack.c.bf16 %v2600_v3, %v2598_v2  ;;  %v2601_v60 = vld [vmem:[#allocation2 + $0xc0] sm:$0xff]  ;;  %v2603_v61 = vld [vmem:[#allocation2 + $0xd0] sm:$0xff] }
0x1161   :  { %v15336_v2 = vld [vmem:[%s23628_s4 + $0xe0] sm:$0x1] }
0x1162   :  { %2503 = vrot.lane.b32.xlu1 %v2501_v14, %s20318_s20  ;;  %18858 = vmatprep.subr.bf16.mxu0 %v18857_v21  ;;  %v18869_v14 = vpack.c.bf16 %v15335_v57, %v15333_v53 }
0x1163   :  { %18860 = vmatpush1.bf16.msra.mxu0 %v18859_v36 }
0x1164   :  { %18862 = vmatprep.subr.bf16.mxu0 %v18861_v56 }
0x11d4   :  { %v2504_v27 = vpop.permute.xlu1 %2503 }
0x11d5   :  { %v2506_v10 = vadd.f32 %v2504_v27, %v2353_v54  ;;  %v15328_v54 = vld [vmem:[%s23628_s4 + $0xa0] sm:$0xff]  ;;  %v18863_v27 = vpack.c.bf16 %v2603_v61, %v2601_v60 }
0x11d6   :  { %v18867_v50 = vpack.c.bf16 %v15330_v49, %v15328_v54 }
0x11d7   :  { %20062 = vtanh.f32 %v2506_v10  ;;  %v15332_v10 = vld [vmem:[%s23628_s4 + $0xc0] sm:$0xff]  ;;  %18864 = vmatpush1.bf16.msra.mxu0 %v18863_v27 }
0x11e1   :  { %v20063_v11 = vpop.eup %20062 }
0x11e2   :  { %2510 = vrot.lane.b32.xlu0 %v20063_v11, %s20319_s3  ;;  %v15334_v11 = vld [vmem:[%s23628_s4 + $0xd0] sm:$0xff] }
0x1254   :  { %v2511_v46 = vpop.permute.xlu0 %2510 }
0x1255   :  { %v2513_v48 = vmul.f32 %v2511_v46, %v2508_v58  ;;  %v18871_v58 = vpack.c.bf16 %v15334_v11, %v15332_v10  ;;  %v2606_v46 = vld [vmem:[#allocation2 + $0xe8] sm:$0x1] }
0x1256   :  { %15325 = vmatprep.subr.msk.mxu0 %vm251_vm2, %v2606_v46 }
0x1257   :  { %v21012_v63 = vadd.f32 %v2514_v16, %v2513_v48  ;;  %v15337_v16 = vld [vmem:[%s23628_s4 + $0xe8] sm:$0x1]  ;;  %v2605_v48 = vld [vmem:[#allocation2 + $0xe0] sm:$0x1] }
0x1258   :  { %15326 = vmatpush1.msk.msra.mxu0 %vm251_vm2, %v2605_v48 }
0x1259   :  { %2517 = vrot.lane.b32.xlu1 %v21012_v63, %s20319_s3  ;;  %18873 = vmatprep.subr.bf16.mxu0 %v20315_v0 }
0x12cb   :  { %v21016_v6 = vpop.permute.xlu1 %2517 }
0x12cc   :  { %16987 = vmatmul.mubr.msk.f32.vlgmr.msra.gmra.mrb[30].mxu1 %vm325_vm6, %v21016_v6 }
0x12cd   :  { %2774 = vmatprep.mubr.f32.mxu1 %v20317_v1  ;;  %18868 = vmatpush1.bf16.msra.mxu1 %v18867_v50 }
0x12ce   :  { %18870 = vmatprep.subr.bf16.mxu1 %v18869_v14 }
0x12d1   :  { %18872 = vmatpush1.bf16.msra.mxu1 %v18871_v58 }
0x12d2   :  { %15338 = vmatprep.subr.msk.mxu1 %vm251_vm2, %v15337_v16  ;;  %v21166_v16 = vld [vmem:[%s23629_s5 + $0xe8] ss:$0 sm:$0xff] }
0x12d5   :  { %15339 = vmatpush1.msk.msra.mxu1 %vm251_vm2, %v15336_v2 }
0x12d6   :  { %18885 = vmatprep.subr.bf16.mxu1 %v20315_v0 }
0x139f   :  { %v2587_v3 = vpop.f32.mrb[30].mxu1 }
0x13a0   :  { %v2588_v62 = vadd.f32 %v20717_v41, %v2587_v3  ;;  %v16988_v21 = vpop.f32.mrb[31].mxu1  ;;  %v15341_v41 = vld [vmem:[%s23624_s0 + $0x6] sm:$0x3] }
0x13a2   :  { %v2591_v4 = vmul.f32 0.5, %v2588_v62 }
0x13a4   :  { %20064 = vtanh.f32 %v2591_v4 }
0x13ae   :  { %v20065_v8 = vpop.eup %20064 }
0x13af   :  { %v2593_v32 = vadd.f32 1.0, %v20065_v8 }
0x13b1   :  { %v2594_v47 = vmul.f32 0.5, %v2593_v32 }
0x13b3   :  { %v2595_v36 = vmul.f32 %v2594_v47, %v20956_v22  ;;  %v2689_v54 = vmul.f32 %v2594_v47, %v20958_v31  ;;  %v21107_v22 = vld [vmem:[%s23629_s5 + $0x20] sm:$0x1] }
0x13b5   :  { %15327 = vmatmul.mubr.msk.f32.vlgmr.msra.gmra.mrb[30].mxu0 %vm247_vm4, %v2595_v36  ;;  %15340 = vmatmul.mubr.msk.f32.vlgmr.msra.gmra.mrb[32].mxu1 %vm247_vm4, %v2689_v54 }
0x13b6   :  { %18875 = vmatpush3.bf16.msra.mxu0 %v20383_v5  ;;  %18887 = vmatpush3.bf16.msra.mxu1 %v20394_v9 }
0x13b7   :  { %18876 = vmatprep.subr.bf16.mxu0 %v20315_v0  ;;  %18888 = vmatprep.subr.bf16.mxu1 %v20315_v0 }
0x13b8   :  { %17005 = vmatprep.mubr.msk.f32.mxu0 %vm20316_vm0, %v20317_v1  ;;  %17024 = vmatprep.mubr.msk.f32.mxu1 %vm20316_vm0, %v20317_v1 }
0x13ba   :  { %18878 = vmatpush3.bf16.msra.mxu0 %v20403_v12  ;;  %18890 = vmatpush3.bf16.msra.mxu1 %v20407_v13 }
0x13bb   :  { %18879 = vmatprep.subr.bf16.mxu0 %v20315_v0  ;;  %18891 = vmatprep.subr.bf16.mxu1 %v20315_v0 }
0x13be   :  { %18881 = vmatpush3.bf16.msra.mxu0 %v20423_v18  ;;  %18893 = vmatpush3.bf16.msra.mxu1 %v20427_v19 }
0x13bf   :  { %18882 = vmatprep.subr.bf16.mxu0 %v20315_v0  ;;  %18894 = vmatprep.subr.bf16.mxu1 %v20315_v0 }
0x13c2   :  { %18884 = vmatpush3.bf16.msra.mxu0 %v20443_v24  ;;  %18896 = vmatpush3.bf16.msra.mxu1 %v20447_v25 }
0x13c3   :  { %18903 = vmatprep.subr.bf16.mxu1 %v20315_v0  ;;  %18897 = vmatprep.subr.bf16.mxu0 %v20315_v0 }
0x13c5   :  { %17006 = vmatmul.mubr.msk.f32.vlgmr.msra.gmra.mrb[32].mxu0 %vm89_vm1, %v15341_v41  ;;  %17025 = vmatmul.mubr.msk.f32.vlgmr.msra.gmra.mrb[34].mxu1 %vm89_vm1, %v15341_v41  ;;  %v21172_v41 = vld [vmem:[%s23629_s5 + $0xf0] ss:$0 sm:$0xff] }
0x13c6   :  { %18905 = vmatpush3.bf16.msra.mxu1 %v20483_v34  ;;  %17048 = vmatprep.mubr.msk.f32.mxu1 %vm20316_vm0, %v20317_v1 }
0x13c7   :  { %18906 = vmatprep.subr.bf16.mxu1 %v20315_v0  ;;  %18899 = vmatpush3.bf16.msra.mxu0 %v20472_v30 }
0x13c8   :  { %18900 = vmatprep.subr.bf16.mxu0 %v20315_v0  ;;  %17037 = vmatprep.mubr.msk.f32.mxu0 %vm20316_vm0, %v20317_v1 }
0x13ca   :  { %18908 = vmatpush3.bf16.msra.mxu1 %v20496_v38 }
0x13cb   :  { %18902 = vmatpush3.bf16.msra.mxu0 %v20492_v37  ;;  %18915 = vmatprep.subr.bf16.mxu1 %v20315_v0 }
0x13cc   :  { %17035 = vmatprep.subr.mxu0 %v20317_v1 }
0x13cd   :  { %17049 = vmatmul.mubr.msk.f32.vlgmr.msra.gmra.mrb[36].mxu1 %vm325_vm6, %v20995_v7 }
0x13ce   :  { %18917 = vmatpush3.bf16.msra.mxu1 %v20570_v23  ;;  %17070 = vmatprep.mubr.msk.f32.mxu1 %vm20316_vm0, %v20317_v1 }
0x13cf   :  { %17036 = vmatpush3.msk.msra.mxu0 %vm251_vm2, %v21107_v22  ;;  %18918 = vmatprep.subr.bf16.mxu1 %v20315_v0 }
0x13d0   :  { %18909 = vmatprep.subr.bf16.mxu0 %v20315_v0 }
0x13d2   :  { %18920 = vmatpush3.bf16.msra.mxu1 %v20590_v33 }
0x13d3   :  { %18927 = vmatprep.subr.bf16.mxu1 %v20315_v0 }
0x1488   :  { %v2682_v31 = vpop.f32.mrb[30].mxu0  ;;  %v21115_v49 = vpop.f32.mrb[32].mxu1 }
0x1489   :  { %v21120_v50 = vadd.f32 %v2682_v31, %v1891_v59  ;;  %v2684_v40 = vpop.f32.mrb[31].mxu0  ;;  %v21122_v52 = vpop.f32.mrb[33].mxu1 }
0x148a   :  { %v21127_v53 = vadd.f32 %v2684_v40, %v1892_v20 }
0x148b   :  { %v2781_v56 = vsub.f32 %v21120_v50, %v21115_v49 }
0x148c   :  { %v2782_v57 = vsub.f32 %v21127_v53, %v21122_v52 }
0x1498   :  { %v21133_v60 = vpop.f32.mrb[32].mxu0  ;;  %v21135_v61 = vpop.f32.mrb[34].mxu1 }
0x1499   :  { %v2928_v44 = vmul.f32 %v21133_v60, %v21133_v60  ;;  %v2929_v15 = vmul.f32 %v21135_v61, %v21135_v61  ;;  %v17007_v59 = vpop.f32.mrb[33].mxu0  ;;  %v17026_v17 = vpop.f32.mrb[35].mxu1 }
0x149b   :  { %v2930_v39 = vadd.f32 %v2929_v15, %v2928_v44 }
0x149d   :  { %20066 = vrsqrt.f32 %v2930_v39  ;;  %vm2933_vm11 = vcmp.eq.f32.partialorder %v2930_v39, inf  ;;  %v2936_v11 = vand.u32 2147483648, %v2930_v39  ;;  %vm2935_vm12 = vcmp.eq.f32.partialorder %v2930_v39, 0.0 }
0x14a0   :  { %v3077_v20 = vpop.f32.mrb[36].mxu1 }
0x14a1   :  { %v17050_v14 = vpop.f32.mrb[37].mxu1 }
0x14a7   :  { %v20067_v27 = vpop.eup %20066 }
0x14a8   :  { %v2932_v10 = vmul.f32 %v20067_v27, %v2930_v39 }
0x14aa   :  { %v2934_v58 = vsel %vm2933_vm11, %v2930_v39, %v2932_v10 }
0x14ab   :  { %v2937_v46 = vsel %vm2935_vm12, %v2936_v11, %v2934_v58  ;;  %v21197_v11 = vld [vmem:[%s23629_s5 + $0xf8] ss:$0 sm:$0xff] }
0x14ac   :  { %17038 = vmatmul.mubr.msk.f32.vlgmr.msra.gmra.mrb[34].mxu0 %vm247_vm4, %v2937_v46 }
0x14ad   :  { %18911 = vmatpush3.bf16.msra.mxu0 %v20523_v43  ;;  %17059 = vmatprep.mubr.msk.f32.mxu0 %vm20316_vm0, %v20317_v1 }
0x14ae   :  { %18912 = vmatprep.subr.bf16.mxu0 %v20315_v0 }
0x14b1   :  { %18914 = vmatpush3.bf16.msra.mxu0 %v20529_v45 }
0x14b2   :  { %18921 = vmatprep.subr.bf16.mxu0 %v20315_v0 }
0x14b4   :  { %17060 = vmatmul.mubr.msk.f32.vlgmr.msra.gmra.mrb[36].mxu0 %vm325_vm6, %v20995_v7 }
0x14b5   :  { %18923 = vmatpush3.bf16.msra.mxu0 %v20581_v29  ;;  %17081 = vmatprep.mubr.msk.f32.mxu0 %vm20316_vm0, %v20317_v1 }
0x14b6   :  { %18924 = vmatprep.subr.bf16.mxu0 %v20315_v0 }
0x14b9   :  { %18926 = vmatpush3.bf16.msra.mxu0 %v20594_v35 }
0x14ba   :  { %18933 = vmatprep.subr.bf16.mxu0 %v20315_v0 }
0x14bc   :  { %17082 = vmatmul.mubr.msk.f32.vlgmr.msra.gmra.mrb[38].mxu0 %vm325_vm6, %v21016_v6 }
0x14bd   :  { %18935 = vmatpush3.bf16.msra.mxu0 %v20658_v26  ;;  %17103 = vmatprep.mubr.msk.f32.mxu0 %vm20316_vm0, %v20317_v1 }
0x14be   :  { %18936 = vmatprep.subr.bf16.mxu0 %v20315_v0 }
0x14c1   :  { %18938 = vmatpush3.bf16.msra.mxu0 %v20664_v28 }
0x157f   :  { %v3007_v7 = vpop.f32.mrb[34].mxu0 }
0x1580   :  { %v3008_v48 = vadd.f32 %v21166_v16, %v3007_v7  ;;  %v17039_v2 = vpop.f32.mrb[35].mxu0 }
0x1582   :  { %v3081_v3 = vadd.f32 %v3077_v20, %v3008_v48 }
0x1584   :  { %v3082_v62 = vmul.f32 0.5, %v3081_v3 }
0x1586   :  { %20068 = vtanh.f32 %v3082_v62 }
0x1587   :  { %v3152_v21 = vpop.f32.mrb[36].mxu0 }
0x1588   :  { %v17061_v4 = vpop.f32.mrb[37].mxu0  ;;  %v3153_v31 = vadd.f32 %v21172_v41, %v3152_v21 }
0x158f   :  { %v3312_v8 = vpop.f32.mrb[38].mxu0 }
0x1590   :  { %v20069_v32 = vpop.eup %20068  ;;  %v17083_v47 = vpop.f32.mrb[39].mxu0 }
0x1591   :  { %v3084_v36 = vadd.f32 1.0, %v20069_v32 }
0x1593   :  { %v3085_v54 = vmul.f32 0.5, %v3084_v36 }
0x1595   :  { %v3156_v40 = vmul.f32 %v3153_v31, %v3085_v54  ;;  %v3163_v17 = vsub.f32 1.0, %v3085_v54  ;;  %v3169_v20 = vmul.f32 %v3085_v54, %v20991_v42 }
0x1597   :  { %3158 = vrot.lane.b32.xlu0 %v3156_v40, %s20318_s20 }
0x1609   :  { %v3159_v44 = vpop.permute.xlu0 %3158 }
0x160a   :  { %v3161_v15 = vadd.f32 %v3159_v44, %v3008_v48 }
0x160c   :  { %20070 = vtanh.f32 %v3161_v15 }
0x1616   :  { %v20071_v59 = vpop.eup %20070 }
0x1617   :  { %3165 = vrot.lane.b32.xlu1 %v20071_v59, %s20319_s3 }
0x1689   :  { %v3166_v39 = vpop.permute.xlu1 %3165 }
0x168a   :  { %v3168_v14 = vmul.f32 %v3166_v39, %v3163_v17  ;;  %v3488_v39 = vld [vmem:[#allocation2 + $0xf8] sm:$0xff] }
0x168c   :  { %v21178_v27 = vadd.f32 %v3169_v20, %v3168_v14  ;;  %v3490_v20 = vld [vmem:[#allocation2 + $0x108] sm:$0xff]  ;;  %v15356_v14 = vld [vmem:[%s23628_s4 + $0xf8] sm:$0xff] }
0x168e   :  { %3172 = vrot.lane.b32.xlu0 %v21178_v27, %s20319_s3 }
0x1700   :  { %v21182_v10 = vpop.permute.xlu0 %3172 }
0x1701   :  { %17071 = vmatmul.mubr.msk.f32.vlgmr.msra.gmra.mrb[38].mxu1 %vm325_vm6, %v21182_v10 }
0x1702   :  { %18929 = vmatpush3.bf16.msra.mxu1 %v20615_v51  ;;  %17092 = vmatprep.mubr.msk.f32.mxu1 %vm20316_vm0, %v20317_v1 }
0x1703   :  { %18930 = vmatprep.subr.bf16.mxu1 %v20315_v0 }
0x1706   :  { %18932 = vmatpush3.bf16.msra.mxu1 %v20628_v55 }
0x1709   :  { %17093 = vmatmul.mubr.msk.f32.vlgmr.msra.gmra.mrb[40].mxu1 %vm325_vm6, %v21016_v6  ;;  %v21203_v6 = vld [vmem:[%s23629_s5 + $0x100] ss:$0 sm:$0xff] }
0x170a   :  { %3570 = vmatprep.mubr.f32.mxu1 %v20317_v1 }
0x17d4   :  { %v3242_v42 = vpop.f32.mrb[38].mxu1 }
0x17d5   :  { %v3243_v58 = vadd.f32 %v21197_v11, %v3242_v42  ;;  %v17072_v46 = vpop.f32.mrb[39].mxu1  ;;  %v15358_v42 = vld [vmem:[%s23628_s4 + $0x108] sm:$0xff] }
0x17d6   :  { %v3489_v46 = vld [vmem:[#allocation2 + $0x100] sm:$0xff] }
0x17d7   :  { %v3316_v7 = vadd.f32 %v3312_v8, %v3243_v58 }
0x17d9   :  { %v3317_v48 = vmul.f32 0.5, %v3316_v7  ;;  %v18947_v7 = vpack.c.bf16 %v15358_v42, %v15356_v14  ;;  %v15364_v14 = vld [vmem:[%s23628_s4 + $0x138] sm:$0x1]  ;;  %v15363_v42 = vld [vmem:[%s23628_s4 + $0x130] sm:$0x1] }
0x17db   :  { %20072 = vtanh.f32 %v3317_v48  ;;  %18948 = vmatprep.subr.bf16.mxu0 %v18947_v7 }
0x17dc   :  { %v3387_v2 = vpop.f32.mrb[40].mxu1 }
0x17dd   :  { %v17094_v3 = vpop.f32.mrb[41].mxu1  ;;  %v3388_v32 = vadd.f32 %v21203_v6, %v3387_v2  ;;  %v15355_v2 = vld [vmem:[%s23628_s4 + $0xf0] sm:$0xff] }
0x17de   :  { %v15357_v3 = vld [vmem:[%s23628_s4 + $0x100] sm:$0xff] }
0x17e5   :  { %v20073_v62 = vpop.eup %20072 }
0x17e6   :  { %v3319_v21 = vadd.f32 1.0, %v20073_v62  ;;  %v18949_v62 = vpack.c.bf16 %v15357_v3, %v15355_v2 }
0x17e8   :  { %v3320_v4 = vmul.f32 0.5, %v3319_v21  ;;  %v3492_v21 = vld [vmem:[#allocation2 + $0x118] sm:$0xff] }
0x17ea   :  { %v3391_v47 = vmul.f32 %v3388_v32, %v3320_v4  ;;  %v3398_v31 = vsub.f32 1.0, %v3320_v4  ;;  %v3404_v44 = vmul.f32 %v3320_v4, %v21012_v63  ;;  %v18939_v63 = vpack.c.bf16 %v3490_v20, %v3488_v39  ;;  %v3494_v4 = vld [vmem:[#allocation2 + $0x128] sm:$0xff]  ;;  %v15360_v32 = vld [vmem:[%s23628_s4 + $0x118] sm:$0xff] }
0x17eb   :  { %v3496_v20 = vld [vmem:[#allocation2 + $0x138] sm:$0x1] }
0x17ec   :  { %3393 = vrot.lane.b32.xlu1 %v3391_v47, %s20318_s20  ;;  %18940 = vmatprep.subr.bf16.mxu1 %v18939_v63  ;;  %v18943_v47 = vpack.c.bf16 %v3494_v4, %v3492_v21  ;;  %v3495_v63 = vld [vmem:[#allocation2 + $0x130] sm:$0x1] }
0x185e   :  { %v3394_v36 = vpop.permute.xlu1 %3393 }
0x185f   :  { %v3396_v54 = vadd.f32 %v3394_v36, %v3243_v58  ;;  %v3487_v58 = vld [vmem:[#allocation2 + $0xf0] sm:$0xff]  ;;  %v15362_v36 = vld [vmem:[%s23628_s4 + $0x128] sm:$0xff] }
0x1860   :  { %v18941_v48 = vpack.c.bf16 %v3489_v46, %v3487_v58  ;;  %v21257_v46 = vld [vmem:[%s23629_s5 + $0x108] ss:$0 sm:$0xff] }
0x1861   :  { %20074 = vtanh.f32 %v3396_v54  ;;  %v3491_v54 = vld [vmem:[#allocation2 + $0x110] sm:$0xff] }
0x1862   :  { %18942 = vmatpush1.bf16.msra.mxu1 %v18941_v48 }
0x1863   :  { %18944 = vmatprep.subr.bf16.mxu1 %v18943_v47 }
0x186b   :  { %v20075_v8 = vpop.eup %20074 }
0x186c   :  { %3400 = vrot.lane.b32.xlu0 %v20075_v8, %s20319_s3  ;;  %v3493_v8 = vld [vmem:[#allocation2 + $0x120] sm:$0xff] }
0x18de   :  { %v3401_v40 = vpop.permute.xlu0 %3400 }
0x18df   :  { %v3403_v15 = vmul.f32 %v3401_v40, %v3398_v31  ;;  %v18951_v31 = vpack.c.bf16 %v15362_v36, %v15360_v32  ;;  %v18945_v40 = vpack.c.bf16 %v3493_v8, %v3491_v54 }
0x18e1   :  { %v21209_v59 = vadd.f32 %v3404_v44, %v3403_v15  ;;  %v15359_v44 = vld [vmem:[%s23628_s4 + $0x110] sm:$0xff]  ;;  %v15361_v15 = vld [vmem:[%s23628_s4 + $0x120] sm:$0xff]  ;;  %18946 = vmatpush1.bf16.msra.mxu1 %v18945_v40 }
0x18e2   :  { %v18953_v39 = vpack.c.bf16 %v15361_v15, %v15359_v44  ;;  %15352 = vmatprep.subr.msk.mxu1 %vm251_vm2, %v3496_v20 }
0x18e3   :  { %3407 = vrot.lane.b32.xlu1 %v21209_v59, %s20319_s3 }
0x18e5   :  { %15353 = vmatpush1.msk.msra.mxu1 %vm251_vm2, %v3495_v63 }
0x18e6   :  { %18955 = vmatprep.subr.bf16.mxu1 %v20315_v0 }
0x1955   :  { %v21213_v17 = vpop.permute.xlu1 %3407 }
0x1956   :  { %17104 = vmatmul.mubr.msk.f32.vlgmr.msra.gmra.mrb[40].mxu0 %vm325_vm6, %v21213_v17 }
0x1957   :  { %3664 = vmatprep.mubr.f32.mxu0 %v20317_v1  ;;  %18950 = vmatpush1.bf16.msra.mxu0 %v18949_v62 }
0x1958   :  { %18952 = vmatprep.subr.bf16.mxu0 %v18951_v31 }
0x195b   :  { %18954 = vmatpush1.bf16.msra.mxu0 %v18953_v39 }
0x195c   :  { %15365 = vmatprep.subr.msk.mxu0 %vm251_vm2, %v15364_v14 }
0x195f   :  { %15366 = vmatpush1.msk.msra.mxu0 %vm251_vm2, %v15363_v42 }
0x1960   :  { %18967 = vmatprep.subr.bf16.mxu0 %v20315_v0 }
0x1a29   :  { %v3477_v58 = vpop.f32.mrb[40].mxu0 }
0x1a2a   :  { %v3478_v7 = vadd.f32 %v21257_v46, %v3477_v58  ;;  %v17105_v48 = vpop.f32.mrb[41].mxu0 }
0x1a2c   :  { %v3481_v2 = vmul.f32 0.5, %v3478_v7 }
0x1a2e   :  { %20076 = vtanh.f32 %v3481_v2 }
0x1a38   :  { %v20077_v3 = vpop.eup %20076 }
0x1a39   :  { %v3483_v62 = vadd.f32 1.0, %v20077_v3 }
0x1a3b   :  { %v3484_v21 = vmul.f32 0.5, %v3483_v62 }
0x1a3d   :  { %v3485_v4 = vmul.f32 %v3484_v21, %v21133_v60  ;;  %v3579_v32 = vmul.f32 %v3484_v21, %v21135_v61  ;;  %v15368_v60 = vld [vmem:[%s23624_s0 + $0x8] sm:$0x3] }
0x1a3f   :  { %15354 = vmatmul.mubr.msk.f32.vlgmr.msra.gmra.mrb[42].mxu1 %vm247_vm4, %v3485_v4  ;;  %15367 = vmatmul.mubr.msk.f32.vlgmr.msra.gmra.mrb[42].mxu0 %vm247_vm4, %v3579_v32 }
0x1a40   :  { %18957 = vmatpush3.bf16.msra.mxu1 %v20383_v5  ;;  %18969 = vmatpush3.bf16.msra.mxu0 %v20394_v9 }
0x1a41   :  { %18958 = vmatprep.subr.bf16.mxu1 %v20315_v0  ;;  %18970 = vmatprep.subr.bf16.mxu0 %v20315_v0 }
0x1a42   :  { %17122 = vmatprep.mubr.msk.f32.mxu1 %vm20316_vm0, %v20317_v1  ;;  %17141 = vmatprep.mubr.msk.f32.mxu0 %vm20316_vm0, %v20317_v1 }
0x1a44   :  { %18960 = vmatpush3.bf16.msra.mxu1 %v20403_v12  ;;  %18972 = vmatpush3.bf16.msra.mxu0 %v20407_v13 }
0x1a45   :  { %18961 = vmatprep.subr.bf16.mxu1 %v20315_v0  ;;  %18973 = vmatprep.subr.bf16.mxu0 %v20315_v0 }
0x1a48   :  { %18963 = vmatpush3.bf16.msra.mxu1 %v20423_v18  ;;  %18975 = vmatpush3.bf16.msra.mxu0 %v20427_v19 }
0x1a49   :  { %18964 = vmatprep.subr.bf16.mxu1 %v20315_v0  ;;  %18976 = vmatprep.subr.bf16.mxu0 %v20315_v0 }
0x1a4c   :  { %18966 = vmatpush3.bf16.msra.mxu1 %v20443_v24  ;;  %18978 = vmatpush3.bf16.msra.mxu0 %v20447_v25 }
0x1a4d   :  { %18985 = vmatprep.subr.bf16.mxu0 %v20315_v0  ;;  %18979 = vmatprep.subr.bf16.mxu1 %v20315_v0 }
0x1a4f   :  { %17123 = vmatmul.mubr.msk.f32.vlgmr.msra.gmra.mrb[44].mxu1 %vm89_vm1, %v15368_v60  ;;  %17142 = vmatmul.mubr.msk.f32.vlgmr.msra.gmra.mrb[44].mxu0 %vm89_vm1, %v15368_v60 }
0x1a50   :  { %18987 = vmatpush3.bf16.msra.mxu0 %v20483_v34  ;;  %17165 = vmatprep.mubr.msk.f32.mxu0 %vm20316_vm0, %v20317_v1 }
0x1a51   :  { %18988 = vmatprep.subr.bf16.mxu0 %v20315_v0  ;;  %18981 = vmatpush3.bf16.msra.mxu1 %v20472_v30 }
0x1a52   :  { %18982 = vmatprep.subr.bf16.mxu1 %v20315_v0  ;;  %17154 = vmatprep.mubr.msk.f32.mxu1 %vm20316_vm0, %v20317_v1 }
0x1a54   :  { %18990 = vmatpush3.bf16.msra.mxu0 %v20496_v38 }
0x1a55   :  { %18984 = vmatpush3.bf16.msra.mxu1 %v20492_v37  ;;  %18997 = vmatprep.subr.bf16.mxu0 %v20315_v0 }
0x1a56   :  { %17152 = vmatprep.subr.mxu1 %v20317_v1 }
0x1a57   :  { %17166 = vmatmul.mubr.msk.f32.vlgmr.msra.gmra.mrb[46].mxu0 %vm325_vm6, %v21182_v10 }
0x1a58   :  { %18999 = vmatpush3.bf16.msra.mxu0 %v20570_v23  ;;  %17187 = vmatprep.mubr.msk.f32.mxu0 %vm20316_vm0, %v20317_v1 }
0x1a59   :  { %17153 = vmatpush3.msk.msra.mxu1 %vm251_vm2, %v21107_v22  ;;  %19000 = vmatprep.subr.bf16.mxu0 %v20315_v0 }
0x1a5a   :  { %18991 = vmatprep.subr.bf16.mxu1 %v20315_v0 }
0x1a5c   :  { %19002 = vmatpush3.bf16.msra.mxu0 %v20590_v33 }
0x1a5d   :  { %19009 = vmatprep.subr.bf16.mxu0 %v20315_v0 }
0x1b12   :  { %v3572_v61 = vpop.f32.mrb[42].mxu1  ;;  %v21312_v47 = vpop.f32.mrb[42].mxu0 }
0x1b13   :  { %v21317_v36 = vadd.f32 %v3572_v61, %v2781_v56  ;;  %v3574_v54 = vpop.f32.mrb[43].mxu1  ;;  %v21319_v8 = vpop.f32.mrb[43].mxu0 }
0x1b14   :  { %v21324_v31 = vadd.f32 %v3574_v54, %v2782_v57 }
0x1b15   :  { %v3671_v40 = vsub.f32 %v21317_v36, %v21312_v47 }
0x1b16   :  { %v3672_v44 = vsub.f32 %v21324_v31, %v21319_v8 }
0x1b22   :  { %v21330_v15 = vpop.f32.mrb[44].mxu1  ;;  %v21332_v39 = vpop.f32.mrb[44].mxu0 }
0x1b23   :  { %v3818_v49 = vmul.f32 %v21330_v15, %v21330_v15  ;;  %v3819_v50 = vmul.f32 %v21332_v39, %v21332_v39  ;;  %v17124_v56 = vpop.f32.mrb[45].mxu1  ;;  %v17143_v52 = vpop.f32.mrb[45].mxu0 }
0x1b25   :  { %v3820_v53 = vadd.f32 %v3819_v50, %v3818_v49 }
0x1b27   :  { %20078 = vrsqrt.f32 %v3820_v53  ;;  %vm3823_vm13 = vcmp.eq.f32.partialorder %v3820_v53, inf  ;;  %v3826_v42 = vand.u32 2147483648, %v3820_v53  ;;  %vm3825_vm14 = vcmp.eq.f32.partialorder %v3820_v53, 0.0 }
0x1b2a   :  { %v3967_v57 = vpop.f32.mrb[46].mxu0 }
0x1b2b   :  { %v17167_v20 = vpop.f32.mrb[47].mxu0 }
0x1b31   :  { %v20079_v14 = vpop.eup %20078 }
0x1b32   :  { %v3822_v63 = vmul.f32 %v20079_v14, %v3820_v53 }
0x1b34   :  { %v3824_v58 = vsel %vm3823_vm13, %v3820_v53, %v3822_v63 }
0x1b35   :  { %v3827_v7 = vsel %vm3825_vm14, %v3826_v42, %v3824_v58 }
0x1b36   :  { %17155 = vmatmul.mubr.msk.f32.vlgmr.msra.gmra.mrb[46].mxu1 %vm247_vm4, %v3827_v7 }
0x1b37   :  { %18993 = vmatpush3.bf16.msra.mxu1 %v20523_v43  ;;  %17176 = vmatprep.mubr.msk.f32.mxu1 %vm20316_vm0, %v20317_v1 }
0x1b38   :  { %18994 = vmatprep.subr.bf16.mxu1 %v20315_v0 }
0x1b3b   :  { %18996 = vmatpush3.bf16.msra.mxu1 %v20529_v45 }
0x1b3c   :  { %19003 = vmatprep.subr.bf16.mxu1 %v20315_v0 }
0x1b3e   :  { %17177 = vmatmul.mubr.msk.f32.vlgmr.msra.gmra.mrb[48].mxu1 %vm325_vm6, %v21182_v10 }
0x1b3f   :  { %19005 = vmatpush3.bf16.msra.mxu1 %v20581_v29  ;;  %17198 = vmatprep.mubr.msk.f32.mxu1 %vm20316_vm0, %v20317_v1 }
0x1b40   :  { %19006 = vmatprep.subr.bf16.mxu1 %v20315_v0 }
0x1b43   :  { %19008 = vmatpush3.bf16.msra.mxu1 %v20594_v35 }
0x1b44   :  { %19015 = vmatprep.subr.bf16.mxu1 %v20315_v0 }
0x1b46   :  { %17199 = vmatmul.mubr.msk.f32.vlgmr.msra.gmra.mrb[50].mxu1 %vm325_vm6, %v21213_v17 }
0x1b47   :  { %19017 = vmatpush3.bf16.msra.mxu1 %v20658_v26  ;;  %17220 = vmatprep.mubr.msk.f32.mxu1 %vm20316_vm0, %v20317_v1 }
0x1b48   :  { %19018 = vmatprep.subr.bf16.mxu1 %v20315_v0 }
0x1b4b   :  { %19020 = vmatpush3.bf16.msra.mxu1 %v20664_v28 }
0x1c09   :  { %v3897_v10 = vpop.f32.mrb[46].mxu1 }
0x1c0a   :  { %v3898_v48 = vadd.f32 %v21166_v16, %v3897_v10  ;;  %v17156_v2 = vpop.f32.mrb[47].mxu1 }
0x1c0c   :  { %v3971_v3 = vadd.f32 %v3967_v57, %v3898_v48 }
0x1c0e   :  { %v3972_v62 = vmul.f32 0.5, %v3971_v3 }
0x1c10   :  { %20080 = vtanh.f32 %v3972_v62 }
0x1c11   :  { %v4042_v21 = vpop.f32.mrb[48].mxu1 }
0x1c12   :  { %v17178_v4 = vpop.f32.mrb[49].mxu1  ;;  %v4043_v50 = vadd.f32 %v21172_v41, %v4042_v21 }
0x1c19   :  { %v4202_v32 = vpop.f32.mrb[50].mxu1 }
0x1c1a   :  { %v20081_v60 = vpop.eup %20080  ;;  %v17200_v61 = vpop.f32.mrb[51].mxu1 }
0x1c1b   :  { %v3974_v54 = vadd.f32 1.0, %v20081_v60 }
0x1c1d   :  { %v3975_v49 = vmul.f32 0.5, %v3974_v54 }
0x1c1f   :  { %v4046_v56 = vmul.f32 %v4043_v50, %v3975_v49  ;;  %v4053_v57 = vsub.f32 1.0, %v3975_v49  ;;  %v4059_v63 = vmul.f32 %v3975_v49, %v21178_v27 }
0x1c21   :  { %4048 = vrot.lane.b32.xlu0 %v4046_v56, %s20318_s20 }
0x1c93   :  { %v4049_v52 = vpop.permute.xlu0 %4048 }
0x1c94   :  { %v4051_v53 = vadd.f32 %v4049_v52, %v3898_v48 }
0x1c96   :  { %20082 = vtanh.f32 %v4051_v53 }
0x1ca0   :  { %v20083_v20 = vpop.eup %20082 }
0x1ca1   :  { %4055 = vrot.lane.b32.xlu1 %v20083_v20, %s20319_s3 }
0x1d13   :  { %v4056_v14 = vpop.permute.xlu1 %4055 }
0x1d14   :  { %v4058_v42 = vmul.f32 %v4056_v14, %v4053_v57 }
0x1d16   :  { %v21365_v58 = vadd.f32 %v4059_v63, %v4058_v42  ;;  %v4378_v63 = vld [vmem:[#allocation2 + $0x148] sm:$0xff]  ;;  %v4380_v42 = vld [vmem:[#allocation2 + $0x158] sm:$0xff] }
0x1d18   :  { %4062 = vrot.lane.b32.xlu0 %v21365_v58, %s20319_s3 }
0x1d8a   :  { %v21369_v7 = vpop.permute.xlu0 %4062 }
0x1d8b   :  { %17188 = vmatmul.mubr.msk.f32.vlgmr.msra.gmra.mrb[48].mxu0 %vm325_vm6, %v21369_v7 }
0x1d8c   :  { %19011 = vmatpush3.bf16.msra.mxu0 %v20615_v51  ;;  %17209 = vmatprep.mubr.msk.f32.mxu0 %vm20316_vm0, %v20317_v1 }
0x1d8d   :  { %19012 = vmatprep.subr.bf16.mxu0 %v20315_v0 }
0x1d90   :  { %19014 = vmatpush3.bf16.msra.mxu0 %v20628_v55 }
0x1d93   :  { %17210 = vmatmul.mubr.msk.f32.vlgmr.msra.gmra.mrb[50].mxu0 %vm325_vm6, %v21213_v17 }
0x1d94   :  { %4460 = vmatprep.mubr.f32.mxu0 %v20317_v1 }
0x1e5e   :  { %v4132_v27 = vpop.f32.mrb[48].mxu0 }
0x1e5f   :  { %v4133_v10 = vadd.f32 %v21197_v11, %v4132_v27  ;;  %v17189_v48 = vpop.f32.mrb[49].mxu0  ;;  %v15383_v27 = vld [vmem:[%s23628_s4 + $0x148] sm:$0xff] }
0x1e60   :  { %v4377_v48 = vld [vmem:[#allocation2 + $0x140] sm:$0xff] }
0x1e61   :  { %v4206_v2 = vadd.f32 %v4202_v32, %v4133_v10 }
0x1e63   :  { %v4207_v3 = vmul.f32 0.5, %v4206_v2  ;;  %v4379_v2 = vld [vmem:[#allocation2 + $0x150] sm:$0xff] }
0x1e65   :  { %20084 = vtanh.f32 %v4207_v3 }
0x1e66   :  { %v4277_v62 = vpop.f32.mrb[50].mxu0 }
0x1e67   :  { %v17211_v21 = vpop.f32.mrb[51].mxu0  ;;  %v4278_v54 = vadd.f32 %v21203_v6, %v4277_v62  ;;  %v19023_v62 = vpack.c.bf16 %v4379_v2, %v4377_v48  ;;  %v15390_v48 = vld [vmem:[%s23628_s4 + $0x180] sm:$0x1] }
0x1e68   :  { %v15382_v21 = vld [vmem:[%s23628_s4 + $0x140] sm:$0xff] }
0x1e6f   :  { %v20085_v4 = vpop.eup %20084 }
0x1e70   :  { %v4209_v60 = vadd.f32 1.0, %v20085_v4  ;;  %v15384_v4 = vld [vmem:[%s23628_s4 + $0x150] sm:$0xff] }
0x1e72   :  { %v4210_v61 = vmul.f32 0.5, %v4209_v60  ;;  %v19031_v60 = vpack.c.bf16 %v15384_v4, %v15382_v21 }
0x1e74   :  { %v4281_v49 = vmul.f32 %v4278_v54, %v4210_v61  ;;  %v4288_v52 = vsub.f32 1.0, %v4210_v61  ;;  %v4294_v53 = vmul.f32 %v4210_v61, %v21209_v59  ;;  %v19021_v59 = vpack.c.bf16 %v4380_v42, %v4378_v63  ;;  %v4382_v61 = vld [vmem:[#allocation2 + $0x168] sm:$0xff]  ;;  %v4384_v54 = vld [vmem:[#allocation2 + $0x178] sm:$0xff]  ;;  %v15388_v63 = vld [vmem:[%s23628_s4 + $0x170] sm:$0xff] }
0x1e76   :  { %4283 = vrot.lane.b32.xlu1 %v4281_v49, %s20318_s20  ;;  %19022 = vmatprep.subr.bf16.mxu0 %v19021_v59  ;;  %v15387_v49 = vld [vmem:[%s23628_s4 + $0x168] sm:$0xff] }
0x1e77   :  { %19024 = vmatpush1.bf16.msra.mxu0 %v19023_v62  ;;  %v15391_v59 = vld [vmem:[%s23628_s4 + $0x188] sm:$0x1] }
0x1ee8   :  { %v4284_v17 = vpop.permute.xlu1 %4283 }
0x1ee9   :  { %v4286_v50 = vadd.f32 %v4284_v17, %v4133_v10  ;;  %v15385_v10 = vld [vmem:[%s23628_s4 + $0x158] sm:$0xff]  ;;  %v19025_v17 = vpack.c.bf16 %v4384_v54, %v4382_v61 }
0x1eea   :  { %v19029_v3 = vpack.c.bf16 %v15385_v10, %v15383_v27  ;;  %v4386_v27 = vld [vmem:[#allocation2 + $0x188] sm:$0x1]  ;;  %v4385_v10 = vld [vmem:[#allocation2 + $0x180] sm:$0x1] }
0x1eeb   :  { %20086 = vtanh.f32 %v4286_v50  ;;  %v15389_v50 = vld [vmem:[%s23628_s4 + $0x178] sm:$0xff]  ;;  %19026 = vmatprep.subr.bf16.mxu0 %v19025_v17 }
0x1eec   :  { %19030 = vmatprep.subr.bf16.mxu1 %v19029_v3 }
0x1ef5   :  { %v20087_v56 = vpop.eup %20086 }
0x1ef6   :  { %4290 = vrot.lane.b32.xlu0 %v20087_v56, %s20319_s3  ;;  %v4381_v56 = vld [vmem:[#allocation2 + $0x160] sm:$0xff] }
0x1f68   :  { %v4291_v32 = vpop.permute.xlu0 %4290 }
0x1f69   :  { %v4293_v20 = vmul.f32 %v4291_v32, %v4288_v52  ;;  %v4383_v52 = vld [vmem:[#allocation2 + $0x170] sm:$0xff]  ;;  %v19033_v32 = vpack.c.bf16 %v15389_v50, %v15387_v49 }
0x1f6b   :  { %v21386_v57 = vadd.f32 %v4294_v53, %v4293_v20  ;;  %v19027_v53 = vpack.c.bf16 %v4383_v52, %v4381_v56  ;;  %v15386_v20 = vld [vmem:[%s23628_s4 + $0x160] sm:$0xff] }
0x1f6c   :  { %v19035_v42 = vpack.c.bf16 %v15388_v63, %v15386_v20 }
0x1f6d   :  { %4297 = vrot.lane.b32.xlu1 %v21386_v57, %s20319_s3  ;;  %19028 = vmatpush1.bf16.msra.mxu0 %v19027_v53 }
0x1f6e   :  { %15379 = vmatprep.subr.msk.mxu0 %vm251_vm2, %v4386_v27 }
0x1f71   :  { %15380 = vmatpush1.msk.msra.mxu0 %vm251_vm2, %v4385_v10 }
0x1f72   :  { %19037 = vmatprep.subr.bf16.mxu0 %v20315_v0 }
0x1fdf   :  { %v21390_v14 = vpop.permute.xlu1 %4297 }
0x1fe0   :  { %17221 = vmatmul.mubr.msk.f32.vlgmr.msra.gmra.mrb[52].mxu1 %vm325_vm6, %v21390_v14 }
0x1fe1   :  { %4554 = vmatprep.mubr.f32.mxu1 %v20317_v1  ;;  %19032 = vmatpush1.bf16.msra.mxu1 %v19031_v60 }
0x1fe2   :  { %19034 = vmatprep.subr.bf16.mxu1 %v19033_v32 }
0x1fe5   :  { %19036 = vmatpush1.bf16.msra.mxu1 %v19035_v42 }
0x1fe6   :  { %15392 = vmatprep.subr.msk.mxu1 %vm251_vm2, %v15391_v59 }
0x1fe9   :  { %15393 = vmatpush1.msk.msra.mxu1 %vm251_vm2, %v15390_v48 }
0x1fea   :  { %19049 = vmatprep.subr.bf16.mxu1 %v20315_v0 }
0x20b3   :  { %v4367_v2 = vpop.f32.mrb[52].mxu1 }
0x20b4   :  { %v4368_v3 = vadd.f32 %v21257_v46, %v4367_v2  ;;  %v17222_v62 = vpop.f32.mrb[53].mxu1 }
0x20b6   :  { %v4371_v21 = vmul.f32 0.5, %v4368_v3 }
0x20b8   :  { %20088 = vtanh.f32 %v4371_v21 }
0x20c2   :  { %v20089_v4 = vpop.eup %20088 }
0x20c3   :  { %v4373_v60 = vadd.f32 1.0, %v20089_v4 }
0x20c5   :  { %v4374_v61 = vmul.f32 0.5, %v4373_v60 }
0x20c7   :  { %v4375_v54 = vmul.f32 %v4374_v61, %v21330_v15  ;;  %v4469_v49 = vmul.f32 %v4374_v61, %v21332_v39  ;;  %v15395_v15 = vld [vmem:[%s23624_s0 + $0xa] sm:$0x3] }
0x20c9   :  { %15381 = vmatmul.mubr.msk.f32.vlgmr.msra.gmra.mrb[52].mxu0 %vm247_vm4, %v4375_v54  ;;  %15394 = vmatmul.mubr.msk.f32.vlgmr.msra.gmra.mrb[54].mxu1 %vm247_vm4, %v4469_v49 }
0x20ca   :  { %19039 = vmatpush3.bf16.msra.mxu0 %v20383_v5  ;;  %19051 = vmatpush3.bf16.msra.mxu1 %v20394_v9 }
0x20cb   :  { %19040 = vmatprep.subr.bf16.mxu0 %v20315_v0  ;;  %19052 = vmatprep.subr.bf16.mxu1 %v20315_v0 }
0x20cc   :  { %17239 = vmatprep.mubr.msk.f32.mxu0 %vm20316_vm0, %v20317_v1  ;;  %17258 = vmatprep.mubr.msk.f32.mxu1 %vm20316_vm0, %v20317_v1 }
0x20ce   :  { %19042 = vmatpush3.bf16.msra.mxu0 %v20403_v12  ;;  %19054 = vmatpush3.bf16.msra.mxu1 %v20407_v13 }
0x20cf   :  { %19043 = vmatprep.subr.bf16.mxu0 %v20315_v0  ;;  %19055 = vmatprep.subr.bf16.mxu1 %v20315_v0 }
0x20d2   :  { %19045 = vmatpush3.bf16.msra.mxu0 %v20423_v18  ;;  %19057 = vmatpush3.bf16.msra.mxu1 %v20427_v19 }
0x20d3   :  { %19046 = vmatprep.subr.bf16.mxu0 %v20315_v0  ;;  %19058 = vmatprep.subr.bf16.mxu1 %v20315_v0 }
0x20d6   :  { %19048 = vmatpush3.bf16.msra.mxu0 %v20443_v24  ;;  %19060 = vmatpush3.bf16.msra.mxu1 %v20447_v25 }
0x20d7   :  { %19067 = vmatprep.subr.bf16.mxu1 %v20315_v0  ;;  %19061 = vmatprep.subr.bf16.mxu0 %v20315_v0 }
0x20d9   :  { %17240 = vmatmul.mubr.msk.f32.vlgmr.msra.gmra.mrb[54].mxu0 %vm89_vm1, %v15395_v15  ;;  %17259 = vmatmul.mubr.msk.f32.vlgmr.msra.gmra.mrb[56].mxu1 %vm89_vm1, %v15395_v15 }
0x20da   :  { %19069 = vmatpush3.bf16.msra.mxu1 %v20483_v34  ;;  %17282 = vmatprep.mubr.msk.f32.mxu1 %vm20316_vm0, %v20317_v1 }
0x20db   :  { %19070 = vmatprep.subr.bf16.mxu1 %v20315_v0  ;;  %19063 = vmatpush3.bf16.msra.mxu0 %v20472_v30 }
0x20dc   :  { %19064 = vmatprep.subr.bf16.mxu0 %v20315_v0  ;;  %17271 = vmatprep.mubr.msk.f32.mxu0 %vm20316_vm0, %v20317_v1 }
0x20de   :  { %19072 = vmatpush3.bf16.msra.mxu1 %v20496_v38 }
0x20df   :  { %19066 = vmatpush3.bf16.msra.mxu0 %v20492_v37  ;;  %19079 = vmatprep.subr.bf16.mxu1 %v20315_v0 }
0x20e0   :  { %17269 = vmatprep.subr.mxu0 %v20317_v1 }
0x20e1   :  { %17283 = vmatmul.mubr.msk.f32.vlgmr.msra.gmra.mrb[58].mxu1 %vm325_vm6, %v21369_v7 }
0x20e2   :  { %19081 = vmatpush3.bf16.msra.mxu1 %v20570_v23  ;;  %17304 = vmatprep.mubr.msk.f32.mxu1 %vm20316_vm0, %v20317_v1 }
0x20e3   :  { %17270 = vmatpush3.msk.msra.mxu0 %vm251_vm2, %v21107_v22  ;;  %19082 = vmatprep.subr.bf16.mxu1 %v20315_v0 }
0x20e4   :  { %19073 = vmatprep.subr.bf16.mxu0 %v20315_v0 }
0x20e6   :  { %19084 = vmatpush3.bf16.msra.mxu1 %v20590_v33 }
0x20e7   :  { %19091 = vmatprep.subr.bf16.mxu1 %v20315_v0 }
0x219c   :  { %v4462_v39 = vpop.f32.mrb[52].mxu0  ;;  %v21484_v17 = vpop.f32.mrb[54].mxu1 }
0x219d   :  { %v21489_v50 = vadd.f32 %v4462_v39, %v3671_v40  ;;  %v4464_v56 = vpop.f32.mrb[53].mxu0  ;;  %v21491_v52 = vpop.f32.mrb[55].mxu1 }
0x219e   :  { %v21496_v22 = vadd.f32 %v4464_v56, %v3672_v44 }
0x219f   :  { %v4561_v32 = vsub.f32 %v21489_v50, %v21484_v17 }
0x21a0   :  { %v4562_v53 = vsub.f32 %v21496_v22, %v21491_v52 }
0x21ac   :  { %v21502_v20 = vpop.f32.mrb[54].mxu0  ;;  %v21504_v63 = vpop.f32.mrb[56].mxu1 }
0x21ad   :  { %v4708_v47 = vmul.f32 %v21502_v20, %v21502_v20  ;;  %v4709_v36 = vmul.f32 %v21504_v63, %v21504_v63  ;;  %v17241_v40 = vpop.f32.mrb[55].mxu0  ;;  %v17260_v8 = vpop.f32.mrb[57].mxu1 }
0x21af   :  { %v4710_v31 = vadd.f32 %v4709_v36, %v4708_v47 }
0x21b1   :  { %20090 = vrsqrt.f32 %v4710_v31  ;;  %vm4713_vm15 = vcmp.eq.f32.partialorder %v4710_v31, inf  ;;  %v4716_v10 = vand.u32 2147483648, %v4710_v31  ;;  %vm4715_vm3 = vcmp.eq.f32.partialorder %v4710_v31, 0.0 }
0x21b4   :  { %v4857_v44 = vpop.f32.mrb[58].mxu1 }
0x21b5   :  { %v17284_v42 = vpop.f32.mrb[59].mxu1 }
0x21bb   :  { %v20091_v27 = vpop.eup %20090 }
0x21bc   :  { %v4712_v59 = vmul.f32 %v20091_v27, %v4710_v31 }
0x21be   :  { %v4714_v48 = vsel %vm4713_vm15, %v4710_v31, %v4712_v59 }
0x21bf   :  { %v4717_v2 = vsel %vm4715_vm3, %v4716_v10, %v4714_v48 }
0x21c0   :  { %17272 = vmatmul.mubr.msk.f32.vlgmr.msra.gmra.mrb[56].mxu0 %vm247_vm4, %v4717_v2 }
0x21c1   :  { %19075 = vmatpush3.bf16.msra.mxu0 %v20523_v43  ;;  %17293 = vmatprep.mubr.msk.f32.mxu0 %vm20316_vm0, %v20317_v1 }
0x21c2   :  { %19076 = vmatprep.subr.bf16.mxu0 %v20315_v0 }
0x21c5   :  { %19078 = vmatpush3.bf16.msra.mxu0 %v20529_v45 }
0x21c6   :  { %19085 = vmatprep.subr.bf16.mxu0 %v20315_v0 }
0x21c8   :  { %17294 = vmatmul.mubr.msk.f32.vlgmr.msra.gmra.mrb[58].mxu0 %vm325_vm6, %v21369_v7 }
0x21c9   :  { %19087 = vmatpush3.bf16.msra.mxu0 %v20581_v29  ;;  %17315 = vmatprep.mubr.msk.f32.mxu0 %vm20316_vm0, %v20317_v1 }
0x21ca   :  { %19088 = vmatprep.subr.bf16.mxu0 %v20315_v0 }
0x21cd   :  { %19090 = vmatpush3.bf16.msra.mxu0 %v20594_v35 }
0x21ce   :  { %19097 = vmatprep.subr.bf16.mxu0 %v20315_v0 }
0x21d0   :  { %17316 = vmatmul.mubr.msk.f32.vlgmr.msra.gmra.mrb[60].mxu0 %vm325_vm6, %v21390_v14 }
0x21d1   :  { %19099 = vmatpush3.bf16.msra.mxu0 %v20658_v26  ;;  %17337 = vmatprep.mubr.msk.f32.mxu0 %vm20316_vm0, %v20317_v1 }
0x21d2   :  { %19100 = vmatprep.subr.bf16.mxu0 %v20315_v0 }
0x21d5   :  { %19102 = vmatpush3.bf16.msra.mxu0 %v20664_v28 }
0x2293   :  { %v4787_v7 = vpop.f32.mrb[56].mxu0 }
0x2294   :  { %v4788_v3 = vadd.f32 %v21166_v16, %v4787_v7  ;;  %v17273_v62 = vpop.f32.mrb[57].mxu0 }
0x2296   :  { %v4861_v21 = vadd.f32 %v4857_v44, %v4788_v3 }
0x2298   :  { %v4862_v4 = vmul.f32 0.5, %v4861_v21 }
0x229a   :  { %20092 = vtanh.f32 %v4862_v4 }
0x229b   :  { %v4932_v60 = vpop.f32.mrb[58].mxu0 }
0x229c   :  { %v17295_v61 = vpop.f32.mrb[59].mxu0  ;;  %v4933_v47 = vadd.f32 %v21172_v41, %v4932_v60 }
0x22a3   :  { %v5092_v54 = vpop.f32.mrb[60].mxu0 }
0x22a4   :  { %v20093_v49 = vpop.eup %20092  ;;  %v17317_v15 = vpop.f32.mrb[61].mxu0 }
0x22a5   :  { %v4864_v39 = vadd.f32 1.0, %v20093_v49 }
0x22a7   :  { %v4865_v56 = vmul.f32 0.5, %v4864_v39 }
0x22a9   :  { %v4936_v36 = vmul.f32 %v4933_v47, %v4865_v56  ;;  %v4943_v31 = vsub.f32 1.0, %v4865_v56  ;;  %v4949_v42 = vmul.f32 %v4865_v56, %v21365_v58 }
0x22ab   :  { %4938 = vrot.lane.b32.xlu0 %v4936_v36, %s20318_s20 }
0x231d   :  { %v4939_v40 = vpop.permute.xlu0 %4938 }
0x231e   :  { %v4941_v8 = vadd.f32 %v4939_v40, %v4788_v3  ;;  %v5268_v40 = vld [vmem:[#allocation2 + $0x198] sm:$0xff] }
0x2320   :  { %20094 = vtanh.f32 %v4941_v8  ;;  %v5270_v8 = vld [vmem:[#allocation2 + $0x1a8] sm:$0xff] }
0x232a   :  { %v20095_v16 = vpop.eup %20094 }
0x232b   :  { %4945 = vrot.lane.b32.xlu1 %v20095_v16, %s20319_s3  ;;  %v15410_v16 = vld [vmem:[%s23628_s4 + $0x198] sm:$0xff] }
0x239d   :  { %v4946_v44 = vpop.permute.xlu1 %4945 }
0x239e   :  { %v4948_v27 = vmul.f32 %v4946_v44, %v4943_v31  ;;  %v15412_v31 = vld [vmem:[%s23628_s4 + $0x1a8] sm:$0xff]  ;;  %v5267_v44 = vld [vmem:[#allocation2 + $0x190] sm:$0xff] }
0x23a0   :  { %v21537_v59 = vadd.f32 %v4949_v42, %v4948_v27  ;;  %v5269_v42 = vld [vmem:[#allocation2 + $0x1a0] sm:$0xff]  ;;  %v19111_v27 = vpack.c.bf16 %v15412_v31, %v15410_v16 }
0x23a2   :  { %4952 = vrot.lane.b32.xlu0 %v21537_v59, %s20319_s3  ;;  %19112 = vmatprep.subr.bf16.mxu0 %v19111_v27 }
0x2414   :  { %v21541_v41 = vpop.permute.xlu0 %4952 }
0x2415   :  { %17305 = vmatmul.mubr.msk.f32.vlgmr.msra.gmra.mrb[60].mxu1 %vm325_vm6, %v21541_v41 }
0x2416   :  { %19093 = vmatpush3.bf16.msra.mxu1 %v20615_v51  ;;  %17326 = vmatprep.mubr.msk.f32.mxu1 %vm20316_vm0, %v20317_v1 }
0x2417   :  { %19094 = vmatprep.subr.bf16.mxu1 %v20315_v0 }
0x241a   :  { %19096 = vmatpush3.bf16.msra.mxu1 %v20628_v55 }
0x241d   :  { %17327 = vmatmul.mubr.msk.f32.vlgmr.msra.gmra.mrb[62].mxu1 %vm325_vm6, %v21390_v14 }
0x241e   :  { %5350 = vmatprep.mubr.f32.mxu1 %v20317_v1 }
0x24e8   :  { %v5022_v58 = vpop.f32.mrb[60].mxu1 }
0x24e9   :  { %v5023_v10 = vadd.f32 %v21197_v11, %v5022_v58  ;;  %v17306_v48 = vpop.f32.mrb[61].mxu1  ;;  %v19105_v58 = vpack.c.bf16 %v5269_v42, %v5267_v44 }
0x24ea   :  { %v15411_v48 = vld [vmem:[%s23628_s4 + $0x1a0] sm:$0xff] }
0x24eb   :  { %v5096_v2 = vadd.f32 %v5092_v54, %v5023_v10 }
0x24ed   :  { %v5097_v7 = vmul.f32 0.5, %v5096_v2 }
0x24ef   :  { %20096 = vtanh.f32 %v5097_v7  ;;  %v5272_v7 = vld [vmem:[#allocation2 + $0x1b8] sm:$0xff] }
0x24f0   :  { %v5167_v3 = vpop.f32.mrb[62].mxu1 }
0x24f1   :  { %v17328_v62 = vpop.f32.mrb[63].mxu1  ;;  %v5168_v61 = vadd.f32 %v21203_v6, %v5167_v3  ;;  %v5274_v3 = vld [vmem:[#allocation2 + $0x1c8] sm:$0xff] }
0x24f2   :  { %v15414_v62 = vld [vmem:[%s23628_s4 + $0x1b8] sm:$0xff] }
0x24f9   :  { %v20097_v21 = vpop.eup %20096 }
0x24fa   :  { %v5099_v4 = vadd.f32 1.0, %v20097_v21  ;;  %v19107_v21 = vpack.c.bf16 %v5274_v3, %v5272_v7 }
0x24fc   :  { %v5100_v60 = vmul.f32 0.5, %v5099_v4  ;;  %v15416_v4 = vld [vmem:[%s23628_s4 + $0x1c8] sm:$0xff] }
0x24fe   :  { %v5171_v49 = vmul.f32 %v5168_v61, %v5100_v60  ;;  %v5178_v11 = vsub.f32 1.0, %v5100_v60  ;;  %v5184_v56 = vmul.f32 %v5100_v60, %v21386_v57  ;;  %v19103_v57 = vpack.c.bf16 %v5270_v8, %v5268_v40  ;;  %v5271_v60 = vld [vmem:[#allocation2 + $0x1b0] sm:$0xff]  ;;  %v5273_v61 = vld [vmem:[#allocation2 + $0x1c0] sm:$0xff] }
0x24ff   :  { %v15417_v40 = vld [vmem:[%s23628_s4 + $0x1d0] sm:$0x1] }
0x2500   :  { %5173 = vrot.lane.b32.xlu1 %v5171_v49, %s20318_s20  ;;  %19104 = vmatprep.subr.bf16.mxu1 %v19103_v57  ;;  %v19115_v49 = vpack.c.bf16 %v15416_v4, %v15414_v62 }
0x2501   :  { %19106 = vmatpush1.bf16.msra.mxu1 %v19105_v58 }
0x2502   :  { %19108 = vmatprep.subr.bf16.mxu1 %v19107_v21 }
0x2572   :  { %v5174_v14 = vpop.permute.xlu1 %5173 }
0x2573   :  { %v5176_v15 = vadd.f32 %v5174_v14, %v5023_v10  ;;  %v15409_v10 = vld [vmem:[%s23628_s4 + $0x190] sm:$0xff]  ;;  %v19109_v14 = vpack.c.bf16 %v5273_v61, %v5271_v60 }
0x2574   :  { %v19113_v2 = vpack.c.bf16 %v15411_v48, %v15409_v10 }
0x2575   :  { %20098 = vtanh.f32 %v5176_v15  ;;  %v15413_v15 = vld [vmem:[%s23628_s4 + $0x1b0] sm:$0xff]  ;;  %19110 = vmatpush1.bf16.msra.mxu1 %v19109_v14 }
0x257f   :  { %v20099_v39 = vpop.eup %20098 }
0x2580   :  { %5180 = vrot.lane.b32.xlu0 %v20099_v39, %s20319_s3  ;;  %v15415_v39 = vld [vmem:[%s23628_s4 + $0x1c0] sm:$0xff] }
0x25f2   :  { %v5181_v54 = vpop.permute.xlu0 %5180 }
0x25f3   :  { %v5183_v47 = vmul.f32 %v5181_v54, %v5178_v11  ;;  %v19117_v11 = vpack.c.bf16 %v15415_v39, %v15413_v15  ;;  %v5276_v54 = vld [vmem:[#allocation2 + $0x1d8] sm:$0x1] }
0x25f4   :  { %15406 = vmatprep.subr.msk.mxu1 %vm251_vm2, %v5276_v54 }
0x25f5   :  { %v21558_v36 = vadd.f32 %v5184_v56, %v5183_v47  ;;  %v15418_v56 = vld [vmem:[%s23628_s4 + $0x1d8] sm:$0x1]  ;;  %v5275_v47 = vld [vmem:[#allocation2 + $0x1d0] sm:$0x1] }
0x25f6   :  { %15407 = vmatpush1.msk.msra.mxu1 %vm251_vm2, %v5275_v47 }
0x25f7   :  { %5187 = vrot.lane.b32.xlu1 %v21558_v36, %s20319_s3  ;;  %19119 = vmatprep.subr.bf16.mxu1 %v20315_v0 }
0x2669   :  { %v21562_v6 = vpop.permute.xlu1 %5187 }
0x266a   :  { %17338 = vmatmul.mubr.msk.f32.vlgmr.msra.gmra.mrb[62].mxu0 %vm325_vm6, %v21562_v6 }
0x266b   :  { %5444 = vmatprep.mubr.f32.mxu0 %v20317_v1  ;;  %19114 = vmatpush1.bf16.msra.mxu0 %v19113_v2 }
0x266c   :  { %19116 = vmatprep.subr.bf16.mxu0 %v19115_v49 }
0x266f   :  { %19118 = vmatpush1.bf16.msra.mxu0 %v19117_v11 }
0x2670   :  { %15419 = vmatprep.subr.msk.mxu0 %vm251_vm2, %v15418_v56  ;;  %v21712_v56 = vld [vmem:[%s23629_s5 + $0xe8] ss:$0 sm:$0xff] }
0x2673   :  { %15420 = vmatpush1.msk.msra.mxu0 %vm251_vm2, %v15417_v40 }
0x2674   :  { %19131 = vmatprep.subr.bf16.mxu0 %v20315_v0 }
0x273d   :  { %v5257_v8 = vpop.f32.mrb[62].mxu0 }
0x273e   :  { %v5258_v16 = vadd.f32 %v21257_v46, %v5257_v8  ;;  %v17339_v57 = vpop.f32.mrb[63].mxu0  ;;  %v15422_v46 = vld [vmem:[%s23624_s0 + $0xc] sm:$0x3] }
0x2740   :  { %v5261_v31 = vmul.f32 0.5, %v5258_v16 }
0x2742   :  { %20100 = vtanh.f32 %v5261_v31 }
0x274c   :  { %v20101_v44 = vpop.eup %20100 }
0x274d   :  { %v5263_v42 = vadd.f32 1.0, %v20101_v44 }
0x274f   :  { %v5264_v27 = vmul.f32 0.5, %v5263_v42 }
0x2751   :  { %v5265_v58 = vmul.f32 %v5264_v27, %v21502_v20  ;;  %v5359_v10 = vmul.f32 %v5264_v27, %v21504_v63  ;;  %v21653_v20 = vld [vmem:[%s23629_s5 + $0x20] sm:$0x1] }
0x2753   :  { %15408 = vmatmul.mubr.msk.f32.vlgmr.msra.gmra.mrb[64].mxu1 %vm247_vm4, %v5265_v58  ;;  %15421 = vmatmul.mubr.msk.f32.vlgmr.msra.gmra.mrb[64].mxu0 %vm247_vm4, %v5359_v10 }
0x2754   :  { %19121 = vmatpush3.bf16.msra.mxu1 %v20383_v5  ;;  %19133 = vmatpush3.bf16.msra.mxu0 %v20394_v9 }
0x2755   :  { %19122 = vmatprep.subr.bf16.mxu1 %v20315_v0  ;;  %19134 = vmatprep.subr.bf16.mxu0 %v20315_v0 }
0x2756   :  { %17356 = vmatprep.mubr.msk.f32.mxu1 %vm20316_vm0, %v20317_v1  ;;  %17375 = vmatprep.mubr.msk.f32.mxu0 %vm20316_vm0, %v20317_v1 }
0x2758   :  { %19124 = vmatpush3.bf16.msra.mxu1 %v20403_v12  ;;  %19136 = vmatpush3.bf16.msra.mxu0 %v20407_v13 }
0x2759   :  { %19125 = vmatprep.subr.bf16.mxu1 %v20315_v0  ;;  %19137 = vmatprep.subr.bf16.mxu0 %v20315_v0 }
0x275c   :  { %19127 = vmatpush3.bf16.msra.mxu1 %v20423_v18  ;;  %19139 = vmatpush3.bf16.msra.mxu0 %v20427_v19 }
0x275d   :  { %19128 = vmatprep.subr.bf16.mxu1 %v20315_v0  ;;  %19140 = vmatprep.subr.bf16.mxu0 %v20315_v0 }
0x2760   :  { %19130 = vmatpush3.bf16.msra.mxu1 %v20443_v24  ;;  %19142 = vmatpush3.bf16.msra.mxu0 %v20447_v25 }
0x2761   :  { %19149 = vmatprep.subr.bf16.mxu0 %v20315_v0  ;;  %19143 = vmatprep.subr.bf16.mxu1 %v20315_v0 }
0x2763   :  { %17357 = vmatmul.mubr.msk.f32.vlgmr.msra.gmra.mrb[66].mxu1 %vm89_vm1, %v15422_v46  ;;  %17376 = vmatmul.mubr.msk.f32.vlgmr.msra.gmra.mrb[66].mxu0 %vm89_vm1, %v15422_v46  ;;  %v21718_v46 = vld [vmem:[%s23629_s5 + $0xf0] ss:$0 sm:$0xff] }
0x2764   :  { %19151 = vmatpush3.bf16.msra.mxu0 %v20483_v34  ;;  %17399 = vmatprep.mubr.msk.f32.mxu0 %vm20316_vm0, %v20317_v1 }
0x2765   :  { %19152 = vmatprep.subr.bf16.mxu0 %v20315_v0  ;;  %19145 = vmatpush3.bf16.msra.mxu1 %v20472_v30 }
0x2766   :  { %19146 = vmatprep.subr.bf16.mxu1 %v20315_v0  ;;  %17388 = vmatprep.mubr.msk.f32.mxu1 %vm20316_vm0, %v20317_v1 }
0x2768   :  { %19154 = vmatpush3.bf16.msra.mxu0 %v20496_v38 }
0x2769   :  { %19148 = vmatpush3.bf16.msra.mxu1 %v20492_v37  ;;  %19161 = vmatprep.subr.bf16.mxu0 %v20315_v0 }
0x276a   :  { %17386 = vmatprep.subr.mxu1 %v20317_v1 }
0x276b   :  { %17400 = vmatmul.mubr.msk.f32.vlgmr.msra.gmra.mrb[68].mxu0 %vm325_vm6, %v21541_v41 }
0x276c   :  { %19163 = vmatpush3.bf16.msra.mxu0 %v20570_v23  ;;  %17421 = vmatprep.mubr.msk.f32.mxu0 %vm20316_vm0, %v20317_v1 }
0x276d   :  { %17387 = vmatpush3.msk.msra.mxu1 %vm251_vm2, %v21653_v20  ;;  %19164 = vmatprep.subr.bf16.mxu0 %v20315_v0 }
0x276e   :  { %19155 = vmatprep.subr.bf16.mxu1 %v20315_v0 }
0x2770   :  { %19166 = vmatpush3.bf16.msra.mxu0 %v20590_v33 }
0x2771   :  { %19173 = vmatprep.subr.bf16.mxu0 %v20315_v0 }
0x2826   :  { %v5352_v63 = vpop.f32.mrb[64].mxu1  ;;  %v21661_v48 = vpop.f32.mrb[64].mxu0 }
0x2827   :  { %v21666_v2 = vadd.f32 %v5352_v63, %v4561_v32  ;;  %v5354_v7 = vpop.f32.mrb[65].mxu1  ;;  %v21668_v3 = vpop.f32.mrb[65].mxu0 }
0x2828   :  { %v21673_v62 = vadd.f32 %v5354_v7, %v4562_v53 }
0x2829   :  { %v5451_v21 = vsub.f32 %v21666_v2, %v21661_v48 }
0x282a   :  { %v5452_v4 = vsub.f32 %v21673_v62, %v21668_v3 }
0x2836   :  { %v21679_v60 = vpop.f32.mrb[66].mxu1  ;;  %v21681_v61 = vpop.f32.mrb[66].mxu0 }
0x2837   :  { %v5598_v17 = vmul.f32 %v21679_v60, %v21679_v60  ;;  %v5599_v50 = vmul.f32 %v21681_v61, %v21681_v61  ;;  %v17358_v32 = vpop.f32.mrb[67].mxu1  ;;  %v17377_v52 = vpop.f32.mrb[67].mxu0 }
0x2839   :  { %v5600_v22 = vadd.f32 %v5599_v50, %v5598_v17 }
0x283b   :  { %20102 = vrsqrt.f32 %v5600_v22  ;;  %vm5603_vm5 = vcmp.eq.f32.partialorder %v5600_v22, inf  ;;  %v5606_v39 = vand.u32 2147483648, %v5600_v22  ;;  %vm5605_vm7 = vcmp.eq.f32.partialorder %v5600_v22, 0.0 }
0x283e   :  { %v5747_v53 = vpop.f32.mrb[68].mxu0 }
0x283f   :  { %v17401_v49 = vpop.f32.mrb[69].mxu0 }
0x2845   :  { %v20103_v14 = vpop.eup %20102 }
0x2846   :  { %v5602_v15 = vmul.f32 %v20103_v14, %v5600_v22 }
0x2848   :  { %v5604_v11 = vsel %vm5603_vm5, %v5600_v22, %v5602_v15 }
0x2849   :  { %v5607_v54 = vsel %vm5605_vm7, %v5606_v39, %v5604_v11  ;;  %v21743_v39 = vld [vmem:[%s23629_s5 + $0xf8] ss:$0 sm:$0xff] }
0x284a   :  { %17389 = vmatmul.mubr.msk.f32.vlgmr.msra.gmra.mrb[68].mxu1 %vm247_vm4, %v5607_v54 }
0x284b   :  { %19157 = vmatpush3.bf16.msra.mxu1 %v20523_v43  ;;  %17410 = vmatprep.mubr.msk.f32.mxu1 %vm20316_vm0, %v20317_v1 }
0x284c   :  { %19158 = vmatprep.subr.bf16.mxu1 %v20315_v0 }
0x284f   :  { %19160 = vmatpush3.bf16.msra.mxu1 %v20529_v45 }
0x2850   :  { %19167 = vmatprep.subr.bf16.mxu1 %v20315_v0 }
0x2852   :  { %17411 = vmatmul.mubr.msk.f32.vlgmr.msra.gmra.mrb[70].mxu1 %vm325_vm6, %v21541_v41 }
0x2853   :  { %19169 = vmatpush3.bf16.msra.mxu1 %v20581_v29  ;;  %17432 = vmatprep.mubr.msk.f32.mxu1 %vm20316_vm0, %v20317_v1 }
0x2854   :  { %19170 = vmatprep.subr.bf16.mxu1 %v20315_v0 }
0x2857   :  { %19172 = vmatpush3.bf16.msra.mxu1 %v20594_v35 }
0x2858   :  { %19179 = vmatprep.subr.bf16.mxu1 %v20315_v0 }
0x285a   :  { %17433 = vmatmul.mubr.msk.f32.vlgmr.msra.gmra.mrb[72].mxu1 %vm325_vm6, %v21562_v6 }
0x285b   :  { %19181 = vmatpush3.bf16.msra.mxu1 %v20658_v26  ;;  %17454 = vmatprep.mubr.msk.f32.mxu1 %vm20316_vm0, %v20317_v1 }
0x285c   :  { %19182 = vmatprep.subr.bf16.mxu1 %v20315_v0 }
0x285f   :  { %19184 = vmatpush3.bf16.msra.mxu1 %v20664_v28 }
0x291d   :  { %v5677_v41 = vpop.f32.mrb[68].mxu1 }
0x291e   :  { %v5678_v47 = vadd.f32 %v21712_v56, %v5677_v41  ;;  %v17390_v40 = vpop.f32.mrb[69].mxu1 }
0x2920   :  { %v5751_v8 = vadd.f32 %v5747_v53, %v5678_v47 }
0x2922   :  { %v5752_v16 = vmul.f32 0.5, %v5751_v8 }
0x2924   :  { %20104 = vtanh.f32 %v5752_v16 }
0x2925   :  { %v5822_v57 = vpop.f32.mrb[70].mxu1 }
0x2926   :  { %v17412_v31 = vpop.f32.mrb[71].mxu1  ;;  %v5823_v63 = vadd.f32 %v21718_v46, %v5822_v57 }
0x292d   :  { %v5982_v44 = vpop.f32.mrb[72].mxu1 }
0x292e   :  { %v20105_v42 = vpop.eup %20104  ;;  %v17434_v27 = vpop.f32.mrb[73].mxu1 }
0x292f   :  { %v5754_v58 = vadd.f32 1.0, %v20105_v42 }
0x2931   :  { %v5755_v10 = vmul.f32 0.5, %v5754_v58 }
0x2933   :  { %v5826_v7 = vmul.f32 %v5823_v63, %v5755_v10  ;;  %v5833_v52 = vsub.f32 1.0, %v5755_v10  ;;  %v5839_v53 = vmul.f32 %v5755_v10, %v21537_v59 }
0x2935   :  { %5828 = vrot.lane.b32.xlu0 %v5826_v7, %s20318_s20 }
0x29a7   :  { %v5829_v17 = vpop.permute.xlu0 %5828 }
0x29a8   :  { %v5831_v50 = vadd.f32 %v5829_v17, %v5678_v47 }
0x29aa   :  { %20106 = vtanh.f32 %v5831_v50 }
0x29b4   :  { %v20107_v32 = vpop.eup %20106 }
0x29b5   :  { %5835 = vrot.lane.b32.xlu1 %v20107_v32, %s20319_s3 }
0x2a27   :  { %v5836_v22 = vpop.permute.xlu1 %5835 }
0x2a28   :  { %v5838_v49 = vmul.f32 %v5836_v22, %v5833_v52  ;;  %v6158_v22 = vld [vmem:[#allocation2 + $0x1e8] sm:$0xff] }
0x2a2a   :  { %v21724_v14 = vadd.f32 %v5839_v53, %v5838_v49  ;;  %v6160_v53 = vld [vmem:[#allocation2 + $0x1f8] sm:$0xff]  ;;  %v15437_v49 = vld [vmem:[%s23628_s4 + $0x1e8] sm:$0xff] }
0x2a2c   :  { %5842 = vrot.lane.b32.xlu0 %v21724_v14, %s20319_s3 }
0x2a9e   :  { %v21728_v15 = vpop.permute.xlu0 %5842 }
0x2a9f   :  { %17422 = vmatmul.mubr.msk.f32.vlgmr.msra.gmra.mrb[70].mxu0 %vm325_vm6, %v21728_v15 }
0x2aa0   :  { %19175 = vmatpush3.bf16.msra.mxu0 %v20615_v51  ;;  %17443 = vmatprep.mubr.msk.f32.mxu0 %vm20316_vm0, %v20317_v1 }
0x2aa1   :  { %19176 = vmatprep.subr.bf16.mxu0 %v20315_v0 }
0x2aa4   :  { %19178 = vmatpush3.bf16.msra.mxu0 %v20628_v55 }
0x2aa7   :  { %17444 = vmatmul.mubr.msk.f32.vlgmr.msra.gmra.mrb[72].mxu0 %vm325_vm6, %v21562_v6  ;;  %v21749_v6 = vld [vmem:[%s23629_s5 + $0x100] ss:$0 sm:$0xff] }
0x2aa8   :  { %6240 = vmatprep.mubr.f32.mxu0 %v20317_v1 }
0x2b72   :  { %v5912_v59 = vpop.f32.mrb[70].mxu0 }
0x2b73   :  { %v5913_v11 = vadd.f32 %v21743_v39, %v5912_v59  ;;  %v17423_v54 = vpop.f32.mrb[71].mxu0  ;;  %v15439_v59 = vld [vmem:[%s23628_s4 + $0x1f8] sm:$0xff] }
0x2b74   :  { %v6159_v54 = vld [vmem:[#allocation2 + $0x1f0] sm:$0xff] }
0x2b75   :  { %v5986_v41 = vadd.f32 %v5982_v44, %v5913_v11 }
0x2b77   :  { %v5987_v47 = vmul.f32 0.5, %v5986_v41  ;;  %v19193_v41 = vpack.c.bf16 %v15439_v59, %v15437_v49  ;;  %v15445_v49 = vld [vmem:[%s23628_s4 + $0x228] sm:$0x1]  ;;  %v15444_v59 = vld [vmem:[%s23628_s4 + $0x220] sm:$0x1] }
0x2b79   :  { %20108 = vtanh.f32 %v5987_v47  ;;  %19194 = vmatprep.subr.bf16.mxu1 %v19193_v41 }
0x2b7a   :  { %v6057_v40 = vpop.f32.mrb[72].mxu0 }
0x2b7b   :  { %v17445_v8 = vpop.f32.mrb[73].mxu0  ;;  %v6058_v42 = vadd.f32 %v21749_v6, %v6057_v40  ;;  %v15436_v40 = vld [vmem:[%s23628_s4 + $0x1e0] sm:$0xff] }
0x2b7c   :  { %v15438_v8 = vld [vmem:[%s23628_s4 + $0x1f0] sm:$0xff] }
0x2b83   :  { %v20109_v16 = vpop.eup %20108 }
0x2b84   :  { %v5989_v57 = vadd.f32 1.0, %v20109_v16  ;;  %v19195_v16 = vpack.c.bf16 %v15438_v8, %v15436_v40 }
0x2b86   :  { %v5990_v31 = vmul.f32 0.5, %v5989_v57  ;;  %v6162_v57 = vld [vmem:[#allocation2 + $0x208] sm:$0xff] }
0x2b88   :  { %v6061_v27 = vmul.f32 %v6058_v42, %v5990_v31  ;;  %v6068_v63 = vsub.f32 1.0, %v5990_v31  ;;  %v6074_v17 = vmul.f32 %v5990_v31, %v21558_v36  ;;  %v19185_v36 = vpack.c.bf16 %v6160_v53, %v6158_v22  ;;  %v6164_v31 = vld [vmem:[#allocation2 + $0x218] sm:$0xff]  ;;  %v15441_v42 = vld [vmem:[%s23628_s4 + $0x208] sm:$0xff] }
0x2b89   :  { %v6166_v53 = vld [vmem:[#allocation2 + $0x228] sm:$0x1] }
0x2b8a   :  { %6063 = vrot.lane.b32.xlu1 %v6061_v27, %s20318_s20  ;;  %19186 = vmatprep.subr.bf16.mxu0 %v19185_v36  ;;  %v19189_v27 = vpack.c.bf16 %v6164_v31, %v6162_v57  ;;  %v6165_v36 = vld [vmem:[#allocation2 + $0x220] sm:$0x1] }
0x2bfc   :  { %v6064_v58 = vpop.permute.xlu1 %6063 }
0x2bfd   :  { %v6066_v10 = vadd.f32 %v6064_v58, %v5913_v11  ;;  %v6157_v11 = vld [vmem:[#allocation2 + $0x1e0] sm:$0xff]  ;;  %v15443_v58 = vld [vmem:[%s23628_s4 + $0x218] sm:$0xff] }
0x2bfe   :  { %v19187_v47 = vpack.c.bf16 %v6159_v54, %v6157_v11  ;;  %v21803_v54 = vld [vmem:[%s23629_s5 + $0x108] ss:$0 sm:$0xff] }
0x2bff   :  { %20110 = vtanh.f32 %v6066_v10  ;;  %v6161_v10 = vld [vmem:[#allocation2 + $0x200] sm:$0xff] }
0x2c00   :  { %19188 = vmatpush1.bf16.msra.mxu0 %v19187_v47 }
0x2c01   :  { %19190 = vmatprep.subr.bf16.mxu0 %v19189_v27 }
0x2c09   :  { %v20111_v44 = vpop.eup %20110 }
0x2c0a   :  { %6070 = vrot.lane.b32.xlu0 %v20111_v44, %s20319_s3  ;;  %v6163_v44 = vld [vmem:[#allocation2 + $0x210] sm:$0xff] }
0x2c7c   :  { %v6071_v7 = vpop.permute.xlu0 %6070 }
0x2c7d   :  { %v6073_v50 = vmul.f32 %v6071_v7, %v6068_v63  ;;  %v19197_v63 = vpack.c.bf16 %v15443_v58, %v15441_v42  ;;  %v19191_v7 = vpack.c.bf16 %v6163_v44, %v6161_v10 }
0x2c7f   :  { %v21755_v32 = vadd.f32 %v6074_v17, %v6073_v50  ;;  %v15440_v17 = vld [vmem:[%s23628_s4 + $0x200] sm:$0xff]  ;;  %v15442_v50 = vld [vmem:[%s23628_s4 + $0x210] sm:$0xff]  ;;  %19192 = vmatpush1.bf16.msra.mxu0 %v19191_v7 }
0x2c80   :  { %v19199_v22 = vpack.c.bf16 %v15442_v50, %v15440_v17  ;;  %15433 = vmatprep.subr.msk.mxu0 %vm251_vm2, %v6166_v53 }
0x2c81   :  { %6077 = vrot.lane.b32.xlu1 %v21755_v32, %s20319_s3 }
0x2c83   :  { %15434 = vmatpush1.msk.msra.mxu0 %vm251_vm2, %v6165_v36 }
0x2c84   :  { %19201 = vmatprep.subr.bf16.mxu0 %v20315_v0 }
0x2cf3   :  { %v21759_v52 = vpop.permute.xlu1 %6077 }
0x2cf4   :  { %17455 = vmatmul.mubr.msk.f32.vlgmr.msra.gmra.mrb[74].mxu1 %vm325_vm6, %v21759_v52 }
0x2cf5   :  { %6334 = vmatprep.mubr.f32.mxu1 %v20317_v1  ;;  %19196 = vmatpush1.bf16.msra.mxu1 %v19195_v16 }
0x2cf6   :  { %19198 = vmatprep.subr.bf16.mxu1 %v19197_v63 }
0x2cf9   :  { %19200 = vmatpush1.bf16.msra.mxu1 %v19199_v22 }
0x2cfa   :  { %15446 = vmatprep.subr.msk.mxu1 %vm251_vm2, %v15445_v49 }
0x2cfd   :  { %15447 = vmatpush1.msk.msra.mxu1 %vm251_vm2, %v15444_v59 }
0x2cfe   :  { %19213 = vmatprep.subr.bf16.mxu1 %v20315_v0 }
0x2dc7   :  { %v6147_v11 = vpop.f32.mrb[74].mxu1 }
0x2dc8   :  { %v6148_v41 = vadd.f32 %v21803_v54, %v6147_v11  ;;  %v17456_v47 = vpop.f32.mrb[75].mxu1 }
0x2dca   :  { %v6151_v40 = vmul.f32 0.5, %v6148_v41 }
0x2dcc   :  { %20112 = vtanh.f32 %v6151_v40 }
0x2dd6   :  { %v20113_v8 = vpop.eup %20112 }
0x2dd7   :  { %v6153_v16 = vadd.f32 1.0, %v20113_v8 }
0x2dd9   :  { %v6154_v57 = vmul.f32 0.5, %v6153_v16 }
0x2ddb   :  { %v6155_v31 = vmul.f32 %v6154_v57, %v21679_v60  ;;  %v6249_v42 = vmul.f32 %v6154_v57, %v21681_v61  ;;  %v15449_v60 = vld [vmem:[%s23624_s0 + $0xe] sm:$0x3] }
0x2ddd   :  { %15435 = vmatmul.mubr.msk.f32.vlgmr.msra.gmra.mrb[74].mxu0 %vm247_vm4, %v6155_v31  ;;  %15448 = vmatmul.mubr.msk.f32.vlgmr.msra.gmra.mrb[76].mxu1 %vm247_vm4, %v6249_v42 }
0x2dde   :  { %19203 = vmatpush3.bf16.msra.mxu0 %v20383_v5  ;;  %19215 = vmatpush3.bf16.msra.mxu1 %v20394_v9 }
0x2ddf   :  { %19204 = vmatprep.subr.bf16.mxu0 %v20315_v0  ;;  %19216 = vmatprep.subr.bf16.mxu1 %v20315_v0 }
0x2de0   :  { %17473 = vmatprep.mubr.msk.f32.mxu0 %vm20316_vm0, %v20317_v1  ;;  %17492 = vmatprep.mubr.msk.f32.mxu1 %vm20316_vm0, %v20317_v1 }
0x2de2   :  { %19206 = vmatpush3.bf16.msra.mxu0 %v20403_v12  ;;  %19218 = vmatpush3.bf16.msra.mxu1 %v20407_v13 }
0x2de3   :  { %19207 = vmatprep.subr.bf16.mxu0 %v20315_v0  ;;  %19219 = vmatprep.subr.bf16.mxu1 %v20315_v0 }
0x2de6   :  { %19209 = vmatpush3.bf16.msra.mxu0 %v20423_v18  ;;  %19221 = vmatpush3.bf16.msra.mxu1 %v20427_v19 }
0x2de7   :  { %19210 = vmatprep.subr.bf16.mxu0 %v20315_v0  ;;  %19222 = vmatprep.subr.bf16.mxu1 %v20315_v0 }
0x2dea   :  { %19212 = vmatpush3.bf16.msra.mxu0 %v20443_v24  ;;  %19224 = vmatpush3.bf16.msra.mxu1 %v20447_v25 }
0x2deb   :  { %19231 = vmatprep.subr.bf16.mxu1 %v20315_v0  ;;  %19225 = vmatprep.subr.bf16.mxu0 %v20315_v0 }
0x2ded   :  { %17474 = vmatmul.mubr.msk.f32.vlgmr.msra.gmra.mrb[76].mxu0 %vm89_vm1, %v15449_v60  ;;  %17493 = vmatmul.mubr.msk.f32.vlgmr.msra.gmra.mrb[78].mxu1 %vm89_vm1, %v15449_v60 }
0x2dee   :  { %19233 = vmatpush3.bf16.msra.mxu1 %v20483_v34  ;;  %17516 = vmatprep.mubr.msk.f32.mxu1 %vm20316_vm0, %v20317_v1 }
0x2def   :  { %19234 = vmatprep.subr.bf16.mxu1 %v20315_v0  ;;  %19227 = vmatpush3.bf16.msra.mxu0 %v20472_v30 }
0x2df0   :  { %19228 = vmatprep.subr.bf16.mxu0 %v20315_v0  ;;  %17505 = vmatprep.mubr.msk.f32.mxu0 %vm20316_vm0, %v20317_v1 }
0x2df2   :  { %19236 = vmatpush3.bf16.msra.mxu1 %v20496_v38 }
0x2df3   :  { %19230 = vmatpush3.bf16.msra.mxu0 %v20492_v37  ;;  %19243 = vmatprep.subr.bf16.mxu1 %v20315_v0 }
0x2df4   :  { %17503 = vmatprep.subr.mxu0 %v20317_v1 }
0x2df5   :  { %17517 = vmatmul.mubr.msk.f32.vlgmr.msra.gmra.mrb[80].mxu1 %vm325_vm6, %v21728_v15 }
0x2df6   :  { %19245 = vmatpush3.bf16.msra.mxu1 %v20570_v23  ;;  %17538 = vmatprep.mubr.msk.f32.mxu1 %vm20316_vm0, %v20317_v1 }
0x2df7   :  { %17504 = vmatpush3.msk.msra.mxu0 %vm251_vm2, %v21653_v20  ;;  %19246 = vmatprep.subr.bf16.mxu1 %v20315_v0 }
0x2df8   :  { %19237 = vmatprep.subr.bf16.mxu0 %v20315_v0 }
0x2dfa   :  { %19248 = vmatpush3.bf16.msra.mxu1 %v20590_v33 }
0x2dfb   :  { %19255 = vmatprep.subr.bf16.mxu1 %v20315_v0 }
0x2eb0   :  { %v6242_v61 = vpop.f32.mrb[74].mxu0  ;;  %v21858_v27 = vpop.f32.mrb[76].mxu1 }
0x2eb1   :  { %v21863_v58 = vadd.f32 %v6242_v61, %v5451_v21  ;;  %v6244_v10 = vpop.f32.mrb[75].mxu0  ;;  %v21865_v44 = vpop.f32.mrb[77].mxu1 }
0x2eb2   :  { %v21870_v63 = vadd.f32 %v6244_v10, %v5452_v4 }
0x2eb3   :  { %v6341_v7 = vsub.f32 %v21863_v58, %v21858_v27 }
0x2eb4   :  { %v6342_v17 = vsub.f32 %v21870_v63, %v21865_v44 }
0x2ec0   :  { %v21876_v50 = vpop.f32.mrb[76].mxu0  ;;  %v21878_v22 = vpop.f32.mrb[78].mxu1 }
0x2ec1   :  { %v6488_v48 = vmul.f32 %v21876_v50, %v21876_v50  ;;  %v6489_v2 = vmul.f32 %v21878_v22, %v21878_v22  ;;  %v17475_v21 = vpop.f32.mrb[77].mxu0  ;;  %v17494_v3 = vpop.f32.mrb[79].mxu1 }
0x2ec3   :  { %v6490_v62 = vadd.f32 %v6489_v2, %v6488_v48 }
0x2ec5   :  { %20114 = vrsqrt.f32 %v6490_v62  ;;  %vm6493_vm8 = vcmp.eq.f32.partialorder %v6490_v62, inf  ;;  %v6496_v59 = vand.u32 2147483648, %v6490_v62  ;;  %vm6495_vm9 = vcmp.eq.f32.partialorder %v6490_v62, 0.0 }
0x2ec8   :  { %v6637_v4 = vpop.f32.mrb[80].mxu1 }
0x2ec9   :  { %v17518_v53 = vpop.f32.mrb[81].mxu1 }
0x2ecf   :  { %v20115_v49 = vpop.eup %20114 }
0x2ed0   :  { %v6492_v36 = vmul.f32 %v20115_v49, %v6490_v62 }
0x2ed2   :  { %v6494_v11 = vsel %vm6493_vm8, %v6490_v62, %v6492_v36 }
0x2ed3   :  { %v6497_v41 = vsel %vm6495_vm9, %v6496_v59, %v6494_v11 }
0x2ed4   :  { %17506 = vmatmul.mubr.msk.f32.vlgmr.msra.gmra.mrb[78].mxu0 %vm247_vm4, %v6497_v41 }
0x2ed5   :  { %19239 = vmatpush3.bf16.msra.mxu0 %v20523_v43  ;;  %17527 = vmatprep.mubr.msk.f32.mxu0 %vm20316_vm0, %v20317_v1 }
0x2ed6   :  { %19240 = vmatprep.subr.bf16.mxu0 %v20315_v0 }
0x2ed9   :  { %19242 = vmatpush3.bf16.msra.mxu0 %v20529_v45 }
0x2eda   :  { %19249 = vmatprep.subr.bf16.mxu0 %v20315_v0 }
0x2edc   :  { %17528 = vmatmul.mubr.msk.f32.vlgmr.msra.gmra.mrb[80].mxu0 %vm325_vm6, %v21728_v15 }
0x2edd   :  { %19251 = vmatpush3.bf16.msra.mxu0 %v20581_v29  ;;  %17549 = vmatprep.mubr.msk.f32.mxu0 %vm20316_vm0, %v20317_v1 }
0x2ede   :  { %19252 = vmatprep.subr.bf16.mxu0 %v20315_v0 }
0x2ee1   :  { %19254 = vmatpush3.bf16.msra.mxu0 %v20594_v35 }
0x2ee2   :  { %19261 = vmatprep.subr.bf16.mxu0 %v20315_v0 }
0x2ee4   :  { %17550 = vmatmul.mubr.msk.f32.vlgmr.msra.gmra.mrb[82].mxu0 %vm325_vm6, %v21759_v52 }
0x2ee5   :  { %19263 = vmatpush3.bf16.msra.mxu0 %v20658_v26  ;;  %17571 = vmatprep.mubr.msk.f32.mxu0 %vm20316_vm0, %v20317_v1 }
0x2ee6   :  { %19264 = vmatprep.subr.bf16.mxu0 %v20315_v0 }
0x2ee9   :  { %19266 = vmatpush3.bf16.msra.mxu0 %v20664_v28 }
0x2fa7   :  { %v6567_v15 = vpop.f32.mrb[78].mxu0 }
0x2fa8   :  { %v6568_v47 = vadd.f32 %v21712_v56, %v6567_v15  ;;  %v17507_v40 = vpop.f32.mrb[79].mxu0 }
0x2faa   :  { %v6641_v8 = vadd.f32 %v6637_v4, %v6568_v47 }
0x2fac   :  { %v6642_v16 = vmul.f32 0.5, %v6641_v8 }
0x2fae   :  { %20116 = vtanh.f32 %v6642_v16 }
0x2faf   :  { %v6712_v57 = vpop.f32.mrb[80].mxu0 }
0x2fb0   :  { %v17529_v31 = vpop.f32.mrb[81].mxu0  ;;  %v6713_v2 = vadd.f32 %v21718_v46, %v6712_v57 }
0x2fb7   :  { %v6872_v42 = vpop.f32.mrb[82].mxu0 }
0x2fb8   :  { %v20117_v60 = vpop.eup %20116  ;;  %v17551_v61 = vpop.f32.mrb[83].mxu0 }
0x2fb9   :  { %v6644_v10 = vadd.f32 1.0, %v20117_v60 }
0x2fbb   :  { %v6645_v48 = vmul.f32 0.5, %v6644_v10 }
0x2fbd   :  { %v6716_v21 = vmul.f32 %v6713_v2, %v6645_v48  ;;  %v6723_v4 = vsub.f32 1.0, %v6645_v48  ;;  %v6729_v36 = vmul.f32 %v6645_v48, %v21724_v14 }
0x2fbf   :  { %6718 = vrot.lane.b32.xlu0 %v6716_v21, %s20318_s20 }
0x3031   :  { %v6719_v3 = vpop.permute.xlu0 %6718 }
0x3032   :  { %v6721_v62 = vadd.f32 %v6719_v3, %v6568_v47 }
0x3034   :  { %20118 = vtanh.f32 %v6721_v62 }
0x303e   :  { %v20119_v53 = vpop.eup %20118 }
0x303f   :  { %6725 = vrot.lane.b32.xlu1 %v20119_v53, %s20319_s3 }
0x30b1   :  { %v6726_v49 = vpop.permute.xlu1 %6725 }
0x30b2   :  { %v6728_v59 = vmul.f32 %v6726_v49, %v6723_v4 }
0x30b4   :  { %v21911_v11 = vadd.f32 %v6729_v36, %v6728_v59  ;;  %v7048_v36 = vld [vmem:[#allocation2 + $0x238] sm:$0xff]  ;;  %v7050_v59 = vld [vmem:[#allocation2 + $0x248] sm:$0xff] }
0x30b6   :  { %6732 = vrot.lane.b32.xlu0 %v21911_v11, %s20319_s3 }
0x3128   :  { %v21915_v41 = vpop.permute.xlu0 %6732 }
0x3129   :  { %17539 = vmatmul.mubr.msk.f32.vlgmr.msra.gmra.mrb[82].mxu1 %vm325_vm6, %v21915_v41 }
0x312a   :  { %19257 = vmatpush3.bf16.msra.mxu1 %v20615_v51  ;;  %17560 = vmatprep.mubr.msk.f32.mxu1 %vm20316_vm0, %v20317_v1 }
0x312b   :  { %19258 = vmatprep.subr.bf16.mxu1 %v20315_v0 }
0x312e   :  { %19260 = vmatpush3.bf16.msra.mxu1 %v20628_v55 }
0x3131   :  { %17561 = vmatmul.mubr.msk.f32.vlgmr.msra.gmra.mrb[84].mxu1 %vm325_vm6, %v21759_v52 }
0x3132   :  { %7130 = vmatprep.mubr.f32.mxu1 %v20317_v1 }
0x31fc   :  { %v6802_v14 = vpop.f32.mrb[82].mxu1 }
0x31fd   :  { %v6803_v15 = vadd.f32 %v21743_v39, %v6802_v14  ;;  %v17540_v47 = vpop.f32.mrb[83].mxu1  ;;  %v15464_v14 = vld [vmem:[%s23628_s4 + $0x238] sm:$0xff] }
0x31fe   :  { %v7047_v47 = vld [vmem:[#allocation2 + $0x230] sm:$0xff] }
0x31ff   :  { %v6876_v40 = vadd.f32 %v6872_v42, %v6803_v15 }
0x3201   :  { %v6877_v8 = vmul.f32 0.5, %v6876_v40  ;;  %v7049_v40 = vld [vmem:[#allocation2 + $0x240] sm:$0xff] }
0x3203   :  { %20120 = vtanh.f32 %v6877_v8 }
0x3204   :  { %v6947_v16 = vpop.f32.mrb[84].mxu1 }
0x3205   :  { %v17562_v57 = vpop.f32.mrb[85].mxu1  ;;  %v6948_v10 = vadd.f32 %v21749_v6, %v6947_v16  ;;  %v19269_v16 = vpack.c.bf16 %v7049_v40, %v7047_v47  ;;  %v15471_v47 = vld [vmem:[%s23628_s4 + $0x270] sm:$0x1] }
0x3206   :  { %v15463_v57 = vld [vmem:[%s23628_s4 + $0x230] sm:$0xff] }
0x320d   :  { %v20121_v31 = vpop.eup %20120 }
0x320e   :  { %v6879_v60 = vadd.f32 1.0, %v20121_v31  ;;  %v15465_v31 = vld [vmem:[%s23628_s4 + $0x240] sm:$0xff] }
0x3210   :  { %v6880_v61 = vmul.f32 0.5, %v6879_v60  ;;  %v19277_v60 = vpack.c.bf16 %v15465_v31, %v15463_v57 }
0x3212   :  { %v6951_v48 = vmul.f32 %v6948_v10, %v6880_v61  ;;  %v6958_v3 = vsub.f32 1.0, %v6880_v61  ;;  %v6964_v62 = vmul.f32 %v6880_v61, %v21755_v32  ;;  %v19267_v32 = vpack.c.bf16 %v7050_v59, %v7048_v36  ;;  %v7052_v61 = vld [vmem:[#allocation2 + $0x258] sm:$0xff]  ;;  %v7054_v10 = vld [vmem:[#allocation2 + $0x268] sm:$0xff]  ;;  %v15469_v36 = vld [vmem:[%s23628_s4 + $0x260] sm:$0xff] }
0x3214   :  { %6953 = vrot.lane.b32.xlu1 %v6951_v48, %s20318_s20  ;;  %19268 = vmatprep.subr.bf16.mxu1 %v19267_v32  ;;  %v15468_v48 = vld [vmem:[%s23628_s4 + $0x258] sm:$0xff] }
0x3215   :  { %19270 = vmatpush1.bf16.msra.mxu1 %v19269_v16  ;;  %v15472_v32 = vld [vmem:[%s23628_s4 + $0x278] sm:$0x1] }
0x3286   :  { %v6954_v52 = vpop.permute.xlu1 %6953 }
0x3287   :  { %v6956_v2 = vadd.f32 %v6954_v52, %v6803_v15  ;;  %v15466_v15 = vld [vmem:[%s23628_s4 + $0x248] sm:$0xff]  ;;  %v19271_v52 = vpack.c.bf16 %v7054_v10, %v7052_v61 }
0x3288   :  { %v19275_v8 = vpack.c.bf16 %v15466_v15, %v15464_v14  ;;  %v7056_v14 = vld [vmem:[#allocation2 + $0x278] sm:$0x1]  ;;  %v7055_v15 = vld [vmem:[#allocation2 + $0x270] sm:$0x1] }
0x3289   :  { %20122 = vtanh.f32 %v6956_v2  ;;  %v15470_v2 = vld [vmem:[%s23628_s4 + $0x268] sm:$0xff]  ;;  %19272 = vmatprep.subr.bf16.mxu1 %v19271_v52 }
0x328a   :  { %19276 = vmatprep.subr.bf16.mxu0 %v19275_v8 }
0x3293   :  { %v20123_v21 = vpop.eup %20122 }
0x3294   :  { %6960 = vrot.lane.b32.xlu0 %v20123_v21, %s20319_s3  ;;  %v7051_v21 = vld [vmem:[#allocation2 + $0x250] sm:$0xff] }
0x3306   :  { %v6961_v42 = vpop.permute.xlu0 %6960 }
0x3307   :  { %v6963_v53 = vmul.f32 %v6961_v42, %v6958_v3  ;;  %v7053_v3 = vld [vmem:[#allocation2 + $0x260] sm:$0xff]  ;;  %v19279_v42 = vpack.c.bf16 %v15470_v2, %v15468_v48 }
0x3309   :  { %v21932_v4 = vadd.f32 %v6964_v62, %v6963_v53  ;;  %v19273_v62 = vpack.c.bf16 %v7053_v3, %v7051_v21  ;;  %v15467_v53 = vld [vmem:[%s23628_s4 + $0x250] sm:$0xff] }
0x330a   :  { %v19281_v59 = vpack.c.bf16 %v15469_v36, %v15467_v53 }
0x330b   :  { %6967 = vrot.lane.b32.xlu1 %v21932_v4, %s20319_s3  ;;  %19274 = vmatpush1.bf16.msra.mxu1 %v19273_v62 }
0x330c   :  { %15460 = vmatprep.subr.msk.mxu1 %vm251_vm2, %v7056_v14 }
0x330f   :  { %15461 = vmatpush1.msk.msra.mxu1 %vm251_vm2, %v7055_v15 }
0x3310   :  { %19283 = vmatprep.subr.bf16.mxu1 %v20315_v0 }
0x337d   :  { %v21936_v49 = vpop.permute.xlu1 %6967 }
0x337e   :  { %17572 = vmatmul.mubr.msk.f32.vlgmr.msra.gmra.mrb[84].mxu0 %vm325_vm6, %v21936_v49 }
0x337f   :  { %7224 = vmatprep.mubr.f32.mxu0 %v20317_v1  ;;  %19278 = vmatpush1.bf16.msra.mxu0 %v19277_v60 }
0x3380   :  { %19280 = vmatprep.subr.bf16.mxu0 %v19279_v42 }
0x3383   :  { %19282 = vmatpush1.bf16.msra.mxu0 %v19281_v59 }
0x3384   :  { %15473 = vmatprep.subr.msk.mxu0 %vm251_vm2, %v15472_v32 }
0x3387   :  { %15474 = vmatpush1.msk.msra.mxu0 %vm251_vm2, %v15471_v47 }
0x3388   :  { %19295 = vmatprep.subr.bf16.mxu0 %v20315_v0 }
0x3451   :  { %v7037_v40 = vpop.f32.mrb[84].mxu0 }
0x3452   :  { %v7038_v8 = vadd.f32 %v21803_v54, %v7037_v40  ;;  %v17573_v16 = vpop.f32.mrb[85].mxu0 }
0x3454   :  { %v7041_v57 = vmul.f32 0.5, %v7038_v8 }
0x3456   :  { %20124 = vtanh.f32 %v7041_v57 }
0x3460   :  { %v20125_v31 = vpop.eup %20124 }
0x3461   :  { %v7043_v60 = vadd.f32 1.0, %v20125_v31 }
0x3463   :  { %v7044_v61 = vmul.f32 0.5, %v7043_v60 }
0x3465   :  { %v7045_v10 = vmul.f32 %v7044_v61, %v21876_v50  ;;  %v7139_v48 = vmul.f32 %v7044_v61, %v21878_v22  ;;  %v15476_v50 = vld [vmem:[%s23624_s0 + $0x10] sm:$0x3] }
0x3467   :  { %15462 = vmatmul.mubr.msk.f32.vlgmr.msra.gmra.mrb[86].mxu1 %vm247_vm4, %v7045_v10  ;;  %15475 = vmatmul.mubr.msk.f32.vlgmr.msra.gmra.mrb[86].mxu0 %vm247_vm4, %v7139_v48 }
0x3468   :  { %19285 = vmatpush3.bf16.msra.mxu1 %v20383_v5  ;;  %19297 = vmatpush3.bf16.msra.mxu0 %v20394_v9 }
0x3469   :  { %19286 = vmatprep.subr.bf16.mxu1 %v20315_v0  ;;  %19298 = vmatprep.subr.bf16.mxu0 %v20315_v0 }
0x346a   :  { %17590 = vmatprep.mubr.msk.f32.mxu1 %vm20316_vm0, %v20317_v1  ;;  %17609 = vmatprep.mubr.msk.f32.mxu0 %vm20316_vm0, %v20317_v1 }
0x346c   :  { %19288 = vmatpush3.bf16.msra.mxu1 %v20403_v12  ;;  %19300 = vmatpush3.bf16.msra.mxu0 %v20407_v13 }
0x346d   :  { %19289 = vmatprep.subr.bf16.mxu1 %v20315_v0  ;;  %19301 = vmatprep.subr.bf16.mxu0 %v20315_v0 }
0x3470   :  { %19291 = vmatpush3.bf16.msra.mxu1 %v20423_v18  ;;  %19303 = vmatpush3.bf16.msra.mxu0 %v20427_v19 }
0x3471   :  { %19292 = vmatprep.subr.bf16.mxu1 %v20315_v0  ;;  %19304 = vmatprep.subr.bf16.mxu0 %v20315_v0 }
0x3474   :  { %19294 = vmatpush3.bf16.msra.mxu1 %v20443_v24  ;;  %19306 = vmatpush3.bf16.msra.mxu0 %v20447_v25 }
0x3475   :  { %19313 = vmatprep.subr.bf16.mxu0 %v20315_v0  ;;  %19307 = vmatprep.subr.bf16.mxu1 %v20315_v0 }
0x3477   :  { %17591 = vmatmul.mubr.msk.f32.vlgmr.msra.gmra.mrb[88].mxu1 %vm89_vm1, %v15476_v50  ;;  %17610 = vmatmul.mubr.msk.f32.vlgmr.msra.gmra.mrb[88].mxu0 %vm89_vm1, %v15476_v50 }
0x3478   :  { %19315 = vmatpush3.bf16.msra.mxu0 %v20483_v34  ;;  %17633 = vmatprep.mubr.msk.f32.mxu0 %vm20316_vm0, %v20317_v1 }
0x3479   :  { %19316 = vmatprep.subr.bf16.mxu0 %v20315_v0  ;;  %19309 = vmatpush3.bf16.msra.mxu1 %v20472_v30 }
0x347a   :  { %19310 = vmatprep.subr.bf16.mxu1 %v20315_v0  ;;  %17622 = vmatprep.mubr.msk.f32.mxu1 %vm20316_vm0, %v20317_v1 }
0x347c   :  { %19318 = vmatpush3.bf16.msra.mxu0 %v20496_v38 }
0x347d   :  { %19312 = vmatpush3.bf16.msra.mxu1 %v20492_v37  ;;  %19325 = vmatprep.subr.bf16.mxu0 %v20315_v0 }
0x347e   :  { %17620 = vmatprep.subr.mxu1 %v20317_v1 }
0x347f   :  { %17634 = vmatmul.mubr.msk.f32.vlgmr.msra.gmra.mrb[90].mxu0 %vm325_vm6, %v21915_v41 }
0x3480   :  { %19327 = vmatpush3.bf16.msra.mxu0 %v20570_v23  ;;  %17655 = vmatprep.mubr.msk.f32.mxu0 %vm20316_vm0, %v20317_v1 }
0x3481   :  { %17621 = vmatpush3.msk.msra.mxu1 %vm251_vm2, %v21653_v20  ;;  %19328 = vmatprep.subr.bf16.mxu0 %v20315_v0 }
0x3482   :  { %19319 = vmatprep.subr.bf16.mxu1 %v20315_v0 }
0x3484   :  { %19330 = vmatpush3.bf16.msra.mxu0 %v20590_v33 }
0x3485   :  { %19337 = vmatprep.subr.bf16.mxu0 %v20315_v0 }
0x353a   :  { %v7132_v22 = vpop.f32.mrb[86].mxu1  ;;  %v22030_v52 = vpop.f32.mrb[86].mxu0 }
0x353b   :  { %v22035_v2 = vadd.f32 %v7132_v22, %v6341_v7  ;;  %v7134_v21 = vpop.f32.mrb[87].mxu1  ;;  %v22037_v3 = vpop.f32.mrb[87].mxu0 }
0x353c   :  { %v22042_v20 = vadd.f32 %v7134_v21, %v6342_v17 }
0x353d   :  { %v7231_v42 = vsub.f32 %v22035_v2, %v22030_v52 }
0x353e   :  { %v7232_v62 = vsub.f32 %v22042_v20, %v22037_v3 }
0x354a   :  { %v22048_v53 = vpop.f32.mrb[88].mxu1  ;;  %v22050_v36 = vpop.f32.mrb[88].mxu0 }
0x354b   :  { %v7378_v27 = vmul.f32 %v22048_v53, %v22048_v53  ;;  %v7379_v58 = vmul.f32 %v22050_v36, %v22050_v36  ;;  %v17592_v7 = vpop.f32.mrb[89].mxu1  ;;  %v17611_v44 = vpop.f32.mrb[89].mxu0 }
0x354d   :  { %v7380_v63 = vadd.f32 %v7379_v58, %v7378_v27 }
0x354f   :  { %20126 = vrsqrt.f32 %v7380_v63  ;;  %vm7383_vm10 = vcmp.eq.f32.partialorder %v7380_v63, inf  ;;  %v7386_v15 = vand.u32 2147483648, %v7380_v63  ;;  %vm7385_vm11 = vcmp.eq.f32.partialorder %v7380_v63, 0.0 }
0x3552   :  { %v7527_v17 = vpop.f32.mrb[90].mxu0 }
0x3553   :  { %v17635_v59 = vpop.f32.mrb[91].mxu0 }
0x3559   :  { %v20127_v14 = vpop.eup %20126 }
0x355a   :  { %v7382_v32 = vmul.f32 %v20127_v14, %v7380_v63 }
0x355c   :  { %v7384_v47 = vsel %vm7383_vm10, %v7380_v63, %v7382_v32 }
0x355d   :  { %v7387_v40 = vsel %vm7385_vm11, %v7386_v15, %v7384_v47 }
0x355e   :  { %17623 = vmatmul.mubr.msk.f32.vlgmr.msra.gmra.mrb[90].mxu1 %vm247_vm4, %v7387_v40 }
0x355f   :  { %19321 = vmatpush3.bf16.msra.mxu1 %v20523_v43  ;;  %17644 = vmatprep.mubr.msk.f32.mxu1 %vm20316_vm0, %v20317_v1 }
0x3560   :  { %19322 = vmatprep.subr.bf16.mxu1 %v20315_v0 }
0x3563   :  { %19324 = vmatpush3.bf16.msra.mxu1 %v20529_v45 }
0x3564   :  { %19331 = vmatprep.subr.bf16.mxu1 %v20315_v0 }
0x3566   :  { %17645 = vmatmul.mubr.msk.f32.vlgmr.msra.gmra.mrb[92].mxu1 %vm325_vm6, %v21915_v41 }
0x3567   :  { %19333 = vmatpush3.bf16.msra.mxu1 %v20581_v29  ;;  %17666 = vmatprep.mubr.msk.f32.mxu1 %vm20316_vm0, %v20317_v1 }
0x3568   :  { %19334 = vmatprep.subr.bf16.mxu1 %v20315_v0 }
0x356b   :  { %19336 = vmatpush3.bf16.msra.mxu1 %v20594_v35 }
0x356c   :  { %19343 = vmatprep.subr.bf16.mxu1 %v20315_v0 }
0x356e   :  { %17667 = vmatmul.mubr.msk.f32.vlgmr.msra.gmra.mrb[94].mxu1 %vm325_vm6, %v21936_v49 }
0x356f   :  { %19345 = vmatpush3.bf16.msra.mxu1 %v20658_v26  ;;  %17688 = vmatprep.mubr.msk.f32.mxu1 %vm20316_vm0, %v20317_v1 }
0x3570   :  { %19346 = vmatprep.subr.bf16.mxu1 %v20315_v0 }
0x3573   :  { %19348 = vmatpush3.bf16.msra.mxu1 %v20664_v28 }
0x3631   :  { %v7457_v41 = vpop.f32.mrb[90].mxu1 }
0x3632   :  { %v7458_v8 = vadd.f32 %v21712_v56, %v7457_v41  ;;  %v17624_v16 = vpop.f32.mrb[91].mxu1 }
0x3634   :  { %v7531_v57 = vadd.f32 %v7527_v17, %v7458_v8 }
0x3636   :  { %v7532_v31 = vmul.f32 0.5, %v7531_v57 }
0x3638   :  { %20128 = vtanh.f32 %v7532_v31 }
0x3639   :  { %v7602_v60 = vpop.f32.mrb[92].mxu1 }
0x363a   :  { %v17646_v61 = vpop.f32.mrb[93].mxu1  ;;  %v7603_v27 = vadd.f32 %v21718_v46, %v7602_v60 }
0x3641   :  { %v7762_v10 = vpop.f32.mrb[94].mxu1 }
0x3642   :  { %v20129_v48 = vpop.eup %20128  ;;  %v17668_v50 = vpop.f32.mrb[95].mxu1 }
0x3643   :  { %v7534_v22 = vadd.f32 1.0, %v20129_v48 }
0x3645   :  { %v7535_v21 = vmul.f32 0.5, %v7534_v22 }
0x3647   :  { %v7606_v58 = vmul.f32 %v7603_v27, %v7535_v21  ;;  %v7613_v63 = vsub.f32 1.0, %v7535_v21  ;;  %v7619_v59 = vmul.f32 %v7535_v21, %v21911_v11 }
0x3649   :  { %7608 = vrot.lane.b32.xlu0 %v7606_v58, %s20318_s20 }
0x36bb   :  { %v7609_v7 = vpop.permute.xlu0 %7608 }
0x36bc   :  { %v7611_v44 = vadd.f32 %v7609_v7, %v7458_v8  ;;  %v7938_v7 = vld [vmem:[#allocation2 + $0x288] sm:$0xff] }
0x36be   :  { %20130 = vtanh.f32 %v7611_v44  ;;  %v7940_v44 = vld [vmem:[#allocation2 + $0x298] sm:$0xff] }
0x36c8   :  { %v20131_v56 = vpop.eup %20130 }
0x36c9   :  { %7615 = vrot.lane.b32.xlu1 %v20131_v56, %s20319_s3  ;;  %v15491_v56 = vld [vmem:[%s23628_s4 + $0x288] sm:$0xff] }
0x373b   :  { %v7616_v17 = vpop.permute.xlu1 %7615 }
0x373c   :  { %v7618_v14 = vmul.f32 %v7616_v17, %v7613_v63  ;;  %v15493_v63 = vld [vmem:[%s23628_s4 + $0x298] sm:$0xff]  ;;  %v7937_v17 = vld [vmem:[#allocation2 + $0x280] sm:$0xff] }
0x373e   :  { %v22083_v32 = vadd.f32 %v7619_v59, %v7618_v14  ;;  %v7939_v59 = vld [vmem:[#allocation2 + $0x290] sm:$0xff]  ;;  %v19357_v14 = vpack.c.bf16 %v15493_v63, %v15491_v56 }
0x3740   :  { %7622 = vrot.lane.b32.xlu0 %v22083_v32, %s20319_s3  ;;  %19358 = vmatprep.subr.bf16.mxu1 %v19357_v14 }
0x37b2   :  { %v22087_v46 = vpop.permute.xlu0 %7622 }
0x37b3   :  { %17656 = vmatmul.mubr.msk.f32.vlgmr.msra.gmra.mrb[92].mxu0 %vm325_vm6, %v22087_v46 }
0x37b4   :  { %19339 = vmatpush3.bf16.msra.mxu0 %v20615_v51  ;;  %17677 = vmatprep.mubr.msk.f32.mxu0 %vm20316_vm0, %v20317_v1 }
0x37b5   :  { %19340 = vmatprep.subr.bf16.mxu0 %v20315_v0 }
0x37b8   :  { %19342 = vmatpush3.bf16.msra.mxu0 %v20628_v55 }
0x37bb   :  { %17678 = vmatmul.mubr.msk.f32.vlgmr.msra.gmra.mrb[94].mxu0 %vm325_vm6, %v21936_v49 }
0x37bc   :  { %8020 = vmatprep.mubr.f32.mxu0 %v20317_v1 }
0x3886   :  { %v7692_v11 = vpop.f32.mrb[92].mxu0 }
0x3887   :  { %v7693_v15 = vadd.f32 %v21743_v39, %v7692_v11  ;;  %v17657_v47 = vpop.f32.mrb[93].mxu0  ;;  %v19351_v11 = vpack.c.bf16 %v7939_v59, %v7937_v17 }
0x3888   :  { %v15492_v47 = vld [vmem:[%s23628_s4 + $0x290] sm:$0xff] }
0x3889   :  { %v7766_v40 = vadd.f32 %v7762_v10, %v7693_v15 }
0x388b   :  { %v7767_v41 = vmul.f32 0.5, %v7766_v40 }
0x388d   :  { %20132 = vtanh.f32 %v7767_v41  ;;  %v7942_v41 = vld [vmem:[#allocation2 + $0x2a8] sm:$0xff] }
0x388e   :  { %v7837_v8 = vpop.f32.mrb[94].mxu0 }
0x388f   :  { %v17679_v16 = vpop.f32.mrb[95].mxu0  ;;  %v7838_v61 = vadd.f32 %v21749_v6, %v7837_v8  ;;  %v7944_v8 = vld [vmem:[#allocation2 + $0x2b8] sm:$0xff] }
0x3890   :  { %v15495_v16 = vld [vmem:[%s23628_s4 + $0x2a8] sm:$0xff] }
0x3897   :  { %v20133_v57 = vpop.eup %20132 }
0x3898   :  { %v7769_v31 = vadd.f32 1.0, %v20133_v57  ;;  %v19353_v57 = vpack.c.bf16 %v7944_v8, %v7942_v41 }
0x389a   :  { %v7770_v60 = vmul.f32 0.5, %v7769_v31  ;;  %v15497_v31 = vld [vmem:[%s23628_s4 + $0x2b8] sm:$0xff] }
0x389c   :  { %v7841_v48 = vmul.f32 %v7838_v61, %v7770_v60  ;;  %v7848_v39 = vsub.f32 1.0, %v7770_v60  ;;  %v7854_v21 = vmul.f32 %v7770_v60, %v21932_v4  ;;  %v19349_v4 = vpack.c.bf16 %v7940_v44, %v7938_v7  ;;  %v7941_v60 = vld [vmem:[#allocation2 + $0x2a0] sm:$0xff]  ;;  %v7943_v61 = vld [vmem:[#allocation2 + $0x2b0] sm:$0xff] }
0x389d   :  { %v15498_v7 = vld [vmem:[%s23628_s4 + $0x2c0] sm:$0x1] }
0x389e   :  { %7843 = vrot.lane.b32.xlu1 %v7841_v48, %s20318_s20  ;;  %19350 = vmatprep.subr.bf16.mxu0 %v19349_v4  ;;  %v19361_v48 = vpack.c.bf16 %v15497_v31, %v15495_v16 }
0x389f   :  { %19352 = vmatpush1.bf16.msra.mxu0 %v19351_v11 }
0x38a0   :  { %19354 = vmatprep.subr.bf16.mxu0 %v19353_v57 }
0x3910   :  { %v7844_v49 = vpop.permute.xlu1 %7843 }
0x3911   :  { %v7846_v50 = vadd.f32 %v7844_v49, %v7693_v15  ;;  %v15490_v15 = vld [vmem:[%s23628_s4 + $0x280] sm:$0xff]  ;;  %v19355_v49 = vpack.c.bf16 %v7943_v61, %v7941_v60 }
0x3912   :  { %v19359_v40 = vpack.c.bf16 %v15492_v47, %v15490_v15 }
0x3913   :  { %20134 = vtanh.f32 %v7846_v50  ;;  %v15494_v50 = vld [vmem:[%s23628_s4 + $0x2a0] sm:$0xff]  ;;  %19356 = vmatpush1.bf16.msra.mxu0 %v19355_v49 }
0x391d   :  { %v20135_v22 = vpop.eup %20134 }
0x391e   :  { %7850 = vrot.lane.b32.xlu0 %v20135_v22, %s20319_s3  ;;  %v15496_v22 = vld [vmem:[%s23628_s4 + $0x2b0] sm:$0xff] }
0x3990   :  { %v7851_v10 = vpop.permute.xlu0 %7850 }
0x3991   :  { %v7853_v27 = vmul.f32 %v7851_v10, %v7848_v39  ;;  %v19363_v39 = vpack.c.bf16 %v15496_v22, %v15494_v50  ;;  %v7946_v10 = vld [vmem:[#allocation2 + $0x2c8] sm:$0x1] }
0x3992   :  { %15487 = vmatprep.subr.msk.mxu0 %vm251_vm2, %v7946_v10 }
0x3993   :  { %v22104_v58 = vadd.f32 %v7854_v21, %v7853_v27  ;;  %v15499_v21 = vld [vmem:[%s23628_s4 + $0x2c8] sm:$0x1]  ;;  %v7945_v27 = vld [vmem:[#allocation2 + $0x2c0] sm:$0x1] }
0x3994   :  { %15488 = vmatpush1.msk.msra.mxu0 %vm251_vm2, %v7945_v27 }
0x3995   :  { %7857 = vrot.lane.b32.xlu1 %v22104_v58, %s20319_s3  ;;  %19365 = vmatprep.subr.bf16.mxu0 %v20315_v0 }
0x3a07   :  { %v22108_v6 = vpop.permute.xlu1 %7857 }
0x3a08   :  { %17689 = vmatmul.mubr.msk.f32.vlgmr.msra.gmra.mrb[96].mxu1 %vm325_vm6, %v22108_v6 }
0x3a09   :  { %8114 = vmatprep.mubr.f32.mxu1 %v20317_v1  ;;  %19360 = vmatpush1.bf16.msra.mxu1 %v19359_v40 }
0x3a0a   :  { %19362 = vmatprep.subr.bf16.mxu1 %v19361_v48 }
0x3a0d   :  { %19364 = vmatpush1.bf16.msra.mxu1 %v19363_v39 }
0x3a0e   :  { %15500 = vmatprep.subr.msk.mxu1 %vm251_vm2, %v15499_v21  ;;  %v22258_v21 = vld [vmem:[%s23629_s5 + $0xe8] ss:$0 sm:$0xff] }
0x3a11   :  { %15501 = vmatpush1.msk.msra.mxu1 %vm251_vm2, %v15498_v7 }
0x3a12   :  { %19377 = vmatprep.subr.bf16.mxu1 %v20315_v0 }
0x3adb   :  { %v7927_v44 = vpop.f32.mrb[96].mxu1 }
0x3adc   :  { %v7928_v56 = vadd.f32 %v21803_v54, %v7927_v44  ;;  %v17690_v4 = vpop.f32.mrb[97].mxu1  ;;  %v15503_v54 = vld [vmem:[%s23624_s0 + $0x12] sm:$0x3] }
0x3ade   :  { %v7931_v63 = vmul.f32 0.5, %v7928_v56 }
0x3ae0   :  { %20136 = vtanh.f32 %v7931_v63 }
0x3aea   :  { %v20137_v17 = vpop.eup %20136 }
0x3aeb   :  { %v7933_v59 = vadd.f32 1.0, %v20137_v17 }
0x3aed   :  { %v7934_v14 = vmul.f32 0.5, %v7933_v59 }
0x3aef   :  { %v7935_v11 = vmul.f32 %v7934_v14, %v22048_v53  ;;  %v8029_v15 = vmul.f32 %v7934_v14, %v22050_v36  ;;  %v22199_v53 = vld [vmem:[%s23629_s5 + $0x20] sm:$0x1] }
0x3af1   :  { %15489 = vmatmul.mubr.msk.f32.vlgmr.msra.gmra.mrb[96].mxu0 %vm247_vm4, %v7935_v11  ;;  %15502 = vmatmul.mubr.msk.f32.vlgmr.msra.gmra.mrb[98].mxu1 %vm247_vm4, %v8029_v15 }
0x3af2   :  { %19367 = vmatpush3.bf16.msra.mxu0 %v20383_v5  ;;  %19379 = vmatpush3.bf16.msra.mxu1 %v20394_v9 }
0x3af3   :  { %19368 = vmatprep.subr.bf16.mxu0 %v20315_v0  ;;  %19380 = vmatprep.subr.bf16.mxu1 %v20315_v0 }
0x3af4   :  { %17707 = vmatprep.mubr.msk.f32.mxu0 %vm20316_vm0, %v20317_v1  ;;  %17726 = vmatprep.mubr.msk.f32.mxu1 %vm20316_vm0, %v20317_v1 }
0x3af6   :  { %19370 = vmatpush3.bf16.msra.mxu0 %v20403_v12  ;;  %19382 = vmatpush3.bf16.msra.mxu1 %v20407_v13 }
0x3af7   :  { %19371 = vmatprep.subr.bf16.mxu0 %v20315_v0  ;;  %19383 = vmatprep.subr.bf16.mxu1 %v20315_v0 }
0x3afa   :  { %19373 = vmatpush3.bf16.msra.mxu0 %v20423_v18  ;;  %19385 = vmatpush3.bf16.msra.mxu1 %v20427_v19 }
0x3afb   :  { %19374 = vmatprep.subr.bf16.mxu0 %v20315_v0  ;;  %19386 = vmatprep.subr.bf16.mxu1 %v20315_v0 }
0x3afe   :  { %19376 = vmatpush3.bf16.msra.mxu0 %v20443_v24  ;;  %19388 = vmatpush3.bf16.msra.mxu1 %v20447_v25 }
0x3aff   :  { %19395 = vmatprep.subr.bf16.mxu1 %v20315_v0  ;;  %19389 = vmatprep.subr.bf16.mxu0 %v20315_v0 }
0x3b01   :  { %17708 = vmatmul.mubr.msk.f32.vlgmr.msra.gmra.mrb[98].mxu0 %vm89_vm1, %v15503_v54  ;;  %17727 = vmatmul.mubr.msk.f32.vlgmr.msra.gmra.mrb[100].mxu1 %vm89_vm1, %v15503_v54  ;;  %v22264_v54 = vld [vmem:[%s23629_s5 + $0xf0] ss:$0 sm:$0xff] }
0x3b02   :  { %19397 = vmatpush3.bf16.msra.mxu1 %v20483_v34  ;;  %17750 = vmatprep.mubr.msk.f32.mxu1 %vm20316_vm0, %v20317_v1 }
0x3b03   :  { %19398 = vmatprep.subr.bf16.mxu1 %v20315_v0  ;;  %19391 = vmatpush3.bf16.msra.mxu0 %v20472_v30 }
0x3b04   :  { %19392 = vmatprep.subr.bf16.mxu0 %v20315_v0  ;;  %17739 = vmatprep.mubr.msk.f32.mxu0 %vm20316_vm0, %v20317_v1 }
0x3b06   :  { %19400 = vmatpush3.bf16.msra.mxu1 %v20496_v38 }
0x3b07   :  { %19394 = vmatpush3.bf16.msra.mxu0 %v20492_v37  ;;  %19407 = vmatprep.subr.bf16.mxu1 %v20315_v0 }
0x3b08   :  { %17737 = vmatprep.subr.mxu0 %v20317_v1 }
0x3b09   :  { %17751 = vmatmul.mubr.msk.f32.vlgmr.msra.gmra.mrb[102].mxu1 %vm325_vm6, %v22087_v46 }
0x3b0a   :  { %19409 = vmatpush3.bf16.msra.mxu1 %v20570_v23  ;;  %17772 = vmatprep.mubr.msk.f32.mxu1 %vm20316_vm0, %v20317_v1 }
0x3b0b   :  { %17738 = vmatpush3.msk.msra.mxu0 %vm251_vm2, %v22199_v53  ;;  %19410 = vmatprep.subr.bf16.mxu1 %v20315_v0 }
0x3b0c   :  { %19401 = vmatprep.subr.bf16.mxu0 %v20315_v0 }
0x3b0e   :  { %19412 = vmatpush3.bf16.msra.mxu1 %v20590_v33 }
0x3b0f   :  { %19419 = vmatprep.subr.bf16.mxu1 %v20315_v0 }
0x3bc4   :  { %v8022_v36 = vpop.f32.mrb[96].mxu0  ;;  %v22207_v47 = vpop.f32.mrb[98].mxu1 }
0x3bc5   :  { %v22212_v40 = vadd.f32 %v8022_v36, %v7231_v42  ;;  %v8024_v41 = vpop.f32.mrb[97].mxu0  ;;  %v22214_v8 = vpop.f32.mrb[99].mxu1 }
0x3bc6   :  { %v22219_v16 = vadd.f32 %v8024_v41, %v7232_v62 }
0x3bc7   :  { %v8121_v57 = vsub.f32 %v22212_v40, %v22207_v47 }
0x3bc8   :  { %v8122_v31 = vsub.f32 %v22219_v16, %v22214_v8 }
0x3bd4   :  { %v22225_v60 = vpop.f32.mrb[98].mxu0  ;;  %v22227_v61 = vpop.f32.mrb[100].mxu1 }
0x3bd5   :  { %v8268_v52 = vmul.f32 %v22225_v60, %v22225_v60  ;;  %v8269_v2 = vmul.f32 %v22227_v61, %v22227_v61  ;;  %v17709_v42 = vpop.f32.mrb[99].mxu0  ;;  %v17728_v3 = vpop.f32.mrb[101].mxu1 }
0x3bd7   :  { %v8270_v20 = vadd.f32 %v8269_v2, %v8268_v52 }
0x3bd9   :  { %20138 = vrsqrt.f32 %v8270_v20  ;;  %vm8273_vm12 = vcmp.eq.f32.partialorder %v8270_v20, inf  ;;  %v8276_v22 = vand.u32 2147483648, %v8270_v20  ;;  %vm8275_vm13 = vcmp.eq.f32.partialorder %v8270_v20, 0.0 }
0x3bdc   :  { %v8417_v62 = vpop.f32.mrb[102].mxu1 }
0x3bdd   :  { %v17752_v48 = vpop.f32.mrb[103].mxu1 }
0x3be3   :  { %v20139_v49 = vpop.eup %20138 }
0x3be4   :  { %v8272_v50 = vmul.f32 %v20139_v49, %v8270_v20 }
0x3be6   :  { %v8274_v39 = vsel %vm8273_vm12, %v8270_v20, %v8272_v50 }
0x3be7   :  { %v8277_v10 = vsel %vm8275_vm13, %v8276_v22, %v8274_v39  ;;  %v22289_v22 = vld [vmem:[%s23629_s5 + $0xf8] ss:$0 sm:$0xff] }
0x3be8   :  { %17740 = vmatmul.mubr.msk.f32.vlgmr.msra.gmra.mrb[100].mxu0 %vm247_vm4, %v8277_v10 }
0x3be9   :  { %19403 = vmatpush3.bf16.msra.mxu0 %v20523_v43  ;;  %17761 = vmatprep.mubr.msk.f32.mxu0 %vm20316_vm0, %v20317_v1 }
0x3bea   :  { %19404 = vmatprep.subr.bf16.mxu0 %v20315_v0 }
0x3bed   :  { %19406 = vmatpush3.bf16.msra.mxu0 %v20529_v45 }
0x3bee   :  { %19413 = vmatprep.subr.bf16.mxu0 %v20315_v0 }
0x3bf0   :  { %17762 = vmatmul.mubr.msk.f32.vlgmr.msra.gmra.mrb[102].mxu0 %vm325_vm6, %v22087_v46 }
0x3bf1   :  { %19415 = vmatpush3.bf16.msra.mxu0 %v20581_v29  ;;  %17783 = vmatprep.mubr.msk.f32.mxu0 %vm20316_vm0, %v20317_v1 }
0x3bf2   :  { %19416 = vmatprep.subr.bf16.mxu0 %v20315_v0 }
0x3bf5   :  { %19418 = vmatpush3.bf16.msra.mxu0 %v20594_v35 }
0x3bf6   :  { %19425 = vmatprep.subr.bf16.mxu0 %v20315_v0 }
0x3bf8   :  { %17784 = vmatmul.mubr.msk.f32.vlgmr.msra.gmra.mrb[104].mxu0 %vm325_vm6, %v22108_v6 }
0x3bf9   :  { %19427 = vmatpush3.bf16.msra.mxu0 %v20658_v26  ;;  %17805 = vmatprep.mubr.msk.f32.mxu0 %vm20316_vm0, %v20317_v1 }
0x3bfa   :  { %19428 = vmatprep.subr.bf16.mxu0 %v20315_v0 }
0x3bfd   :  { %19430 = vmatpush3.bf16.msra.mxu0 %v20664_v28 }
0x3cbb   :  { %v8347_v46 = vpop.f32.mrb[100].mxu0 }
0x3cbc   :  { %v8348_v27 = vadd.f32 %v22258_v21, %v8347_v46  ;;  %v17741_v7 = vpop.f32.mrb[101].mxu0 }
0x3cbe   :  { %v8421_v44 = vadd.f32 %v8417_v62, %v8348_v27 }
0x3cc0   :  { %v8422_v56 = vmul.f32 0.5, %v8421_v44 }
0x3cc2   :  { %20140 = vtanh.f32 %v8422_v56 }
0x3cc3   :  { %v8492_v4 = vpop.f32.mrb[102].mxu0 }
0x3cc4   :  { %v17763_v63 = vpop.f32.mrb[103].mxu0  ;;  %v8493_v36 = vadd.f32 %v22264_v54, %v8492_v4 }
0x3ccb   :  { %v8652_v17 = vpop.f32.mrb[104].mxu0 }
0x3ccc   :  { %v20141_v59 = vpop.eup %20140  ;;  %v17785_v14 = vpop.f32.mrb[105].mxu0 }
0x3ccd   :  { %v8424_v11 = vadd.f32 1.0, %v20141_v59 }
0x3ccf   :  { %v8425_v15 = vmul.f32 0.5, %v8424_v11 }
0x3cd1   :  { %v8496_v41 = vmul.f32 %v8493_v36, %v8425_v15  ;;  %v8503_v3 = vsub.f32 1.0, %v8425_v15  ;;  %v8509_v62 = vmul.f32 %v8425_v15, %v22083_v32 }
0x3cd3   :  { %8498 = vrot.lane.b32.xlu0 %v8496_v41, %s20318_s20 }
0x3d45   :  { %v8499_v52 = vpop.permute.xlu0 %8498 }
0x3d46   :  { %v8501_v2 = vadd.f32 %v8499_v52, %v8348_v27 }
0x3d48   :  { %20142 = vtanh.f32 %v8501_v2 }
0x3d52   :  { %v20143_v42 = vpop.eup %20142 }
0x3d53   :  { %8505 = vrot.lane.b32.xlu1 %v20143_v42, %s20319_s3 }
0x3dc5   :  { %v8506_v20 = vpop.permute.xlu1 %8505 }
0x3dc6   :  { %v8508_v48 = vmul.f32 %v8506_v20, %v8503_v3  ;;  %v8828_v20 = vld [vmem:[#allocation2 + $0x2d8] sm:$0xff] }
0x3dc8   :  { %v22270_v49 = vadd.f32 %v8509_v62, %v8508_v48  ;;  %v8830_v62 = vld [vmem:[#allocation2 + $0x2e8] sm:$0xff]  ;;  %v15518_v48 = vld [vmem:[%s23628_s4 + $0x2d8] sm:$0xff] }
0x3dca   :  { %8512 = vrot.lane.b32.xlu0 %v22270_v49, %s20319_s3 }
0x3e3c   :  { %v22274_v50 = vpop.permute.xlu0 %8512 }
0x3e3d   :  { %17773 = vmatmul.mubr.msk.f32.vlgmr.msra.gmra.mrb[104].mxu1 %vm325_vm6, %v22274_v50 }
0x3e3e   :  { %19421 = vmatpush3.bf16.msra.mxu1 %v20615_v51  ;;  %17794 = vmatprep.mubr.msk.f32.mxu1 %vm20316_vm0, %v20317_v1 }
0x3e3f   :  { %19422 = vmatprep.subr.bf16.mxu1 %v20315_v0 }
0x3e42   :  { %19424 = vmatpush3.bf16.msra.mxu1 %v20628_v55 }
0x3e45   :  { %17795 = vmatmul.mubr.msk.f32.vlgmr.msra.gmra.mrb[106].mxu1 %vm325_vm6, %v22108_v6  ;;  %v22295_v6 = vld [vmem:[%s23629_s5 + $0x100] ss:$0 sm:$0xff] }
0x3e46   :  { %8910 = vmatprep.mubr.f32.mxu1 %v20317_v1 }
0x3f10   :  { %v8582_v32 = vpop.f32.mrb[104].mxu1 }
0x3f11   :  { %v8583_v39 = vadd.f32 %v22289_v22, %v8582_v32  ;;  %v17774_v10 = vpop.f32.mrb[105].mxu1  ;;  %v15520_v32 = vld [vmem:[%s23628_s4 + $0x2e8] sm:$0xff] }
0x3f12   :  { %v8829_v10 = vld [vmem:[#allocation2 + $0x2e0] sm:$0xff] }
0x3f13   :  { %v8656_v46 = vadd.f32 %v8652_v17, %v8583_v39 }
0x3f15   :  { %v8657_v27 = vmul.f32 0.5, %v8656_v46  ;;  %v19439_v46 = vpack.c.bf16 %v15520_v32, %v15518_v48  ;;  %v15526_v48 = vld [vmem:[%s23628_s4 + $0x318] sm:$0x1]  ;;  %v15525_v32 = vld [vmem:[%s23628_s4 + $0x310] sm:$0x1] }
0x3f17   :  { %20144 = vtanh.f32 %v8657_v27  ;;  %19440 = vmatprep.subr.bf16.mxu0 %v19439_v46 }
0x3f18   :  { %v8727_v7 = vpop.f32.mrb[106].mxu1 }
0x3f19   :  { %v17796_v44 = vpop.f32.mrb[107].mxu1  ;;  %v8728_v59 = vadd.f32 %v22295_v6, %v8727_v7  ;;  %v15517_v7 = vld [vmem:[%s23628_s4 + $0x2d0] sm:$0xff] }
0x3f1a   :  { %v15519_v44 = vld [vmem:[%s23628_s4 + $0x2e0] sm:$0xff] }
0x3f21   :  { %v20145_v56 = vpop.eup %20144 }
0x3f22   :  { %v8659_v4 = vadd.f32 1.0, %v20145_v56  ;;  %v19441_v56 = vpack.c.bf16 %v15519_v44, %v15517_v7 }
0x3f24   :  { %v8660_v63 = vmul.f32 0.5, %v8659_v4  ;;  %v8832_v4 = vld [vmem:[#allocation2 + $0x2f8] sm:$0xff] }
0x3f26   :  { %v8731_v14 = vmul.f32 %v8728_v59, %v8660_v63  ;;  %v8738_v36 = vsub.f32 1.0, %v8660_v63  ;;  %v8744_v52 = vmul.f32 %v8660_v63, %v22104_v58  ;;  %v19431_v58 = vpack.c.bf16 %v8830_v62, %v8828_v20  ;;  %v8834_v63 = vld [vmem:[#allocation2 + $0x308] sm:$0xff]  ;;  %v15522_v59 = vld [vmem:[%s23628_s4 + $0x2f8] sm:$0xff] }
0x3f27   :  { %v8836_v62 = vld [vmem:[#allocation2 + $0x318] sm:$0x1] }
0x3f28   :  { %8733 = vrot.lane.b32.xlu1 %v8731_v14, %s20318_s20  ;;  %19432 = vmatprep.subr.bf16.mxu1 %v19431_v58  ;;  %v19435_v14 = vpack.c.bf16 %v8834_v63, %v8832_v4  ;;  %v8835_v58 = vld [vmem:[#allocation2 + $0x310] sm:$0x1] }
0x3f9a   :  { %v8734_v11 = vpop.permute.xlu1 %8733 }
0x3f9b   :  { %v8736_v15 = vadd.f32 %v8734_v11, %v8583_v39  ;;  %v8827_v39 = vld [vmem:[#allocation2 + $0x2d0] sm:$0xff]  ;;  %v15524_v11 = vld [vmem:[%s23628_s4 + $0x308] sm:$0xff] }
0x3f9c   :  { %v19433_v27 = vpack.c.bf16 %v8829_v10, %v8827_v39  ;;  %v22349_v10 = vld [vmem:[%s23629_s5 + $0x108] ss:$0 sm:$0xff] }
0x3f9d   :  { %20146 = vtanh.f32 %v8736_v15  ;;  %v8831_v15 = vld [vmem:[#allocation2 + $0x2f0] sm:$0xff] }
0x3f9e   :  { %19434 = vmatpush1.bf16.msra.mxu1 %v19433_v27 }
0x3f9f   :  { %19436 = vmatprep.subr.bf16.mxu1 %v19435_v14 }
0x3fa7   :  { %v20147_v17 = vpop.eup %20146 }
0x3fa8   :  { %8740 = vrot.lane.b32.xlu0 %v20147_v17, %s20319_s3  ;;  %v8833_v17 = vld [vmem:[#allocation2 + $0x300] sm:$0xff] }
0x401a   :  { %v8741_v41 = vpop.permute.xlu0 %8740 }
0x401b   :  { %v8743_v2 = vmul.f32 %v8741_v41, %v8738_v36  ;;  %v19443_v36 = vpack.c.bf16 %v15524_v11, %v15522_v59  ;;  %v19437_v41 = vpack.c.bf16 %v8833_v17, %v8831_v15 }
0x401d   :  { %v22301_v42 = vadd.f32 %v8744_v52, %v8743_v2  ;;  %v15521_v52 = vld [vmem:[%s23628_s4 + $0x2f0] sm:$0xff]  ;;  %v15523_v2 = vld [vmem:[%s23628_s4 + $0x300] sm:$0xff]  ;;  %19438 = vmatpush1.bf16.msra.mxu1 %v19437_v41 }
0x401e   :  { %v19445_v20 = vpack.c.bf16 %v15523_v2, %v15521_v52  ;;  %15514 = vmatprep.subr.msk.mxu1 %vm251_vm2, %v8836_v62 }
0x401f   :  { %8747 = vrot.lane.b32.xlu1 %v22301_v42, %s20319_s3 }
0x4021   :  { %15515 = vmatpush1.msk.msra.mxu1 %vm251_vm2, %v8835_v58 }
0x4022   :  { %19447 = vmatprep.subr.bf16.mxu1 %v20315_v0 }
0x4091   :  { %v22305_v3 = vpop.permute.xlu1 %8747 }
0x4092   :  { %17806 = vmatmul.mubr.msk.f32.vlgmr.msra.gmra.mrb[106].mxu0 %vm325_vm6, %v22305_v3 }
0x4093   :  { %9004 = vmatprep.mubr.f32.mxu0 %v20317_v1  ;;  %19442 = vmatpush1.bf16.msra.mxu0 %v19441_v56 }
0x4094   :  { %19444 = vmatprep.subr.bf16.mxu0 %v19443_v36 }
0x4097   :  { %19446 = vmatpush1.bf16.msra.mxu0 %v19445_v20 }
0x4098   :  { %15527 = vmatprep.subr.msk.mxu0 %vm251_vm2, %v15526_v48 }
0x409b   :  { %15528 = vmatpush1.msk.msra.mxu0 %vm251_vm2, %v15525_v32 }
0x409c   :  { %19459 = vmatprep.subr.bf16.mxu0 %v20315_v0 }
0x4165   :  { %v8817_v39 = vpop.f32.mrb[106].mxu0 }
0x4166   :  { %v8818_v46 = vadd.f32 %v22349_v10, %v8817_v39  ;;  %v17807_v27 = vpop.f32.mrb[107].mxu0 }
0x4168   :  { %v8821_v7 = vmul.f32 0.5, %v8818_v46 }
0x416a   :  { %20148 = vtanh.f32 %v8821_v7 }
0x4174   :  { %v20149_v44 = vpop.eup %20148 }
0x4175   :  { %v8823_v56 = vadd.f32 1.0, %v20149_v44 }
0x4177   :  { %v8824_v4 = vmul.f32 0.5, %v8823_v56 }
0x4179   :  { %v8825_v63 = vmul.f32 %v8824_v4, %v22225_v60  ;;  %v8919_v59 = vmul.f32 %v8824_v4, %v22227_v61  ;;  %v15530_v60 = vld [vmem:[%s23624_s0 + $0x14] sm:$0x3] }
0x417b   :  { %15516 = vmatmul.mubr.msk.f32.vlgmr.msra.gmra.mrb[108].mxu1 %vm247_vm4, %v8825_v63  ;;  %15529 = vmatmul.mubr.msk.f32.vlgmr.msra.gmra.mrb[108].mxu0 %vm247_vm4, %v8919_v59 }
0x417c   :  { %19449 = vmatpush3.bf16.msra.mxu1 %v20383_v5  ;;  %19461 = vmatpush3.bf16.msra.mxu0 %v20394_v9 }
0x417d   :  { %19450 = vmatprep.subr.bf16.mxu1 %v20315_v0  ;;  %19462 = vmatprep.subr.bf16.mxu0 %v20315_v0 }
0x417e   :  { %17824 = vmatprep.mubr.msk.f32.mxu1 %vm20316_vm0, %v20317_v1  ;;  %17843 = vmatprep.mubr.msk.f32.mxu0 %vm20316_vm0, %v20317_v1 }
0x4180   :  { %19452 = vmatpush3.bf16.msra.mxu1 %v20403_v12  ;;  %19464 = vmatpush3.bf16.msra.mxu0 %v20407_v13 }
0x4181   :  { %19453 = vmatprep.subr.bf16.mxu1 %v20315_v0  ;;  %19465 = vmatprep.subr.bf16.mxu0 %v20315_v0 }
0x4184   :  { %19455 = vmatpush3.bf16.msra.mxu1 %v20423_v18  ;;  %19467 = vmatpush3.bf16.msra.mxu0 %v20427_v19 }
0x4185   :  { %19456 = vmatprep.subr.bf16.mxu1 %v20315_v0  ;;  %19468 = vmatprep.subr.bf16.mxu0 %v20315_v0 }
0x4188   :  { %19458 = vmatpush3.bf16.msra.mxu1 %v20443_v24  ;;  %19470 = vmatpush3.bf16.msra.mxu0 %v20447_v25 }
0x4189   :  { %19477 = vmatprep.subr.bf16.mxu0 %v20315_v0  ;;  %19471 = vmatprep.subr.bf16.mxu1 %v20315_v0 }
0x418b   :  { %17825 = vmatmul.mubr.msk.f32.vlgmr.msra.gmra.mrb[110].mxu1 %vm89_vm1, %v15530_v60  ;;  %17844 = vmatmul.mubr.msk.f32.vlgmr.msra.gmra.mrb[110].mxu0 %vm89_vm1, %v15530_v60 }
0x418c   :  { %19479 = vmatpush3.bf16.msra.mxu0 %v20483_v34  ;;  %17867 = vmatprep.mubr.msk.f32.mxu0 %vm20316_vm0, %v20317_v1 }
0x418d   :  { %19480 = vmatprep.subr.bf16.mxu0 %v20315_v0  ;;  %19473 = vmatpush3.bf16.msra.mxu1 %v20472_v30 }
0x418e   :  { %19474 = vmatprep.subr.bf16.mxu1 %v20315_v0  ;;  %17856 = vmatprep.mubr.msk.f32.mxu1 %vm20316_vm0, %v20317_v1 }
0x4190   :  { %19482 = vmatpush3.bf16.msra.mxu0 %v20496_v38 }
0x4191   :  { %19476 = vmatpush3.bf16.msra.mxu1 %v20492_v37  ;;  %19489 = vmatprep.subr.bf16.mxu0 %v20315_v0 }
0x4192   :  { %17854 = vmatprep.subr.mxu1 %v20317_v1 }
0x4193   :  { %17868 = vmatmul.mubr.msk.f32.vlgmr.msra.gmra.mrb[112].mxu0 %vm325_vm6, %v22274_v50 }
0x4194   :  { %19491 = vmatpush3.bf16.msra.mxu0 %v20570_v23  ;;  %17889 = vmatprep.mubr.msk.f32.mxu0 %vm20316_vm0, %v20317_v1 }
0x4195   :  { %17855 = vmatpush3.msk.msra.mxu1 %vm251_vm2, %v22199_v53  ;;  %19492 = vmatprep.subr.bf16.mxu0 %v20315_v0 }
0x4196   :  { %19483 = vmatprep.subr.bf16.mxu1 %v20315_v0 }
0x4198   :  { %19494 = vmatpush3.bf16.msra.mxu0 %v20590_v33 }
0x4199   :  { %19501 = vmatprep.subr.bf16.mxu0 %v20315_v0 }
0x424e   :  { %v8912_v61 = vpop.f32.mrb[108].mxu1  ;;  %v22404_v14 = vpop.f32.mrb[108].mxu0 }
0x424f   :  { %v22409_v11 = vadd.f32 %v8912_v61, %v8121_v57  ;;  %v8914_v15 = vpop.f32.mrb[109].mxu1  ;;  %v22411_v17 = vpop.f32.mrb[109].mxu0 }
0x4250   :  { %v22416_v36 = vadd.f32 %v8914_v15, %v8122_v31 }
0x4251   :  { %v9011_v41 = vsub.f32 %v22409_v11, %v22404_v14 }
0x4252   :  { %v9012_v52 = vsub.f32 %v22416_v36, %v22411_v17 }
0x425e   :  { %v22422_v2 = vpop.f32.mrb[110].mxu1  ;;  %v22424_v20 = vpop.f32.mrb[110].mxu0 }
0x425f   :  { %v9158_v47 = vmul.f32 %v22422_v2, %v22422_v2  ;;  %v9159_v40 = vmul.f32 %v22424_v20, %v22424_v20  ;;  %v17826_v57 = vpop.f32.mrb[111].mxu1  ;;  %v17845_v8 = vpop.f32.mrb[111].mxu0 }
0x4261   :  { %v9160_v16 = vadd.f32 %v9159_v40, %v9158_v47 }
0x4263   :  { %20150 = vrsqrt.f32 %v9160_v16  ;;  %vm9163_vm14 = vcmp.eq.f32.partialorder %v9160_v16, inf  ;;  %v9166_v32 = vand.u32 2147483648, %v9160_v16  ;;  %vm9165_vm15 = vcmp.eq.f32.partialorder %v9160_v16, 0.0 }
0x4266   :  { %v9307_v31 = vpop.f32.mrb[112].mxu0 }
0x4267   :  { %v17869_v62 = vpop.f32.mrb[113].mxu0 }
0x426d   :  { %v20151_v48 = vpop.eup %20150 }
0x426e   :  { %v9162_v58 = vmul.f32 %v20151_v48, %v9160_v16 }
0x4270   :  { %v9164_v39 = vsel %vm9163_vm14, %v9160_v16, %v9162_v58 }
0x4271   :  { %v9167_v46 = vsel %vm9165_vm15, %v9166_v32, %v9164_v39 }
0x4272   :  { %17857 = vmatmul.mubr.msk.f32.vlgmr.msra.gmra.mrb[112].mxu1 %vm247_vm4, %v9167_v46 }
0x4273   :  { %19485 = vmatpush3.bf16.msra.mxu1 %v20523_v43  ;;  %17878 = vmatprep.mubr.msk.f32.mxu1 %vm20316_vm0, %v20317_v1 }
0x4274   :  { %19486 = vmatprep.subr.bf16.mxu1 %v20315_v0 }
0x4277   :  { %19488 = vmatpush3.bf16.msra.mxu1 %v20529_v45 }
0x4278   :  { %19495 = vmatprep.subr.bf16.mxu1 %v20315_v0 }
0x427a   :  { %17879 = vmatmul.mubr.msk.f32.vlgmr.msra.gmra.mrb[114].mxu1 %vm325_vm6, %v22274_v50 }
0x427b   :  { %19497 = vmatpush3.bf16.msra.mxu1 %v20581_v29  ;;  %17900 = vmatprep.mubr.msk.f32.mxu1 %vm20316_vm0, %v20317_v1 }
0x427c   :  { %19498 = vmatprep.subr.bf16.mxu1 %v20315_v0 }
0x427f   :  { %19500 = vmatpush3.bf16.msra.mxu1 %v20594_v35 }
0x4280   :  { %19507 = vmatprep.subr.bf16.mxu1 %v20315_v0 }
0x4282   :  { %17901 = vmatmul.mubr.msk.f32.vlgmr.msra.gmra.mrb[116].mxu1 %vm325_vm6, %v22305_v3 }
0x4283   :  { %19509 = vmatpush3.bf16.msra.mxu1 %v20658_v26  ;;  %17922 = vmatprep.mubr.msk.f32.mxu1 %vm20316_vm0, %v20317_v1 }
0x4284   :  { %19510 = vmatprep.subr.bf16.mxu1 %v20315_v0 }
0x4287   :  { %19512 = vmatpush3.bf16.msra.mxu1 %v20664_v28 }
0x4345   :  { %v9237_v50 = vpop.f32.mrb[112].mxu1 }
0x4346   :  { %v9238_v27 = vadd.f32 %v22258_v21, %v9237_v50  ;;  %v17858_v7 = vpop.f32.mrb[113].mxu1 }
0x4348   :  { %v9311_v44 = vadd.f32 %v9307_v31, %v9238_v27 }
0x434a   :  { %v9312_v56 = vmul.f32 0.5, %v9311_v44 }
0x434c   :  { %20152 = vtanh.f32 %v9312_v56 }
0x434d   :  { %v9382_v4 = vpop.f32.mrb[114].mxu1 }
0x434e   :  { %v17880_v63 = vpop.f32.mrb[115].mxu1  ;;  %v9383_v40 = vadd.f32 %v22264_v54, %v9382_v4 }
0x4355   :  { %v9542_v59 = vpop.f32.mrb[116].mxu1 }
0x4356   :  { %v20153_v60 = vpop.eup %20152  ;;  %v17902_v61 = vpop.f32.mrb[117].mxu1 }
0x4357   :  { %v9314_v15 = vadd.f32 1.0, %v20153_v60 }
0x4359   :  { %v9315_v47 = vmul.f32 0.5, %v9314_v15 }
0x435b   :  { %v9386_v57 = vmul.f32 %v9383_v40, %v9315_v47  ;;  %v9393_v31 = vsub.f32 1.0, %v9315_v47  ;;  %v9399_v58 = vmul.f32 %v9315_v47, %v22270_v49 }
0x435d   :  { %9388 = vrot.lane.b32.xlu0 %v9386_v57, %s20318_s20 }
0x43cf   :  { %v9389_v8 = vpop.permute.xlu0 %9388 }
0x43d0   :  { %v9391_v16 = vadd.f32 %v9389_v8, %v9238_v27 }
0x43d2   :  { %20154 = vtanh.f32 %v9391_v16 }
0x43dc   :  { %v20155_v62 = vpop.eup %20154 }
0x43dd   :  { %9395 = vrot.lane.b32.xlu1 %v20155_v62, %s20319_s3 }
0x444f   :  { %v9396_v48 = vpop.permute.xlu1 %9395 }
0x4450   :  { %v9398_v32 = vmul.f32 %v9396_v48, %v9393_v31 }
0x4452   :  { %v22457_v39 = vadd.f32 %v9399_v58, %v9398_v32  ;;  %v9718_v58 = vld [vmem:[#allocation2 + $0x328] sm:$0xff]  ;;  %v9720_v32 = vld [vmem:[#allocation2 + $0x338] sm:$0xff] }
0x4454   :  { %9402 = vrot.lane.b32.xlu0 %v22457_v39, %s20319_s3 }
0x44c6   :  { %v22461_v46 = vpop.permute.xlu0 %9402 }
0x44c7   :  { %17890 = vmatmul.mubr.msk.f32.vlgmr.msra.gmra.mrb[114].mxu0 %vm325_vm6, %v22461_v46 }
0x44c8   :  { %19503 = vmatpush3.bf16.msra.mxu0 %v20615_v51  ;;  %17911 = vmatprep.mubr.msk.f32.mxu0 %vm20316_vm0, %v20317_v1 }
0x44c9   :  { %19504 = vmatprep.subr.bf16.mxu0 %v20315_v0 }
0x44cc   :  { %19506 = vmatpush3.bf16.msra.mxu0 %v20628_v55 }
0x44cf   :  { %17912 = vmatmul.mubr.msk.f32.vlgmr.msra.gmra.mrb[116].mxu0 %vm325_vm6, %v22305_v3 }
0x44d0   :  { %9800 = vmatprep.mubr.f32.mxu0 %v20317_v1 }
0x459a   :  { %v9472_v49 = vpop.f32.mrb[114].mxu0 }
0x459b   :  { %v9473_v50 = vadd.f32 %v22289_v22, %v9472_v49  ;;  %v17891_v27 = vpop.f32.mrb[115].mxu0  ;;  %v15545_v49 = vld [vmem:[%s23628_s4 + $0x328] sm:$0xff] }
0x459c   :  { %v9717_v27 = vld [vmem:[#allocation2 + $0x320] sm:$0xff] }
0x459d   :  { %v9546_v7 = vadd.f32 %v9542_v59, %v9473_v50 }
0x459f   :  { %v9547_v44 = vmul.f32 0.5, %v9546_v7  ;;  %v9719_v7 = vld [vmem:[#allocation2 + $0x330] sm:$0xff] }
0x45a1   :  { %20156 = vtanh.f32 %v9547_v44 }
0x45a2   :  { %v9617_v56 = vpop.f32.mrb[116].mxu0 }
0x45a3   :  { %v17913_v4 = vpop.f32.mrb[117].mxu0  ;;  %v9618_v15 = vadd.f32 %v22295_v6, %v9617_v56  ;;  %v19515_v56 = vpack.c.bf16 %v9719_v7, %v9717_v27  ;;  %v15552_v27 = vld [vmem:[%s23628_s4 + $0x360] sm:$0x1] }
0x45a4   :  { %v15544_v4 = vld [vmem:[%s23628_s4 + $0x320] sm:$0xff] }
0x45ab   :  { %v20157_v63 = vpop.eup %20156 }
0x45ac   :  { %v9549_v60 = vadd.f32 1.0, %v20157_v63  ;;  %v15546_v63 = vld [vmem:[%s23628_s4 + $0x330] sm:$0xff] }
0x45ae   :  { %v9550_v61 = vmul.f32 0.5, %v9549_v60  ;;  %v19523_v60 = vpack.c.bf16 %v15546_v63, %v15544_v4 }
0x45b0   :  { %v9621_v47 = vmul.f32 %v9618_v15, %v9550_v61  ;;  %v9628_v8 = vsub.f32 1.0, %v9550_v61  ;;  %v9634_v16 = vmul.f32 %v9550_v61, %v22301_v42  ;;  %v19513_v42 = vpack.c.bf16 %v9720_v32, %v9718_v58  ;;  %v9722_v61 = vld [vmem:[#allocation2 + $0x348] sm:$0xff]  ;;  %v9724_v15 = vld [vmem:[#allocation2 + $0x358] sm:$0xff]  ;;  %v15550_v58 = vld [vmem:[%s23628_s4 + $0x350] sm:$0xff] }
0x45b2   :  { %9623 = vrot.lane.b32.xlu1 %v9621_v47, %s20318_s20  ;;  %19514 = vmatprep.subr.bf16.mxu0 %v19513_v42  ;;  %v15549_v47 = vld [vmem:[%s23628_s4 + $0x348] sm:$0xff] }
0x45b3   :  { %19516 = vmatpush1.bf16.msra.mxu0 %v19515_v56  ;;  %v15553_v42 = vld [vmem:[%s23628_s4 + $0x368] sm:$0x1] }
0x4624   :  { %v9624_v3 = vpop.permute.xlu1 %9623 }
0x4625   :  { %v9626_v40 = vadd.f32 %v9624_v3, %v9473_v50  ;;  %v15547_v50 = vld [vmem:[%s23628_s4 + $0x338] sm:$0xff]  ;;  %v19517_v3 = vpack.c.bf16 %v9724_v15, %v9722_v61 }
0x4626   :  { %v19521_v44 = vpack.c.bf16 %v15547_v50, %v15545_v49  ;;  %v9726_v49 = vld [vmem:[#allocation2 + $0x368] sm:$0x1]  ;;  %v9725_v50 = vld [vmem:[#allocation2 + $0x360] sm:$0x1] }
0x4627   :  { %20158 = vtanh.f32 %v9626_v40  ;;  %v15551_v40 = vld [vmem:[%s23628_s4 + $0x358] sm:$0xff]  ;;  %19518 = vmatprep.subr.bf16.mxu0 %v19517_v3 }
0x4628   :  { %19522 = vmatprep.subr.bf16.mxu1 %v19521_v44 }
0x4631   :  { %v20159_v57 = vpop.eup %20158 }
0x4632   :  { %9630 = vrot.lane.b32.xlu0 %v20159_v57, %s20319_s3  ;;  %v9721_v57 = vld [vmem:[#allocation2 + $0x340] sm:$0xff] }
0x46a4   :  { %v9631_v59 = vpop.permute.xlu0 %9630 }
0x46a5   :  { %v9633_v62 = vmul.f32 %v9631_v59, %v9628_v8  ;;  %v9723_v8 = vld [vmem:[#allocation2 + $0x350] sm:$0xff]  ;;  %v19525_v59 = vpack.c.bf16 %v15551_v40, %v15549_v47 }
0x46a7   :  { %v22478_v31 = vadd.f32 %v9634_v16, %v9633_v62  ;;  %v19519_v16 = vpack.c.bf16 %v9723_v8, %v9721_v57  ;;  %v15548_v62 = vld [vmem:[%s23628_s4 + $0x340] sm:$0xff] }
0x46a8   :  { %v19527_v32 = vpack.c.bf16 %v15550_v58, %v15548_v62 }
0x46a9   :  { %9637 = vrot.lane.b32.xlu1 %v22478_v31, %s20319_s3  ;;  %19520 = vmatpush1.bf16.msra.mxu0 %v19519_v16 }
0x46aa   :  { %15541 = vmatprep.subr.msk.mxu0 %vm251_vm2, %v9726_v49 }
0x46ad   :  { %15542 = vmatpush1.msk.msra.mxu0 %vm251_vm2, %v9725_v50 }
0x46ae   :  { %19529 = vmatprep.subr.bf16.mxu0 %v20315_v0 }
0x471b   :  { %v22482_v48 = vpop.permute.xlu1 %9637 }
0x471c   :  { %17923 = vmatmul.mubr.msk.f32.vlgmr.msra.gmra.mrb[118].mxu1 %vm325_vm6, %v22482_v48 }
0x471d   :  { %9894 = vmatprep.mubr.f32.mxu1 %v20317_v1  ;;  %19524 = vmatpush1.bf16.msra.mxu1 %v19523_v60 }
0x471e   :  { %19526 = vmatprep.subr.bf16.mxu1 %v19525_v59 }
0x4721   :  { %19528 = vmatpush1.bf16.msra.mxu1 %v19527_v32 }
0x4722   :  { %15554 = vmatprep.subr.msk.mxu1 %vm251_vm2, %v15553_v42 }
0x4725   :  { %15555 = vmatpush1.msk.msra.mxu1 %vm251_vm2, %v15552_v27 }
0x4726   :  { %19541 = vmatprep.subr.bf16.mxu1 %v20315_v0 }
0x47ef   :  { %v9707_v7 = vpop.f32.mrb[118].mxu1 }
0x47f0   :  { %v9708_v44 = vadd.f32 %v22349_v10, %v9707_v7  ;;  %v17924_v56 = vpop.f32.mrb[119].mxu1 }
0x47f2   :  { %v9711_v4 = vmul.f32 0.5, %v9708_v44 }
0x47f4   :  { %20160 = vtanh.f32 %v9711_v4 }
0x47fe   :  { %v20161_v63 = vpop.eup %20160 }
0x47ff   :  { %v9713_v60 = vadd.f32 1.0, %v20161_v63 }
0x4801   :  { %v9714_v61 = vmul.f32 0.5, %v9713_v60 }
0x4803   :  { %v9715_v15 = vmul.f32 %v9714_v61, %v22422_v2  ;;  %v9809_v47 = vmul.f32 %v9714_v61, %v22424_v20  ;;  %v15557_v2 = vld [vmem:[%s23624_s0 + $0x16] sm:$0x3] }
0x4805   :  { %15543 = vmatmul.mubr.msk.f32.vlgmr.msra.gmra.mrb[118].mxu0 %vm247_vm4, %v9715_v15  ;;  %15556 = vmatmul.mubr.msk.f32.vlgmr.msra.gmra.mrb[120].mxu1 %vm247_vm4, %v9809_v47 }
0x4806   :  { %19531 = vmatpush3.bf16.msra.mxu0 %v20383_v5  ;;  %19543 = vmatpush3.bf16.msra.mxu1 %v20394_v9 }
0x4807   :  { %19532 = vmatprep.subr.bf16.mxu0 %v20315_v0  ;;  %19544 = vmatprep.subr.bf16.mxu1 %v20315_v0 }
0x4808   :  { %17941 = vmatprep.mubr.msk.f32.mxu0 %vm20316_vm0, %v20317_v1  ;;  %17960 = vmatprep.mubr.msk.f32.mxu1 %vm20316_vm0, %v20317_v1 }
0x480a   :  { %19534 = vmatpush3.bf16.msra.mxu0 %v20403_v12  ;;  %19546 = vmatpush3.bf16.msra.mxu1 %v20407_v13 }
0x480b   :  { %19535 = vmatprep.subr.bf16.mxu0 %v20315_v0  ;;  %19547 = vmatprep.subr.bf16.mxu1 %v20315_v0 }
0x480e   :  { %19537 = vmatpush3.bf16.msra.mxu0 %v20423_v18  ;;  %19549 = vmatpush3.bf16.msra.mxu1 %v20427_v19 }
0x480f   :  { %19538 = vmatprep.subr.bf16.mxu0 %v20315_v0  ;;  %19550 = vmatprep.subr.bf16.mxu1 %v20315_v0 }
0x4812   :  { %19540 = vmatpush3.bf16.msra.mxu0 %v20443_v24  ;;  %19552 = vmatpush3.bf16.msra.mxu1 %v20447_v25 }
0x4813   :  { %19559 = vmatprep.subr.bf16.mxu1 %v20315_v0  ;;  %19553 = vmatprep.subr.bf16.mxu0 %v20315_v0 }
0x4815   :  { %17942 = vmatmul.mubr.msk.f32.vlgmr.msra.gmra.mrb[120].mxu0 %vm89_vm1, %v15557_v2  ;;  %17961 = vmatmul.mubr.msk.f32.vlgmr.msra.gmra.mrb[122].mxu1 %vm89_vm1, %v15557_v2 }
0x4816   :  { %19561 = vmatpush3.bf16.msra.mxu1 %v20483_v34  ;;  %17984 = vmatprep.mubr.msk.f32.mxu1 %vm20316_vm0, %v20317_v1 }
0x4817   :  { %19562 = vmatprep.subr.bf16.mxu1 %v20315_v0  ;;  %19555 = vmatpush3.bf16.msra.mxu0 %v20472_v30 }
0x4818   :  { %19556 = vmatprep.subr.bf16.mxu0 %v20315_v0  ;;  %17973 = vmatprep.mubr.msk.f32.mxu0 %vm20316_vm0, %v20317_v1 }
0x481a   :  { %19564 = vmatpush3.bf16.msra.mxu1 %v20496_v38 }
0x481b   :  { %19558 = vmatpush3.bf16.msra.mxu0 %v20492_v37  ;;  %19571 = vmatprep.subr.bf16.mxu1 %v20315_v0 }
0x481c   :  { %17971 = vmatprep.subr.mxu0 %v20317_v1 }
0x481d   :  { %17985 = vmatmul.mubr.msk.f32.vlgmr.msra.gmra.mrb[124].mxu1 %vm325_vm6, %v22461_v46 }
0x481e   :  { %19573 = vmatpush3.bf16.msra.mxu1 %v20570_v23  ;;  %18006 = vmatprep.mubr.msk.f32.mxu1 %vm20316_vm0, %v20317_v1 }
0x481f   :  { %17972 = vmatpush3.msk.msra.mxu0 %vm251_vm2, %v22199_v53  ;;  %19574 = vmatprep.subr.bf16.mxu1 %v20315_v0 }
0x4820   :  { %19565 = vmatprep.subr.bf16.mxu0 %v20315_v0 }
0x4822   :  { %19576 = vmatpush3.bf16.msra.mxu1 %v20590_v33 }
0x4823   :  { %19583 = vmatprep.subr.bf16.mxu1 %v20315_v0 }
0x48d8   :  { %v9802_v20 = vpop.f32.mrb[118].mxu0  ;;  %v22576_v3 = vpop.f32.mrb[120].mxu1 }
0x48d9   :  { %v22581_v40 = vadd.f32 %v9802_v20, %v9011_v41  ;;  %v9804_v57 = vpop.f32.mrb[119].mxu0  ;;  %v22583_v8 = vpop.f32.mrb[121].mxu1 }
0x48da   :  { %v22588_v53 = vadd.f32 %v9804_v57, %v9012_v52 }
0x48db   :  { %v9901_v59 = vsub.f32 %v22581_v40, %v22576_v3 }
0x48dc   :  { %v9902_v16 = vsub.f32 %v22588_v53, %v22583_v8 }
0x48e8   :  { %v22594_v62 = vpop.f32.mrb[120].mxu0  ;;  %v22596_v58 = vpop.f32.mrb[122].mxu1 }
0x48e9   :  { %v10048_v14 = vmul.f32 %v22594_v62, %v22594_v62  ;;  %v10049_v11 = vmul.f32 %v22596_v58, %v22596_v58  ;;  %v17943_v41 = vpop.f32.mrb[121].mxu0  ;;  %v17962_v17 = vpop.f32.mrb[123].mxu1 }
0x48eb   :  { %v10050_v36 = vadd.f32 %v10049_v11, %v10048_v14 }
0x48ed   :  { %20162 = vrsqrt.f32 %v10050_v36  ;;  %vm10053_vm3 = vcmp.eq.f32.partialorder %v10050_v36, inf  ;;  %v10056_v50 = vand.u32 2147483648, %v10050_v36  ;;  %vm10055_vm5 = vcmp.eq.f32.partialorder %v10050_v36, 0.0 }
0x48f0   :  { %v10197_v52 = vpop.f32.mrb[124].mxu1 }
0x48f1   :  { %v17986_v32 = vpop.f32.mrb[125].mxu1 }
0x48f7   :  { %v20163_v49 = vpop.eup %20162 }
0x48f8   :  { %v10052_v42 = vmul.f32 %v20163_v49, %v10050_v36 }
0x48fa   :  { %v10054_v27 = vsel %vm10053_vm3, %v10050_v36, %v10052_v42 }
0x48fb   :  { %v10057_v7 = vsel %vm10055_vm5, %v10056_v50, %v10054_v27 }
0x48fc   :  { %17974 = vmatmul.mubr.msk.f32.vlgmr.msra.gmra.mrb[122].mxu0 %vm247_vm4, %v10057_v7 }
0x48fd   :  { %19567 = vmatpush3.bf16.msra.mxu0 %v20523_v43  ;;  %17995 = vmatprep.mubr.msk.f32.mxu0 %vm20316_vm0, %v20317_v1 }
0x48fe   :  { %19568 = vmatprep.subr.bf16.mxu0 %v20315_v0 }
0x4901   :  { %19570 = vmatpush3.bf16.msra.mxu0 %v20529_v45 }
0x4902   :  { %19577 = vmatprep.subr.bf16.mxu0 %v20315_v0 }
0x4904   :  { %17996 = vmatmul.mubr.msk.f32.vlgmr.msra.gmra.mrb[124].mxu0 %vm325_vm6, %v22461_v46 }
0x4905   :  { %19579 = vmatpush3.bf16.msra.mxu0 %v20581_v29  ;;  %18017 = vmatprep.mubr.msk.f32.mxu0 %vm20316_vm0, %v20317_v1 }
0x4906   :  { %19580 = vmatprep.subr.bf16.mxu0 %v20315_v0 }
0x4909   :  { %19582 = vmatpush3.bf16.msra.mxu0 %v20594_v35 }
0x490a   :  { %19589 = vmatprep.subr.bf16.mxu0 %v20315_v0 }
0x490c   :  { %18018 = vmatmul.mubr.msk.f32.vlgmr.msra.gmra.mrb[126].mxu0 %vm325_vm6, %v22482_v48 }
0x490d   :  { %19591 = vmatpush3.bf16.msra.mxu0 %v20658_v26  ;;  %18039 = vmatprep.mubr.msk.f32.mxu0 %vm20316_vm0, %v20317_v1 }
0x490e   :  { %19592 = vmatprep.subr.bf16.mxu0 %v20315_v0 }
0x4911   :  { %19594 = vmatpush3.bf16.msra.mxu0 %v20664_v28 }
0x49cf   :  { %v10127_v46 = vpop.f32.mrb[122].mxu0 }
0x49d0   :  { %v10128_v44 = vadd.f32 %v22258_v21, %v10127_v46  ;;  %v17975_v56 = vpop.f32.mrb[123].mxu0 }
0x49d2   :  { %v10201_v4 = vadd.f32 %v10197_v52, %v10128_v44 }
0x49d4   :  { %v10202_v63 = vmul.f32 0.5, %v10201_v4 }
0x49d6   :  { %20164 = vtanh.f32 %v10202_v63 }
0x49d7   :  { %v10272_v60 = vpop.f32.mrb[124].mxu0 }
0x49d8   :  { %v17997_v61 = vpop.f32.mrb[125].mxu0  ;;  %v10273_v14 = vadd.f32 %v22264_v54, %v10272_v60 }
0x49df   :  { %v10432_v15 = vpop.f32.mrb[126].mxu0 }
0x49e0   :  { %v20165_v47 = vpop.eup %20164  ;;  %v18019_v2 = vpop.f32.mrb[127].mxu0 }
0x49e1   :  { %v10204_v20 = vadd.f32 1.0, %v20165_v47 }
0x49e3   :  { %v10205_v57 = vmul.f32 0.5, %v10204_v20 }
0x49e5   :  { %v10276_v11 = vmul.f32 %v10273_v14, %v10205_v57  ;;  %v10283_v36 = vsub.f32 1.0, %v10205_v57  ;;  %v10289_v32 = vmul.f32 %v10205_v57, %v22457_v39 }
0x49e7   :  { %10278 = vrot.lane.b32.xlu0 %v10276_v11, %s20318_s20 }
0x4a59   :  { %v10279_v41 = vpop.permute.xlu0 %10278 }
0x4a5a   :  { %v10281_v17 = vadd.f32 %v10279_v41, %v10128_v44  ;;  %v10608_v41 = vld [vmem:[#allocation2 + $0x378] sm:$0xff] }
0x4a5c   :  { %20166 = vtanh.f32 %v10281_v17  ;;  %v10610_v17 = vld [vmem:[#allocation2 + $0x388] sm:$0xff] }
0x4a66   :  { %v20167_v21 = vpop.eup %20166 }
0x4a67   :  { %10285 = vrot.lane.b32.xlu1 %v20167_v21, %s20319_s3  ;;  %v15572_v21 = vld [vmem:[%s23628_s4 + $0x378] sm:$0xff] }
0x4ad9   :  { %v10286_v52 = vpop.permute.xlu1 %10285 }
0x4ada   :  { %v10288_v49 = vmul.f32 %v10286_v52, %v10283_v36  ;;  %v15574_v36 = vld [vmem:[%s23628_s4 + $0x388] sm:$0xff]  ;;  %v10607_v52 = vld [vmem:[#allocation2 + $0x370] sm:$0xff] }
0x4adc   :  { %v22629_v42 = vadd.f32 %v10289_v32, %v10288_v49  ;;  %v10609_v32 = vld [vmem:[#allocation2 + $0x380] sm:$0xff]  ;;  %v19603_v49 = vpack.c.bf16 %v15574_v36, %v15572_v21 }
0x4ade   :  { %10292 = vrot.lane.b32.xlu0 %v22629_v42, %s20319_s3  ;;  %19604 = vmatprep.subr.bf16.mxu0 %v19603_v49 }
0x4b50   :  { %v22633_v54 = vpop.permute.xlu0 %10292 }
0x4b51   :  { %18007 = vmatmul.mubr.msk.f32.vlgmr.msra.gmra.mrb[126].mxu1 %vm325_vm6, %v22633_v54 }
0x4b52   :  { %19585 = vmatpush3.bf16.msra.mxu1 %v20615_v51  ;;  %18028 = vmatprep.mubr.msk.f32.mxu1 %vm20316_vm0, %v20317_v1 }
0x4b53   :  { %19586 = vmatprep.subr.bf16.mxu1 %v20315_v0 }
0x4b56   :  { %19588 = vmatpush3.bf16.msra.mxu1 %v20628_v55 }
0x4b59   :  { %18029 = vmatmul.mubr.msk.f32.vlgmr.msra.gmra.mrb[128].mxu1 %vm325_vm6, %v22482_v48 }
0x4b5a   :  { %10690 = vmatprep.mubr.f32.mxu1 %v20317_v1 }
0x4c24   :  { %v10362_v39 = vpop.f32.mrb[126].mxu1 }
0x4c25   :  { %v10363_v50 = vadd.f32 %v22289_v22, %v10362_v39  ;;  %v18008_v27 = vpop.f32.mrb[127].mxu1  ;;  %v19597_v39 = vpack.c.bf16 %v10609_v32, %v10607_v52 }
0x4c26   :  { %v15573_v27 = vld [vmem:[%s23628_s4 + $0x380] sm:$0xff] }
0x4c27   :  { %v10436_v7 = vadd.f32 %v10432_v15, %v10363_v50 }
0x4c29   :  { %v10437_v46 = vmul.f32 0.5, %v10436_v7 }
0x4c2b   :  { %20168 = vtanh.f32 %v10437_v46  ;;  %v10612_v46 = vld [vmem:[#allocation2 + $0x398] sm:$0xff] }
0x4c2c   :  { %v10507_v44 = vpop.f32.mrb[128].mxu1 }
0x4c2d   :  { %v18030_v56 = vpop.f32.mrb[129].mxu1  ;;  %v10508_v61 = vadd.f32 %v22295_v6, %v10507_v44  ;;  %v10614_v44 = vld [vmem:[#allocation2 + $0x3a8] sm:$0xff] }
0x4c2e   :  { %v15576_v56 = vld [vmem:[%s23628_s4 + $0x398] sm:$0xff] }
0x4c35   :  { %v20169_v4 = vpop.eup %20168 }
0x4c36   :  { %v10439_v63 = vadd.f32 1.0, %v20169_v4  ;;  %v19599_v4 = vpack.c.bf16 %v10614_v44, %v10612_v46 }
0x4c38   :  { %v10440_v60 = vmul.f32 0.5, %v10439_v63  ;;  %v15578_v63 = vld [vmem:[%s23628_s4 + $0x3a8] sm:$0xff] }
0x4c3a   :  { %v10511_v47 = vmul.f32 %v10508_v61, %v10440_v60  ;;  %v10518_v22 = vsub.f32 1.0, %v10440_v60  ;;  %v10524_v57 = vmul.f32 %v10440_v60, %v22478_v31  ;;  %v19595_v31 = vpack.c.bf16 %v10610_v17, %v10608_v41  ;;  %v10611_v60 = vld [vmem:[#allocation2 + $0x390] sm:$0xff]  ;;  %v10613_v61 = vld [vmem:[#allocation2 + $0x3a0] sm:$0xff] }
0x4c3b   :  { %v15579_v41 = vld [vmem:[%s23628_s4 + $0x3b0] sm:$0x1] }
0x4c3c   :  { %10513 = vrot.lane.b32.xlu1 %v10511_v47, %s20318_s20  ;;  %19596 = vmatprep.subr.bf16.mxu1 %v19595_v31  ;;  %v19607_v47 = vpack.c.bf16 %v15578_v63, %v15576_v56 }
0x4c3d   :  { %19598 = vmatpush1.bf16.msra.mxu1 %v19597_v39 }
0x4c3e   :  { %19600 = vmatprep.subr.bf16.mxu1 %v19599_v4 }
0x4cae   :  { %v10514_v48 = vpop.permute.xlu1 %10513 }
0x4caf   :  { %v10516_v2 = vadd.f32 %v10514_v48, %v10363_v50  ;;  %v15571_v50 = vld [vmem:[%s23628_s4 + $0x370] sm:$0xff]  ;;  %v19601_v48 = vpack.c.bf16 %v10613_v61, %v10611_v60 }
0x4cb0   :  { %v19605_v7 = vpack.c.bf16 %v15573_v27, %v15571_v50 }
0x4cb1   :  { %20170 = vtanh.f32 %v10516_v2  ;;  %v15575_v2 = vld [vmem:[%s23628_s4 + $0x390] sm:$0xff]  ;;  %19602 = vmatpush1.bf16.msra.mxu1 %v19601_v48 }
0x4cbb   :  { %v20171_v20 = vpop.eup %20170 }
0x4cbc   :  { %10520 = vrot.lane.b32.xlu0 %v20171_v20, %s20319_s3  ;;  %v15577_v20 = vld [vmem:[%s23628_s4 + $0x3a0] sm:$0xff] }
0x4d2e   :  { %v10521_v15 = vpop.permute.xlu0 %10520 }
0x4d2f   :  { %v10523_v14 = vmul.f32 %v10521_v15, %v10518_v22  ;;  %v19609_v22 = vpack.c.bf16 %v15577_v20, %v15575_v2  ;;  %v10616_v15 = vld [vmem:[#allocation2 + $0x3b8] sm:$0x1] }
0x4d30   :  { %15568 = vmatprep.subr.msk.mxu1 %vm251_vm2, %v10616_v15 }
0x4d31   :  { %v22650_v11 = vadd.f32 %v10524_v57, %v10523_v14  ;;  %v15580_v57 = vld [vmem:[%s23628_s4 + $0x3b8] sm:$0x1]  ;;  %v10615_v14 = vld [vmem:[#allocation2 + $0x3b0] sm:$0x1] }
0x4d32   :  { %15569 = vmatpush1.msk.msra.mxu1 %vm251_vm2, %v10615_v14 }
0x4d33   :  { %10527 = vrot.lane.b32.xlu1 %v22650_v11, %s20319_s3  ;;  %19611 = vmatprep.subr.bf16.mxu1 %v20315_v0 }
0x4da5   :  { %v22654_v6 = vpop.permute.xlu1 %10527 }
0x4da6   :  { %18040 = vmatmul.mubr.msk.f32.vlgmr.msra.gmra.mrb[128].mxu0 %vm325_vm6, %v22654_v6 }
0x4da7   :  { %10784 = vmatprep.mubr.f32.mxu0 %v20317_v1  ;;  %19606 = vmatpush1.bf16.msra.mxu0 %v19605_v7 }
0x4da8   :  { %19608 = vmatprep.subr.bf16.mxu0 %v19607_v47 }
0x4dab   :  { %19610 = vmatpush1.bf16.msra.mxu0 %v19609_v22 }
0x4dac   :  { %15581 = vmatprep.subr.msk.mxu0 %vm251_vm2, %v15580_v57  ;;  %v22804_v57 = vld [vmem:[%s23629_s5 + $0xe8] ss:$0 sm:$0xff] }
0x4daf   :  { %15582 = vmatpush1.msk.msra.mxu0 %vm251_vm2, %v15579_v41 }
0x4db0   :  { %19623 = vmatprep.subr.bf16.mxu0 %v20315_v0 }
0x4e79   :  { %v10597_v17 = vpop.f32.mrb[128].mxu0 }
0x4e7a   :  { %v10598_v21 = vadd.f32 %v22349_v10, %v10597_v17  ;;  %v18041_v31 = vpop.f32.mrb[129].mxu0  ;;  %v15584_v10 = vld [vmem:[%s23624_s0 + $0x18] sm:$0x3] }
0x4e7c   :  { %v10601_v36 = vmul.f32 0.5, %v10598_v21 }
0x4e7e   :  { %20172 = vtanh.f32 %v10601_v36 }
0x4e88   :  { %v20173_v52 = vpop.eup %20172 }
0x4e89   :  { %v10603_v32 = vadd.f32 1.0, %v20173_v52 }
0x4e8b   :  { %v10604_v49 = vmul.f32 0.5, %v10603_v32 }
0x4e8d   :  { %v10605_v39 = vmul.f32 %v10604_v49, %v22594_v62  ;;  %v10699_v50 = vmul.f32 %v10604_v49, %v22596_v58  ;;  %v22745_v62 = vld [vmem:[%s23629_s5 + $0x20] sm:$0x1] }
0x4e8f   :  { %15570 = vmatmul.mubr.msk.f32.vlgmr.msra.gmra.mrb[130].mxu1 %vm247_vm4, %v10605_v39  ;;  %15583 = vmatmul.mubr.msk.f32.vlgmr.msra.gmra.mrb[130].mxu0 %vm247_vm4, %v10699_v50 }
0x4e90   :  { %19613 = vmatpush3.bf16.msra.mxu1 %v20383_v5  ;;  %19625 = vmatpush3.bf16.msra.mxu0 %v20394_v9 }
0x4e91   :  { %19614 = vmatprep.subr.bf16.mxu1 %v20315_v0  ;;  %19626 = vmatprep.subr.bf16.mxu0 %v20315_v0 }
0x4e92   :  { %18058 = vmatprep.mubr.msk.f32.mxu1 %vm20316_vm0, %v20317_v1  ;;  %18077 = vmatprep.mubr.msk.f32.mxu0 %vm20316_vm0, %v20317_v1 }
0x4e94   :  { %19616 = vmatpush3.bf16.msra.mxu1 %v20403_v12  ;;  %19628 = vmatpush3.bf16.msra.mxu0 %v20407_v13 }
0x4e95   :  { %19617 = vmatprep.subr.bf16.mxu1 %v20315_v0  ;;  %19629 = vmatprep.subr.bf16.mxu0 %v20315_v0 }
0x4e98   :  { %19619 = vmatpush3.bf16.msra.mxu1 %v20423_v18  ;;  %19631 = vmatpush3.bf16.msra.mxu0 %v20427_v19 }
0x4e99   :  { %19620 = vmatprep.subr.bf16.mxu1 %v20315_v0  ;;  %19632 = vmatprep.subr.bf16.mxu0 %v20315_v0 }
0x4e9c   :  { %19622 = vmatpush3.bf16.msra.mxu1 %v20443_v24  ;;  %19634 = vmatpush3.bf16.msra.mxu0 %v20447_v25 }
0x4e9d   :  { %19641 = vmatprep.subr.bf16.mxu0 %v20315_v0  ;;  %19635 = vmatprep.subr.bf16.mxu1 %v20315_v0 }
0x4e9f   :  { %18059 = vmatmul.mubr.msk.f32.vlgmr.msra.gmra.mrb[132].mxu1 %vm89_vm1, %v15584_v10  ;;  %18078 = vmatmul.mubr.msk.f32.vlgmr.msra.gmra.mrb[132].mxu0 %vm89_vm1, %v15584_v10  ;;  %v22810_v10 = vld [vmem:[%s23629_s5 + $0xf0] ss:$0 sm:$0xff] }
0x4ea0   :  { %19643 = vmatpush3.bf16.msra.mxu0 %v20483_v34  ;;  %18101 = vmatprep.mubr.msk.f32.mxu0 %vm20316_vm0, %v20317_v1 }
0x4ea1   :  { %19644 = vmatprep.subr.bf16.mxu0 %v20315_v0  ;;  %19637 = vmatpush3.bf16.msra.mxu1 %v20472_v30 }
0x4ea2   :  { %19638 = vmatprep.subr.bf16.mxu1 %v20315_v0  ;;  %18090 = vmatprep.mubr.msk.f32.mxu1 %vm20316_vm0, %v20317_v1 }
0x4ea4   :  { %19646 = vmatpush3.bf16.msra.mxu0 %v20496_v38 }
0x4ea5   :  { %19640 = vmatpush3.bf16.msra.mxu1 %v20492_v37  ;;  %19653 = vmatprep.subr.bf16.mxu0 %v20315_v0 }
0x4ea6   :  { %18088 = vmatprep.subr.mxu1 %v20317_v1 }
0x4ea7   :  { %18102 = vmatmul.mubr.msk.f32.vlgmr.msra.gmra.mrb[134].mxu0 %vm325_vm6, %v22633_v54 }
0x4ea8   :  { %19655 = vmatpush3.bf16.msra.mxu0 %v20570_v23  ;;  %18123 = vmatprep.mubr.msk.f32.mxu0 %vm20316_vm0, %v20317_v1 }
0x4ea9   :  { %18089 = vmatpush3.msk.msra.mxu1 %vm251_vm2, %v22745_v62  ;;  %19656 = vmatprep.subr.bf16.mxu0 %v20315_v0 }
0x4eaa   :  { %19647 = vmatprep.subr.bf16.mxu1 %v20315_v0 }
0x4eac   :  { %19658 = vmatpush3.bf16.msra.mxu0 %v20590_v33 }
0x4ead   :  { %19665 = vmatprep.subr.bf16.mxu0 %v20315_v0 }
0x4f62   :  { %v10692_v58 = vpop.f32.mrb[130].mxu1  ;;  %v22753_v27 = vpop.f32.mrb[130].mxu0 }
0x4f63   :  { %v22758_v7 = vadd.f32 %v10692_v58, %v9901_v59  ;;  %v10694_v46 = vpop.f32.mrb[131].mxu1  ;;  %v22760_v44 = vpop.f32.mrb[131].mxu0 }
0x4f64   :  { %v22765_v56 = vadd.f32 %v10694_v46, %v9902_v16 }
0x4f65   :  { %v10791_v4 = vsub.f32 %v22758_v7, %v22753_v27 }
0x4f66   :  { %v10792_v63 = vsub.f32 %v22765_v56, %v22760_v44 }
0x4f72   :  { %v22771_v60 = vpop.f32.mrb[132].mxu1  ;;  %v22773_v61 = vpop.f32.mrb[132].mxu0 }
0x4f73   :  { %v10938_v3 = vmul.f32 %v22771_v60, %v22771_v60  ;;  %v10939_v40 = vmul.f32 %v22773_v61, %v22773_v61  ;;  %v18060_v59 = vpop.f32.mrb[133].mxu1  ;;  %v18079_v8 = vpop.f32.mrb[133].mxu0 }
0x4f75   :  { %v10940_v53 = vadd.f32 %v10939_v40, %v10938_v3 }
0x4f77   :  { %20174 = vrsqrt.f32 %v10940_v53  ;;  %vm10943_vm7 = vcmp.eq.f32.partialorder %v10940_v53, inf  ;;  %v10946_v20 = vand.u32 2147483648, %v10940_v53  ;;  %vm10945_vm8 = vcmp.eq.f32.partialorder %v10940_v53, 0.0 }
0x4f7a   :  { %v11087_v16 = vpop.f32.mrb[134].mxu0 }
0x4f7b   :  { %v18103_v47 = vpop.f32.mrb[135].mxu0 }
0x4f81   :  { %v20175_v48 = vpop.eup %20174 }
0x4f82   :  { %v10942_v2 = vmul.f32 %v20175_v48, %v10940_v53 }
0x4f84   :  { %v10944_v22 = vsel %vm10943_vm7, %v10940_v53, %v10942_v2 }
0x4f85   :  { %v10947_v15 = vsel %vm10945_vm8, %v10946_v20, %v10944_v22  ;;  %v22835_v20 = vld [vmem:[%s23629_s5 + $0xf8] ss:$0 sm:$0xff] }
0x4f86   :  { %18091 = vmatmul.mubr.msk.f32.vlgmr.msra.gmra.mrb[134].mxu1 %vm247_vm4, %v10947_v15 }
0x4f87   :  { %19649 = vmatpush3.bf16.msra.mxu1 %v20523_v43  ;;  %18112 = vmatprep.mubr.msk.f32.mxu1 %vm20316_vm0, %v20317_v1 }
0x4f88   :  { %19650 = vmatprep.subr.bf16.mxu1 %v20315_v0 }
0x4f8b   :  { %19652 = vmatpush3.bf16.msra.mxu1 %v20529_v45 }
0x4f8c   :  { %19659 = vmatprep.subr.bf16.mxu1 %v20315_v0 }
0x4f8e   :  { %18113 = vmatmul.mubr.msk.f32.vlgmr.msra.gmra.mrb[136].mxu1 %vm325_vm6, %v22633_v54 }
0x4f8f   :  { %19661 = vmatpush3.bf16.msra.mxu1 %v20581_v29  ;;  %18134 = vmatprep.mubr.msk.f32.mxu1 %vm20316_vm0, %v20317_v1 }
0x4f90   :  { %19662 = vmatprep.subr.bf16.mxu1 %v20315_v0 }
0x4f93   :  { %19664 = vmatpush3.bf16.msra.mxu1 %v20594_v35 }
0x4f94   :  { %19671 = vmatprep.subr.bf16.mxu1 %v20315_v0 }
0x4f96   :  { %18135 = vmatmul.mubr.msk.f32.vlgmr.msra.gmra.mrb[138].mxu1 %vm325_vm6, %v22654_v6 }
0x4f97   :  { %19673 = vmatpush3.bf16.msra.mxu1 %v20658_v26  ;;  %18156 = vmatprep.mubr.msk.f32.mxu1 %vm20316_vm0, %v20317_v1 }
0x4f98   :  { %19674 = vmatprep.subr.bf16.mxu1 %v20315_v0 }
0x4f9b   :  { %19676 = vmatpush3.bf16.msra.mxu1 %v20664_v28 }
0x5059   :  { %v11017_v54 = vpop.f32.mrb[134].mxu1 }
0x505a   :  { %v11018_v14 = vadd.f32 %v22804_v57, %v11017_v54  ;;  %v18092_v41 = vpop.f32.mrb[135].mxu1 }
0x505c   :  { %v11091_v17 = vadd.f32 %v11087_v16, %v11018_v14 }
0x505e   :  { %v11092_v21 = vmul.f32 0.5, %v11091_v17 }
0x5060   :  { %20176 = vtanh.f32 %v11092_v21 }
0x5061   :  { %v11162_v31 = vpop.f32.mrb[136].mxu1 }
0x5062   :  { %v18114_v36 = vpop.f32.mrb[137].mxu1  ;;  %v11163_v58 = vadd.f32 %v22810_v10, %v11162_v31 }
0x5069   :  { %v11322_v52 = vpop.f32.mrb[138].mxu1 }
0x506a   :  { %v20177_v32 = vpop.eup %20176  ;;  %v18136_v49 = vpop.f32.mrb[139].mxu1 }
0x506b   :  { %v11094_v39 = vadd.f32 1.0, %v20177_v32 }
0x506d   :  { %v11095_v50 = vmul.f32 0.5, %v11094_v39 }
0x506f   :  { %v11166_v46 = vmul.f32 %v11163_v58, %v11095_v50  ;;  %v11173_v8 = vsub.f32 1.0, %v11095_v50  ;;  %v11179_v16 = vmul.f32 %v11095_v50, %v22629_v42 }
0x5071   :  { %11168 = vrot.lane.b32.xlu0 %v11166_v46, %s20318_s20 }
0x50e3   :  { %v11169_v3 = vpop.permute.xlu0 %11168 }
0x50e4   :  { %v11171_v40 = vadd.f32 %v11169_v3, %v11018_v14 }
0x50e6   :  { %20178 = vtanh.f32 %v11171_v40 }
0x50f0   :  { %v20179_v59 = vpop.eup %20178 }
0x50f1   :  { %11175 = vrot.lane.b32.xlu1 %v20179_v59, %s20319_s3 }
0x5163   :  { %v11176_v53 = vpop.permute.xlu1 %11175 }
0x5164   :  { %v11178_v47 = vmul.f32 %v11176_v53, %v11173_v8  ;;  %v11498_v53 = vld [vmem:[#allocation2 + $0x3c8] sm:$0xff] }
0x5166   :  { %v22816_v48 = vadd.f32 %v11179_v16, %v11178_v47  ;;  %v11500_v16 = vld [vmem:[#allocation2 + $0x3d8] sm:$0xff]  ;;  %v15599_v47 = vld [vmem:[%s23628_s4 + $0x3c8] sm:$0xff] }
0x5168   :  { %11182 = vrot.lane.b32.xlu0 %v22816_v48, %s20319_s3 }
0x51da   :  { %v22820_v2 = vpop.permute.xlu0 %11182 }
0x51db   :  { %18124 = vmatmul.mubr.msk.f32.vlgmr.msra.gmra.mrb[136].mxu0 %vm325_vm6, %v22820_v2 }
0x51dc   :  { %19667 = vmatpush3.bf16.msra.mxu0 %v20615_v51  ;;  %18145 = vmatprep.mubr.msk.f32.mxu0 %vm20316_vm0, %v20317_v1 }
0x51dd   :  { %19668 = vmatprep.subr.bf16.mxu0 %v20315_v0 }
0x51e0   :  { %19670 = vmatpush3.bf16.msra.mxu0 %v20628_v55 }
0x51e3   :  { %18146 = vmatmul.mubr.msk.f32.vlgmr.msra.gmra.mrb[138].mxu0 %vm325_vm6, %v22654_v6  ;;  %v22841_v6 = vld [vmem:[%s23629_s5 + $0x100] ss:$0 sm:$0xff] }
0x51e4   :  { %11580 = vmatprep.mubr.f32.mxu0 %v20317_v1 }
0x52ae   :  { %v11252_v42 = vpop.f32.mrb[136].mxu0 }
0x52af   :  { %v11253_v22 = vadd.f32 %v22835_v20, %v11252_v42  ;;  %v18125_v15 = vpop.f32.mrb[137].mxu0  ;;  %v15601_v42 = vld [vmem:[%s23628_s4 + $0x3d8] sm:$0xff] }
0x52b0   :  { %v11499_v15 = vld [vmem:[#allocation2 + $0x3d0] sm:$0xff] }
0x52b1   :  { %v11326_v54 = vadd.f32 %v11322_v52, %v11253_v22 }
0x52b3   :  { %v11327_v14 = vmul.f32 0.5, %v11326_v54  ;;  %v19685_v54 = vpack.c.bf16 %v15601_v42, %v15599_v47  ;;  %v15607_v47 = vld [vmem:[%s23628_s4 + $0x408] sm:$0x1]  ;;  %v15606_v42 = vld [vmem:[%s23628_s4 + $0x400] sm:$0x1] }
0x52b5   :  { %20180 = vtanh.f32 %v11327_v14  ;;  %19686 = vmatprep.subr.bf16.mxu1 %v19685_v54 }
0x52b6   :  { %v11397_v41 = vpop.f32.mrb[138].mxu0 }
0x52b7   :  { %v18147_v17 = vpop.f32.mrb[139].mxu0  ;;  %v11398_v32 = vadd.f32 %v22841_v6, %v11397_v41  ;;  %v15598_v41 = vld [vmem:[%s23628_s4 + $0x3c0] sm:$0xff] }
0x52b8   :  { %v15600_v17 = vld [vmem:[%s23628_s4 + $0x3d0] sm:$0xff] }
0x52bf   :  { %v20181_v21 = vpop.eup %20180 }
0x52c0   :  { %v11329_v31 = vadd.f32 1.0, %v20181_v21  ;;  %v19687_v21 = vpack.c.bf16 %v15600_v17, %v15598_v41 }
0x52c2   :  { %v11330_v36 = vmul.f32 0.5, %v11329_v31  ;;  %v11502_v31 = vld [vmem:[#allocation2 + $0x3e8] sm:$0xff] }
0x52c4   :  { %v11401_v49 = vmul.f32 %v11398_v32, %v11330_v36  ;;  %v11408_v58 = vsub.f32 1.0, %v11330_v36  ;;  %v11414_v3 = vmul.f32 %v11330_v36, %v22650_v11  ;;  %v19677_v11 = vpack.c.bf16 %v11500_v16, %v11498_v53  ;;  %v11504_v36 = vld [vmem:[#allocation2 + $0x3f8] sm:$0xff]  ;;  %v15603_v32 = vld [vmem:[%s23628_s4 + $0x3e8] sm:$0xff] }
0x52c5   :  { %v11506_v16 = vld [vmem:[#allocation2 + $0x408] sm:$0x1] }
0x52c6   :  { %11403 = vrot.lane.b32.xlu1 %v11401_v49, %s20318_s20  ;;  %19678 = vmatprep.subr.bf16.mxu0 %v19677_v11  ;;  %v19681_v49 = vpack.c.bf16 %v11504_v36, %v11502_v31  ;;  %v11505_v11 = vld [vmem:[#allocation2 + $0x400] sm:$0x1] }
0x5338   :  { %v11404_v39 = vpop.permute.xlu1 %11403 }
0x5339   :  { %v11406_v50 = vadd.f32 %v11404_v39, %v11253_v22  ;;  %v11497_v22 = vld [vmem:[#allocation2 + $0x3c0] sm:$0xff]  ;;  %v15605_v39 = vld [vmem:[%s23628_s4 + $0x3f8] sm:$0xff] }
0x533a   :  { %v19679_v14 = vpack.c.bf16 %v11499_v15, %v11497_v22  ;;  %v22895_v15 = vld [vmem:[%s23629_s5 + $0x108] ss:$0 sm:$0xff] }
0x533b   :  { %20182 = vtanh.f32 %v11406_v50  ;;  %v11501_v50 = vld [vmem:[#allocation2 + $0x3e0] sm:$0xff] }
0x533c   :  { %19680 = vmatpush1.bf16.msra.mxu0 %v19679_v14 }
0x533d   :  { %19682 = vmatprep.subr.bf16.mxu0 %v19681_v49 }
0x5345   :  { %v20183_v52 = vpop.eup %20182 }
0x5346   :  { %11410 = vrot.lane.b32.xlu0 %v20183_v52, %s20319_s3  ;;  %v11503_v52 = vld [vmem:[#allocation2 + $0x3f0] sm:$0xff] }
0x53b8   :  { %v11411_v46 = vpop.permute.xlu0 %11410 }
0x53b9   :  { %v11413_v40 = vmul.f32 %v11411_v46, %v11408_v58  ;;  %v19689_v58 = vpack.c.bf16 %v15605_v39, %v15603_v32  ;;  %v19683_v46 = vpack.c.bf16 %v11503_v52, %v11501_v50 }
0x53bb   :  { %v22847_v59 = vadd.f32 %v11414_v3, %v11413_v40  ;;  %v15602_v3 = vld [vmem:[%s23628_s4 + $0x3e0] sm:$0xff]  ;;  %v15604_v40 = vld [vmem:[%s23628_s4 + $0x3f0] sm:$0xff]  ;;  %19684 = vmatpush1.bf16.msra.mxu0 %v19683_v46 }
0x53bc   :  { %v19691_v53 = vpack.c.bf16 %v15604_v40, %v15602_v3  ;;  %15595 = vmatprep.subr.msk.mxu0 %vm251_vm2, %v11506_v16 }
0x53bd   :  { %11417 = vrot.lane.b32.xlu1 %v22847_v59, %s20319_s3 }
0x53bf   :  { %15596 = vmatpush1.msk.msra.mxu0 %vm251_vm2, %v11505_v11 }
0x53c0   :  { %19693 = vmatprep.subr.bf16.mxu0 %v20315_v0 }
0x542f   :  { %v22851_v8 = vpop.permute.xlu1 %11417 }
0x5430   :  { %18157 = vmatmul.mubr.msk.f32.vlgmr.msra.gmra.mrb[140].mxu1 %vm325_vm6, %v22851_v8 }
0x5431   :  { %11674 = vmatprep.mubr.f32.mxu1 %v20317_v1  ;;  %19688 = vmatpush1.bf16.msra.mxu1 %v19687_v21 }
0x5432   :  { %19690 = vmatprep.subr.bf16.mxu1 %v19689_v58 }
0x5435   :  { %19692 = vmatpush1.bf16.msra.mxu1 %v19691_v53 }
0x5436   :  { %15608 = vmatprep.subr.msk.mxu1 %vm251_vm2, %v15607_v47 }
0x5439   :  { %15609 = vmatpush1.msk.msra.mxu1 %vm251_vm2, %v15606_v42 }
0x543a   :  { %19705 = vmatprep.subr.bf16.mxu1 %v20315_v0 }
0x5503   :  { %v11487_v22 = vpop.f32.mrb[140].mxu1 }
0x5504   :  { %v11488_v54 = vadd.f32 %v22895_v15, %v11487_v22  ;;  %v18158_v14 = vpop.f32.mrb[141].mxu1 }
0x5506   :  { %v11491_v41 = vmul.f32 0.5, %v11488_v54 }
0x5508   :  { %20184 = vtanh.f32 %v11491_v41 }
0x5512   :  { %v20185_v17 = vpop.eup %20184 }
0x5513   :  { %v11493_v21 = vadd.f32 1.0, %v20185_v17 }
0x5515   :  { %v11494_v31 = vmul.f32 0.5, %v11493_v21 }
0x5517   :  { %v11495_v36 = vmul.f32 %v11494_v31, %v22771_v60  ;;  %v11589_v32 = vmul.f32 %v11494_v31, %v22773_v61  ;;  %v15611_v60 = vld [vmem:[%s23624_s0 + $0x1a] sm:$0x3] }
0x5519   :  { %15597 = vmatmul.mubr.msk.f32.vlgmr.msra.gmra.mrb[140].mxu0 %vm247_vm4, %v11495_v36  ;;  %15610 = vmatmul.mubr.msk.f32.vlgmr.msra.gmra.mrb[142].mxu1 %vm247_vm4, %v11589_v32 }
0x551a   :  { %19695 = vmatpush3.bf16.msra.mxu0 %v20383_v5  ;;  %19707 = vmatpush3.bf16.msra.mxu1 %v20394_v9 }
0x551b   :  { %19696 = vmatprep.subr.bf16.mxu0 %v20315_v0  ;;  %19708 = vmatprep.subr.bf16.mxu1 %v20315_v0 }
0x551c   :  { %18175 = vmatprep.mubr.msk.f32.mxu0 %vm20316_vm0, %v20317_v1  ;;  %18194 = vmatprep.mubr.msk.f32.mxu1 %vm20316_vm0, %v20317_v1 }
0x551e   :  { %19698 = vmatpush3.bf16.msra.mxu0 %v20403_v12  ;;  %19710 = vmatpush3.bf16.msra.mxu1 %v20407_v13 }
0x551f   :  { %19699 = vmatprep.subr.bf16.mxu0 %v20315_v0  ;;  %19711 = vmatprep.subr.bf16.mxu1 %v20315_v0 }
0x5522   :  { %19701 = vmatpush3.bf16.msra.mxu0 %v20423_v18  ;;  %19713 = vmatpush3.bf16.msra.mxu1 %v20427_v19 }
0x5523   :  { %19702 = vmatprep.subr.bf16.mxu0 %v20315_v0  ;;  %19714 = vmatprep.subr.bf16.mxu1 %v20315_v0 }
0x5526   :  { %19704 = vmatpush3.bf16.msra.mxu0 %v20443_v24  ;;  %19716 = vmatpush3.bf16.msra.mxu1 %v20447_v25 }
0x5527   :  { %19723 = vmatprep.subr.bf16.mxu1 %v20315_v0  ;;  %19717 = vmatprep.subr.bf16.mxu0 %v20315_v0 }
0x5529   :  { %18176 = vmatmul.mubr.msk.f32.vlgmr.msra.gmra.mrb[142].mxu0 %vm89_vm1, %v15611_v60  ;;  %18195 = vmatmul.mubr.msk.f32.vlgmr.msra.gmra.mrb[144].mxu1 %vm89_vm1, %v15611_v60 }
0x552a   :  { %19725 = vmatpush3.bf16.msra.mxu1 %v20483_v34  ;;  %18218 = vmatprep.mubr.msk.f32.mxu1 %vm20316_vm0, %v20317_v1 }
0x552b   :  { %19726 = vmatprep.subr.bf16.mxu1 %v20315_v0  ;;  %19719 = vmatpush3.bf16.msra.mxu0 %v20472_v30 }
0x552c   :  { %19720 = vmatprep.subr.bf16.mxu0 %v20315_v0  ;;  %18207 = vmatprep.mubr.msk.f32.mxu0 %vm20316_vm0, %v20317_v1 }
0x552e   :  { %19728 = vmatpush3.bf16.msra.mxu1 %v20496_v38 }
0x552f   :  { %19722 = vmatpush3.bf16.msra.mxu0 %v20492_v37  ;;  %19735 = vmatprep.subr.bf16.mxu1 %v20315_v0 }
0x5530   :  { %18205 = vmatprep.subr.mxu0 %v20317_v1 }
0x5531   :  { %18219 = vmatmul.mubr.msk.f32.vlgmr.msra.gmra.mrb[146].mxu1 %vm325_vm6, %v22820_v2 }
0x5532   :  { %19737 = vmatpush3.bf16.msra.mxu1 %v20570_v23  ;;  %18240 = vmatprep.mubr.msk.f32.mxu1 %vm20316_vm0, %v20317_v1 }
0x5533   :  { %18206 = vmatpush3.msk.msra.mxu0 %vm251_vm2, %v22745_v62  ;;  %19738 = vmatprep.subr.bf16.mxu1 %v20315_v0 }
0x5534   :  { %19729 = vmatprep.subr.bf16.mxu0 %v20315_v0 }
0x5536   :  { %19740 = vmatpush3.bf16.msra.mxu1 %v20590_v33 }
0x5537   :  { %19747 = vmatprep.subr.bf16.mxu1 %v20315_v0 }
0x55ec   :  { %v11582_v61 = vpop.f32.mrb[140].mxu0  ;;  %v22950_v49 = vpop.f32.mrb[142].mxu1 }
0x55ed   :  { %v22955_v39 = vadd.f32 %v11582_v61, %v10791_v4  ;;  %v11584_v50 = vpop.f32.mrb[141].mxu0  ;;  %v22957_v52 = vpop.f32.mrb[143].mxu1 }
0x55ee   :  { %v22962_v58 = vadd.f32 %v11584_v50, %v10792_v63 }
0x55ef   :  { %v11681_v46 = vsub.f32 %v22955_v39, %v22950_v49 }
0x55f0   :  { %v11682_v3 = vsub.f32 %v22962_v58, %v22957_v52 }
0x55fc   :  { %v22968_v40 = vpop.f32.mrb[142].mxu0  ;;  %v22970_v53 = vpop.f32.mrb[144].mxu1 }
0x55fd   :  { %v11828_v27 = vmul.f32 %v22968_v40, %v22968_v40  ;;  %v11829_v7 = vmul.f32 %v22970_v53, %v22970_v53  ;;  %v18177_v4 = vpop.f32.mrb[143].mxu0  ;;  %v18196_v44 = vpop.f32.mrb[145].mxu1 }
0x55ff   :  { %v11830_v56 = vadd.f32 %v11829_v7, %v11828_v27 }
0x5601   :  { %20186 = vrsqrt.f32 %v11830_v56  ;;  %vm11833_vm9 = vcmp.eq.f32.partialorder %v11830_v56, inf  ;;  %v11836_v42 = vand.u32 2147483648, %v11830_v56  ;;  %vm11835_vm10 = vcmp.eq.f32.partialorder %v11830_v56, 0.0 }
0x5604   :  { %v11977_v63 = vpop.f32.mrb[146].mxu1 }
0x5605   :  { %v18220_v16 = vpop.f32.mrb[147].mxu1 }
0x560b   :  { %v20187_v47 = vpop.eup %20186 }
0x560c   :  { %v11832_v11 = vmul.f32 %v20187_v47, %v11830_v56 }
0x560e   :  { %v11834_v22 = vsel %vm11833_vm9, %v11830_v56, %v11832_v11 }
0x560f   :  { %v11837_v54 = vsel %vm11835_vm10, %v11836_v42, %v11834_v22 }
0x5610   :  { %18208 = vmatmul.mubr.msk.f32.vlgmr.msra.gmra.mrb[144].mxu0 %vm247_vm4, %v11837_v54 }
0x5611   :  { %19731 = vmatpush3.bf16.msra.mxu0 %v20523_v43  ;;  %18229 = vmatprep.mubr.msk.f32.mxu0 %vm20316_vm0, %v20317_v1 }
0x5612   :  { %19732 = vmatprep.subr.bf16.mxu0 %v20315_v0 }
0x5615   :  { %19734 = vmatpush3.bf16.msra.mxu0 %v20529_v45 }
0x5616   :  { %19741 = vmatprep.subr.bf16.mxu0 %v20315_v0 }
0x5618   :  { %18230 = vmatmul.mubr.msk.f32.vlgmr.msra.gmra.mrb[146].mxu0 %vm325_vm6, %v22820_v2 }
0x5619   :  { %19743 = vmatpush3.bf16.msra.mxu0 %v20581_v29  ;;  %18251 = vmatprep.mubr.msk.f32.mxu0 %vm20316_vm0, %v20317_v1 }
0x561a   :  { %19744 = vmatprep.subr.bf16.mxu0 %v20315_v0 }
0x561d   :  { %19746 = vmatpush3.bf16.msra.mxu0 %v20594_v35 }
0x561e   :  { %19753 = vmatprep.subr.bf16.mxu0 %v20315_v0 }
0x5620   :  { %18252 = vmatmul.mubr.msk.f32.vlgmr.msra.gmra.mrb[148].mxu0 %vm325_vm6, %v22851_v8 }
0x5621   :  { %19755 = vmatpush3.bf16.msra.mxu0 %v20658_v26  ;;  %18273 = vmatprep.mubr.msk.f32.mxu0 %vm20316_vm0, %v20317_v1 }
0x5622   :  { %19756 = vmatprep.subr.bf16.mxu0 %v20315_v0 }
0x5625   :  { %19758 = vmatpush3.bf16.msra.mxu0 %v20664_v28 }
0x56e3   :  { %v11907_v2 = vpop.f32.mrb[144].mxu0 }
0x56e4   :  { %v11908_v14 = vadd.f32 %v22804_v57, %v11907_v2  ;;  %v18209_v41 = vpop.f32.mrb[145].mxu0 }
0x56e6   :  { %v11981_v17 = vadd.f32 %v11977_v63, %v11908_v14 }
0x56e8   :  { %v11982_v21 = vmul.f32 0.5, %v11981_v17 }
0x56ea   :  { %20188 = vtanh.f32 %v11982_v21 }
0x56eb   :  { %v12052_v31 = vpop.f32.mrb[146].mxu0 }
0x56ec   :  { %v18231_v36 = vpop.f32.mrb[147].mxu0  ;;  %v12053_v7 = vadd.f32 %v22810_v10, %v12052_v31 }
0x56f3   :  { %v12212_v32 = vpop.f32.mrb[148].mxu0 }
0x56f4   :  { %v20189_v60 = vpop.eup %20188  ;;  %v18253_v61 = vpop.f32.mrb[149].mxu0 }
0x56f5   :  { %v11984_v50 = vadd.f32 1.0, %v20189_v60 }
0x56f7   :  { %v11985_v27 = vmul.f32 0.5, %v11984_v50 }
0x56f9   :  { %v12056_v4 = vmul.f32 %v12053_v7, %v11985_v27  ;;  %v12063_v63 = vsub.f32 1.0, %v11985_v27  ;;  %v12069_v11 = vmul.f32 %v11985_v27, %v22816_v48 }
0x56fb   :  { %12058 = vrot.lane.b32.xlu0 %v12056_v4, %s20318_s20 }
0x576d   :  { %v12059_v44 = vpop.permute.xlu0 %12058 }
0x576e   :  { %v12061_v56 = vadd.f32 %v12059_v44, %v11908_v14 }
0x5770   :  { %20190 = vtanh.f32 %v12061_v56 }
0x577a   :  { %v20191_v16 = vpop.eup %20190 }
0x577b   :  { %12065 = vrot.lane.b32.xlu1 %v20191_v16, %s20319_s3 }
0x57ed   :  { %v12066_v47 = vpop.permute.xlu1 %12065 }
0x57ee   :  { %v12068_v42 = vmul.f32 %v12066_v47, %v12063_v63 }
0x57f0   :  { %v23003_v22 = vadd.f32 %v12069_v11, %v12068_v42  ;;  %v12388_v11 = vld [vmem:[#allocation2 + $0x418] sm:$0xff]  ;;  %v12390_v42 = vld [vmem:[#allocation2 + $0x428] sm:$0xff] }
0x57f2   :  { %12072 = vrot.lane.b32.xlu0 %v23003_v22, %s20319_s3 }
0x5864   :  { %v23007_v54 = vpop.permute.xlu0 %12072 }
0x5865   :  { %18241 = vmatmul.mubr.msk.f32.vlgmr.msra.gmra.mrb[148].mxu1 %vm325_vm6, %v23007_v54 }
0x5866   :  { %19749 = vmatpush3.bf16.msra.mxu1 %v20615_v51  ;;  %18262 = vmatprep.mubr.msk.f32.mxu1 %vm20316_vm0, %v20317_v1 }
0x5867   :  { %19750 = vmatprep.subr.bf16.mxu1 %v20315_v0 }
0x586a   :  { %19752 = vmatpush3.bf16.msra.mxu1 %v20628_v55 }
0x586d   :  { %18263 = vmatmul.mubr.msk.f32.vlgmr.msra.gmra.mrb[150].mxu1 %vm325_vm6, %v22851_v8 }
0x586e   :  { %12470 = vmatprep.mubr.f32.mxu1 %v20317_v1 }
0x5938   :  { %v12142_v48 = vpop.f32.mrb[148].mxu1 }
0x5939   :  { %v12143_v2 = vadd.f32 %v22835_v20, %v12142_v48  ;;  %v18242_v14 = vpop.f32.mrb[149].mxu1  ;;  %v15626_v48 = vld [vmem:[%s23628_s4 + $0x418] sm:$0xff] }
0x593a   :  { %v12387_v14 = vld [vmem:[#allocation2 + $0x410] sm:$0xff] }
0x593b   :  { %v12216_v41 = vadd.f32 %v12212_v32, %v12143_v2 }
0x593d   :  { %v12217_v17 = vmul.f32 0.5, %v12216_v41  ;;  %v12389_v41 = vld [vmem:[#allocation2 + $0x420] sm:$0xff] }
0x593f   :  { %20192 = vtanh.f32 %v12217_v17 }
0x5940   :  { %v12287_v21 = vpop.f32.mrb[150].mxu1 }
0x5941   :  { %v18264_v31 = vpop.f32.mrb[151].mxu1  ;;  %v12288_v50 = vadd.f32 %v22841_v6, %v12287_v21  ;;  %v19761_v21 = vpack.c.bf16 %v12389_v41, %v12387_v14  ;;  %v15633_v14 = vld [vmem:[%s23628_s4 + $0x450] sm:$0x1] }
0x5942   :  { %v15625_v31 = vld [vmem:[%s23628_s4 + $0x410] sm:$0xff] }
0x5949   :  { %v20193_v36 = vpop.eup %20192 }
0x594a   :  { %v12219_v60 = vadd.f32 1.0, %v20193_v36  ;;  %v15627_v36 = vld [vmem:[%s23628_s4 + $0x420] sm:$0xff] }
0x594c   :  { %v12220_v61 = vmul.f32 0.5, %v12219_v60  ;;  %v19769_v60 = vpack.c.bf16 %v15627_v36, %v15625_v31 }
0x594e   :  { %v12291_v27 = vmul.f32 %v12288_v50, %v12220_v61  ;;  %v12298_v44 = vsub.f32 1.0, %v12220_v61  ;;  %v12304_v56 = vmul.f32 %v12220_v61, %v22847_v59  ;;  %v19759_v59 = vpack.c.bf16 %v12390_v42, %v12388_v11  ;;  %v12392_v61 = vld [vmem:[#allocation2 + $0x438] sm:$0xff]  ;;  %v12394_v50 = vld [vmem:[#allocation2 + $0x448] sm:$0xff]  ;;  %v15631_v11 = vld [vmem:[%s23628_s4 + $0x440] sm:$0xff] }
0x5950   :  { %12293 = vrot.lane.b32.xlu1 %v12291_v27, %s20318_s20  ;;  %19760 = vmatprep.subr.bf16.mxu1 %v19759_v59  ;;  %v15630_v27 = vld [vmem:[%s23628_s4 + $0x438] sm:$0xff] }
0x5951   :  { %19762 = vmatpush1.bf16.msra.mxu1 %v19761_v21  ;;  %v15634_v59 = vld [vmem:[%s23628_s4 + $0x458] sm:$0x1] }
0x59c2   :  { %v12294_v8 = vpop.permute.xlu1 %12293 }
0x59c3   :  { %v12296_v7 = vadd.f32 %v12294_v8, %v12143_v2  ;;  %v15628_v2 = vld [vmem:[%s23628_s4 + $0x428] sm:$0xff]  ;;  %v19763_v8 = vpack.c.bf16 %v12394_v50, %v12392_v61 }
0x59c4   :  { %v19767_v17 = vpack.c.bf16 %v15628_v2, %v15626_v48  ;;  %v12396_v48 = vld [vmem:[#allocation2 + $0x458] sm:$0x1]  ;;  %v12395_v2 = vld [vmem:[#allocation2 + $0x450] sm:$0x1] }
0x59c5   :  { %20194 = vtanh.f32 %v12296_v7  ;;  %v15632_v7 = vld [vmem:[%s23628_s4 + $0x448] sm:$0xff]  ;;  %19764 = vmatprep.subr.bf16.mxu1 %v19763_v8 }
0x59c6   :  { %19768 = vmatprep.subr.bf16.mxu0 %v19767_v17 }
0x59cf   :  { %v20195_v4 = vpop.eup %20194 }
0x59d0   :  { %12300 = vrot.lane.b32.xlu0 %v20195_v4, %s20319_s3  ;;  %v12391_v4 = vld [vmem:[#allocation2 + $0x430] sm:$0xff] }
0x5a42   :  { %v12301_v32 = vpop.permute.xlu0 %12300 }
0x5a43   :  { %v12303_v16 = vmul.f32 %v12301_v32, %v12298_v44  ;;  %v12393_v44 = vld [vmem:[#allocation2 + $0x440] sm:$0xff]  ;;  %v19771_v32 = vpack.c.bf16 %v15632_v7, %v15630_v27 }
0x5a45   :  { %v23024_v63 = vadd.f32 %v12304_v56, %v12303_v16  ;;  %v19765_v56 = vpack.c.bf16 %v12393_v44, %v12391_v4  ;;  %v15629_v16 = vld [vmem:[%s23628_s4 + $0x430] sm:$0xff] }
0x5a46   :  { %v19773_v42 = vpack.c.bf16 %v15631_v11, %v15629_v16 }
0x5a47   :  { %12307 = vrot.lane.b32.xlu1 %v23024_v63, %s20319_s3  ;;  %19766 = vmatpush1.bf16.msra.mxu1 %v19765_v56 }
0x5a48   :  { %15622 = vmatprep.subr.msk.mxu1 %vm251_vm2, %v12396_v48 }
0x5a4b   :  { %15623 = vmatpush1.msk.msra.mxu1 %vm251_vm2, %v12395_v2 }
0x5a4c   :  { %19775 = vmatprep.subr.bf16.mxu1 %v20315_v0 }
0x5ab9   :  { %v23028_v47 = vpop.permute.xlu1 %12307 }
0x5aba   :  { %18274 = vmatmul.mubr.msk.f32.vlgmr.msra.gmra.mrb[150].mxu0 %vm325_vm6, %v23028_v47 }
0x5abb   :  { %12564 = vmatprep.mubr.f32.mxu0 %v20317_v1  ;;  %19770 = vmatpush1.bf16.msra.mxu0 %v19769_v60 }
0x5abc   :  { %19772 = vmatprep.subr.bf16.mxu0 %v19771_v32 }
0x5abf   :  { %19774 = vmatpush1.bf16.msra.mxu0 %v19773_v42 }
0x5ac0   :  { %15635 = vmatprep.subr.msk.mxu0 %vm251_vm2, %v15634_v59 }
0x5ac3   :  { %15636 = vmatpush1.msk.msra.mxu0 %vm251_vm2, %v15633_v14 }
0x5ac4   :  { %19787 = vmatprep.subr.bf16.mxu0 %v20315_v0 }
0x5b8d   :  { %v12377_v41 = vpop.f32.mrb[150].mxu0 }
0x5b8e   :  { %v12378_v17 = vadd.f32 %v22895_v15, %v12377_v41  ;;  %v18275_v21 = vpop.f32.mrb[151].mxu0 }
0x5b90   :  { %v12381_v31 = vmul.f32 0.5, %v12378_v17 }
0x5b92   :  { %20196 = vtanh.f32 %v12381_v31 }
0x5b9c   :  { %v20197_v36 = vpop.eup %20196 }
0x5b9d   :  { %v12383_v60 = vadd.f32 1.0, %v20197_v36 }
0x5b9f   :  { %v12384_v61 = vmul.f32 0.5, %v12383_v60 }
0x5ba1   :  { %v12385_v50 = vmul.f32 %v12384_v61, %v22968_v40  ;;  %v12479_v27 = vmul.f32 %v12384_v61, %v22970_v53  ;;  %v15638_v40 = vld [vmem:[%s23624_s0 + $0x1c] sm:$0x3] }
0x5ba3   :  { %15624 = vmatmul.mubr.msk.f32.vlgmr.msra.gmra.mrb[152].mxu1 %vm247_vm4, %v12385_v50  ;;  %15637 = vmatmul.mubr.msk.f32.vlgmr.msra.gmra.mrb[152].mxu0 %vm247_vm4, %v12479_v27 }
0x5ba4   :  { %19777 = vmatpush3.bf16.msra.mxu1 %v20383_v5  ;;  %19789 = vmatpush3.bf16.msra.mxu0 %v20394_v9 }
0x5ba5   :  { %19778 = vmatprep.subr.bf16.mxu1 %v20315_v0  ;;  %19790 = vmatprep.subr.bf16.mxu0 %v20315_v0 }
0x5ba6   :  { %18292 = vmatprep.mubr.msk.f32.mxu1 %vm20316_vm0, %v20317_v1  ;;  %18311 = vmatprep.mubr.msk.f32.mxu0 %vm20316_vm0, %v20317_v1 }
0x5ba8   :  { %19780 = vmatpush3.bf16.msra.mxu1 %v20403_v12  ;;  %19792 = vmatpush3.bf16.msra.mxu0 %v20407_v13 }
0x5ba9   :  { %19781 = vmatprep.subr.bf16.mxu1 %v20315_v0  ;;  %19793 = vmatprep.subr.bf16.mxu0 %v20315_v0 }
0x5bac   :  { %19783 = vmatpush3.bf16.msra.mxu1 %v20423_v18  ;;  %19795 = vmatpush3.bf16.msra.mxu0 %v20427_v19 }
0x5bad   :  { %19784 = vmatprep.subr.bf16.mxu1 %v20315_v0  ;;  %19796 = vmatprep.subr.bf16.mxu0 %v20315_v0 }
0x5bb0   :  { %19786 = vmatpush3.bf16.msra.mxu1 %v20443_v24  ;;  %19798 = vmatpush3.bf16.msra.mxu0 %v20447_v25 }
0x5bb1   :  { %19805 = vmatprep.subr.bf16.mxu0 %v20315_v0  ;;  %19799 = vmatprep.subr.bf16.mxu1 %v20315_v0 }
0x5bb3   :  { %18293 = vmatmul.mubr.msk.f32.vlgmr.msra.gmra.mrb[154].mxu1 %vm89_vm1, %v15638_v40  ;;  %18312 = vmatmul.mubr.msk.f32.vlgmr.msra.gmra.mrb[154].mxu0 %vm89_vm1, %v15638_v40 }
0x5bb4   :  { %19807 = vmatpush3.bf16.msra.mxu0 %v20483_v34  ;;  %18335 = vmatprep.mubr.msk.f32.mxu0 %vm20316_vm0, %v20317_v1 }
0x5bb5   :  { %19808 = vmatprep.subr.bf16.mxu0 %v20315_v0  ;;  %19801 = vmatpush3.bf16.msra.mxu1 %v20472_v30 }
0x5bb6   :  { %19802 = vmatprep.subr.bf16.mxu1 %v20315_v0  ;;  %18324 = vmatprep.mubr.msk.f32.mxu1 %vm20316_vm0, %v20317_v1 }
0x5bb8   :  { %19810 = vmatpush3.bf16.msra.mxu0 %v20496_v38 }
0x5bb9   :  { %19804 = vmatpush3.bf16.msra.mxu1 %v20492_v37  ;;  %19817 = vmatprep.subr.bf16.mxu0 %v20315_v0 }
0x5bba   :  { %18322 = vmatprep.subr.mxu1 %v20317_v1 }
0x5bbb   :  { %18336 = vmatmul.mubr.msk.f32.vlgmr.msra.gmra.mrb[156].mxu0 %vm325_vm6, %v23007_v54 }
0x5bbc   :  { %19819 = vmatpush3.bf16.msra.mxu0 %v20570_v23  ;;  %18357 = vmatprep.mubr.msk.f32.mxu0 %vm20316_vm0, %v20317_v1 }
0x5bbd   :  { %18323 = vmatpush3.msk.msra.mxu1 %vm251_vm2, %v22745_v62  ;;  %19820 = vmatprep.subr.bf16.mxu0 %v20315_v0 }
0x5bbe   :  { %19811 = vmatprep.subr.bf16.mxu1 %v20315_v0 }
0x5bc0   :  { %19822 = vmatpush3.bf16.msra.mxu0 %v20590_v33 }
0x5bc1   :  { %19829 = vmatprep.subr.bf16.mxu0 %v20315_v0 }
0x5c76   :  { %v12472_v53 = vpop.f32.mrb[152].mxu1  ;;  %v23122_v8 = vpop.f32.mrb[152].mxu0 }
0x5c77   :  { %v23127_v7 = vadd.f32 %v12472_v53, %v11681_v46  ;;  %v12474_v4 = vpop.f32.mrb[153].mxu1  ;;  %v23129_v44 = vpop.f32.mrb[153].mxu0 }
0x5c78   :  { %v23134_v62 = vadd.f32 %v12474_v4, %v11682_v3 }
0x5c79   :  { %v12571_v32 = vsub.f32 %v23127_v7, %v23122_v8 }
0x5c7a   :  { %v12572_v56 = vsub.f32 %v23134_v62, %v23129_v44 }
0x5c86   :  { %v23140_v16 = vpop.f32.mrb[154].mxu1  ;;  %v23142_v11 = vpop.f32.mrb[154].mxu0 }
0x5c87   :  { %v12718_v49 = vmul.f32 %v23140_v16, %v23140_v16  ;;  %v12719_v39 = vmul.f32 %v23142_v11, %v23142_v11  ;;  %v18294_v46 = vpop.f32.mrb[155].mxu1  ;;  %v18313_v52 = vpop.f32.mrb[155].mxu0 }
0x5c89   :  { %v12720_v58 = vadd.f32 %v12719_v39, %v12718_v49 }
0x5c8b   :  { %20198 = vrsqrt.f32 %v12720_v58  ;;  %vm12723_vm11 = vcmp.eq.f32.partialorder %v12720_v58, inf  ;;  %v12726_v2 = vand.u32 2147483648, %v12720_v58  ;;  %vm12725_vm12 = vcmp.eq.f32.partialorder %v12720_v58, 0.0 }
0x5c8e   :  { %v12867_v3 = vpop.f32.mrb[156].mxu0 }
0x5c8f   :  { %v18337_v42 = vpop.f32.mrb[157].mxu0 }
0x5c95   :  { %v20199_v48 = vpop.eup %20198 }
0x5c96   :  { %v12722_v59 = vmul.f32 %v20199_v48, %v12720_v58 }
0x5c98   :  { %v12724_v14 = vsel %vm12723_vm11, %v12720_v58, %v12722_v59 }
0x5c99   :  { %v12727_v41 = vsel %vm12725_vm12, %v12726_v2, %v12724_v14 }
0x5c9a   :  { %18325 = vmatmul.mubr.msk.f32.vlgmr.msra.gmra.mrb[156].mxu1 %vm247_vm4, %v12727_v41 }
0x5c9b   :  { %19813 = vmatpush3.bf16.msra.mxu1 %v20523_v43  ;;  %18346 = vmatprep.mubr.msk.f32.mxu1 %vm20316_vm0, %v20317_v1 }
0x5c9c   :  { %19814 = vmatprep.subr.bf16.mxu1 %v20315_v0 }
0x5c9f   :  { %19816 = vmatpush3.bf16.msra.mxu1 %v20529_v45 }
0x5ca0   :  { %19823 = vmatprep.subr.bf16.mxu1 %v20315_v0 }
0x5ca2   :  { %18347 = vmatmul.mubr.msk.f32.vlgmr.msra.gmra.mrb[158].mxu1 %vm325_vm6, %v23007_v54 }
0x5ca3   :  { %19825 = vmatpush3.bf16.msra.mxu1 %v20581_v29  ;;  %18368 = vmatprep.mubr.msk.f32.mxu1 %vm20316_vm0, %v20317_v1 }
0x5ca4   :  { %19826 = vmatprep.subr.bf16.mxu1 %v20315_v0 }
0x5ca7   :  { %19828 = vmatpush3.bf16.msra.mxu1 %v20594_v35 }
0x5ca8   :  { %19835 = vmatprep.subr.bf16.mxu1 %v20315_v0 }
0x5caa   :  { %18369 = vmatmul.mubr.msk.f32.vlgmr.msra.gmra.mrb[160].mxu1 %vm325_vm6, %v23028_v47 }
0x5cab   :  { %19837 = vmatpush3.bf16.msra.mxu1 %v20658_v26  ;;  %18390 = vmatprep.mubr.msk.f32.mxu1 %vm20316_vm0, %v20317_v1 }
0x5cac   :  { %19838 = vmatprep.subr.bf16.mxu1 %v20315_v0 }
0x5caf   :  { %19840 = vmatpush3.bf16.msra.mxu1 %v20664_v28 }
0x5d6d   :  { %v12797_v54 = vpop.f32.mrb[156].mxu1 }
0x5d6e   :  { %v12798_v17 = vadd.f32 %v22804_v57, %v12797_v54  ;;  %v18326_v21 = vpop.f32.mrb[157].mxu1 }
0x5d70   :  { %v12871_v31 = vadd.f32 %v12867_v3, %v12798_v17 }
0x5d72   :  { %v12872_v36 = vmul.f32 0.5, %v12871_v31 }
0x5d74   :  { %20200 = vtanh.f32 %v12872_v36 }
0x5d75   :  { %v12942_v60 = vpop.f32.mrb[158].mxu1 }
0x5d76   :  { %v18348_v61 = vpop.f32.mrb[159].mxu1  ;;  %v12943_v49 = vadd.f32 %v22810_v10, %v12942_v60 }
0x5d7d   :  { %v13102_v50 = vpop.f32.mrb[160].mxu1 }
0x5d7e   :  { %v20201_v27 = vpop.eup %20200  ;;  %v18370_v40 = vpop.f32.mrb[161].mxu1 }
0x5d7f   :  { %v12874_v53 = vadd.f32 1.0, %v20201_v27 }
0x5d81   :  { %v12875_v4 = vmul.f32 0.5, %v12874_v53 }
0x5d83   :  { %v12946_v39 = vmul.f32 %v12943_v49, %v12875_v4  ;;  %v12953_v58 = vsub.f32 1.0, %v12875_v4  ;;  %v12959_v42 = vmul.f32 %v12875_v4, %v23003_v22 }
0x5d85   :  { %12948 = vrot.lane.b32.xlu0 %v12946_v39, %s20318_s20 }
0x5df7   :  { %v12949_v46 = vpop.permute.xlu0 %12948 }
0x5df8   :  { %v12951_v52 = vadd.f32 %v12949_v46, %v12798_v17  ;;  %v13278_v46 = vld [vmem:[#allocation2 + $0x468] sm:$0xff] }
0x5dfa   :  { %20202 = vtanh.f32 %v12951_v52  ;;  %v13280_v52 = vld [vmem:[#allocation2 + $0x478] sm:$0xff] }
0x5e04   :  { %v20203_v57 = vpop.eup %20202 }
0x5e05   :  { %12955 = vrot.lane.b32.xlu1 %v20203_v57, %s20319_s3  ;;  %v15653_v57 = vld [vmem:[%s23628_s4 + $0x468] sm:$0xff] }
0x5e77   :  { %v12956_v3 = vpop.permute.xlu1 %12955 }
0x5e78   :  { %v12958_v48 = vmul.f32 %v12956_v3, %v12953_v58  ;;  %v15655_v58 = vld [vmem:[%s23628_s4 + $0x478] sm:$0xff]  ;;  %v13277_v3 = vld [vmem:[#allocation2 + $0x460] sm:$0xff] }
0x5e7a   :  { %v23175_v59 = vadd.f32 %v12959_v42, %v12958_v48  ;;  %v13279_v42 = vld [vmem:[#allocation2 + $0x470] sm:$0xff]  ;;  %v19849_v48 = vpack.c.bf16 %v15655_v58, %v15653_v57 }
0x5e7c   :  { %12962 = vrot.lane.b32.xlu0 %v23175_v59, %s20319_s3  ;;  %19850 = vmatprep.subr.bf16.mxu1 %v19849_v48 }
0x5eee   :  { %v23179_v10 = vpop.permute.xlu0 %12962 }
0x5eef   :  { %18358 = vmatmul.mubr.msk.f32.vlgmr.msra.gmra.mrb[158].mxu0 %vm325_vm6, %v23179_v10 }
0x5ef0   :  { %19831 = vmatpush3.bf16.msra.mxu0 %v20615_v51  ;;  %18379 = vmatprep.mubr.msk.f32.mxu0 %vm20316_vm0, %v20317_v1 }
0x5ef1   :  { %19832 = vmatprep.subr.bf16.mxu0 %v20315_v0 }
0x5ef4   :  { %19834 = vmatpush3.bf16.msra.mxu0 %v20628_v55 }
0x5ef7   :  { %18380 = vmatmul.mubr.msk.f32.vlgmr.msra.gmra.mrb[160].mxu0 %vm325_vm6, %v23028_v47 }
0x5ef8   :  { %13360 = vmatprep.mubr.f32.mxu0 %v20317_v1 }
0x5fc2   :  { %v13032_v22 = vpop.f32.mrb[158].mxu0 }
0x5fc3   :  { %v13033_v2 = vadd.f32 %v22835_v20, %v13032_v22  ;;  %v18359_v14 = vpop.f32.mrb[159].mxu0  ;;  %v19843_v22 = vpack.c.bf16 %v13279_v42, %v13277_v3 }
0x5fc4   :  { %v15654_v14 = vld [vmem:[%s23628_s4 + $0x470] sm:$0xff] }
0x5fc5   :  { %v13106_v41 = vadd.f32 %v13102_v50, %v13033_v2 }
0x5fc7   :  { %v13107_v54 = vmul.f32 0.5, %v13106_v41 }
0x5fc9   :  { %20204 = vtanh.f32 %v13107_v54  ;;  %v13282_v54 = vld [vmem:[#allocation2 + $0x488] sm:$0xff] }
0x5fca   :  { %v13177_v17 = vpop.f32.mrb[160].mxu0 }
0x5fcb   :  { %v18381_v21 = vpop.f32.mrb[161].mxu0  ;;  %v13178_v61 = vadd.f32 %v22841_v6, %v13177_v17  ;;  %v13284_v17 = vld [vmem:[#allocation2 + $0x498] sm:$0xff] }
0x5fcc   :  { %v15657_v21 = vld [vmem:[%s23628_s4 + $0x488] sm:$0xff] }
0x5fd3   :  { %v20205_v31 = vpop.eup %20204 }
0x5fd4   :  { %v13109_v36 = vadd.f32 1.0, %v20205_v31  ;;  %v19845_v31 = vpack.c.bf16 %v13284_v17, %v13282_v54 }
0x5fd6   :  { %v13110_v60 = vmul.f32 0.5, %v13109_v36  ;;  %v15659_v36 = vld [vmem:[%s23628_s4 + $0x498] sm:$0xff] }
0x5fd8   :  { %v13181_v27 = vmul.f32 %v13178_v61, %v13110_v60  ;;  %v13188_v20 = vsub.f32 1.0, %v13110_v60  ;;  %v13194_v4 = vmul.f32 %v13110_v60, %v23024_v63  ;;  %v19841_v63 = vpack.c.bf16 %v13280_v52, %v13278_v46  ;;  %v13281_v60 = vld [vmem:[#allocation2 + $0x480] sm:$0xff]  ;;  %v13283_v61 = vld [vmem:[#allocation2 + $0x490] sm:$0xff] }
0x5fd9   :  { %v15660_v46 = vld [vmem:[%s23628_s4 + $0x4a0] sm:$0x1] }
0x5fda   :  { %13183 = vrot.lane.b32.xlu1 %v13181_v27, %s20318_s20  ;;  %19842 = vmatprep.subr.bf16.mxu0 %v19841_v63  ;;  %v19853_v27 = vpack.c.bf16 %v15659_v36, %v15657_v21 }
0x5fdb   :  { %19844 = vmatpush1.bf16.msra.mxu0 %v19843_v22 }
0x5fdc   :  { %19846 = vmatprep.subr.bf16.mxu0 %v19845_v31 }
0x604c   :  { %v13184_v47 = vpop.permute.xlu1 %13183 }
0x604d   :  { %v13186_v40 = vadd.f32 %v13184_v47, %v13033_v2  ;;  %v15652_v2 = vld [vmem:[%s23628_s4 + $0x460] sm:$0xff]  ;;  %v19847_v47 = vpack.c.bf16 %v13283_v61, %v13281_v60 }
0x604e   :  { %v19851_v41 = vpack.c.bf16 %v15654_v14, %v15652_v2 }
0x604f   :  { %20206 = vtanh.f32 %v13186_v40  ;;  %v15656_v40 = vld [vmem:[%s23628_s4 + $0x480] sm:$0xff]  ;;  %19848 = vmatpush1.bf16.msra.mxu0 %v19847_v47 }
0x6059   :  { %v20207_v53 = vpop.eup %20206 }
0x605a   :  { %13190 = vrot.lane.b32.xlu0 %v20207_v53, %s20319_s3  ;;  %v15658_v53 = vld [vmem:[%s23628_s4 + $0x490] sm:$0xff] }
0x60cc   :  { %v13191_v50 = vpop.permute.xlu0 %13190 }
0x60cd   :  { %v13193_v49 = vmul.f32 %v13191_v50, %v13188_v20  ;;  %v19855_v20 = vpack.c.bf16 %v15658_v53, %v15656_v40  ;;  %v13286_v50 = vld [vmem:[#allocation2 + $0x4a8] sm:$0x1] }
0x60ce   :  { %15649 = vmatprep.subr.msk.mxu0 %vm251_vm2, %v13286_v50 }
0x60cf   :  { %v23196_v39 = vadd.f32 %v13194_v4, %v13193_v49  ;;  %v15661_v4 = vld [vmem:[%s23628_s4 + $0x4a8] sm:$0x1]  ;;  %v13285_v49 = vld [vmem:[#allocation2 + $0x4a0] sm:$0x1] }
0x60d0   :  { %15650 = vmatpush1.msk.msra.mxu0 %vm251_vm2, %v13285_v49 }
0x60d1   :  { %13197 = vrot.lane.b32.xlu1 %v23196_v39, %s20319_s3  ;;  %19857 = vmatprep.subr.bf16.mxu0 %v20315_v0 }
0x6143   :  { %v23200_v6 = vpop.permute.xlu1 %13197 }
0x6144   :  { %18391 = vmatmul.mubr.msk.f32.vlgmr.msra.gmra.mrb[162].mxu1 %vm325_vm6, %v23200_v6 }
0x6145   :  { %13454 = vmatprep.mubr.f32.mxu1 %v20317_v1  ;;  %19852 = vmatpush1.bf16.msra.mxu1 %v19851_v41 }
0x6146   :  { %19854 = vmatprep.subr.bf16.mxu1 %v19853_v27 }
0x6149   :  { %19856 = vmatpush1.bf16.msra.mxu1 %v19855_v20 }
0x614a   :  { %15662 = vmatprep.subr.msk.mxu1 %vm251_vm2, %v15661_v4  ;;  %v23350_v4 = vld [vmem:[%s23629_s5 + $0xe8] ss:$0 sm:$0xff] }
0x614d   :  { %15663 = vmatpush1.msk.msra.mxu1 %vm251_vm2, %v15660_v46 }
0x614e   :  { %19869 = vmatprep.subr.bf16.mxu1 %v20315_v0 }
0x6217   :  { %v13267_v52 = vpop.f32.mrb[162].mxu1 }
0x6218   :  { %v13268_v57 = vadd.f32 %v22895_v15, %v13267_v52  ;;  %v18392_v63 = vpop.f32.mrb[163].mxu1  ;;  %v15665_v15 = vld [vmem:[%s23624_s0 + $0x1e] sm:$0x3] }
0x621a   :  { %v13271_v58 = vmul.f32 0.5, %v13268_v57 }
0x621c   :  { %20208 = vtanh.f32 %v13271_v58 }
0x6226   :  { %v20209_v3 = vpop.eup %20208 }
0x6227   :  { %v13273_v42 = vadd.f32 1.0, %v20209_v3 }
0x6229   :  { %v13274_v48 = vmul.f32 0.5, %v13273_v42 }
0x622b   :  { %v13275_v22 = vmul.f32 %v13274_v48, %v23140_v16  ;;  %v13369_v2 = vmul.f32 %v13274_v48, %v23142_v11  ;;  %v23291_v16 = vld [vmem:[%s23629_s5 + $0x20] sm:$0x1] }
0x622d   :  { %15651 = vmatmul.mubr.msk.f32.vlgmr.msra.gmra.mrb[162].mxu0 %vm247_vm4, %v13275_v22  ;;  %15664 = vmatmul.mubr.msk.f32.vlgmr.msra.gmra.mrb[164].mxu1 %vm247_vm4, %v13369_v2 }
0x622e   :  { %19859 = vmatpush3.bf16.msra.mxu0 %v20383_v5  ;;  %19871 = vmatpush3.bf16.msra.mxu1 %v20394_v9 }
0x622f   :  { %19860 = vmatprep.subr.bf16.mxu0 %v20315_v0  ;;  %19872 = vmatprep.subr.bf16.mxu1 %v20315_v0 }
0x6230   :  { %18409 = vmatprep.mubr.msk.f32.mxu0 %vm20316_vm0, %v20317_v1  ;;  %18428 = vmatprep.mubr.msk.f32.mxu1 %vm20316_vm0, %v20317_v1 }
0x6232   :  { %19862 = vmatpush3.bf16.msra.mxu0 %v20403_v12  ;;  %19874 = vmatpush3.bf16.msra.mxu1 %v20407_v13 }
0x6233   :  { %19863 = vmatprep.subr.bf16.mxu0 %v20315_v0  ;;  %19875 = vmatprep.subr.bf16.mxu1 %v20315_v0 }
0x6236   :  { %19865 = vmatpush3.bf16.msra.mxu0 %v20423_v18  ;;  %19877 = vmatpush3.bf16.msra.mxu1 %v20427_v19 }
0x6237   :  { %19866 = vmatprep.subr.bf16.mxu0 %v20315_v0  ;;  %19878 = vmatprep.subr.bf16.mxu1 %v20315_v0 }
0x623a   :  { %19868 = vmatpush3.bf16.msra.mxu0 %v20443_v24  ;;  %19880 = vmatpush3.bf16.msra.mxu1 %v20447_v25 }
0x623b   :  { %19887 = vmatprep.subr.bf16.mxu1 %v20315_v0  ;;  %19881 = vmatprep.subr.bf16.mxu0 %v20315_v0 }
0x623d   :  { %18410 = vmatmul.mubr.msk.f32.vlgmr.msra.gmra.mrb[164].mxu0 %vm89_vm1, %v15665_v15  ;;  %18429 = vmatmul.mubr.msk.f32.vlgmr.msra.gmra.mrb[166].mxu1 %vm89_vm1, %v15665_v15  ;;  %v23356_v15 = vld [vmem:[%s23629_s5 + $0xf0] ss:$0 sm:$0xff] }
0x623e   :  { %19889 = vmatpush3.bf16.msra.mxu1 %v20483_v34  ;;  %18452 = vmatprep.mubr.msk.f32.mxu1 %vm20316_vm0, %v20317_v1 }
0x623f   :  { %19890 = vmatprep.subr.bf16.mxu1 %v20315_v0  ;;  %19883 = vmatpush3.bf16.msra.mxu0 %v20472_v30 }
0x6240   :  { %19884 = vmatprep.subr.bf16.mxu0 %v20315_v0  ;;  %18441 = vmatprep.mubr.msk.f32.mxu0 %vm20316_vm0, %v20317_v1 }
0x6242   :  { %19892 = vmatpush3.bf16.msra.mxu1 %v20496_v38 }
0x6243   :  { %19886 = vmatpush3.bf16.msra.mxu0 %v20492_v37  ;;  %19899 = vmatprep.subr.bf16.mxu1 %v20315_v0 }
0x6244   :  { %18439 = vmatprep.subr.mxu0 %v20317_v1 }
0x6245   :  { %18453 = vmatmul.mubr.msk.f32.vlgmr.msra.gmra.mrb[168].mxu1 %vm325_vm6, %v23179_v10 }
0x6246   :  { %19901 = vmatpush3.bf16.msra.mxu1 %v20570_v23  ;;  %18474 = vmatprep.mubr.msk.f32.mxu1 %vm20316_vm0, %v20317_v1 }
0x6247   :  { %18440 = vmatpush3.msk.msra.mxu0 %vm251_vm2, %v23291_v16  ;;  %19902 = vmatprep.subr.bf16.mxu1 %v20315_v0 }
0x6248   :  { %19893 = vmatprep.subr.bf16.mxu0 %v20315_v0 }
0x624a   :  { %19904 = vmatpush3.bf16.msra.mxu1 %v20590_v33 }
0x624b   :  { %19911 = vmatprep.subr.bf16.mxu1 %v20315_v0 }
0x6300   :  { %v13362_v11 = vpop.f32.mrb[162].mxu0  ;;  %v23299_v14 = vpop.f32.mrb[164].mxu1 }
0x6301   :  { %v23304_v41 = vadd.f32 %v13362_v11, %v12571_v32  ;;  %v13364_v54 = vpop.f32.mrb[163].mxu0  ;;  %v23306_v17 = vpop.f32.mrb[165].mxu1 }
0x6302   :  { %v23311_v21 = vadd.f32 %v13364_v54, %v12572_v56 }
0x6303   :  { %v13461_v31 = vsub.f32 %v23304_v41, %v23299_v14 }
0x6304   :  { %v13462_v36 = vsub.f32 %v23311_v21, %v23306_v17 }
0x6310   :  { %v23317_v60 = vpop.f32.mrb[164].mxu0  ;;  %v23319_v61 = vpop.f32.mrb[166].mxu1 }
0x6311   :  { %v13608_v8 = vmul.f32 %v23317_v60, %v23317_v60  ;;  %v13609_v7 = vmul.f32 %v23319_v61, %v23319_v61  ;;  %v18411_v32 = vpop.f32.mrb[165].mxu0  ;;  %v18430_v44 = vpop.f32.mrb[167].mxu1 }
0x6313   :  { %v13610_v62 = vadd.f32 %v13609_v7, %v13608_v8 }
0x6315   :  { %20210 = vrsqrt.f32 %v13610_v62  ;;  %vm13613_vm13 = vcmp.eq.f32.partialorder %v13610_v62, inf  ;;  %v13616_v53 = vand.u32 2147483648, %v13610_v62  ;;  %vm13615_vm14 = vcmp.eq.f32.partialorder %v13610_v62, 0.0 }
0x6318   :  { %v13757_v56 = vpop.f32.mrb[168].mxu1 }
0x6319   :  { %v18454_v27 = vpop.f32.mrb[169].mxu1 }
0x631f   :  { %v20211_v47 = vpop.eup %20210 }
0x6320   :  { %v13612_v40 = vmul.f32 %v20211_v47, %v13610_v62 }
0x6322   :  { %v13614_v20 = vsel %vm13613_vm13, %v13610_v62, %v13612_v40 }
0x6323   :  { %v13617_v50 = vsel %vm13615_vm14, %v13616_v53, %v13614_v20  ;;  %v23381_v53 = vld [vmem:[%s23629_s5 + $0xf8] ss:$0 sm:$0xff] }
0x6324   :  { %18442 = vmatmul.mubr.msk.f32.vlgmr.msra.gmra.mrb[166].mxu0 %vm247_vm4, %v13617_v50 }
0x6325   :  { %19895 = vmatpush3.bf16.msra.mxu0 %v20523_v43  ;;  %18463 = vmatprep.mubr.msk.f32.mxu0 %vm20316_vm0, %v20317_v1 }
0x6326   :  { %19896 = vmatprep.subr.bf16.mxu0 %v20315_v0 }
0x6329   :  { %19898 = vmatpush3.bf16.msra.mxu0 %v20529_v45 }
0x632a   :  { %19905 = vmatprep.subr.bf16.mxu0 %v20315_v0 }
0x632c   :  { %18464 = vmatmul.mubr.msk.f32.vlgmr.msra.gmra.mrb[168].mxu0 %vm325_vm6, %v23179_v10 }
0x632d   :  { %19907 = vmatpush3.bf16.msra.mxu0 %v20581_v29  ;;  %18485 = vmatprep.mubr.msk.f32.mxu0 %vm20316_vm0, %v20317_v1 }
0x632e   :  { %19908 = vmatprep.subr.bf16.mxu0 %v20315_v0 }
0x6331   :  { %19910 = vmatpush3.bf16.msra.mxu0 %v20594_v35 }
0x6332   :  { %19917 = vmatprep.subr.bf16.mxu0 %v20315_v0 }
0x6334   :  { %18486 = vmatmul.mubr.msk.f32.vlgmr.msra.gmra.mrb[170].mxu0 %vm325_vm6, %v23200_v6 }
0x6335   :  { %19919 = vmatpush3.bf16.msra.mxu0 %v20658_v26  ;;  %18507 = vmatprep.mubr.msk.f32.mxu0 %vm20316_vm0, %v20317_v1 }
0x6336   :  { %19920 = vmatprep.subr.bf16.mxu0 %v20315_v0 }
0x6339   :  { %19922 = vmatpush3.bf16.msra.mxu0 %v20664_v28 }
0x63f7   :  { %v13687_v10 = vpop.f32.mrb[166].mxu0 }
0x63f8   :  { %v13688_v49 = vadd.f32 %v23350_v4, %v13687_v10  ;;  %v18443_v46 = vpop.f32.mrb[167].mxu0 }
0x63fa   :  { %v13761_v52 = vadd.f32 %v13757_v56, %v13688_v49 }
0x63fc   :  { %v13762_v57 = vmul.f32 0.5, %v13761_v52 }
0x63fe   :  { %20212 = vtanh.f32 %v13762_v57 }
0x63ff   :  { %v13832_v63 = vpop.f32.mrb[168].mxu0 }
0x6400   :  { %v18465_v58 = vpop.f32.mrb[169].mxu0  ;;  %v13833_v11 = vadd.f32 %v23356_v15, %v13832_v63 }
0x6407   :  { %v13992_v3 = vpop.f32.mrb[170].mxu0 }
0x6408   :  { %v20213_v42 = vpop.eup %20212  ;;  %v18487_v48 = vpop.f32.mrb[171].mxu0 }
0x6409   :  { %v13764_v22 = vadd.f32 1.0, %v20213_v42 }
0x640b   :  { %v13765_v2 = vmul.f32 0.5, %v13764_v22 }
0x640d   :  { %v13836_v54 = vmul.f32 %v13833_v11, %v13765_v2  ;;  %v13843_v44 = vsub.f32 1.0, %v13765_v2  ;;  %v13849_v56 = vmul.f32 %v13765_v2, %v23175_v59 }
0x640f   :  { %13838 = vrot.lane.b32.xlu0 %v13836_v54, %s20318_s20 }
0x6481   :  { %v13839_v8 = vpop.permute.xlu0 %13838 }
0x6482   :  { %v13841_v7 = vadd.f32 %v13839_v8, %v13688_v49 }
0x6484   :  { %20214 = vtanh.f32 %v13841_v7 }
0x648e   :  { %v20215_v32 = vpop.eup %20214 }
0x648f   :  { %13845 = vrot.lane.b32.xlu1 %v20215_v32, %s20319_s3 }
0x6501   :  { %v13846_v62 = vpop.permute.xlu1 %13845 }
0x6502   :  { %v13848_v27 = vmul.f32 %v13846_v62, %v13843_v44  ;;  %v14168_v62 = vld [vmem:[#allocation2 + $0x4b8] sm:$0xff] }
0x6504   :  { %v23362_v47 = vadd.f32 %v13849_v56, %v13848_v27  ;;  %v14170_v56 = vld [vmem:[#allocation2 + $0x4c8] sm:$0xff]  ;;  %v15680_v27 = vld [vmem:[%s23628_s4 + $0x4b8] sm:$0xff] }
0x6506   :  { %13852 = vrot.lane.b32.xlu0 %v23362_v47, %s20319_s3 }
0x6578   :  { %v23366_v40 = vpop.permute.xlu0 %13852 }
0x6579   :  { %18475 = vmatmul.mubr.msk.f32.vlgmr.msra.gmra.mrb[170].mxu1 %vm325_vm6, %v23366_v40 }
0x657a   :  { %19913 = vmatpush3.bf16.msra.mxu1 %v20615_v51  ;;  %18496 = vmatprep.mubr.msk.f32.mxu1 %vm20316_vm0, %v20317_v1 }
0x657b   :  { %19914 = vmatprep.subr.bf16.mxu1 %v20315_v0 }
0x657e   :  { %19916 = vmatpush3.bf16.msra.mxu1 %v20628_v55 }
0x6581   :  { %18497 = vmatmul.mubr.msk.f32.vlgmr.msra.gmra.mrb[172].mxu1 %vm325_vm6, %v23200_v6  ;;  %v23387_v6 = vld [vmem:[%s23629_s5 + $0x100] ss:$0 sm:$0xff] }
0x6582   :  { %14250 = vmatprep.mubr.f32.mxu1 %v20317_v1 }
0x664c   :  { %v13922_v59 = vpop.f32.mrb[170].mxu1 }
0x664d   :  { %v13923_v20 = vadd.f32 %v23381_v53, %v13922_v59  ;;  %v18476_v50 = vpop.f32.mrb[171].mxu1  ;;  %v15682_v59 = vld [vmem:[%s23628_s4 + $0x4c8] sm:$0xff] }
0x664e   :  { %v14169_v50 = vld [vmem:[#allocation2 + $0x4c0] sm:$0xff] }
0x664f   :  { %v13996_v10 = vadd.f32 %v13992_v3, %v13923_v20 }
0x6651   :  { %v13997_v49 = vmul.f32 0.5, %v13996_v10  ;;  %v19931_v10 = vpack.c.bf16 %v15682_v59, %v15680_v27  ;;  %v15688_v27 = vld [vmem:[%s23628_s4 + $0x4f8] sm:$0x1]  ;;  %v15687_v59 = vld [vmem:[%s23628_s4 + $0x4f0] sm:$0x1] }
0x6653   :  { %20216 = vtanh.f32 %v13997_v49  ;;  %19932 = vmatprep.subr.bf16.mxu0 %v19931_v10 }
0x6654   :  { %v14067_v46 = vpop.f32.mrb[172].mxu1 }
0x6655   :  { %v18498_v52 = vpop.f32.mrb[173].mxu1  ;;  %v14068_v42 = vadd.f32 %v23387_v6, %v14067_v46  ;;  %v15679_v46 = vld [vmem:[%s23628_s4 + $0x4b0] sm:$0xff] }
0x6656   :  { %v15681_v52 = vld [vmem:[%s23628_s4 + $0x4c0] sm:$0xff] }
0x665d   :  { %v20217_v57 = vpop.eup %20216 }
0x665e   :  { %v13999_v63 = vadd.f32 1.0, %v20217_v57  ;;  %v19933_v57 = vpack.c.bf16 %v15681_v52, %v15679_v46 }
0x6660   :  { %v14000_v58 = vmul.f32 0.5, %v13999_v63  ;;  %v14172_v63 = vld [vmem:[#allocation2 + $0x4d8] sm:$0xff] }
0x6662   :  { %v14071_v48 = vmul.f32 %v14068_v42, %v14000_v58  ;;  %v14078_v11 = vsub.f32 1.0, %v14000_v58  ;;  %v14084_v8 = vmul.f32 %v14000_v58, %v23196_v39  ;;  %v19923_v39 = vpack.c.bf16 %v14170_v56, %v14168_v62  ;;  %v14174_v58 = vld [vmem:[#allocation2 + $0x4e8] sm:$0xff]  ;;  %v15684_v42 = vld [vmem:[%s23628_s4 + $0x4d8] sm:$0xff] }
0x6663   :  { %v14176_v56 = vld [vmem:[#allocation2 + $0x4f8] sm:$0x1] }
0x6664   :  { %14073 = vrot.lane.b32.xlu1 %v14071_v48, %s20318_s20  ;;  %19924 = vmatprep.subr.bf16.mxu1 %v19923_v39  ;;  %v19927_v48 = vpack.c.bf16 %v14174_v58, %v14172_v63  ;;  %v14175_v39 = vld [vmem:[#allocation2 + $0x4f0] sm:$0x1] }
0x66d6   :  { %v14074_v22 = vpop.permute.xlu1 %14073 }
0x66d7   :  { %v14076_v2 = vadd.f32 %v14074_v22, %v13923_v20  ;;  %v14167_v20 = vld [vmem:[#allocation2 + $0x4b0] sm:$0xff]  ;;  %v15686_v22 = vld [vmem:[%s23628_s4 + $0x4e8] sm:$0xff] }
0x66d8   :  { %v19925_v49 = vpack.c.bf16 %v14169_v50, %v14167_v20  ;;  %v23441_v50 = vld [vmem:[%s23629_s5 + $0x108] ss:$0 sm:$0xff] }
0x66d9   :  { %20218 = vtanh.f32 %v14076_v2  ;;  %v14171_v2 = vld [vmem:[#allocation2 + $0x4d0] sm:$0xff] }
0x66da   :  { %19926 = vmatpush1.bf16.msra.mxu1 %v19925_v49 }
0x66db   :  { %19928 = vmatprep.subr.bf16.mxu1 %v19927_v48 }
0x66e3   :  { %v20219_v3 = vpop.eup %20218 }
0x66e4   :  { %14080 = vrot.lane.b32.xlu0 %v20219_v3, %s20319_s3  ;;  %v14173_v3 = vld [vmem:[#allocation2 + $0x4e0] sm:$0xff] }
0x6756   :  { %v14081_v54 = vpop.permute.xlu0 %14080 }
0x6757   :  { %v14083_v7 = vmul.f32 %v14081_v54, %v14078_v11  ;;  %v19935_v11 = vpack.c.bf16 %v15686_v22, %v15684_v42  ;;  %v19929_v54 = vpack.c.bf16 %v14173_v3, %v14171_v2 }
0x6759   :  { %v23393_v32 = vadd.f32 %v14084_v8, %v14083_v7  ;;  %v15683_v8 = vld [vmem:[%s23628_s4 + $0x4d0] sm:$0xff]  ;;  %v15685_v7 = vld [vmem:[%s23628_s4 + $0x4e0] sm:$0xff]  ;;  %19930 = vmatpush1.bf16.msra.mxu1 %v19929_v54 }
0x675a   :  { %v19937_v62 = vpack.c.bf16 %v15685_v7, %v15683_v8  ;;  %15676 = vmatprep.subr.msk.mxu1 %vm251_vm2, %v14176_v56 }
0x675b   :  { %14087 = vrot.lane.b32.xlu1 %v23393_v32, %s20319_s3 }
0x675d   :  { %15677 = vmatpush1.msk.msra.mxu1 %vm251_vm2, %v14175_v39 }
0x675e   :  { %19939 = vmatprep.subr.bf16.mxu1 %v20315_v0 }
0x67cd   :  { %v23397_v44 = vpop.permute.xlu1 %14087 }
0x67ce   :  { %18508 = vmatmul.mubr.msk.f32.vlgmr.msra.gmra.mrb[172].mxu0 %vm325_vm6, %v23397_v44 }
0x67cf   :  { %14344 = vmatprep.mubr.f32.mxu0 %v20317_v1  ;;  %19934 = vmatpush1.bf16.msra.mxu0 %v19933_v57 }
0x67d0   :  { %19936 = vmatprep.subr.bf16.mxu0 %v19935_v11 }
0x67d3   :  { %19938 = vmatpush1.bf16.msra.mxu0 %v19937_v62 }
0x67d4   :  { %15689 = vmatprep.subr.msk.mxu0 %vm251_vm2, %v15688_v27 }
0x67d7   :  { %15690 = vmatpush1.msk.msra.mxu0 %vm251_vm2, %v15687_v59 }
0x67d8   :  { %19951 = vmatprep.subr.bf16.mxu0 %v20315_v0 }
0x68a1   :  { %v14157_v20 = vpop.f32.mrb[172].mxu0 }
0x68a2   :  { %v14158_v10 = vadd.f32 %v23441_v50, %v14157_v20  ;;  %v18509_v49 = vpop.f32.mrb[173].mxu0 }
0x68a4   :  { %v14161_v46 = vmul.f32 0.5, %v14158_v10 }
0x68a6   :  { %20220 = vtanh.f32 %v14161_v46 }
0x68b0   :  { %v20221_v52 = vpop.eup %20220 }
0x68b1   :  { %v14163_v57 = vadd.f32 1.0, %v20221_v52 }
0x68b3   :  { %v14164_v63 = vmul.f32 0.5, %v14163_v57 }
0x68b5   :  { %v14165_v58 = vmul.f32 %v14164_v63, %v23317_v60  ;;  %v14259_v42 = vmul.f32 %v14164_v63, %v23319_v61 }
0x68b7   :  { %15678 = vmatmul.mubr.msk.f32.vlgmr.msra.gmra.mrb[174].mxu1 %vm247_vm4, %v14165_v58  ;;  %15691 = vmatmul.mubr.msk.f32.vlgmr.msra.gmra.mrb[174].mxu0 %vm247_vm4, %v14259_v42 }
0x68b8   :  { %19941 = vmatpush3.bf16.msra.mxu1 %v20383_v5  ;;  %19953 = vmatpush3.bf16.msra.mxu0 %v20394_v9  ;;  %v15692_v5 = vld [vmem:[%s23624_s0 + $0x20] sm:$0x3] }
0x68b9   :  { %19942 = vmatprep.subr.bf16.mxu1 %v20315_v0  ;;  %19954 = vmatprep.subr.bf16.mxu0 %v20315_v0 }
0x68ba   :  { %18526 = vmatprep.mubr.msk.f32.mxu1 %vm20316_vm0, %v20317_v1  ;;  %18545 = vmatprep.mubr.msk.f32.mxu0 %vm20316_vm0, %v20317_v1 }
0x68bc   :  { %19944 = vmatpush3.bf16.msra.mxu1 %v20403_v12  ;;  %19956 = vmatpush3.bf16.msra.mxu0 %v20407_v13 }
0x68bd   :  { %19945 = vmatprep.subr.bf16.mxu1 %v20315_v0  ;;  %19957 = vmatprep.subr.bf16.mxu0 %v20315_v0 }
0x68c0   :  { %19947 = vmatpush3.bf16.msra.mxu1 %v20423_v18  ;;  %19959 = vmatpush3.bf16.msra.mxu0 %v20427_v19 }
0x68c1   :  { %19948 = vmatprep.subr.bf16.mxu1 %v20315_v0  ;;  %19960 = vmatprep.subr.bf16.mxu0 %v20315_v0 }
0x68c4   :  { %19950 = vmatpush3.bf16.msra.mxu1 %v20443_v24  ;;  %19962 = vmatpush3.bf16.msra.mxu0 %v20447_v25 }
0x68c5   :  { %19969 = vmatprep.subr.bf16.mxu0 %v20315_v0  ;;  %19963 = vmatprep.subr.bf16.mxu1 %v20315_v0 }
0x68c7   :  { %18527 = vmatmul.mubr.msk.f32.vlgmr.msra.gmra.mrb[176].mxu1 %vm89_vm1, %v15692_v5  ;;  %18546 = vmatmul.mubr.msk.f32.vlgmr.msra.gmra.mrb[176].mxu0 %vm89_vm1, %v15692_v5 }
0x68c8   :  { %19971 = vmatpush3.bf16.msra.mxu0 %v20483_v34  ;;  %18569 = vmatprep.mubr.msk.f32.mxu0 %vm20316_vm0, %v20317_v1 }
0x68c9   :  { %19972 = vmatprep.subr.bf16.mxu0 %v20315_v0  ;;  %19965 = vmatpush3.bf16.msra.mxu1 %v20472_v30 }
0x68ca   :  { %19966 = vmatprep.subr.bf16.mxu1 %v20315_v0  ;;  %18558 = vmatprep.mubr.msk.f32.mxu1 %vm20316_vm0, %v20317_v1 }
0x68cc   :  { %19974 = vmatpush3.bf16.msra.mxu0 %v20496_v38 }
0x68cd   :  { %19968 = vmatpush3.bf16.msra.mxu1 %v20492_v37  ;;  %19981 = vmatprep.subr.bf16.mxu0 %v20315_v0 }
0x68ce   :  { %18556 = vmatprep.subr.mxu1 %v20317_v1 }
0x68cf   :  { %18570 = vmatmul.mubr.msk.f32.vlgmr.msra.gmra.mrb[178].mxu0 %vm325_vm6, %v23366_v40 }
0x68d0   :  { %19983 = vmatpush3.bf16.msra.mxu0 %v20570_v23  ;;  %18591 = vmatprep.mubr.msk.f32.mxu0 %vm20316_vm0, %v20317_v1 }
0x68d1   :  { %18557 = vmatpush3.msk.msra.mxu1 %vm251_vm2, %v23291_v16  ;;  %19984 = vmatprep.subr.bf16.mxu0 %v20315_v0 }
0x68d2   :  { %19975 = vmatprep.subr.bf16.mxu1 %v20315_v0 }
0x68d4   :  { %19986 = vmatpush3.bf16.msra.mxu0 %v20590_v33 }
0x68d5   :  { %19993 = vmatprep.subr.bf16.mxu0 %v20315_v0 }
0x698a   :  { %v14252_v9 = vpop.f32.mrb[174].mxu1  ;;  %v23496_v12 = vpop.f32.mrb[174].mxu0 }
0x698b   :  { %v23501_v13 = vadd.f32 %v14252_v9, %v13461_v31  ;;  %v14254_v18 = vpop.f32.mrb[175].mxu1  ;;  %v23503_v19 = vpop.f32.mrb[175].mxu0 }
0x698c   :  { %v23508_v24 = vadd.f32 %v14254_v18, %v13462_v36 }
0x698d   :  { %v14351_v25 = vsub.f32 %v23501_v13, %v23496_v12 }
0x698e   :  { %v14352_v30 = vsub.f32 %v23508_v24, %v23503_v19 }
0x699a   :  { %v23514_v34 = vpop.f32.mrb[176].mxu1  ;;  %v23516_v37 = vpop.f32.mrb[176].mxu0 }
0x699b   :  { %v14498_v38 = vmul.f32 %v23514_v34, %v23514_v34  ;;  %v14499_v23 = vmul.f32 %v23516_v37, %v23516_v37  ;;  %v18528_v33 = vpop.f32.mrb[177].mxu1  ;;  %v18547_v16 = vpop.f32.mrb[177].mxu0 }
0x699d   :  { %v14500_v14 = vadd.f32 %v14499_v23, %v14498_v38 }
0x699f   :  { %20222 = vrsqrt.f32 %v14500_v14  ;;  %vm14503_vm1 = vcmp.eq.f32.partialorder %v14500_v14, inf  ;;  %v14506_v36 = vand.u32 2147483648, %v14500_v14  ;;  %vm14505_vm15 = vcmp.eq.f32.partialorder %v14500_v14, 0.0 }
0x69a2   :  { %v14647_v41 = vpop.f32.mrb[178].mxu0 }
0x69a3   :  { %v18571_v17 = vpop.f32.mrb[179].mxu0 }
0x69a9   :  { %v20223_v21 = vpop.eup %20222 }
0x69aa   :  { %v14502_v31 = vmul.f32 %v20223_v21, %v14500_v14  ;;  %v15057_v21 = vld [vmem:[#allocation2 + $0x500] sm:$0xff] }
0x69ac   :  { %v14504_v60 = vsel %vm14503_vm1, %v14500_v14, %v14502_v31  ;;  %v15060_v14 = vld [vmem:[#allocation2 + $0x518] sm:$0xff]  ;;  %v15059_v31 = vld [vmem:[#allocation2 + $0x510] sm:$0xff] }
0x69ad   :  { %v14507_v61 = vsel %vm14505_vm15, %v14506_v36, %v14504_v60  ;;  %v20007_v60 = vpack.c.bf16 %v15059_v31, %v15057_v21 }
0x69ae   :  { %18559 = vmatmul.mubr.msk.f32.vlgmr.msra.gmra.mrb[178].mxu1 %vm247_vm4, %v14507_v61  ;;  %v15706_v61 = vld [vmem:[%s23628_s4 + $0x500] sm:$0xff] }
0x69af   :  { %19977 = vmatpush3.bf16.msra.mxu1 %v20523_v43  ;;  %18580 = vmatprep.mubr.msk.f32.mxu1 %vm20316_vm0, %v20317_v1 }
0x69b0   :  { %19978 = vmatprep.subr.bf16.mxu1 %v20315_v0 }
0x69b3   :  { %19980 = vmatpush3.bf16.msra.mxu1 %v20529_v45 }
0x69b4   :  { %19987 = vmatprep.subr.bf16.mxu1 %v20315_v0 }
0x69b6   :  { %18581 = vmatmul.mubr.msk.f32.vlgmr.msra.gmra.mrb[180].mxu1 %vm325_vm6, %v23366_v40 }
0x69b7   :  { %19989 = vmatpush3.bf16.msra.mxu1 %v20581_v29  ;;  %18602 = vmatprep.mubr.msk.f32.mxu1 %vm20316_vm0, %v20317_v1 }
0x69b8   :  { %19990 = vmatprep.subr.bf16.mxu1 %v20315_v0 }
0x69bb   :  { %19992 = vmatpush3.bf16.msra.mxu1 %v20594_v35 }
0x69bc   :  { %19999 = vmatprep.subr.bf16.mxu1 %v20315_v0 }
0x69be   :  { %18603 = vmatmul.mubr.msk.f32.vlgmr.msra.gmra.mrb[182].mxu1 %vm325_vm6, %v23397_v44 }
0x69bf   :  { %20001 = vmatpush3.bf16.msra.mxu1 %v20658_v26  ;;  %18624 = vmatprep.mubr.msk.f32.mxu1 %vm20316_vm0, %v20317_v1 }
0x69c0   :  { %20002 = vmatprep.subr.bf16.mxu1 %v20315_v0 }
0x69c3   :  { %20004 = vmatpush3.bf16.msra.mxu1 %v20664_v28 }
0x6a81   :  { %v14577_v43 = vpop.f32.mrb[178].mxu1 }
0x6a82   :  { %v14578_v45 = vadd.f32 %v23350_v4, %v14577_v43  ;;  %v18560_v29 = vpop.f32.mrb[179].mxu1 }
0x6a83   :  { %v15064_v29 = vld [vmem:[#allocation2 + $0x538] sm:$0xff] }
0x6a84   :  { %v14651_v40 = vadd.f32 %v14647_v41, %v14578_v45  ;;  %v15707_v41 = vld [vmem:[%s23628_s4 + $0x508] sm:$0xff] }
0x6a86   :  { %v14652_v35 = vmul.f32 0.5, %v14651_v40  ;;  %v15711_v40 = vld [vmem:[%s23628_s4 + $0x528] sm:$0xff] }
0x6a88   :  { %20224 = vtanh.f32 %v14652_v35 }
0x6a89   :  { %v14722_v48 = vpop.f32.mrb[180].mxu1 }
0x6a8a   :  { %v18582_v22 = vpop.f32.mrb[181].mxu1  ;;  %v14723_v8 = vadd.f32 %v23356_v15, %v14722_v48  ;;  %v15713_v48 = vld [vmem:[%s23628_s4 + $0x538] sm:$0xff] }
0x6a8b   :  { %v15061_v22 = vld [vmem:[#allocation2 + $0x520] sm:$0xff] }
0x6a91   :  { %v14882_v2 = vpop.f32.mrb[182].mxu1 }
0x6a92   :  { %v20225_v3 = vpop.eup %20224  ;;  %v18604_v11 = vpop.f32.mrb[183].mxu1 }
0x6a93   :  { %v14654_v26 = vadd.f32 1.0, %v20225_v3  ;;  %v20017_v3 = vpack.c.bf16 %v15713_v48, %v15711_v40 }
0x6a95   :  { %v14655_v54 = vmul.f32 0.5, %v14654_v26  ;;  %v15710_v26 = vld [vmem:[%s23628_s4 + $0x520] sm:$0xff] }
0x6a97   :  { %v14726_v7 = vmul.f32 %v14723_v8, %v14655_v54  ;;  %v14733_v56 = vsub.f32 1.0, %v14655_v54  ;;  %v14739_v39 = vmul.f32 %v14655_v54, %v23362_v47  ;;  %v15712_v54 = vld [vmem:[%s23628_s4 + $0x530] sm:$0xff] }
0x6a98   :  { %v20019_v8 = vpack.c.bf16 %v15712_v54, %v15710_v26 }
0x6a99   :  { %14728 = vrot.lane.b32.xlu0 %v14726_v7, %s20318_s20  ;;  %v15066_v7 = vld [vmem:[#allocation2 + $0x548] sm:$0x1] }
0x6b0b   :  { %v14729_v28 = vpop.permute.xlu0 %14728 }
0x6b0c   :  { %v14731_v62 = vadd.f32 %v14729_v28, %v14578_v45  ;;  %v15062_v45 = vld [vmem:[#allocation2 + $0x528] sm:$0xff] }
0x6b0d   :  { %v20009_v35 = vpack.c.bf16 %v15064_v29, %v15062_v45  ;;  %v15715_v28 = vld [vmem:[%s23628_s4 + $0x548] sm:$0x1] }
0x6b0e   :  { %20226 = vtanh.f32 %v14731_v62  ;;  %v15065_v62 = vld [vmem:[#allocation2 + $0x540] sm:$0x1] }
0x6b18   :  { %v20227_v4 = vpop.eup %20226 }
0x6b19   :  { %14735 = vrot.lane.b32.xlu1 %v20227_v4, %s20319_s3  ;;  %v15714_v4 = vld [vmem:[%s23628_s4 + $0x540] sm:$0x1] }
0x6b8b   :  { %v14736_v27 = vpop.permute.xlu1 %14735 }
0x6b8c   :  { %v14738_v59 = vmul.f32 %v14736_v27, %v14733_v56 }
0x6b8e   :  { %v14740_v20 = vadd.f32 %v14739_v39, %v14738_v59 }
0x6b90   :  { %14742 = vrot.lane.b32.xlu0 %v14740_v20, %s20319_s3 }
0x6c02   :  { %v14743_v10 = vpop.permute.xlu0 %14742 }
0x6c03   :  { %18592 = vmatmul.mubr.msk.f32.vlgmr.msra.gmra.mrb[180].mxu0 %vm325_vm6, %v14743_v10 }
0x6c04   :  { %19995 = vmatpush3.bf16.msra.mxu0 %v20615_v51  ;;  %18613 = vmatprep.mubr.msk.f32.mxu0 %vm20316_vm0, %v20317_v1 }
0x6c05   :  { %19996 = vmatprep.subr.bf16.mxu0 %v20315_v0 }
0x6c08   :  { %19998 = vmatpush3.bf16.msra.mxu0 %v20628_v55 }
0x6c0b   :  { %18614 = vmatmul.mubr.msk.f32.vlgmr.msra.gmra.mrb[182].mxu0 %vm325_vm6, %v23397_v44 }
0x6c0c   :  { %15140 = vmatprep.mubr.f32.mxu0 %v20317_v1 }
0x6cd6   :  { %v14812_v15 = vpop.f32.mrb[180].mxu0 }
0x6cd7   :  { %v14813_v47 = vadd.f32 %v23381_v53, %v14812_v15  ;;  %v18593_v49 = vpop.f32.mrb[181].mxu0 }
0x6cd9   :  { %v14886_v46 = vadd.f32 %v14882_v2, %v14813_v47  ;;  %v15063_v2 = vld [vmem:[#allocation2 + $0x530] sm:$0xff] }
0x6cda   :  { %v20011_v11 = vpack.c.bf16 %v15063_v2, %v15061_v22 }
0x6cdb   :  { %v14887_v52 = vmul.f32 0.5, %v14886_v46 }
0x6cdd   :  { %20228 = vtanh.f32 %v14887_v52 }
0x6cde   :  { %v14957_v51 = vpop.f32.mrb[182].mxu0 }
0x6cdf   :  { %v18615_v57 = vpop.f32.mrb[183].mxu0  ;;  %v14958_v0 = vadd.f32 %v23387_v6, %v14957_v51  ;;  %v15058_v6 = vld [vmem:[#allocation2 + $0x508] sm:$0xff] }
0x6ce0   :  { %v20005_v17 = vpack.c.bf16 %v15060_v14, %v15058_v6 }
0x6ce2   :  { %20006 = vmatprep.subr.bf16.mxu0 %v20005_v17 }
0x6ce3   :  { %20008 = vmatpush1.bf16.msra.mxu0 %v20007_v60 }
0x6ce4   :  { %20010 = vmatprep.subr.bf16.mxu0 %v20009_v35 }
0x6ce7   :  { %v20229_v63 = vpop.eup %20228  ;;  %20012 = vmatpush1.bf16.msra.mxu0 %v20011_v11 }
0x6ce8   :  { %v14889_v58 = vadd.f32 1.0, %v20229_v63  ;;  %15703 = vmatprep.subr.msk.mxu0 %vm251_vm2, %v15066_v7 }
0x6cea   :  { %v14890_v42 = vmul.f32 0.5, %v14889_v58 }
0x6ceb   :  { %15704 = vmatpush1.msk.msra.mxu0 %vm251_vm2, %v15065_v62 }
0x6cec   :  { %v14961_v55 = vmul.f32 %v14958_v0, %v14890_v42  ;;  %v14968_v53 = vsub.f32 1.0, %v14890_v42  ;;  %v14974_v38 = vmul.f32 %v14890_v42, %v23393_v32  ;;  %v15709_v32 = vld [vmem:[%s23628_s4 + $0x518] sm:$0xff] }
0x6ced   :  { %v20013_v36 = vpack.c.bf16 %v15709_v32, %v15707_v41 }
0x6cee   :  { %14963 = vrot.lane.b32.xlu1 %v14961_v55, %s20318_s20 }
0x6cef   :  { %20014 = vmatprep.subr.bf16.mxu1 %v20013_v36 }
0x6d60   :  { %v14964_v44 = vpop.permute.xlu1 %14963 }
0x6d61   :  { %v14966_v5 = vadd.f32 %v14964_v44, %v14813_v47 }
0x6d63   :  { %20230 = vtanh.f32 %v14966_v5 }
0x6d6d   :  { %v20231_v9 = vpop.eup %20230 }
0x6d6e   :  { %14970 = vrot.lane.b32.xlu0 %v20231_v9, %s20319_s3 }
0x6de0   :  { %v14971_v18 = vpop.permute.xlu0 %14970 }
0x6de1   :  { %v14973_v23 = vmul.f32 %v14971_v18, %v14968_v53 }
0x6de3   :  { %v14975_v33 = vadd.f32 %v14974_v38, %v14973_v23 }
0x6de5   :  { %14977 = vrot.lane.b32.xlu1 %v14975_v33, %s20319_s3 }
0x6e57   :  { %v14978_v16 = vpop.permute.xlu1 %14977 }
0x6e58   :  { %18625 = vmatmul.mubr.msk.f32.vlgmr.msra.gmra.mrb[184].mxu1 %vm325_vm6, %v14978_v16 }
0x6e59   :  { %15234 = vmatprep.mubr.f32.mxu1 %v20317_v1  ;;  %v15708_v1 = vld [vmem:[%s23628_s4 + $0x510] sm:$0xff]  ;;  %s20320_s4 = smov [#allocation5]  }
0x6e5a   :  { %v20015_v43 = vpack.c.bf16 %v15708_v1, %v15706_v61  ;;  %s15261_s13 = sshll.u32 %s20320_s4, 4  ;;  %s15262_s13 = int_to_ptr.vmem [resolvable:$true] %s15261_s13 }
0x6e5b   :  { %s20286_s14 = scalar_lea.vmem %s15262_s13, 64  ;;  %p20291_p9 = scmp.lt.s32.totalorder %s15262_s13, %s15262_s13 }
0x6e5c   :  { %20016 = vmatpush1.bf16.msra.mxu1 %v20015_v43  ;;  %p20287_p8 = scmp.ne.s32.totalorder %s15262_s13, %s20286_s14  ;;  %p20292_p10 = scmp.lt.s32.totalorder %s20286_s14, %s20286_s14 }
0x6e5d   :  { %20018 = vmatprep.subr.bf16.mxu1 %v20017_v3 }
0x6e5e   :  { %p20293_p11 = por %p20292_p10, %p20291_p9 }
0x6e60   :  { %20020 = vmatpush1.bf16.msra.mxu1 %v20019_v8  ;;  %p20294_p12 = pnand %p20293_p11, %p20287_p8 }
0x6e61   :  { %15716 = vmatprep.subr.msk.mxu1 %vm251_vm2, %v15715_v28 }
0x6e64   :  { %15717 = vmatpush1.msk.msra.mxu1 %vm251_vm2, %v15714_v4 }
0x6f2b   :  { %v15047_v56 = vpop.f32.mrb[184].mxu1 }
0x6f2c   :  { %v15048_v27 = vadd.f32 %v23441_v50, %v15047_v56  ;;  %v18626_v39 = vpop.f32.mrb[185].mxu1 }
0x6f2e   :  { %v15051_v59 = vmul.f32 0.5, %v15048_v27 }
0x6f30   :  { %20232 = vtanh.f32 %v15051_v59 }
0x6f3a   :  { %v20233_v20 = vpop.eup %20232 }
0x6f3b   :  { %v15053_v10 = vadd.f32 1.0, %v20233_v20 }
0x6f3d   :  { %v15054_v15 = vmul.f32 0.5, %v15053_v10 }
0x6f3f   :  { %v15055_v47 = vmul.f32 %v15054_v15, %v23514_v34  ;;  %v15149_v49 = vmul.f32 %v15054_v15, %v23516_v37 }
0x6f41   :  { %15705 = vmatmul.mubr.msk.f32.vlgmr.msra.gmra.mrb[184].mxu0 %vm247_vm4, %v15055_v47  ;;  %15718 = vmatmul.mubr.msk.f32.vlgmr.msra.gmra.mrb[186].mxu1 %vm247_vm4, %v15149_v49 }
0x7014   :  { %v15142_v46 = vpop.f32.mrb[184].mxu0  ;;  %v15236_v52 = vpop.f32.mrb[186].mxu1 }
0x7015   :  { %v15147_v50 = vadd.f32 %v15142_v46, %v14351_v25  ;;  %v15144_v51 = vpop.f32.mrb[185].mxu0  ;;  %v15238_v57 = vpop.f32.mrb[187].mxu1 }
0x7016   :  { %v15148_v63 = vadd.f32 %v15144_v51, %v14352_v30 }
0x7017   :  { %v15241_v58 = vsub.f32 %v15147_v50, %v15236_v52 }
0x7018   :  { %v15242_v34 = vsub.f32 %v15148_v63, %v15238_v57 }
0x701a   :  { %v15245_v37 = vcombine.low %v15241_v58, %v15242_v34 }
0x701c   :  { %15719 = vst.sshfl [vmem:[#allocation5] sm:$0x33 pattern:$0x76325410] %v15245_v37 }
0x701d   :  { %20297 = shalt.err (!%p20294_p12)
}
0x701e   :  { %s20298_s1 = scalar_lea.hbm %s23630_s6, 64 }
0x701f   :  { %p20299_p13 = scmp.ne.s32.totalorder %s23630_s6, %s20298_s1  ;;  %p20302_p0 = scmp.lt.u32.totalorder %s20298_s1, %s23630_s6 }
0x7021   :  { %p20304_p1 = pnand %p20302_p0, %p20299_p13 }
0x7023   :  { %20307 = shalt.err (!%p20304_p1)
}
0x7024   :  { %15264 = dma.vmem_to_hbm [thread:$0]  %s15262_s13, 64, %s23630_s6, [#allocation4]  }
0x7025   :  { %20310 = dma.done.wait [#allocation4], 64  }
0x7026   :  { %20311 = vsyncadd [#allocation4], 4294967232 }
0x7027   :  { %15268 = vsyncpa [#allocation3], 1 }
0x7028   :  { %15269 = vsyncpa [#allocation4], 1 }

</bundles_post_ra>
